<compile_context>
chip_gen: v7x
topology: tpu7x:2x2x1
jax: 0.10.0
libtpu: 0.0.40
codegen_flags: <defaults>
</compile_context>

<pallas_src>
import functools

import jax
import jax.numpy as jnp
from jax.experimental import pallas as pl
from jax.experimental.pallas import tpu as pltpu

_HIGHEST = jax.lax.Precision.HIGHEST


# ---------------------------------------------------------------------------
# Kernel
# ---------------------------------------------------------------------------
def _softplus(x):
    # match torch.nn.Softplus(beta=1, threshold=20)
    return jnp.where(x > 20.0, x, jnp.log1p(jnp.exp(jnp.minimum(x, 20.0))))


def _sigmoid(x):
    # exact sigmoid (approx reciprocal was the source of the previous mismatch)
    return 1.0 / (1.0 + jnp.exp(-x))


def _net5_kernel(n_a, n_b, y_dim, *refs):
    """Feature-major: every activation is (features, tile_n).

    refs = [u, (Wa, ba) * n_a, (Wb, bb) * n_b, sel, out]
      u     : (2*x_dim + c_dim, tile_n) fused [x; x_ref; c] columns for this tile
      Wa/Wb : PyTorch-layout (out_features, in_features); the first layer of each
              net is zero-padded to consume the fused input directly
              (x_scale already folded into Wa[0] in the wrapper)
      b     : (out_features, 1), broadcast along lanes
      sel   : (y_dim, y_dim*h_dim) block-diagonal selector for the bmm tail
    """
    u_ref = refs[0]
    a_refs = refs[1:1 + 2 * n_a]
    b_refs = refs[1 + 2 * n_a:1 + 2 * (n_a + n_b)]
    sel_ref = refs[1 + 2 * (n_a + n_b)]
    out_ref = refs[-1]

    u = u_ref[...]

    # --- netA: [Linear -> Softplus]* -> Linear  => y1 (y_dim*h_dim, tile_n)
    h = u
    for li in range(n_a):
        w = a_refs[2 * li][...]
        b = a_refs[2 * li + 1][...]
        h = jnp.dot(w, h, preferred_element_type=jnp.float32,
                    precision=_HIGHEST) + b
        if li < n_a - 1:
            h = _softplus(h)
    y1 = h

    # --- netB ('sigmoid'): Linear->Softplus->Linear->Softplus->Linear->Sigmoid
    g = u
    for li in range(n_b):
        w = b_refs[2 * li][...]
        b = b_refs[2 * li + 1][...]
        g = jnp.dot(w, g, preferred_element_type=jnp.float32,
                    precision=_HIGHEST) + b
        if li < n_b - 1:
            g = _softplus(g)
    y2 = _sigmoid(g)                          # (h_dim, tile_n)

    # --- torch.bmm tail: out[i, n] = sum_k y1[i*h_dim + k, n] * y2[k, n]
    # sublane-tile y2 (cheap) and contract with the block-diagonal selector (MXU).
    prod = y1 * jnp.tile(y2, (y_dim, 1))      # (y_dim*h_dim, tile_n)
    out_ref[...] = jnp.dot(sel_ref[...], prod,
                           preferred_element_type=jnp.float32,
                           precision=_HIGHEST)


# ---------------------------------------------------------------------------
# Wrapper
# ---------------------------------------------------------------------------
def _choose_tile(n, tile_max=1024):
    """Batch (lane) tile: multiple of 128, <= tile_max, and (for batches larger
    than 2 lane-tiles) >= 2 grid steps so v7x's two TensorCores can both be used
    via dimension_semantics=("parallel",)."""
    n128 = 128 * pl.cdiv(max(int(n), 1), 128)
    if n128 <= 256:
        return n128
    return max(128, min(tile_max, 128 * pl.cdiv(pl.cdiv(n128, 128), 2)))


def net5_forward(x, x_ref, c, a_params, b_params, *,
                 x_scale, h_dim, y_dim, tile_n_max=1024):
    """Net5.forward.  a_params / b_params hold PyTorch-layout Linear params:
    weight (out_features, in_features), bias (out_features,).  Returns (N, y_dim)
    float32."""
    N, x_dim = x.shape
    c_dim = c.shape[1]
    in_dim = 2 * x_dim + c_dim

    tile_n = _choose_tile(N, tile_n_max)
    n_tiles = pl.cdiv(N, tile_n)
    n_pad = n_tiles * tile_n

    f32 = jnp.float32
    # Fused feature-major input: one DMA per grid step instead of three.
    # (On v6e/v7x this and the weights could be bf16 to halve HBM traffic; kept
    #  f32 here so the kernel is exact on every TPU generation incl. v5e.)
    u = jnp.concatenate([x, x_ref, c], axis=1).astype(f32).T      # (in_dim, N)
    u = jnp.pad(u, ((0, 0), (0, n_pad - N)))

    # First netA layer: fold x_scale + cat([x, x_ref]) into a weight that reads
    # the fused input directly (zeros over the c columns).  First netB layer
    # likewise ignores the x/x_ref columns.
    wa0, ba0 = a_params[0]                      # (h, 2*x_dim), (h,)
    wa0_eff = jnp.concatenate(
        [wa0.astype(f32) * jnp.float32(x_scale),
         jnp.zeros((wa0.shape[0], c_dim), f32)], axis=1)
    wb0, bb0 = b_params[0]                      # (h, c_dim), (h,)
    wb0_eff = jnp.concatenate(
        [jnp.zeros((wb0.shape[0], 2 * x_dim), f32),
         wb0.astype(f32)], axis=1)

    def as_bias(b):
        return b.astype(f32).reshape(-1, 1)

    flat = [u, wa0_eff, as_bias(ba0)]
    for w, b in a_params[1:]:
        flat += [w.astype(f32), as_bias(b)]
    flat += [wb0_eff, as_bias(bb0)]
    for w, b in b_params[1:]:
        flat += [w.astype(f32), as_bias(b)]

    # Block-diagonal selector for the bmm tail: sel[i, j] = (j // h_dim == i).
    sel = (jnp.arange(y_dim, dtype=jnp.int32)[:, None]
           == jnp.arange(y_dim * h_dim, dtype=jnp.int32)[None, :] // h_dim
           ).astype(f32)
    flat.append(sel)

    n_a, n_b = len(a_params), len(b_params)
    kernel = functools.partial(_net5_kernel, n_a, n_b, y_dim)

    # batch-tiled spec for the fused input / output, resident specs for the rest
    in_specs = ([pl.BlockSpec((in_dim, tile_n), lambda i: (0, i))]
                + [pl.BlockSpec(a.shape, lambda i: (0, 0)) for a in flat[1:]])
    out_specs = pl.BlockSpec((y_dim, tile_n), lambda i: (0, i))

    # advisory cost estimate for the XLA scheduler
    mm_flops = sum(2 * int(w.shape[0]) * int(w.shape[1])
                   for w, _ in list(a_params) + list(b_params))
    mm_flops += 2 * y_dim * h_dim + 2 * y_dim * y_dim * h_dim
    cost = pl.CostEstimate(
        flops=int(n_pad) * int(mm_flops),
        transcendentals=int(n_pad) * int(h_dim) * (n_a + n_b),
        bytes_accessed=4 * (int(n_pad) * (in_dim + y_dim)
                            + sum(int(a.size) for a in flat[1:])),
    )

    out = pl.pallas_call(
        kernel,
        out_shape=jax.ShapeDtypeStruct((y_dim, n_pad), jnp.float32),
        grid=(n_tiles,),
        in_specs=in_specs,
        out_specs=out_specs,
        compiler_params=pltpu.CompilerParams(
            dimension_semantics=("parallel",)),
        cost_estimate=cost,
    )(*flat)
    return out[:, :N].T                         # back to (N, y_dim)


# ---------------------------------------------------------------------------
# Deterministic parameter init (PyTorch Linear: U(-1/sqrt(fan_in), 1/sqrt(fan_in)))
# ---------------------------------------------------------------------------
def _init_linear(key, fan_in, fan_out):
    kw, kb = jax.random.split(key)
    bound = 1.0 / float(fan_in) ** 0.5
    w = jax.random.uniform(kw, (fan_out, fan_in), jnp.float32, -bound, bound)
    b = jax.random.uniform(kb, (fan_out,), jnp.float32, -bound, bound)
    return w, b


def make_params(key, x_dim, c_dim, h_dim, n_layers, y_dim):
    keys = jax.random.split(key, n_layers + 4)
    a_params = []
    in_dim = 2 * x_dim                          # netA input is cat([x, x_ref])
    for li in range(n_layers):                  # hidden layers of netA
        a_params.append(_init_linear(keys[li], in_dim, h_dim))
        in_dim = h_dim
    a_params.append(_init_linear(keys[n_layers], h_dim, y_dim * h_dim))  # output
    b_params = [
        _init_linear(keys[n_layers + 1], c_dim, h_dim),
        _init_linear(keys[n_layers + 2], h_dim, h_dim),
        _init_linear(keys[n_layers + 3], h_dim, h_dim),
    ]
    return a_params, b_params


# ---------------------------------------------------------------------------
# Pure-JAX reference for verification
# ---------------------------------------------------------------------------
def net5_reference(x, x_ref, c, a_params, b_params, *, x_scale, h_dim, y_dim):
    N = x.shape[0]
    h = jnp.concatenate([x, x_ref], axis=1) * x_scale
    for li, (w, b) in enumerate(a_params):
        h = jnp.dot(h, w.T, precision=_HIGHEST) + b
        if li < len(a_params) - 1:
            h = jax.nn.softplus(h)
    y1 = h.reshape(N, y_dim, h_dim)
    g = c
    for li, (w, b) in enumerate(b_params):
        g = jnp.dot(g, w.T, precision=_HIGHEST) + b
        if li < len(b_params) - 1:
            g = jax.nn.softplus(g)
    y2 = jax.nn.sigmoid(g)
    return jnp.einsum("nyh,nh->ny", y1, y2, precision=_HIGHEST)


# ---------------------------------------------------------------------------
if __name__ == "__main__":
    # small config consistent with Net5.forward; N not a multiple of 128 to
    # exercise the pad-and-slice path and a >=2-step parallel grid.
    N, x_dim, c_dim, h_dim, n_layers, y_dim = 1000, 4, 4, 32, 3, 4
    x_scale = 2.0

    key = jax.random.PRNGKey(0)
    kx, kr, kc, kp = jax.random.split(key, 4)
    x = jax.random.normal(kx, (N, x_dim), jnp.float32)
    x_ref = jax.random.normal(kr, (N, x_dim), jnp.float32)
    c = jax.random.normal(kc, (N, c_dim), jnp.float32)
    a_params, b_params = make_params(kp, x_dim, c_dim, h_dim, n_layers, y_dim)

    y = net5_forward(x, x_ref, c, a_params, b_params,
                     x_scale=x_scale, h_dim=h_dim, y_dim=y_dim)
    y = jax.block_until_ready(y)

    y_ref = net5_reference(x, x_ref, c, a_params, b_params,
                           x_scale=x_scale, h_dim=h_dim, y_dim=y_dim)
    assert y.shape == (N, y_dim)
    max_err = float(jnp.max(jnp.abs(y - y_ref)))
    assert jnp.allclose(y, y_ref, atol=1e-3, rtol=1e-3), \
        f"mismatch vs reference (max abs err {max_err:.3e})"

    print("KERNEL_OK")
</pallas_src>

<mosaic_0001>
module attributes {stable_mosaic.version = 11 : i64} {
  func.func @_net5_kernel(%arg0: i32, %arg1: memref<12x512xf32, #tpu.memory_space<vmem>>, %arg2: memref<32x12xf32, #tpu.memory_space<vmem>>, %arg3: memref<32x1xf32, #tpu.memory_space<vmem>>, %arg4: memref<32x32xf32, #tpu.memory_space<vmem>>, %arg5: memref<32x1xf32, #tpu.memory_space<vmem>>, %arg6: memref<32x32xf32, #tpu.memory_space<vmem>>, %arg7: memref<32x1xf32, #tpu.memory_space<vmem>>, %arg8: memref<128x32xf32, #tpu.memory_space<vmem>>, %arg9: memref<128x1xf32, #tpu.memory_space<vmem>>, %arg10: memref<32x12xf32, #tpu.memory_space<vmem>>, %arg11: memref<32x1xf32, #tpu.memory_space<vmem>>, %arg12: memref<32x32xf32, #tpu.memory_space<vmem>>, %arg13: memref<32x1xf32, #tpu.memory_space<vmem>>, %arg14: memref<32x32xf32, #tpu.memory_space<vmem>>, %arg15: memref<32x1xf32, #tpu.memory_space<vmem>>, %arg16: memref<4x128xf32, #tpu.memory_space<vmem>>, %arg17: memref<4x512xf32, #tpu.memory_space<vmem>>) attributes {dimension_semantics = [#tpu.dimension_semantics<parallel>], iteration_bounds = array<i64: 2>, scalar_prefetch = 0 : i64, scratch_operands = 0 : i64, tpu.core_type = #tpu.core_type<tc>, window_params = [{transform_indices = @transform_0, window_bounds = array<i64: 12, 512>}, {pipeline_mode = #tpu.pipeline_mode<synchronous>, transform_indices = @transform_1, window_bounds = array<i64: 32, 12>}, {pipeline_mode = #tpu.pipeline_mode<synchronous>, transform_indices = @transform_2, window_bounds = array<i64: 32, 1>}, {pipeline_mode = #tpu.pipeline_mode<synchronous>, transform_indices = @transform_3, window_bounds = array<i64: 32, 32>}, {pipeline_mode = #tpu.pipeline_mode<synchronous>, transform_indices = @transform_4, window_bounds = array<i64: 32, 1>}, {pipeline_mode = #tpu.pipeline_mode<synchronous>, transform_indices = @transform_5, window_bounds = array<i64: 32, 32>}, {pipeline_mode = #tpu.pipeline_mode<synchronous>, transform_indices = @transform_6, window_bounds = array<i64: 32, 1>}, {pipeline_mode = #tpu.pipeline_mode<synchronous>, transform_indices = @transform_7, window_bounds = array<i64: 128, 32>}, {pipeline_mode = #tpu.pipeline_mode<synchronous>, transform_indices = @transform_8, window_bounds = array<i64: 128, 1>}, {pipeline_mode = #tpu.pipeline_mode<synchronous>, transform_indices = @transform_9, window_bounds = array<i64: 32, 12>}, {pipeline_mode = #tpu.pipeline_mode<synchronous>, transform_indices = @transform_10, window_bounds = array<i64: 32, 1>}, {pipeline_mode = #tpu.pipeline_mode<synchronous>, transform_indices = @transform_11, window_bounds = array<i64: 32, 32>}, {pipeline_mode = #tpu.pipeline_mode<synchronous>, transform_indices = @transform_12, window_bounds = array<i64: 32, 1>}, {pipeline_mode = #tpu.pipeline_mode<synchronous>, transform_indices = @transform_13, window_bounds = array<i64: 32, 32>}, {pipeline_mode = #tpu.pipeline_mode<synchronous>, transform_indices = @transform_14, window_bounds = array<i64: 32, 1>}, {pipeline_mode = #tpu.pipeline_mode<synchronous>, transform_indices = @transform_15, window_bounds = array<i64: 4, 128>}, {transform_indices = @transform_16, window_bounds = array<i64: 4, 512>}]} {
    %c0 = arith.constant 0 : index
    %c0_0 = arith.constant 0 : index
    %0 = vector.load %arg1[%c0, %c0_0] : memref<12x512xf32, #tpu.memory_space<vmem>>, vector<12x512xf32>
    %c0_1 = arith.constant 0 : index
    %c0_2 = arith.constant 0 : index
    %1 = vector.load %arg2[%c0_1, %c0_2] : memref<32x12xf32, #tpu.memory_space<vmem>>, vector<32x12xf32>
    %c0_3 = arith.constant 0 : index
    %c0_4 = arith.constant 0 : index
    %2 = vector.load %arg3[%c0_3, %c0_4] : memref<32x1xf32, #tpu.memory_space<vmem>>, vector<32x1xf32>
    %cst = arith.constant dense<0.000000e+00> : vector<32x512xf32>
    %3 = tpu.matmul %1, %0, %cst {dimension_numbers = #tpu.dot_dimension_numbers<[1], [0], [0], [1], [0, 0, 1, 1], [], []>, precision = #tpu.contract_precision<fp32>} : vector<32x12xf32>, vector<12x512xf32>, vector<32x512xf32> -> vector<32x512xf32>
    %4 = vector.broadcast %2 : vector<32x1xf32> to vector<32x512xf32>
    %5 = arith.addf %3, %4 : vector<32x512xf32>
    %cst_5 = arith.constant 2.000000e+01 : f32
    %6 = vector.broadcast %cst_5 : f32 to vector<32x512xf32>
    %7 = arith.cmpf ogt, %5, %6 : vector<32x512xf32>
    %cst_6 = arith.constant 2.000000e+01 : f32
    %8 = vector.broadcast %cst_6 : f32 to vector<32x512xf32>
    %9 = arith.minimumf %5, %8 : vector<32x512xf32>
    %10 = math.exp %9 : vector<32x512xf32>
    %11 = math.log1p %10 : vector<32x512xf32>
    %12 = arith.select %7, %5, %11 : vector<32x512xi1>, vector<32x512xf32>
    %c0_7 = arith.constant 0 : index
    %c0_8 = arith.constant 0 : index
    %13 = vector.load %arg4[%c0_7, %c0_8] : memref<32x32xf32, #tpu.memory_space<vmem>>, vector<32x32xf32>
    %c0_9 = arith.constant 0 : index
    %c0_10 = arith.constant 0 : index
    %14 = vector.load %arg5[%c0_9, %c0_10] : memref<32x1xf32, #tpu.memory_space<vmem>>, vector<32x1xf32>
    %cst_11 = arith.constant dense<0.000000e+00> : vector<32x512xf32>
    %15 = tpu.matmul %13, %12, %cst_11 {dimension_numbers = #tpu.dot_dimension_numbers<[1], [0], [0], [1], [0, 0, 1, 1], [], []>, precision = #tpu.contract_precision<fp32>} : vector<32x32xf32>, vector<32x512xf32>, vector<32x512xf32> -> vector<32x512xf32>
    %16 = vector.broadcast %14 : vector<32x1xf32> to vector<32x512xf32>
    %17 = arith.addf %15, %16 : vector<32x512xf32>
    %cst_12 = arith.constant 2.000000e+01 : f32
    %18 = vector.broadcast %cst_12 : f32 to vector<32x512xf32>
    %19 = arith.cmpf ogt, %17, %18 : vector<32x512xf32>
    %cst_13 = arith.constant 2.000000e+01 : f32
    %20 = vector.broadcast %cst_13 : f32 to vector<32x512xf32>
    %21 = arith.minimumf %17, %20 : vector<32x512xf32>
    %22 = math.exp %21 : vector<32x512xf32>
    %23 = math.log1p %22 : vector<32x512xf32>
    %24 = arith.select %19, %17, %23 : vector<32x512xi1>, vector<32x512xf32>
    %c0_14 = arith.constant 0 : index
    %c0_15 = arith.constant 0 : index
    %25 = vector.load %arg6[%c0_14, %c0_15] : memref<32x32xf32, #tpu.memory_space<vmem>>, vector<32x32xf32>
    %c0_16 = arith.constant 0 : index
    %c0_17 = arith.constant 0 : index
    %26 = vector.load %arg7[%c0_16, %c0_17] : memref<32x1xf32, #tpu.memory_space<vmem>>, vector<32x1xf32>
    %cst_18 = arith.constant dense<0.000000e+00> : vector<32x512xf32>
    %27 = tpu.matmul %25, %24, %cst_18 {dimension_numbers = #tpu.dot_dimension_numbers<[1], [0], [0], [1], [0, 0, 1, 1], [], []>, precision = #tpu.contract_precision<fp32>} : vector<32x32xf32>, vector<32x512xf32>, vector<32x512xf32> -> vector<32x512xf32>
    %28 = vector.broadcast %26 : vector<32x1xf32> to vector<32x512xf32>
    %29 = arith.addf %27, %28 : vector<32x512xf32>
    %cst_19 = arith.constant 2.000000e+01 : f32
    %30 = vector.broadcast %cst_19 : f32 to vector<32x512xf32>
    %31 = arith.cmpf ogt, %29, %30 : vector<32x512xf32>
    %cst_20 = arith.constant 2.000000e+01 : f32
    %32 = vector.broadcast %cst_20 : f32 to vector<32x512xf32>
    %33 = arith.minimumf %29, %32 : vector<32x512xf32>
    %34 = math.exp %33 : vector<32x512xf32>
    %35 = math.log1p %34 : vector<32x512xf32>
    %36 = arith.select %31, %29, %35 : vector<32x512xi1>, vector<32x512xf32>
    %c0_21 = arith.constant 0 : index
    %c0_22 = arith.constant 0 : index
    %37 = vector.load %arg8[%c0_21, %c0_22] : memref<128x32xf32, #tpu.memory_space<vmem>>, vector<128x32xf32>
    %c0_23 = arith.constant 0 : index
    %c0_24 = arith.constant 0 : index
    %38 = vector.load %arg9[%c0_23, %c0_24] : memref<128x1xf32, #tpu.memory_space<vmem>>, vector<128x1xf32>
    %cst_25 = arith.constant dense<0.000000e+00> : vector<128x512xf32>
    %39 = tpu.matmul %37, %36, %cst_25 {dimension_numbers = #tpu.dot_dimension_numbers<[1], [0], [0], [1], [0, 0, 1, 1], [], []>, precision = #tpu.contract_precision<fp32>} : vector<128x32xf32>, vector<32x512xf32>, vector<128x512xf32> -> vector<128x512xf32>
    %40 = vector.broadcast %38 : vector<128x1xf32> to vector<128x512xf32>
    %41 = arith.addf %39, %40 : vector<128x512xf32>
    %c0_26 = arith.constant 0 : index
    %c0_27 = arith.constant 0 : index
    %42 = vector.load %arg10[%c0_26, %c0_27] : memref<32x12xf32, #tpu.memory_space<vmem>>, vector<32x12xf32>
    %c0_28 = arith.constant 0 : index
    %c0_29 = arith.constant 0 : index
    %43 = vector.load %arg11[%c0_28, %c0_29] : memref<32x1xf32, #tpu.memory_space<vmem>>, vector<32x1xf32>
    %cst_30 = arith.constant dense<0.000000e+00> : vector<32x512xf32>
    %44 = tpu.matmul %42, %0, %cst_30 {dimension_numbers = #tpu.dot_dimension_numbers<[1], [0], [0], [1], [0, 0, 1, 1], [], []>, precision = #tpu.contract_precision<fp32>} : vector<32x12xf32>, vector<12x512xf32>, vector<32x512xf32> -> vector<32x512xf32>
    %45 = vector.broadcast %43 : vector<32x1xf32> to vector<32x512xf32>
    %46 = arith.addf %44, %45 : vector<32x512xf32>
    %cst_31 = arith.constant 2.000000e+01 : f32
    %47 = vector.broadcast %cst_31 : f32 to vector<32x512xf32>
    %48 = arith.cmpf ogt, %46, %47 : vector<32x512xf32>
    %cst_32 = arith.constant 2.000000e+01 : f32
    %49 = vector.broadcast %cst_32 : f32 to vector<32x512xf32>
    %50 = arith.minimumf %46, %49 : vector<32x512xf32>
    %51 = math.exp %50 : vector<32x512xf32>
    %52 = math.log1p %51 : vector<32x512xf32>
    %53 = arith.select %48, %46, %52 : vector<32x512xi1>, vector<32x512xf32>
    %c0_33 = arith.constant 0 : index
    %c0_34 = arith.constant 0 : index
    %54 = vector.load %arg12[%c0_33, %c0_34] : memref<32x32xf32, #tpu.memory_space<vmem>>, vector<32x32xf32>
    %c0_35 = arith.constant 0 : index
    %c0_36 = arith.constant 0 : index
    %55 = vector.load %arg13[%c0_35, %c0_36] : memref<32x1xf32, #tpu.memory_space<vmem>>, vector<32x1xf32>
    %cst_37 = arith.constant dense<0.000000e+00> : vector<32x512xf32>
    %56 = tpu.matmul %54, %53, %cst_37 {dimension_numbers = #tpu.dot_dimension_numbers<[1], [0], [0], [1], [0, 0, 1, 1], [], []>, precision = #tpu.contract_precision<fp32>} : vector<32x32xf32>, vector<32x512xf32>, vector<32x512xf32> -> vector<32x512xf32>
    %57 = vector.broadcast %55 : vector<32x1xf32> to vector<32x512xf32>
    %58 = arith.addf %56, %57 : vector<32x512xf32>
    %cst_38 = arith.constant 2.000000e+01 : f32
    %59 = vector.broadcast %cst_38 : f32 to vector<32x512xf32>
    %60 = arith.cmpf ogt, %58, %59 : vector<32x512xf32>
    %cst_39 = arith.constant 2.000000e+01 : f32
    %61 = vector.broadcast %cst_39 : f32 to vector<32x512xf32>
    %62 = arith.minimumf %58, %61 : vector<32x512xf32>
    %63 = math.exp %62 : vector<32x512xf32>
    %64 = math.log1p %63 : vector<32x512xf32>
    %65 = arith.select %60, %58, %64 : vector<32x512xi1>, vector<32x512xf32>
    %c0_40 = arith.constant 0 : index
    %c0_41 = arith.constant 0 : index
    %66 = vector.load %arg14[%c0_40, %c0_41] : memref<32x32xf32, #tpu.memory_space<vmem>>, vector<32x32xf32>
    %c0_42 = arith.constant 0 : index
    %c0_43 = arith.constant 0 : index
    %67 = vector.load %arg15[%c0_42, %c0_43] : memref<32x1xf32, #tpu.memory_space<vmem>>, vector<32x1xf32>
    %cst_44 = arith.constant dense<0.000000e+00> : vector<32x512xf32>
    %68 = tpu.matmul %66, %65, %cst_44 {dimension_numbers = #tpu.dot_dimension_numbers<[1], [0], [0], [1], [0, 0, 1, 1], [], []>, precision = #tpu.contract_precision<fp32>} : vector<32x32xf32>, vector<32x512xf32>, vector<32x512xf32> -> vector<32x512xf32>
    %69 = vector.broadcast %67 : vector<32x1xf32> to vector<32x512xf32>
    %70 = arith.addf %68, %69 : vector<32x512xf32>
    %cst_45 = arith.constant 0.000000e+00 : f32
    %71 = vector.broadcast %cst_45 : f32 to vector<32x512xf32>
    %72 = arith.subf %71, %70 : vector<32x512xf32>
    %73 = math.exp %72 : vector<32x512xf32>
    %cst_46 = arith.constant 1.000000e+00 : f32
    %74 = vector.broadcast %cst_46 : f32 to vector<32x512xf32>
    %75 = arith.addf %74, %73 : vector<32x512xf32>
    %cst_47 = arith.constant 1.000000e+00 : f32
    %76 = vector.broadcast %cst_47 : f32 to vector<32x512xf32>
    %77 = arith.divf %76, %75 : vector<32x512xf32>
    %78 = tpu.concatenate %77, %77, %77, %77 in 0 : vector<32x512xf32>, vector<32x512xf32>, vector<32x512xf32>, vector<32x512xf32> -> vector<128x512xf32>
    %79 = arith.mulf %41, %78 : vector<128x512xf32>
    %c0_48 = arith.constant 0 : index
    %c0_49 = arith.constant 0 : index
    %80 = vector.load %arg16[%c0_48, %c0_49] : memref<4x128xf32, #tpu.memory_space<vmem>>, vector<4x128xf32>
    %cst_50 = arith.constant dense<0.000000e+00> : vector<4x512xf32>
    %81 = tpu.matmul %80, %79, %cst_50 {dimension_numbers = #tpu.dot_dimension_numbers<[1], [0], [0], [1], [0, 0, 1, 1], [], []>, precision = #tpu.contract_precision<fp32>} : vector<4x128xf32>, vector<128x512xf32>, vector<4x512xf32> -> vector<4x512xf32>
    %c0_51 = arith.constant 0 : index
    %c0_52 = arith.constant 0 : index
    %82 = vector.load %arg17[%c0_51, %c0_52] : memref<4x512xf32, #tpu.memory_space<vmem>>, vector<4x512xf32>
    tpu.vector_store %arg17[%c0_51, %c0_52], %81 {strides = array<i32>} : memref<4x512xf32, #tpu.memory_space<vmem>>, vector<4x512xf32>,
    return
  }
  func.func @transform_0(%arg0: i32) -> (i32, i32) {
    %c0_i32 = arith.constant 0 : i32
    %c0_i32_0 = arith.constant 0 : i32
    return %c0_i32, %arg0 : i32, i32
  }
  func.func @transform_1(%arg0: i32) -> (i32, i32) {
    %c0_i32 = arith.constant 0 : i32
    %c0_i32_0 = arith.constant 0 : i32
    %c0_i32_1 = arith.constant 0 : i32
    return %c0_i32, %c0_i32_0 : i32, i32
  }
  func.func @transform_2(%arg0: i32) -> (i32, i32) {
    %c0_i32 = arith.constant 0 : i32
    %c0_i32_0 = arith.constant 0 : i32
    %c0_i32_1 = arith.constant 0 : i32
    return %c0_i32, %c0_i32_0 : i32, i32
  }
  func.func @transform_3(%arg0: i32) -> (i32, i32) {
    %c0_i32 = arith.constant 0 : i32
    %c0_i32_0 = arith.constant 0 : i32
    %c0_i32_1 = arith.constant 0 : i32
    return %c0_i32, %c0_i32_0 : i32, i32
  }
  func.func @transform_4(%arg0: i32) -> (i32, i32) {
    %c0_i32 = arith.constant 0 : i32
    %c0_i32_0 = arith.constant 0 : i32
    %c0_i32_1 = arith.constant 0 : i32
    return %c0_i32, %c0_i32_0 : i32, i32
  }
  func.func @transform_5(%arg0: i32) -> (i32, i32) {
    %c0_i32 = arith.constant 0 : i32
    %c0_i32_0 = arith.constant 0 : i32
    %c0_i32_1 = arith.constant 0 : i32
    return %c0_i32, %c0_i32_0 : i32, i32
  }
  func.func @transform_6(%arg0: i32) -> (i32, i32) {
    %c0_i32 = arith.constant 0 : i32
    %c0_i32_0 = arith.constant 0 : i32
    %c0_i32_1 = arith.constant 0 : i32
    return %c0_i32, %c0_i32_0 : i32, i32
  }
  func.func @transform_7(%arg0: i32) -> (i32, i32) {
    %c0_i32 = arith.constant 0 : i32
    %c0_i32_0 = arith.constant 0 : i32
    %c0_i32_1 = arith.constant 0 : i32
    return %c0_i32, %c0_i32_0 : i32, i32
  }
  func.func @transform_8(%arg0: i32) -> (i32, i32) {
    %c0_i32 = arith.constant 0 : i32
    %c0_i32_0 = arith.constant 0 : i32
    %c0_i32_1 = arith.constant 0 : i32
    return %c0_i32, %c0_i32_0 : i32, i32
  }
  func.func @transform_9(%arg0: i32) -> (i32, i32) {
    %c0_i32 = arith.constant 0 : i32
    %c0_i32_0 = arith.constant 0 : i32
    %c0_i32_1 = arith.constant 0 : i32
    return %c0_i32, %c0_i32_0 : i32, i32
  }
  func.func @transform_10(%arg0: i32) -> (i32, i32) {
    %c0_i32 = arith.constant 0 : i32
    %c0_i32_0 = arith.constant 0 : i32
    %c0_i32_1 = arith.constant 0 : i32
    return %c0_i32, %c0_i32_0 : i32, i32
  }
  func.func @transform_11(%arg0: i32) -> (i32, i32) {
    %c0_i32 = arith.constant 0 : i32
    %c0_i32_0 = arith.constant 0 : i32
    %c0_i32_1 = arith.constant 0 : i32
    return %c0_i32, %c0_i32_0 : i32, i32
  }
  func.func @transform_12(%arg0: i32) -> (i32, i32) {
    %c0_i32 = arith.constant 0 : i32
    %c0_i32_0 = arith.constant 0 : i32
    %c0_i32_1 = arith.constant 0 : i32
    return %c0_i32, %c0_i32_0 : i32, i32
  }
  func.func @transform_13(%arg0: i32) -> (i32, i32) {
    %c0_i32 = arith.constant 0 : i32
    %c0_i32_0 = arith.constant 0 : i32
    %c0_i32_1 = arith.constant 0 : i32
    return %c0_i32, %c0_i32_0 : i32, i32
  }
  func.func @transform_14(%arg0: i32) -> (i32, i32) {
    %c0_i32 = arith.constant 0 : i32
    %c0_i32_0 = arith.constant 0 : i32
    %c0_i32_1 = arith.constant 0 : i32
    return %c0_i32, %c0_i32_0 : i32, i32
  }
  func.func @transform_15(%arg0: i32) -> (i32, i32) {
    %c0_i32 = arith.constant 0 : i32
    %c0_i32_0 = arith.constant 0 : i32
    %c0_i32_1 = arith.constant 0 : i32
    return %c0_i32, %c0_i32_0 : i32, i32
  }
  func.func @transform_16(%arg0: i32) -> (i32, i32) {
    %c0_i32 = arith.constant 0 : i32
    %c0_i32_0 = arith.constant 0 : i32
    return %c0_i32, %arg0 : i32, i32
  }
}

</mosaic_0001>

<bundles_post_ra>
// kernel: tpu_custom_call.1
= control target key start
LH: loop header
LB: loop body
LE: loop exit
PB: predicated region body
PF: predicated region fallthrough
CT: control target
= control target key end

     0   :  { %s23251_s0 = inlined_call_operand.vmem [shape: f32[12,1024], index: 0, kind: input, shape index: {}]   ;;  %s23252_s1 = inlined_call_operand.vmem [shape: f32[32,12], index: 1, kind: input, shape index: {}]   ;;  %s23253_s2 = inlined_call_operand.vmem [shape: f32[32,1], index: 2, kind: input, shape index: {}]   ;;  %s23254_s3 = inlined_call_operand.vmem [shape: f32[32,32], index: 3, kind: input, shape index: {}]   ;;  %s23255_s4 = inlined_call_operand.vmem [shape: f32[32,1], index: 4, kind: input, shape index: {}]   ;;  %s23256_s5 = inlined_call_operand.vmem [shape: f32[32,32], index: 5, kind: input, shape index: {}]   ;;  %s23257_s6 = inlined_call_operand.vmem [shape: f32[32,1], index: 6, kind: input, shape index: {}]   ;;  %s23258_s7 = inlined_call_operand.vmem [shape: f32[128,32], index: 7, kind: input, shape index: {}]   ;;  %s23259_s8 = inlined_call_operand.vmem [shape: f32[128,1], index: 8, kind: input, shape index: {}]   ;;  %s23260_s9 = inlined_call_operand.vmem [shape: f32[32,12], index: 9, kind: input, shape index: {}]   ;;  %s23261_s10 = inlined_call_operand.vmem [shape: f32[32,1], index: 10, kind: input, shape index: {}]   ;;  %s23262_s11 = inlined_call_operand.vmem [shape: f32[32,32], index: 11, kind: input, shape index: {}]   ;;  %s23263_s12 = inlined_call_operand.vmem [shape: f32[32,1], index: 12, kind: input, shape index: {}]   ;;  %s23264_s13 = inlined_call_operand.vmem [shape: f32[32,32], index: 13, kind: input, shape index: {}]   ;;  %s23265_s14 = inlined_call_operand.vmem [shape: f32[32,1], index: 14, kind: input, shape index: {}]   ;;  %s23266_s15 = inlined_call_operand.vmem [shape: f32[4,128], index: 15, kind: input, shape index: {}]   ;;  %s23267_s16 = inlined_call_operand.hbm [shape: f32[4,1024], index: 16, kind: output, shape index: {}]  }
   0x1   :  { %23611 = sst [smem:[#allocation89_spill]] %s23251_s0 }
   0x2   :  { %23612 = sst [smem:[#allocation90_spill]] %s23252_s1 }
   0x3   :  { %23613 = sst [smem:[#allocation91_spill]] %s23253_s2 }
   0x4   :  { %23614 = sst [smem:[#allocation92_spill]] %s23254_s3 }
   0x5   :  { %23615 = sst [smem:[#allocation93_spill]] %s23255_s4 }
   0x6   :  { %21 = vsyncpa [#allocation4], 0 }
   0x7   :  { %23 = vsyncpa [#allocation4 + $0x1], 0  ;;  %s17223_s21 = smov 0   ;;  %s17225_s22 = smov 0  }
   0x8   :  { %s17227_s23 = smov 0   ;;  %s17229_s24 = smov 0  }
   0x9 LB: > { %s23268_s25 = sadd.s32 4294967295, %s17133_s24   ;;  %s14688_s26 = sadd.s32 4294967294, %s17133_s24   ;;  %s17133_s24 = sphi %s17229_s24, %s24464_s24   ;;  %s17129_s23 = sphi %s17227_s23, %s24463_s23   ;;  %s17125_s22 = sphi %s17225_s22, %s24462_s22   ;;  %s17121_s21 = sphi %s17223_s21, %s24461_s21  }
   0xa   : > { %s17246_s27 = sadd.s32 1, %s17133_s24   ;;  %s36_s28 = sadd.s32 1, %s17129_s23 }
   0xb   : > { %s33_s29 = ssub.s32 %s17133_s24, %s17246_s27  ;;  %p43_p0 = scmp.ne.s32.totalorder %s17129_s23, %s17125_s22 }
   0xc   : > { %p34_p1 = scmp.eq.s32.totalorder %s33_s29, 0  ;;  %p44_p2 = scmp.eq.s32.totalorder %s17133_s24, 0 }
   0xd   : > { %p388_p3 = scmp.eq.s32.totalorder %s23268_s25, 1  ;;  %p393_p4 = scmp.ne.s32.totalorder %s17125_s22, %s17121_s21 }
   0xe   : > { %s17259_s30 = scalar_select %p34_p1, %s17129_s23, %s36_s28  }
   0xf   : > { %p45_p5 = por %p44_p2, %p43_p0  ;;  %p17261_p6 = por %p388_p3, %p43_p0 }
  0x10   : > { %23616 = sst [smem:[#allocation6_spill]] %s17259_s30  ;;  %p394_p7 = scmp.eq.s32.totalorder %s14688_s26, 1 }
  0x11   : > { %p14690_p9 = scmp.ge.s32.totalorder %s17133_s24, 2 }
  0x12   : > { %p17265_p8 = por %p394_p7, %p393_p4 }
  0x13   : > { %455 = sbr.rel (%p14690_p9) target bundleno = 40 (0x28), region = 76 }
  0x1a   : > { %458 = sbr.rel (!%p45_p5) target bundleno = 40 (0x28), region = 80  ;;  %s460_s18 = sand.u32 (%p45_p5), 1, %s17129_s23  }
  0x1b   : > { %s14702_s19 = sshll.u32 (%p45_p5), %s17133_s24, 5  ;;  %s14691_s20 = sshll.u32 (%p45_p5), %s460_s18, 6 }
  0x1c   : > { %s23619_s25 = sld [smem:[#allocation89_spill]] (%p45_p5)  ;;  %s462_s26 = scalar_lea.vmem (%p45_p5), [#allocation2], %s14691_s20 }
  0x22   : > { %s465_s30 = scalar_lea.vmem %s23619_s25, %s14702_s19 }
  0x23   : > { %v478_v0 = vld [vmem:[%s465_s30] sm:$0xff]  ;;  %v480_v1 = vld [vmem:[%s465_s30 + $0x8] sm:$0xff]  ;;  %v482_v2 = vld [vmem:[%s465_s30 + $0x10] sm:$0xff] }
  0x24   : > { %479 = vst [vmem:[%s462_s26] sm:$0xff] %v478_v0  ;;  %481 = vst [vmem:[%s462_s26 + $0x8] sm:$0xff] %v480_v1  ;;  %v484_v3 = vld [vmem:[%s465_s30 + $0x18] sm:$0xff]  ;;  %v486_v4 = vld [vmem:[%s465_s30 + $0x40] sm:$0xff] }
  0x25   : > { %483 = vst [vmem:[%s462_s26 + $0x10] sm:$0xff] %v482_v2  ;;  %v488_v5 = vld [vmem:[%s465_s30 + $0x48] sm:$0xff]  ;;  %485 = vst [vmem:[%s462_s26 + $0x18] sm:$0xff] %v484_v3  ;;  %v490_v6 = vld [vmem:[%s465_s30 + $0x50] sm:$0xff] }
  0x26   : > { %487 = vst [vmem:[%s462_s26 + $0x20] sm:$0xff] %v486_v4  ;;  %489 = vst [vmem:[%s462_s26 + $0x28] sm:$0xff] %v488_v5  ;;  %v492_v7 = vld [vmem:[%s465_s30 + $0x58] sm:$0xff] }
  0x27   : > { %491 = vst [vmem:[%s462_s26 + $0x30] sm:$0xff] %v490_v6  ;;  %493 = vst [vmem:[%s462_s26 + $0x38] sm:$0xff] %v492_v7 }
  0x28 PF: > { %p14694_p10 = scmp.ge.s32.totalorder %s17133_s24, 1  ;;  %p498_p11 = scmp.lt.s32.totalorder %s17133_s24, 3 }
  0x2a   : > { %p499_p12 = pnand %p14694_p10, %p498_p11 }
  0x2c   : > { %502 = sbr.rel (%p499_p12) target bundleno = 3198 (0xc7e), region = 103 }
  0x33   : > { %s17280_s25 = sand.u32 1, %s17125_s22   ;;  %vm605_vm0 = vcmask 1043456   ;;  %s23620_s1 = sld [smem:[#allocation90_spill]]  ;;  %vm592_vm1 = vcmask 97280   ;;  %v23269_v10 = vmov 0.0   ;;  %v17136_v19 = vmov 0  }
  0x34   : > { %s14695_s28 = sshll.u32 %s17280_s25, 6  ;;  %686 = vmatprep.mubr.f32.mxu0 %v23269_v10  ;;  %1324 = vmatprep.mubr.f32.mxu1 %v23269_v10  ;;  %s23621_s2 = sld [smem:[#allocation91_spill]]  ;;  %vm2146_vm2 = vcmask 261120  }
  0x35   : > { %16685 = vset.pattern.permute.xlu0 %v17136_v19  ;;  %16686 = vset.pattern.permute.xlu1 %v17136_v19  ;;  %s507_s29 = scalar_lea.vmem [#allocation2], %s14695_s28  ;;  %s23625_s4 = sld [smem:[#allocation93_spill]] }
  0x36   : > { %v557_v21 = vld [vmem:[%s507_s29 + $0x8] sm:$0xff]  ;;  %v559_v23 = vld [vmem:[%s507_s29 + $0x18] sm:$0xff]  ;;  %v556_v30 = vld [vmem:[%s507_s29] sm:$0xff]  ;;  %s23639_s3 = sld [smem:[#allocation92_spill]]  ;;  %s14696_s20 = sshll.u32 %s17280_s25, 4 }
  0x37   : > { %v561_v22 = vld [vmem:[%s507_s29 + $0x28] sm:$0xf]  ;;  %v618_v27 = vand.u32 4294901760, %v557_v21  ;;  %v563_v28 = vld [vmem:[%s507_s29 + $0x38] sm:$0xf]  ;;  %v1256_v29 = vand.u32 4294901760, %v559_v23 }
  0x38   : > { %v610_v26 = vsel %vm605_vm0, %v561_v22, 0  ;;  %v616_v33 = vsel %vm605_vm0, %v563_v28, 0  ;;  %v560_v34 = vld [vmem:[%s507_s29 + $0x20] sm:$0xf]  ;;  %v620_v35 = vand.u32 4294901760, %v556_v30  ;;  %v558_v36 = vld [vmem:[%s507_s29 + $0x10] sm:$0xff] }
  0x39   : > { %v564_v8 = vld [vmem:[%s23620_s1] sm:$0xff]  ;;  %v565_v9 = vld [vmem:[%s23620_s1 + $0x8] sm:$0xff]  ;;  %v566_v13 = vld [vmem:[%s23620_s1 + $0x10] sm:$0xff]  ;;  %v622_v32 = vand.u32 4294901760, %v610_v26  ;;  %v1260_v38 = vand.u32 4294901760, %v616_v33  ;;  %v607_v39 = vsel %vm605_vm0, %v560_v34, 0  ;;  %v17346_v52 = vsub.f32 %v557_v21, %v618_v27 }
  0x3a   : > { %v594_v11 = vsel %vm592_vm1, %v564_v8, 0  ;;  %v597_v12 = vsel %vm592_vm1, %v565_v9, 0  ;;  %v567_v14 = vld [vmem:[%s23620_s1 + $0x18] sm:$0xff]  ;;  %v17304_v17 = vsel %vm592_vm1, %v566_v13, 0  ;;  %v568_v20 = vld [vmem:[%s23621_s2] sm:$0xff]  ;;  %v1258_v41 = vand.u32 4294901760, %v558_v36 }
  0x3b   : > { %v17299_v15 = vand.u32 4294901760, %v594_v11  ;;  %v17301_v16 = vand.u32 4294901760, %v597_v12  ;;  %v17307_v18 = vsel %vm592_vm1, %v567_v14, 0  ;;  %v17313_v24 = vand.u32 4294901760, %v17304_v17  ;;  %574 = vperm.xlu0 %16685, %v568_v20   ;;  %v562_v40 = vld [vmem:[%s507_s29 + $0x30] sm:$0xf] }
  0x3c   : > { %v17316_v25 = vand.u32 4294901760, %v17307_v18  ;;  %v17330_v43 = vpack.c.bf16 %v622_v32, %v618_v27  ;;  %v624_v44 = vand.u32 4294901760, %v607_v39  ;;  %v613_v45 = vsel %vm605_vm0, %v562_v40, 0  ;;  %v569_v47 = vld [vmem:[%s23621_s2 + $0x8] sm:$0xff]  ;;  %v570_v48 = vld [vmem:[%s23621_s2 + $0x10] sm:$0xff]  ;;  %v2122_v57 = vld [vmem:[%s23625_s4] sm:$0xff] }
  0x3d   : > { %v17320_v31 = vsub.f32 %v594_v11, %v17299_v15  ;;  %v17324_v37 = vsub.f32 %v597_v12, %v17301_v16  ;;  %v17342_v49 = vpack.c.bf16 %v1260_v38, %v1256_v29  ;;  %v1262_v50 = vand.u32 4294901760, %v613_v45  ;;  %584 = vperm.xlu1 %16686, %v570_v48   ;;  %v571_v62 = vld [vmem:[%s23621_s2 + $0x18] sm:$0xff]  ;;  %v2124_v12 = vld [vmem:[%s23625_s4 + $0x10] sm:$0xff]  ;;  %v2123_v21 = vld [vmem:[%s23625_s4 + $0x8] sm:$0xff]  ;;  %s24459_s29 = sadd.s32 4294967295, %s17133_s24   ;;  %s553_s26 = scalar_lea.vmem [#allocation3], %s14696_s20 }
  0x3e   : > { %23622 = vst [vmem:[#allocation7_spill] sm:$0xff] %v17330_v43  ;;  %14705 = vmatprep.subr.bf16.mxu0 %v17330_v43  ;;  %v17349_v53 = vpack.c.bf16 %v624_v44, %v620_v35  ;;  %v17353_v55 = vsub.f32 %v610_v26, %v622_v32  ;;  %v17355_v56 = vsub.f32 %v559_v23, %v1256_v29  ;;  %v733_v60 = vand.u32 4294901760, %v17346_v52  ;;  %s14703_s28 = sshll.u32 %s24459_s29, 8  ;;  %s14623_s18 = sshll.u32 %s553_s26, 4  ;;  %s23209_s18 = int_to_ptr.vmem [resolvable:$true] %s14623_s18 }
  0x3f   : > { %v17328_v42 = vand.u32 4294901760, %v17320_v31  ;;  %v17334_v46 = vand.u32 4294901760, %v17324_v37  ;;  %23623 = vst [vmem:[#allocation8_spill] sm:$0xff] %v17342_v49  ;;  %579 = vperm.xlu0 %16685, %v569_v47   ;;  %14729 = vmatprep.subr.bf16.mxu1 %v17342_v49  ;;  %v17361_v58 = vpack.c.bf16 %v1262_v50, %v1258_v41  ;;  %v17364_v61 = vsub.f32 %v616_v33, %v1260_v38  ;;  %s23207_s1 = scalar_lea.hbm %s23267_s16, %s14703_s28  ;;  %s14609_s29 = scalar_lea.sflag [#allocation4], %s17280_s25 }
  0x40   : > { %23624 = vst [vmem:[#allocation9_spill] sm:$0xff] %v17349_v53  ;;  %14707 = vmatpush1.bf16.msra.mxu0 %v17349_v53  ;;  %v745_v0 = vand.u32 4294901760, %v17353_v55  ;;  %v1371_v1 = vand.u32 4294901760, %v17355_v56  ;;  %v17372_v2 = vsub.f32 %v556_v30, %v620_v35  ;;  %v734_v3 = vsub.f32 %v17346_v52, %v733_v60  ;;  %s17071_s20 = scalar_lea.vmem %s23209_s18, 256  ;;  %s17137_s2 = smov [#allocation3]  }
  0x41   : > { %v690_v51 = vsub.f32 %v17320_v31, %v17328_v42  ;;  %v701_v54 = vsub.f32 %v17324_v37, %v17334_v46  ;;  %23626 = vst [vmem:[#allocation10_spill] sm:$0xff] %v17361_v58  ;;  %14731 = vmatpush1.bf16.msra.mxu1 %v17361_v58  ;;  %v1383_v4 = vand.u32 4294901760, %v17364_v61  ;;  %v17379_v5 = vsub.f32 %v607_v39, %v624_v44  ;;  %p17072_p13 = scmp.ne.s32.totalorder %s23209_s18, %s17071_s20 }
  0x42   : > { %v17381_v6 = vsub.f32 %v558_v36, %v1258_v41  ;;  %v746_v7 = vsub.f32 %v17353_v55, %v745_v0  ;;  %v1372_v8 = vsub.f32 %v17355_v56, %v1371_v1  ;;  %v739_v9 = vand.u32 4294901760, %v17372_v2  ;;  %589 = vperm.xlu1 %16686, %v571_v62  }
  0x43   : > { %v691_v59 = vand.u32 4294901760, %v690_v51  ;;  %v702_v63 = vand.u32 4294901760, %v701_v54  ;;  %2128 = vperm.xlu0 %16685, %v2122_v57   ;;  %v17390_v11 = vsub.f32 %v613_v45, %v1262_v50  ;;  %v735_v13 = vand.u32 4294901760, %v734_v3  ;;  %v3767_v45 = vld [vmem:[%s23257_s6] sm:$0xff]  ;;  %v3768_v3 = vld [vmem:[%s23257_s6 + $0x8] sm:$0xff]  ;;  %p17073_p0 = pnand %p17072_p13, %p17261_p6 }
  0x44   : > { %v1384_v14 = vsub.f32 %v17364_v61, %v1383_v4  ;;  %v751_v19 = vand.u32 4294901760, %v17379_v5  ;;  %v1377_v20 = vand.u32 4294901760, %v17381_v6  ;;  %v747_v22 = vand.u32 4294901760, %v746_v7  ;;  %v8127_v7 = vld [vmem:[%s23261_s10] sm:$0xff] }
  0x45   : > { %692 = vmatmul.mubr.f32.vlgmr.msra.gmra.mrb[0].mxu0 %v691_v59  ;;  %1330 = vmatmul.mubr.f32.vlgmr.msra.gmra.mrb[0].mxu1 %v691_v59  ;;  %v1373_v23 = vand.u32 4294901760, %v1372_v8  ;;  %v740_v26 = vsub.f32 %v17372_v2, %v739_v9  ;;  %v1389_v27 = vand.u32 4294901760, %v17390_v11  ;;  %v17417_v32 = vsub.f32 %v17304_v17, %v17313_v24  ;;  %v2125_v59 = vld [vmem:[%s23625_s4 + $0x18] sm:$0xff]  ;;  %p17074_p1 = pneg %p17073_p0 }
  0x46   : > { %697 = vmatprep.mubr.f32.mxu0 %v23269_v10  ;;  %1335 = vmatprep.mubr.f32.mxu1 %v23269_v10  ;;  %v1385_v28 = vand.u32 4294901760, %v1384_v14  ;;  %v752_v29 = vsub.f32 %v17379_v5, %v751_v19  ;;  %v1378_v30 = vsub.f32 %v17381_v6, %v1377_v20  ;;  %v17419_v33 = vpack.c.bf16 %v747_v22, %v735_v13  ;;  %v3770_v13 = vld [vmem:[%s23257_s6 + $0x18] sm:$0xff]  ;;  %v8129_v14 = vld [vmem:[%s23261_s10 + $0x10] sm:$0xff]  ;;  %v9667_v22 = vld [vmem:[%s23263_s12] sm:$0xff] }
  0x47   : > { %2138 = vperm.xlu0 %16685, %v2124_v12   ;;  %v741_v34 = vand.u32 4294901760, %v740_v26  ;;  %v1390_v35 = vsub.f32 %v17390_v11, %v1389_v27  ;;  %v17426_v36 = vsub.f32 %v17307_v18, %v17316_v25  ;;  %2133 = vperm.xlu1 %16686, %v2123_v21   ;;  %v17431_v17 = vand.u32 4294901760, %v17417_v32  ;;  %v8128_v21 = vld [vmem:[%s23261_s10 + $0x8] sm:$0xff]  ;;  %v9669_v26 = vld [vmem:[%s23263_s12 + $0x10] sm:$0xff] }
  0x48   : > { %23627 = vst [vmem:[#allocation11_spill] sm:$0xff] %v17419_v33  ;;  %v17428_v38 = vpack.c.bf16 %v1385_v28, %v1373_v23  ;;  %v753_v39 = vand.u32 4294901760, %v752_v29  ;;  %v1379_v40 = vand.u32 4294901760, %v1378_v30  ;;  %14709 = vmatprep.subr.bf16.mxu0 %v17419_v33  ;;  %v17439_v18 = vpack.c.bf16 %v17353_v55, %v17346_v52  ;;  %v8130_v23 = vld [vmem:[%s23261_s10 + $0x18] sm:$0xff]  ;;  %v9668_v52 = vld [vmem:[%s23263_s12 + $0x8] sm:$0xff] }
  0x49   : > { %703 = vmatmul.mubr.f32.gmra.mrb[2].mxu0 %v702_v63  ;;  %1341 = vmatmul.mubr.f32.gmra.mrb[2].mxu1 %v702_v63  ;;  %v1391_v41 = vand.u32 4294901760, %v1390_v35  ;;  %v17435_v44 = vand.u32 4294901760, %v17426_v36  ;;  %v712_v48 = vsub.f32 %v17417_v32, %v17431_v17  ;;  %v17458_v57 = vpack.c.bf16 %v17364_v61, %v17355_v56  ;;  %v3769_v63 = vld [vmem:[%s23257_s6 + $0x10] sm:$0xff]  ;;  %v9670_v55 = vld [vmem:[%s23263_s12 + $0x18] sm:$0xff] }
  0x4a   : > { %23628 = vst [vmem:[#allocation12_spill] sm:$0xff] %v17428_v38  ;;  %23629 = vst [vmem:[#allocation13_spill] sm:$0xff] %v17439_v18  ;;  %14733 = vmatprep.subr.bf16.mxu1 %v17428_v38  ;;  %v17445_v47 = vpack.c.bf16 %v753_v39, %v741_v34  ;;  %708 = vmatprep.mubr.f32.mxu0 %v23269_v10  ;;  %v17481_v8 = vpack.c.bf16 %v17379_v5, %v17372_v2  ;;  %v11313_v56 = vld [vmem:[%s23265_s14 + $0x10] sm:$0xff]  ;;  %v5424_v2 = vld [vmem:[%s23259_s8 + $0x8] sm:$0xff] }
  0x4b   : > { %v17450_v50 = vpack.c.bf16 %v1391_v41, %v1379_v40  ;;  %1346 = vmatprep.mubr.f32.mxu1 %v23269_v10  ;;  %v723_v51 = vsub.f32 %v17426_v36, %v17435_v44  ;;  %v713_v54 = vand.u32 4294901760, %v712_v48  ;;  %23632 = vst [vmem:[#allocation16_spill] sm:$0xff] %v17458_v57  ;;  %3773 = vperm.xlu0 %16685, %v3767_v45   ;;  %v5429_v5 = vld [vmem:[%s23259_s8 + $0x30] sm:$0xff]  ;;  %v5434_v30 = vld [vmem:[%s23259_s8 + $0x58] sm:$0xff]  ;;  %v5436_v34 = vld [vmem:[%s23259_s8 + $0x68] sm:$0xff] }
  0x4c   : > { %23630 = vst [vmem:[#allocation14_spill] sm:$0xff] %v17445_v47  ;;  %14711 = vmatpush1.bf16.msra.mxu0 %v17445_v47  ;;  %2143 = vperm.xlu1 %16686, %v2125_v59   ;;  %23633 = vst [vmem:[#allocation17_spill] sm:$0xff] %v17481_v8  ;;  %v17485_v12 = vpack.c.bf16 %v17390_v11, %v17381_v6  ;;  %v17529_v28 = vpack.c.bf16 %v745_v0, %v733_v60  ;;  %v5423_v60 = vld [vmem:[%s23259_s8] sm:$0xff]  ;;  %v5428_v6 = vld [vmem:[%s23259_s8 + $0x28] sm:$0xff] }
  0x4d   : > { %23631 = vst [vmem:[#allocation15_spill] sm:$0xff] %v17450_v50  ;;  %14735 = vmatpush1.bf16.msra.mxu1 %v17450_v50  ;;  %14713 = vmatprep.subr.bf16.mxu0 %v17439_v18  ;;  %v724_v62 = vand.u32 4294901760, %v723_v51  ;;  %v17535_v29 = vpack.c.bf16 %v1383_v4, %v1371_v1  ;;  %v17579_v61 = vpack.c.bf16 %v751_v19, %v739_v9  ;;  %v11314_v1 = vld [vmem:[%s23265_s14 + $0x18] sm:$0xff]  ;;  %v5427_v4 = vld [vmem:[%s23259_s8 + $0x20] sm:$0xff]  ;;  %v5433_v19 = vld [vmem:[%s23259_s8 + $0x50] sm:$0xff] }
  0x4e   : > { %714 = vmatmul.mubr.f32.gmra.mrb[4].mxu0 %v713_v54  ;;  %1352 = vmatmul.mubr.f32.gmra.mrb[4].mxu1 %v713_v54  ;;  %23634 = vst [vmem:[#allocation18_spill] sm:$0xff] %v17485_v12  ;;  %23635 = vst [vmem:[#allocation19_spill] sm:$0xff] %v17529_v28  ;;  %v17585_v0 = vpack.c.bf16 %v1389_v27, %v1377_v20  ;;  %v5431_v9 = vld [vmem:[%s23259_s8 + $0x40] sm:$0xff]  ;;  %v5430_v11 = vld [vmem:[%s23259_s8 + $0x38] sm:$0xff] }
  0x4f   : > { %719 = vmatprep.mubr.f32.mxu0 %v23269_v10  ;;  %1357 = vmatprep.mubr.f32.mxu1 %v23269_v10  ;;  %23636 = vst [vmem:[#allocation20_spill] sm:$0xff] %v17535_v29  ;;  %23637 = vst [vmem:[#allocation21_spill] sm:$0xff] %v17579_v61  ;;  %v5432_v20 = vld [vmem:[%s23259_s8 + $0x48] sm:$0xff]  ;;  %v5435_v27 = vld [vmem:[%s23259_s8 + $0x60] sm:$0xff] }
  0x50   : > { %14737 = vmatprep.subr.bf16.mxu1 %v17458_v57  ;;  %3783 = vperm.xlu0 %16685, %v3769_v63   ;;  %23638 = vst [vmem:[#allocation22_spill] sm:$0xff] %v17585_v0  ;;  %v5438_v35 = vld [vmem:[%s23259_s8 + $0x78] sm:$0xff] }
  0x51   : > { %3778 = vperm.xlu1 %16686, %v3768_v3  }
  0x52   : > { %725 = vmatmul.mubr.f32.gmra.mrb[6].mxu0 %v724_v62  ;;  %1363 = vmatmul.mubr.f32.gmra.mrb[6].mxu1 %v724_v62 }
  0x53   : > { %815 = vmatprep.mubr.f32.mxu0 %v23269_v10  ;;  %1453 = vmatprep.mubr.f32.mxu1 %v23269_v10 }
  0x54   : > { %8133 = vperm.xlu0 %16685, %v8127_v7  }
  0x55   : > { %3788 = vperm.xlu1 %16686, %v3770_v13  }
  0x56   : > { %817 = vmatmul.mubr.f32.vlgmr.msra.gmra.mrb[0].mxu0 %v17299_v15  ;;  %1455 = vmatmul.mubr.f32.vlgmr.msra.gmra.mrb[0].mxu1 %v17299_v15 }
  0x57   : > { %822 = vmatprep.mubr.f32.mxu0 %v23269_v10  ;;  %1460 = vmatprep.mubr.f32.mxu1 %v23269_v10 }
  0x58   : > { %14715 = vmatpush1.bf16.msra.mxu0 %v17481_v8  ;;  %14739 = vmatpush1.bf16.msra.mxu1 %v17485_v12 }
  0x59   : > { %14717 = vmatprep.subr.bf16.mxu0 %v17330_v43  ;;  %14741 = vmatprep.subr.bf16.mxu1 %v17342_v49 }
  0x5a   : > { %824 = vmatmul.mubr.f32.gmra.mrb[2].mxu0 %v17301_v16  ;;  %1462 = vmatmul.mubr.f32.gmra.mrb[2].mxu1 %v17301_v16 }
  0x5b   : > { %829 = vmatprep.mubr.f32.mxu0 %v23269_v10  ;;  %1467 = vmatprep.mubr.f32.mxu1 %v23269_v10 }
  0x5c   : > { %8143 = vperm.xlu0 %16685, %v8129_v14   ;;  %8138 = vperm.xlu1 %16686, %v8128_v21  }
  0x5e   : > { %831 = vmatmul.mubr.f32.gmra.mrb[4].mxu0 %v17313_v24  ;;  %1469 = vmatmul.mubr.f32.gmra.mrb[4].mxu1 %v17313_v24 }
  0x5f   : > { %836 = vmatprep.mubr.f32.mxu0 %v23269_v10  ;;  %1474 = vmatprep.mubr.f32.mxu1 %v23269_v10 }
  0x60   : > { %9673 = vperm.xlu0 %16685, %v9667_v22   ;;  %8148 = vperm.xlu1 %16686, %v8130_v23  }
  0x62   : > { %838 = vmatmul.mubr.f32.gmra.mrb[6].mxu0 %v17316_v25  ;;  %1476 = vmatmul.mubr.f32.gmra.mrb[6].mxu1 %v17316_v25 }
  0x63   : > { %916 = vmatprep.mubr.f32.mxu0 %v23269_v10  ;;  %1554 = vmatprep.mubr.f32.mxu1 %v23269_v10 }
  0x64   : > { %9683 = vperm.xlu0 %16685, %v9669_v26   ;;  %9678 = vperm.xlu1 %16686, %v9668_v52  }
  0x66   : > { %919 = vmatmul.mubr.f32.vlgmr.msra.gmra.mrb[0].mxu0 %v17320_v31  ;;  %1557 = vmatmul.mubr.f32.vlgmr.msra.gmra.mrb[0].mxu1 %v17320_v31  ;;  %v11311_v31 = vld [vmem:[%s23265_s14] sm:$0xff] }
  0x67   : > { %924 = vmatprep.mubr.f32.mxu0 %v23269_v10  ;;  %1562 = vmatprep.mubr.f32.mxu1 %v23269_v10 }
  0x68   : > { %14719 = vmatpush1.bf16.msra.mxu0 %v17349_v53  ;;  %14743 = vmatpush1.bf16.msra.mxu1 %v17361_v58 }
  0x69   : > { %14721 = vmatprep.subr.bf16.mxu0 %v17529_v28  ;;  %14745 = vmatprep.subr.bf16.mxu1 %v17535_v29 }
  0x6a   : > { %927 = vmatmul.mubr.f32.gmra.mrb[2].mxu0 %v17324_v37  ;;  %1565 = vmatmul.mubr.f32.gmra.mrb[2].mxu1 %v17324_v37  ;;  %v11312_v37 = vld [vmem:[%s23265_s14 + $0x8] sm:$0xff] }
  0x6b   : > { %932 = vmatprep.mubr.f32.mxu0 %v23269_v10  ;;  %1570 = vmatprep.mubr.f32.mxu1 %v23269_v10 }
  0x6c   : > { %11317 = vperm.xlu0 %16685, %v11311_v31   ;;  %9688 = vperm.xlu1 %16686, %v9670_v55  }
  0x6e   : > { %935 = vmatmul.mubr.f32.gmra.mrb[4].mxu0 %v17417_v32  ;;  %1573 = vmatmul.mubr.f32.gmra.mrb[4].mxu1 %v17417_v32  ;;  %v5437_v32 = vld [vmem:[%s23259_s8 + $0x70] sm:$0xff] }
  0x6f   : > { %940 = vmatprep.mubr.f32.mxu0 %v23269_v10  ;;  %1578 = vmatprep.mubr.f32.mxu1 %v23269_v10 }
  0x70   : > { %11327 = vperm.xlu0 %16685, %v11313_v56   ;;  %11322 = vperm.xlu1 %16686, %v11312_v37  }
  0x72   : > { %943 = vmatmul.mubr.f32.gmra.mrb[6].mxu0 %v17426_v36  ;;  %1581 = vmatmul.mubr.f32.gmra.mrb[6].mxu1 %v17426_v36 }
  0x73   : > { %1017 = vmatprep.mubr.f32.mxu0 %v23269_v10  ;;  %1655 = vmatprep.mubr.f32.mxu1 %v23269_v10 }
  0x74   : > { %5441 = vperm.xlu0 %16685, %v5423_v60   ;;  %11332 = vperm.xlu1 %16686, %v11314_v1  }
  0x76   : > { %1021 = vmatmul.mubr.f32.vlgmr.msra.gmra.mrb[0].mxu0 %v17328_v42  ;;  %1659 = vmatmul.mubr.f32.vlgmr.msra.gmra.mrb[0].mxu1 %v17328_v42  ;;  %v5425_v42 = vld [vmem:[%s23259_s8 + $0x10] sm:$0xff] }
  0x77   : > { %1026 = vmatprep.mubr.f32.mxu0 %v23269_v10  ;;  %1664 = vmatprep.mubr.f32.mxu1 %v23269_v10 }
  0x78   : > { %14723 = vmatpush1.bf16.msra.mxu0 %v17579_v61  ;;  %14747 = vmatpush1.bf16.msra.mxu1 %v17585_v0 }
  0x79   : > { %14725 = vmatprep.subr.bf16.mxu0 %v17330_v43  ;;  %14749 = vmatprep.subr.bf16.mxu1 %v17342_v49 }
  0x7a   : > { %1030 = vmatmul.mubr.f32.gmra.mrb[2].mxu0 %v17334_v46  ;;  %1668 = vmatmul.mubr.f32.gmra.mrb[2].mxu1 %v17334_v46  ;;  %v5426_v46 = vld [vmem:[%s23259_s8 + $0x18] sm:$0xff] }
  0x7b   : > { %1035 = vmatprep.mubr.f32.mxu0 %v23269_v10  ;;  %1673 = vmatprep.mubr.f32.mxu1 %v23269_v10 }
  0x7c   : > { %5451 = vperm.xlu0 %16685, %v5425_v42   ;;  %5446 = vperm.xlu1 %16686, %v5424_v2  }
  0x7e   : > { %1039 = vmatmul.mubr.f32.gmra.mrb[4].mxu0 %v17431_v17  ;;  %1677 = vmatmul.mubr.f32.gmra.mrb[4].mxu1 %v17431_v17 }
  0x7f   : > { %1044 = vmatprep.mubr.f32.mxu0 %v23269_v10  ;;  %1682 = vmatprep.mubr.f32.mxu1 %v23269_v10 }
  0x80   : > { %5461 = vperm.xlu0 %16685, %v5427_v4   ;;  %5456 = vperm.xlu1 %16686, %v5426_v46  }
  0x82   : > { %1048 = vmatmul.mubr.f32.gmra.mrb[6].mxu0 %v17435_v44  ;;  %1686 = vmatmul.mubr.f32.gmra.mrb[6].mxu1 %v17435_v44  ;;  %v2119_v44 = vld [vmem:[%s23639_s3 + $0x8] sm:$0xff] }
  0x83   : > { %1130 = vmatprep.mubr.f32.mxu0 %v23269_v10  ;;  %1768 = vmatprep.mubr.f32.mxu1 %v23269_v10  ;;  %v2151_v14 = vsel %vm2146_vm2, %v2119_v44, 0 }
  0x84   : > { %5471 = vperm.xlu0 %16685, %v5429_v5   ;;  %5466 = vperm.xlu1 %16686, %v5428_v6  }
  0x86   : > { %1132 = vmatmul.mubr.f32.vlgmr.msra.gmra.mrb[0].mxu0 %v17299_v15  ;;  %1770 = vmatmul.mubr.f32.vlgmr.msra.gmra.mrb[0].mxu1 %v17299_v15 }
  0x87   : > { %1137 = vmatprep.mubr.f32.mxu0 %v23269_v10  ;;  %1775 = vmatprep.mubr.f32.mxu1 %v23269_v10 }
  0x88   : > { %14727 = vmatpush1.bf16.msra.mxu0 %v17349_v53  ;;  %14751 = vmatpush1.bf16.msra.mxu1 %v17361_v58 }
  0x89   : > { %5481 = vperm.xlu0 %16685, %v5431_v9   ;;  %5476 = vperm.xlu1 %16686, %v5430_v11  }
  0x8a   : > { %1139 = vmatmul.mubr.f32.gmra.mrb[2].mxu0 %v17301_v16  ;;  %1777 = vmatmul.mubr.f32.gmra.mrb[2].mxu1 %v17301_v16 }
  0x8b   : > { %1144 = vmatprep.mubr.f32.mxu0 %v23269_v10  ;;  %1782 = vmatprep.mubr.f32.mxu1 %v23269_v10 }
  0x8d   : > { %5491 = vperm.xlu0 %16685, %v5433_v19   ;;  %5486 = vperm.xlu1 %16686, %v5432_v20  }
  0x8e   : > { %1146 = vmatmul.mubr.f32.gmra.mrb[4].mxu0 %v17313_v24  ;;  %1784 = vmatmul.mubr.f32.gmra.mrb[4].mxu1 %v17313_v24 }
  0x8f   : > { %1151 = vmatprep.mubr.f32.mxu0 %v23269_v10  ;;  %1789 = vmatprep.mubr.f32.mxu1 %v23269_v10 }
  0x91   : > { %5501 = vperm.xlu0 %16685, %v5435_v27   ;;  %5496 = vperm.xlu1 %16686, %v5434_v30   ;;  %v17726_v27 = vand.u32 4294901760, %v2151_v14 }
  0x92   : > { %1153 = vmatmul.mubr.f32.gmra.mrb[6].mxu0 %v17316_v25  ;;  %1791 = vmatmul.mubr.f32.gmra.mrb[6].mxu1 %v17316_v25 }
  0x93   : > { %1227 = vmatprep.mubr.f32.mxu0 %v23269_v10  ;;  %1865 = vmatprep.mubr.f32.mxu1 %v23269_v10 }
  0x95   : > { %5511 = vperm.xlu0 %16685, %v5437_v32   ;;  %5506 = vperm.xlu1 %16686, %v5436_v34  }
  0x96   : > { %1229 = vmatmul.mubr.f32.vlgmr.msra.gmra.mrb[0].mxu0 %v17299_v15  ;;  %1867 = vmatmul.mubr.f32.vlgmr.msra.gmra.mrb[0].mxu1 %v17299_v15 }
  0x97   : > { %1234 = vmatprep.mubr.f32.mxu0 %v23269_v10  ;;  %1872 = vmatprep.mubr.f32.mxu1 %v23269_v10 }
  0x99   : > { %5516 = vperm.xlu1 %16686, %v5438_v35  }
  0x9a   : > { %1236 = vmatmul.mubr.f32.gmra.mrb[2].mxu0 %v17301_v16  ;;  %1874 = vmatmul.mubr.f32.gmra.mrb[2].mxu1 %v17301_v16  ;;  %v2118_v16 = vld [vmem:[%s23639_s3] sm:$0xff] }
  0x9b   : > { %1241 = vmatprep.mubr.f32.mxu0 %v23269_v10  ;;  %1879 = vmatprep.mubr.f32.mxu1 %v23269_v10 }
  0x9e   : > { %1243 = vmatmul.mubr.f32.gmra.mrb[4].mxu0 %v17313_v24  ;;  %1881 = vmatmul.mubr.f32.gmra.mrb[4].mxu1 %v17313_v24 }
  0x9f   : > { %1248 = vmatprep.mubr.f32.mxu0 %v23269_v10  ;;  %1886 = vmatprep.mubr.f32.mxu1 %v23269_v10 }
  0xa2   : > { %1250 = vmatmul.mubr.f32.gmra.mrb[6].mxu0 %v17316_v25  ;;  %1888 = vmatmul.mubr.f32.gmra.mrb[6].mxu1 %v17316_v25  ;;  %v2148_v25 = vsel %vm2146_vm2, %v2118_v16, 0  ;;  %v2120_v16 = vld [vmem:[%s23639_s3 + $0x10] sm:$0xff] }
  0xa3   : > { %2231 = vmatprep.mubr.f32.mxu0 %v23269_v10  ;;  %2921 = vmatprep.mubr.f32.mxu1 %v23269_v10  ;;  %v17708_v13 = vand.u32 4294901760, %v2148_v25 }
  0xa5   : > { %v17723_v6 = vsub.f32 %v2148_v25, %v17708_v13 }
  0xa7   : > { %v17739_v25 = vand.u32 4294901760, %v17723_v6 }
  0xa9   : > { %23640 = vst [vmem:[#allocation23_spill] sm:$0xff] %v17739_v25 }
  0xba   : > { %v575_v15 = vpop.permute.xlu0 %574 }
  0xbc   : > { %v585_v1 = vpop.permute.xlu1 %584 }
  0xbe   : > { %v580_v51 = vpop.permute.xlu0 %579 }
 0x169   : > { %v1230_v36 = vpop.f32.mrb[0].mxu0  ;;  %v1868_v24 = vpop.f32.mrb[0].mxu1 }
 0x16a   : > { %v17692_v39 = vadd.f32 %v1230_v36, %v575_v15  ;;  %v17694_v40 = vadd.f32 %v1868_v24, %v575_v15  ;;  %v1232_v17 = vpop.f32.mrb[1].mxu0  ;;  %v1870_v41 = vpop.f32.mrb[1].mxu1 }
 0x16b   : > { %v17700_v45 = vadd.f32 %v1232_v17, %v575_v15  ;;  %v17702_v48 = vadd.f32 %v1870_v41, %v575_v15 }
 0x16c   : > { %v1910_v54 = vmin.f32 %v17692_v39, 20.0  ;;  %v1912_v59 = vmin.f32 %v17694_v40, 20.0  ;;  %vm1894_vm3 = vcmp.gt.f32.partialorder %v17692_v39, 20.0  ;;  %vm1896_vm6 = vcmp.gt.f32.partialorder %v17694_v40, 20.0 }
 0x16d   : > { %v1911_v62 = vmin.f32 %v17700_v45, 20.0  ;;  %v1913_v63 = vmin.f32 %v17702_v48, 20.0  ;;  %v1237_v3 = vpop.f32.mrb[2].mxu0  ;;  %v1875_v7 = vpop.f32.mrb[2].mxu1  ;;  %vm1895_vm9 = vcmp.gt.f32.partialorder %v17700_v45, 20.0  ;;  %vm1897_vm10 = vcmp.gt.f32.partialorder %v17702_v48, 20.0 }
 0x16e   : > { %v1926_v21 = vmul.f32 1.442695, %v1910_v54  ;;  %v1930_v22 = vmul.f32 1.442695, %v1912_v59  ;;  %v17711_v23 = vadd.f32 %v1237_v3, %v580_v51  ;;  %v17713_v26 = vadd.f32 %v1875_v7, %v580_v51  ;;  %v1239_v52 = vpop.f32.mrb[3].mxu0  ;;  %v1877_v31 = vpop.f32.mrb[3].mxu1 }
 0x16f   : > { %v1928_v55 = vmul.f32 1.442695, %v1911_v62  ;;  %v1932_v56 = vmul.f32 1.442695, %v1913_v63  ;;  %v17715_v37 = vadd.f32 %v1239_v52, %v580_v51  ;;  %v17717_v60 = vadd.f32 %v1877_v31, %v580_v51 }
 0x170   : > { %16687 = vpow2.f32 %v1926_v21  ;;  %v1914_v42 = vmin.f32 %v17711_v23, 20.0  ;;  %v1916_v2 = vmin.f32 %v17713_v26, 20.0  ;;  %v17745_v62 = vsub.f32 %v2151_v14, %v17726_v27 }
 0x171   : > { %16689 = vpow2.f32 %v1930_v22  ;;  %v1915_v4 = vmin.f32 %v17715_v37, 20.0  ;;  %v1244_v46 = vpop.f32.mrb[4].mxu0  ;;  %v1882_v5 = vpop.f32.mrb[4].mxu1  ;;  %v1917_v11 = vmin.f32 %v17717_v60, 20.0  ;;  %v2154_v3 = vsel %vm2146_vm2, %v2120_v16, 0 }
 0x172   : > { %16691 = vpow2.f32 %v1928_v55  ;;  %v1934_v9 = vmul.f32 1.442695, %v1914_v42  ;;  %v1246_v19 = vpop.f32.mrb[5].mxu0  ;;  %v1884_v20 = vpop.f32.mrb[5].mxu1  ;;  %v1938_v30 = vmul.f32 1.442695, %v1916_v2  ;;  %v17728_v34 = vadd.f32 %v1244_v46, %v585_v1 }
 0x173   : > { %16693 = vpow2.f32 %v1932_v56  ;;  %v1936_v32 = vmul.f32 1.442695, %v1915_v4  ;;  %v17730_v35 = vadd.f32 %v1882_v5, %v585_v1  ;;  %v17732_v15 = vadd.f32 %v1246_v19, %v585_v1  ;;  %v2121_v5 = vld [vmem:[%s23639_s3 + $0x18] sm:$0xff]  ;;  %s17075_s3 = sshll.u32 %s17137_s2, 4  ;;  %s17076_s3 = int_to_ptr.vmem [resolvable:$false] %s17075_s3 }
 0x174   : > { %16695 = vpow2.f32 %v1934_v9  ;;  %v1940_v36 = vmul.f32 1.442695, %v1917_v11  ;;  %v1918_v24 = vmin.f32 %v17728_v34, 20.0  ;;  %v17742_v51 = vadd.f32 %v1884_v20, %v585_v1  ;;  %s17077_s4 = scalar_lea.vmem %s17076_s3, 512  ;;  %p17078_p2 = scmp.lt.s32.totalorder %s23209_s18, %s17076_s3 }
 0x175   : > { %v1251_v17 = vpop.f32.mrb[6].mxu0  ;;  %v1889_v41 = vpop.f32.mrb[6].mxu1  ;;  %16697 = vpow2.f32 %v1938_v30  ;;  %v1920_v44 = vmin.f32 %v17730_v35, 20.0  ;;  %v1919_v21 = vmin.f32 %v17732_v15, 20.0  ;;  %v2235_v22 = vsub.f32 %v17723_v6, %v17739_v25  ;;  %p17079_p3 = scmp.lt.s32.totalorder %s17077_s4, %s17071_s20 }
 0x176   : > { %v1253_v54 = vpop.f32.mrb[7].mxu0  ;;  %v1891_v59 = vpop.f32.mrb[7].mxu1  ;;  %16699 = vpow2.f32 %v1936_v32  ;;  %v1942_v63 = vmul.f32 1.442695, %v1918_v24  ;;  %v1921_v31 = vmin.f32 %v17742_v51, 20.0  ;;  %v17753_v55 = vand.u32 4294901760, %v17745_v62 }
 0x177   : > { %v1946_v7 = vmul.f32 1.442695, %v1920_v44  ;;  %16701 = vpow2.f32 %v1940_v36  ;;  %v17755_v56 = vand.u32 4294901760, %v2154_v3  ;;  %v1944_v46 = vmul.f32 1.442695, %v1919_v21  ;;  %v590_v32 = vpop.permute.xlu1 %589  ;;  %p17080_p4 = por %p17079_p3, %p17078_p2 }
 0x178   : > { %16703 = vpow2.f32 %v1942_v63  ;;  %v17765_v20 = vand.u32 4294901760, %v2235_v22  ;;  %v1948_v16 = vmul.f32 1.442695, %v1921_v31  ;;  %v17775_v63 = vadd.f32 %v1251_v17, %v590_v32 }
 0x179   : > { %16705 = vpow2.f32 %v1946_v7  ;;  %v17772_v24 = vsub.f32 %v2154_v3, %v17755_v56  ;;  %v17778_v7 = vsel %vm2146_vm2, %v2121_v5, 0  ;;  %v17786_v17 = vadd.f32 %v1889_v41, %v590_v32  ;;  %p17081_p5 = pnand %p17080_p4, %p17074_p1 }
 0x17a   : > { %v16688_v52 = vpop.eup %16687  ;;  %v17788_v36 = vadd.f32 %v1253_v54, %v590_v32  ;;  %v17790_v5 = vadd.f32 %v1891_v59, %v590_v32  ;;  %vm1898_vm8 = vcmp.gt.f32.partialorder %v17711_v23, 20.0  ;;  %vm1900_vm13 = vcmp.gt.f32.partialorder %v17713_v26, 20.0 }
 0x17b   : > { %v16690_v14 = vpop.eup %16689  ;;  %v1958_v1 = vadd.f32 1.0, %v16688_v52  ;;  %v1961_v2 = vmul.f32 -0.5, %v16688_v52  ;;  %vm1899_vm15 = vcmp.gt.f32.partialorder %v17715_v37, 20.0 }
 0x17c   : > { %v17757_v42 = vpop.eup %16691  ;;  %v1976_v4 = vadd.f32 1.0, %v16690_v14  ;;  %v1979_v11 = vmul.f32 -0.5, %v16690_v14 }
 0x17d   : > { %v17762_v9 = vpop.eup %16693  ;;  %16707 = vlog2.f32 %v1958_v1  ;;  %v1967_v19 = vadd.f32 1.0, %v17757_v42  ;;  %v1962_v22 = vadd.f32 1.0, %v1961_v2  ;;  %v1964_v1 = vand.u32 2147483647, %v16688_v52 }
 0x17e   : > { %v17767_v30 = vpop.eup %16695  ;;  %16709 = vlog2.f32 %v1976_v4  ;;  %v1985_v44 = vadd.f32 1.0, %v17762_v9  ;;  %v1982_v4 = vand.u32 2147483647, %v16690_v14  ;;  %v1980_v10 = vadd.f32 1.0, %v1979_v11 }
 0x17f   : > { %16711 = vlog2.f32 %v1967_v19  ;;  %v17780_v21 = vpop.eup %16697  ;;  %v1970_v3 = vmul.f32 -0.5, %v17757_v42  ;;  %v1994_v19 = vadd.f32 1.0, %v17767_v30  ;;  %v1973_v2 = vand.u32 2147483647, %v17757_v42 }
 0x180   : > { %16713 = vpow2.f32 %v1944_v46  ;;  %v17782_v31 = vpop.eup %16699  ;;  %v1988_v46 = vmul.f32 -0.5, %v17762_v9  ;;  %v2012_v11 = vadd.f32 1.0, %v17780_v21  ;;  %vm17798_vm4 = vcmp.lt.f32.partialorder %v1964_v1, 0.0004427343 }
 0x181   : > { %16715 = vlog2.f32 %v1985_v44  ;;  %v17792_v0 = vpop.eup %16701  ;;  %v1963_v44 = vmul.f32 %v16688_v52, %v1962_v22  ;;  %vm17802_vm5 = vcmp.lt.f32.partialorder %v1982_v4, 0.0004427343  ;;  %v2003_v54 = vadd.f32 1.0, %v17782_v31 }
 0x182   : > { %16717 = vpow2.f32 %v1948_v16  ;;  %v17807_v59 = vpop.eup %16703  ;;  %v1981_v32 = vmul.f32 %v16690_v14, %v1980_v10  ;;  %v1971_v61 = vadd.f32 1.0, %v1970_v3  ;;  %v1991_v52 = vand.u32 2147483647, %v17762_v9 }
 0x183   : > { %16719 = vlog2.f32 %v1994_v19  ;;  %v1997_v19 = vmul.f32 -0.5, %v17767_v30  ;;  %v17810_v29 = vpop.eup %16705  ;;  %v2015_v22 = vmul.f32 -0.5, %v17780_v21  ;;  %v2021_v1 = vadd.f32 1.0, %v17792_v0 }
 0x184   : > { %16721 = vlog2.f32 %v2012_v11  ;;  %vm17816_vm7 = vcmp.lt.f32.partialorder %v1973_v2, 0.0004427343  ;;  %v1989_v10 = vadd.f32 1.0, %v1988_v46  ;;  %v2000_v14 = vand.u32 2147483647, %v17767_v30 }
 0x185   : > { %16723 = vlog2.f32 %v2003_v54  ;;  %v2006_v3 = vmul.f32 -0.5, %v17782_v31  ;;  %v2024_v8 = vmul.f32 -0.5, %v17792_v0  ;;  %v2030_v54 = vadd.f32 1.0, %v17807_v59 }
 0x186   : > { %16725 = vlog2.f32 %v2021_v1  ;;  %v1972_v2 = vmul.f32 %v17757_v42, %v1971_v61  ;;  %v1998_v46 = vadd.f32 1.0, %v1997_v19  ;;  %v2018_v50 = vand.u32 2147483647, %v17780_v21 }
 0x187   : > { %v16708_v4 = vpop.eup %16707  ;;  %v2009_v38 = vand.u32 2147483647, %v17782_v31  ;;  %16727 = vlog2.f32 %v2030_v54  ;;  %v1990_v58 = vmul.f32 %v17762_v9, %v1989_v10  ;;  %vm17835_vm11 = vcmp.lt.f32.partialorder %v1991_v52, 0.0004427343 }
 0x188   : > { %v16710_v11 = vpop.eup %16709  ;;  %v1960_v12 = vmul.f32 0.6931472, %v16708_v4  ;;  %v2016_v4 = vadd.f32 1.0, %v2015_v22  ;;  %v2007_v42 = vadd.f32 1.0, %v2006_v3  ;;  %vm17843_vm12 = vcmp.lt.f32.partialorder %v2000_v14, 0.0004427343 }
 0x189   : > { %v16712_v57 = vpop.eup %16711  ;;  %v1978_v18 = vmul.f32 0.6931472, %v16710_v11  ;;  %v1999_v9 = vmul.f32 %v17767_v30, %v1998_v46  ;;  %vm17854_vm14 = vcmp.lt.f32.partialorder %v2018_v50, 0.0004427343  ;;  %vm17861_vm0 = vcmp.lt.f32.partialorder %v2009_v38, 0.0004427343 }
 0x18a   : > { %v17829_v47 = vpop.eup %16713  ;;  %v1966_v1 = vsel %vm17798_vm4, %v1963_v44, %v1960_v12  ;;  %v1969_v11 = vmul.f32 0.6931472, %v16712_v57  ;;  %v2025_v44 = vadd.f32 1.0, %v2024_v8  ;;  %v2017_v8 = vmul.f32 %v17780_v21, %v2016_v4 }
 0x18b   : > { %v16716_v33 = vpop.eup %16715  ;;  %v1984_v53 = vsel %vm17802_vm5, %v1981_v32, %v1978_v18  ;;  %v17850_v57 = vsel %vm1894_vm3, %v17692_v39, %v1966_v1  ;;  %vm1901_vm3 = vcmp.gt.f32.partialorder %v17717_v60, 20.0  ;;  %v2033_v39 = vmul.f32 -0.5, %v17807_v59 }
 0x18c   : > { %v17839_v19 = vpop.eup %16717  ;;  %v1987_v16 = vmul.f32 0.6931472, %v16716_v33  ;;  %v2027_v33 = vand.u32 2147483647, %v17792_v0  ;;  %v17870_v50 = vsel %vm1896_vm6, %v17694_v40, %v1984_v53  ;;  %v1975_v32 = vsel %vm17816_vm7, %v1972_v2, %v1969_v11 }
 0x18d   : > { %v16720_v22 = vpop.eup %16719  ;;  %v2008_v38 = vmul.f32 %v17782_v31, %v2007_v42  ;;  %v2161_v14 = vand.u32 4294901760, %v17850_v57  ;;  %v2026_v54 = vmul.f32 %v17792_v0, %v2025_v44  ;;  %v2048_v46 = vadd.f32 1.0, %v17810_v29 }
 0x18e   : > { %v1996_v18 = vmul.f32 0.6931472, %v16720_v22  ;;  %v16722_v30 = vpop.eup %16721  ;;  %v1993_v21 = vsel %vm17835_vm11, %v1990_v58, %v1987_v16  ;;  %v2036_v58 = vand.u32 2147483647, %v17807_v59  ;;  %v2851_v2 = vand.u32 4294901760, %v17870_v50 }
 0x18f   : > { %v16724_v10 = vpop.eup %16723  ;;  %v2014_v28 = vmul.f32 0.6931472, %v16722_v30  ;;  %v2103_v1 = vsel %vm1895_vm9, %v17700_v45, %v1975_v32  ;;  %v2105_v0 = vsel %vm1897_vm10, %v17702_v48, %v1993_v21  ;;  %v2034_v4 = vadd.f32 1.0, %v2033_v39 }
 0x190   : > { %v2002_v3 = vsel %vm17843_vm12, %v1999_v9, %v1996_v18  ;;  %v2005_v40 = vmul.f32 0.6931472, %v16724_v10  ;;  %v16726_v31 = vpop.eup %16725  ;;  %vm1902_vm4 = vcmp.gt.f32.partialorder %v17728_v34, 20.0  ;;  %v17904_v45 = vsub.f32 %v17850_v57, %v2161_v14 }
 0x191   : > { %v17885_v53 = vsel %vm1898_vm8, %v17711_v23, %v2002_v3  ;;  %v2020_v23 = vsel %vm17854_vm14, %v2017_v8, %v2014_v28  ;;  %v2023_v42 = vmul.f32 0.6931472, %v16726_v31  ;;  %v16728_v16 = vpop.eup %16727  ;;  %vm2028_vm5 = vcmp.lt.f32.partialorder %v2027_v33, 0.0004427343 }
 0x192   : > { %v2165_v11 = vand.u32 4294901760, %v17885_v53  ;;  %v2011_v61 = vsel %vm17861_vm0, %v2008_v38, %v2005_v40  ;;  %16729 = vlog2.f32 %v2048_v46  ;;  %v2051_v48 = vmul.f32 -0.5, %v17810_v29 }
 0x193   : > { %v2029_v12 = vsel %vm2028_vm5, %v2026_v54, %v2023_v42  ;;  %v2032_v44 = vmul.f32 0.6931472, %v16728_v16  ;;  %vm17907_vm6 = vcmp.lt.f32.partialorder %v2036_v58, 0.0004427343  ;;  %v1922_v9 = vmin.f32 %v17775_v63, 20.0 }
 0x194   : > { %v2159_v52 = vand.u32 4294901760, %v2103_v1  ;;  %v2849_v18 = vand.u32 4294901760, %v2105_v0  ;;  %v2108_v8 = vsel %vm1900_vm13, %v17713_v26, %v2020_v23  ;;  %v2107_v33 = vsel %vm1899_vm15, %v17715_v37, %v2011_v61 }
 0x195   : > { %v17921_v41 = vsub.f32 %v17870_v50, %v2851_v2  ;;  %v17926_v39 = vsub.f32 %v17885_v53, %v2165_v11  ;;  %v2109_v30 = vsel %vm1901_vm3, %v17717_v60, %v2029_v12  ;;  %v2035_v26 = vmul.f32 %v17807_v59, %v2034_v4 }
 0x196   : > { %v23288_v32 = vand.u32 4294901760, %v17904_v45  ;;  %v2052_v21 = vadd.f32 1.0, %v2051_v48  ;;  %v2054_v37 = vand.u32 2147483647, %v17810_v29  ;;  %v2039_v38 = vadd.f32 1.0, %v17829_v47 }
 0x197   : > { %v2855_v10 = vand.u32 4294901760, %v2108_v8  ;;  %v2163_v3 = vand.u32 4294901760, %v2107_v33  ;;  %v2038_v54 = vsel %vm17907_vm6, %v2035_v26, %v2032_v44  ;;  %v2057_v46 = vadd.f32 1.0, %v17839_v19 }
 0x198   : > { %v17938_v28 = vsub.f32 %v2103_v1, %v2159_v52  ;;  %v17940_v40 = vsub.f32 %v2105_v0, %v2849_v18  ;;  %v2853_v60 = vand.u32 4294901760, %v2109_v30  ;;  %16731 = vlog2.f32 %v2039_v38 }
 0x199   : > { %v23287_v59 = vand.u32 4294901760, %v17926_v39  ;;  %v2042_v58 = vmul.f32 -0.5, %v17829_v47  ;;  %16733 = vlog2.f32 %v2057_v46  ;;  %v1950_v31 = vmul.f32 1.442695, %v1922_v9 }
 0x19a   : > { %v17947_v4 = vsel %vm1902_vm4, %v17728_v34, %v2038_v54  ;;  %v17950_v23 = vmul.f32 %v17810_v29, %v2052_v21  ;;  %v2060_v1 = vmul.f32 -0.5, %v17839_v19  ;;  %v1924_v0 = vmin.f32 %v17786_v17, 20.0 }
 0x19b   : > { %v17954_v61 = vsub.f32 %v2108_v8, %v2855_v10  ;;  %v17956_v42 = vsub.f32 %v2107_v33, %v2163_v3  ;;  %vm17958_vm7 = vcmp.lt.f32.partialorder %v2054_v37, 0.0004427343  ;;  %16735 = vpow2.f32 %v1950_v31 }
 0x19c   : > { %v16730_v48 = vpop.eup %16729  ;;  %v17962_v12 = vsub.f32 %v2109_v30, %v2853_v60  ;;  %v2045_v34 = vand.u32 2147483647, %v17829_v47  ;;  %v1954_v29 = vmul.f32 1.442695, %v1924_v0  ;;  %v1923_v44 = vmin.f32 %v17788_v36, 20.0 }
 0x19d   : > { %v23290_v22 = vand.u32 4294901760, %v17947_v4  ;;  %v2043_v9 = vadd.f32 1.0, %v2042_v58  ;;  %v1925_v8 = vmin.f32 %v17790_v5, 20.0  ;;  %v17968_v33 = vpack.c.bf16 %v2163_v3, %v2159_v52 }
 0x19e   : > { %vm1904_vm8 = vcmp.gt.f32.partialorder %v17730_v35, 20.0  ;;  %v2061_v26 = vadd.f32 1.0, %v2060_v1  ;;  %16737 = vpow2.f32 %v1954_v29  ;;  %v1952_v21 = vmul.f32 1.442695, %v1923_v44 }
 0x19f   : > { %v17971_v37 = vpack.c.bf16 %v2853_v60, %v2849_v18  ;;  %v2050_v30 = vmul.f32 0.6931472, %v16730_v48  ;;  %vm1903_vm9 = vcmp.gt.f32.partialorder %v17732_v15, 20.0  ;;  %v1956_v38 = vmul.f32 1.442695, %v1925_v8  ;;  %14753 = vmatprep.subr.bf16.mxu0 %v17968_v33 }
 0x1a0   : > { %v17979_v54 = vpack.c.bf16 %v2165_v11, %v2161_v14  ;;  %v17983_v52 = vpack.c.bf16 %v2855_v10, %v2851_v2  ;;  %16739 = vpow2.f32 %v1952_v21  ;;  %v23296_v18 = vand.u32 4294901760, %v17938_v28 }
 0x1a1   : > { %14801 = vmatprep.subr.bf16.mxu1 %v17971_v37  ;;  %v23294_v3 = vand.u32 4294901760, %v17956_v42  ;;  %v23293_v46 = vand.u32 4294901760, %v17940_v40  ;;  %vm17989_vm10 = vcmp.lt.f32.partialorder %v2045_v34, 0.0004427343  ;;  %v2063_v57 = vand.u32 2147483647, %v17839_v19 }
 0x1a2   : > { %23659 = vst [vmem:[#allocation24_spill] sm:$0xff] %v17983_v52  ;;  %16741 = vpow2.f32 %v1956_v38  ;;  %14755 = vmatpush1.bf16.msra.mxu0 %v17979_v54  ;;  %14803 = vmatpush1.bf16.msra.mxu1 %v17983_v52  ;;  %v23292_v50 = vand.u32 4294901760, %v17962_v12  ;;  %v16732_v14 = vpop.eup %16731  ;;  %v2279_v53 = vsub.f32 %v17938_v28, %v23296_v18  ;;  %v2297_v10 = vsub.f32 %v17926_v39, %v23287_v59 }
 0x1a3   : > { %v2291_v2 = vsub.f32 %v17956_v42, %v23294_v3  ;;  %v2969_v11 = vsub.f32 %v17940_v40, %v23293_v46  ;;  %v16734_v58 = vpop.eup %16733  ;;  %v2041_v31 = vmul.f32 0.6931472, %v16732_v14  ;;  %v2044_v1 = vmul.f32 %v17829_v47, %v2043_v9 }
 0x1a4   : > { %v2981_v0 = vsub.f32 %v17962_v12, %v23292_v50  ;;  %v2285_v48 = vsub.f32 %v17904_v45, %v23288_v32  ;;  %v2056_v34 = vsel %vm17958_vm7, %v17950_v23, %v2050_v30  ;;  %v2059_v29 = vmul.f32 0.6931472, %v16734_v58 }
 0x1a5   : > { %v2062_v44 = vmul.f32 %v17839_v19, %v2061_v26  ;;  %v2292_v8 = vand.u32 4294901760, %v2291_v2  ;;  %v16736_v21 = vpop.eup %16735  ;;  %v2047_v47 = vsel %vm17989_vm10, %v2044_v1, %v2041_v31  ;;  %vm18022_vm11 = vcmp.lt.f32.partialorder %v2063_v57, 0.0004427343 }
 0x1a6   : > { %v2280_v38 = vand.u32 4294901760, %v2279_v53  ;;  %v2982_v14 = vand.u32 4294901760, %v2981_v0  ;;  %v2066_v32 = vadd.f32 1.0, %v16736_v21  ;;  %v2970_v16 = vand.u32 4294901760, %v2969_v11 }
 0x1a7   : > { %v2065_v59 = vsel %vm18022_vm11, %v2062_v44, %v2059_v29  ;;  %v2298_v23 = vand.u32 4294901760, %v2297_v10  ;;  %v18031_v19 = vsel %vm1904_vm8, %v17730_v35, %v2056_v34  ;;  %vm1905_vm12 = vcmp.gt.f32.partialorder %v17742_v51, 20.0 }
 0x1a8   : > { %v18034_v26 = vpack.c.bf16 %v2292_v8, %v2280_v38  ;;  %v2286_v30 = vand.u32 4294901760, %v2285_v48  ;;  %v18036_v60 = vpop.eup %16737  ;;  %v18041_v57 = vsel %vm1903_vm9, %v17732_v15, %v2047_v47  ;;  %16743 = vlog2.f32 %v2066_v32 }
 0x1a9   : > { %v2069_v53 = vmul.f32 -0.5, %v16736_v21  ;;  %v18043_v2 = vpack.c.bf16 %v2982_v14, %v2970_v16  ;;  %v2974_v11 = vand.u32 4294901760, %v17921_v41  ;;  %v18047_v35 = vsel %vm1905_vm12, %v17742_v51, %v2065_v59 }
 0x1aa   : > { %v2084_v10 = vadd.f32 1.0, %v18036_v60  ;;  %v18051_v58 = vand.u32 4294901760, %v17778_v7  ;;  %v16740_v31 = vpop.eup %16739  ;;  %v2986_v1 = vand.u32 4294901760, %v17954_v61  ;;  %v18057_v15 = vsub.f32 %v17947_v4, %v23290_v22 }
 0x1ab   : > { %v23289_v32 = vand.u32 4294901760, %v18031_v19  ;;  %v18060_v0 = vpack.c.bf16 %v2298_v23, %v2286_v30  ;;  %v23291_v51 = vand.u32 4294901760, %v18041_v57  ;;  %v2072_v59 = vand.u32 2147483647, %v16736_v21 }
 0x1ac   : > { %v16742_v48 = vpop.eup %16741  ;;  %16745 = vlog2.f32 %v2084_v10  ;;  %v2075_v34 = vadd.f32 1.0, %v16740_v31  ;;  %v23295_v29 = vand.u32 4294901760, %v18047_v35  ;;  %v2070_v44 = vadd.f32 1.0, %v2069_v53 }
 0x1ad   : > { %v2093_v8 = vadd.f32 1.0, %v16742_v48  ;;  %v18065_v47 = vand.u32 4294901760, %v17772_v24  ;;  %vm1906_vm13 = vcmp.gt.f32.partialorder %v17775_v63, 20.0  ;;  %v2975_v9 = vsub.f32 %v17921_v41, %v2974_v11 }
 0x1ae   : > { %16747 = vlog2.f32 %v2075_v34  ;;  %v18071_v38 = vsub.f32 %v17778_v7, %v18051_v58  ;;  %v2087_v16 = vmul.f32 -0.5, %v18036_v60  ;;  %v2078_v23 = vmul.f32 -0.5, %v16740_v31 }
 0x1af   : > { %16749 = vlog2.f32 %v2093_v8  ;;  %v18078_v30 = vsub.f32 %v18031_v19, %v23289_v32  ;;  %v18083_v53 = vsub.f32 %v18041_v57, %v23291_v51  ;;  %vm18085_vm14 = vcmp.lt.f32.partialorder %v2072_v59, 0.0004427343 }
 0x1b0   : > { %v2987_v7 = vsub.f32 %v17954_v61, %v2986_v1  ;;  %v18093_v34 = vsub.f32 %v18047_v35, %v23295_v29  ;;  %v2071_v8 = vmul.f32 %v16736_v21, %v2070_v44  ;;  %vm1908_vm15 = vcmp.gt.f32.partialorder %v17786_v17, 20.0 }
 0x1b1   : > { %v2090_v32 = vand.u32 2147483647, %v18036_v60  ;;  %v2096_v14 = vmul.f32 -0.5, %v16742_v48  ;;  %v2976_v22 = vand.u32 4294901760, %v2975_v9  ;;  %v2088_v3 = vadd.f32 1.0, %v2087_v16 }
 0x1b2   : > { %v2988_v51 = vand.u32 4294901760, %v2987_v7  ;;  %v16744_v46 = vpop.eup %16743  ;;  %vm1907_vm0 = vcmp.gt.f32.partialorder %v17788_v36, 20.0  ;;  %v2079_v29 = vadd.f32 1.0, %v2078_v23  ;;  %v2081_v18 = vand.u32 2147483647, %v16740_v31 }
 0x1b3   : > { %v2068_v44 = vmul.f32 0.6931472, %v16744_v46  ;;  %vm1909_vm3 = vcmp.gt.f32.partialorder %v17790_v5, 20.0  ;;  %v2099_v9 = vand.u32 2147483647, %v16742_v48  ;;  %v2097_v49 = vadd.f32 1.0, %v2096_v14 }
 0x1b4   : > { %v18105_v7 = vpack.c.bf16 %v2988_v51, %v2976_v22  ;;  %v23666_v50 = vand.u32 4294901760, %v17938_v28  ;;  %v23667_v16 = vand.u32 4294901760, %v17956_v42  ;;  %v23668_v23 = vand.u32 4294901760, %v17940_v40 }
 0x1b5   : > { %v23669_v21 = vand.u32 4294901760, %v17962_v12  ;;  %v23670_v25 = vand.u32 4294901760, %v17904_v45  ;;  %v23671_v22 = vand.u32 4294901760, %v17926_v39  ;;  %v2998_v14 = vand.u32 4294901760, %v18078_v30 }
 0x1b6   : > { %v18113_v43 = vpack.c.bf16 %v23667_v16, %v23666_v50  ;;  %v16746_v59 = vpop.eup %16745  ;;  %v2074_v52 = vsel %vm18085_vm14, %v2071_v8, %v2068_v44  ;;  %vm18130_vm4 = vcmp.lt.f32.partialorder %v2090_v32, 0.0004427343  ;;  %v18134_v16 = vpack.c.bf16 %v2986_v1, %v2974_v11 }
 0x1b7   : > { %v18119_v46 = vpack.c.bf16 %v23669_v21, %v23668_v23  ;;  %v18125_v51 = vpack.c.bf16 %v23671_v22, %v23670_v25  ;;  %v2114_v21 = vsel %vm1906_vm13, %v17775_v63, %v2074_v52  ;;  %v2086_v23 = vmul.f32 0.6931472, %v16746_v59 }
 0x1b8   : > { %v2089_v25 = vmul.f32 %v18036_v60, %v2088_v3  ;;  %vm18140_vm5 = vcmp.lt.f32.partialorder %v2081_v18, 0.0004427343  ;;  %v2173_v10 = vand.u32 4294901760, %v2114_v21  ;;  %v2080_v8 = vmul.f32 %v16740_v31, %v2079_v29 }
 0x1b9   : > { %23672 = vst [vmem:[#allocation25_spill] sm:$0xff] %v18125_v51  ;;  %v16748_v51 = vpop.eup %16747  ;;  %vm18144_vm6 = vcmp.lt.f32.partialorder %v2099_v9, 0.0004427343  ;;  %v2302_v11 = vand.u32 4294901760, %v18083_v53  ;;  %v2098_v59 = vmul.f32 %v16742_v48, %v2097_v49  ;;  %v2992_v18 = vand.u32 4294901760, %v18093_v34 }
 0x1ba   : > { %v16750_v1 = vpop.eup %16749  ;;  %v2092_v63 = vsel %vm18130_vm4, %v2089_v25, %v2086_v23  ;;  %v2077_v52 = vmul.f32 0.6931472, %v16748_v51  ;;  %v18152_v3 = vsub.f32 %v2114_v21, %v2173_v10  ;;  %v23679_v29 = vand.u32 4294901760, %v17947_v4 }
 0x1bb   : > { %v2116_v60 = vsel %vm1908_vm15, %v17786_v17, %v2092_v63  ;;  %v2095_v31 = vmul.f32 0.6931472, %v16750_v1  ;;  %v23680_v51 = vand.u32 4294901760, %v18057_v15  ;;  %v2999_v48 = vsub.f32 %v18078_v30, %v2998_v14 }
 0x1bc   : > { %v18159_v44 = vpack.c.bf16 %v2173_v10, %v23679_v29  ;;  %v2863_v9 = vand.u32 4294901760, %v2116_v60  ;;  %v2083_v50 = vsel %vm18140_vm5, %v2080_v8, %v2077_v52  ;;  %v2320_v21 = vand.u32 4294901760, %v18152_v3 }
 0x1bd   : > { %v2309_v49 = vsub.f32 %v18057_v15, %v23680_v51  ;;  %v2115_v17 = vsel %vm1907_vm0, %v17788_v36, %v2083_v50  ;;  %v2101_v4 = vsel %vm18144_vm6, %v2098_v59, %v2095_v31  ;;  %v14774_v23 = vpack.c.bf16 %v18152_v3, %v18057_v15 }
 0x1be   : > { %v18175_v25 = vsub.f32 %v2116_v60, %v2863_v9  ;;  %v2171_v22 = vand.u32 4294901760, %v2115_v17  ;;  %v2117_v10 = vsel %vm1909_vm3, %v17790_v5, %v2101_v4  ;;  %v23681_v8 = vand.u32 4294901760, %v18031_v19 }
 0x1bf   : > { %v2861_v63 = vand.u32 4294901760, %v2117_v10  ;;  %v2303_v36 = vsub.f32 %v18083_v53, %v2302_v11  ;;  %v2321_v32 = vsub.f32 %v18152_v3, %v2320_v21  ;;  %v23682_v52 = vmov %v23680_v51 }
 0x1c0   : > { %v18182_v1 = vpack.c.bf16 %v2863_v9, %v23681_v8  ;;  %v18188_v59 = vpack.c.bf16 %v2320_v21, %v23682_v52  ;;  %v3010_v60 = vand.u32 4294901760, %v18175_v25  ;;  %v18191_v31 = vsub.f32 %v2115_v17, %v2171_v22 }
 0x1c1   : > { %v23683_v29 = vand.u32 4294901760, %v18041_v57  ;;  %v14822_v19 = vpack.c.bf16 %v18175_v25, %v18078_v30  ;;  %v18199_v9 = vsub.f32 %v2117_v10, %v2861_v63  ;;  %v23684_v50 = vand.u32 4294901760, %v18047_v35 }
 0x1c2   : > { %v2310_v4 = vand.u32 4294901760, %v2309_v49  ;;  %v2322_v21 = vand.u32 4294901760, %v2321_v32  ;;  %v2314_v17 = vand.u32 4294901760, %v18191_v31  ;;  %v3011_v8 = vsub.f32 %v18175_v25, %v3010_v60 }
 0x1c3   : > { %v18195_v5 = vpack.c.bf16 %v2171_v22, %v23683_v29  ;;  %v18203_v51 = vpack.c.bf16 %v2861_v63, %v23684_v50  ;;  %v14772_v57 = vpack.c.bf16 %v18191_v31, %v18083_v53  ;;  %v18210_v22 = vpack.c.bf16 %v3010_v60, %v2998_v14 }
 0x1c4   : > { %v2993_v35 = vsub.f32 %v18093_v34, %v2992_v18  ;;  %v3004_v49 = vand.u32 4294901760, %v18199_v9  ;;  %v14766_v10 = vpack.c.bf16 %v2322_v21, %v2310_v4  ;;  %v14820_v63 = vpack.c.bf16 %v18199_v9, %v18093_v34 }
 0x1c5   : > { %14757 = vmatprep.subr.bf16.mxu0 %v18195_v5  ;;  %14805 = vmatprep.subr.bf16.mxu1 %v18203_v51  ;;  %v2315_v53 = vsub.f32 %v18191_v31, %v2314_v17  ;;  %v3000_v14 = vand.u32 4294901760, %v2999_v48  ;;  %v3012_v32 = vand.u32 4294901760, %v3011_v8  ;;  %v18221_v52 = vpack.c.bf16 %v2314_v17, %v2302_v11 }
 0x1c6   : > { %14759 = vmatpush1.bf16.msra.mxu0 %v18159_v44  ;;  %14807 = vmatpush1.bf16.msra.mxu1 %v18182_v1  ;;  %v3005_v60 = vsub.f32 %v18199_v9, %v3004_v49  ;;  %v18225_v29 = vpack.c.bf16 %v3004_v49, %v2992_v18  ;;  %v23685_v34 = vsub.f32 %v17745_v62, %v17753_v55  ;;  %v2304_v4 = vand.u32 4294901760, %v2303_v36 }
 0x1c7   : > { %14761 = vmatprep.subr.bf16.mxu0 %v18034_v26  ;;  %14809 = vmatprep.subr.bf16.mxu1 %v18043_v2  ;;  %v2316_v26 = vand.u32 4294901760, %v2315_v53  ;;  %v14814_v21 = vpack.c.bf16 %v3012_v32, %v3000_v14  ;;  %v2994_v11 = vand.u32 4294901760, %v2993_v35  ;;  %v2257_v2 = vsub.f32 %v17772_v24, %v18065_v47 }
 0x1c8   : > { %v2247_v50 = vand.u32 4294901760, %v23685_v34  ;;  %v3006_v48 = vand.u32 4294901760, %v3005_v60  ;;  %v18236_v18 = vand.u32 4294901760, %v18071_v38  ;;  %v23686_v31 = vmov 0.0  }
 0x1c9   : > { %2237 = vmatmul.mubr.f32.vlgmr.msra.gmra.mrb[8].mxu0 %v17765_v20  ;;  %2927 = vmatmul.mubr.f32.vlgmr.msra.gmra.mrb[8].mxu1 %v17765_v20  ;;  %v14764_v9 = vpack.c.bf16 %v2316_v26, %v2304_v4  ;;  %v2258_v20 = vand.u32 4294901760, %v2257_v2  ;;  %v23687_v17 = vpack.c.bf16 %v17956_v42, %v17938_v28  ;;  %v23689_v28 = vpack.c.bf16 %v17926_v39, %v17904_v45  ;;  %v23691_v45 = vld [vmem:[#allocation24_spill] sm:$0xff] }
 0x1ca   : > { %14763 = vmatpush1.bf16.msra.mxu0 %v18060_v0  ;;  %14811 = vmatpush1.bf16.msra.mxu1 %v18105_v7  ;;  %v14812_v36 = vpack.c.bf16 %v3006_v48, %v2994_v11  ;;  %v2268_v0 = vsub.f32 %v18071_v38, %v18236_v18  ;;  %v23688_v7 = vpack.c.bf16 %v17962_v12, %v17940_v40  ;;  %v3764_v42 = vld [vmem:[%s23256_s5 + $0x8] sm:$0xff]  ;;  %v3765_v48 = vld [vmem:[%s23256_s5 + $0x10] sm:$0xff] }
 0x1cb   : > { %2242 = vmatprep.mubr.f32.mxu0 %v23686_v31  ;;  %2932 = vmatprep.mubr.f32.mxu1 %v23686_v31  ;;  %v23690_v40 = vpack.c.bf16 %v17954_v61, %v17921_v41 }
 0x1cc   : > { %14765 = vmatprep.subr.bf16.mxu0 %v14764_v9  ;;  %14813 = vmatprep.subr.bf16.mxu1 %v14812_v36  ;;  %v2269_v8 = vand.u32 4294901760, %v2268_v0 }
 0x1cd   : > { %2248 = vmatmul.mubr.f32.gmra.mrb[10].mxu0 %v2247_v50  ;;  %2938 = vmatmul.mubr.f32.gmra.mrb[10].mxu1 %v2247_v50 }
 0x1ce   : > { %14767 = vmatpush1.bf16.msra.mxu0 %v14766_v10  ;;  %14815 = vmatpush1.bf16.msra.mxu1 %v14814_v21 }
 0x1cf   : > { %14769 = vmatprep.subr.bf16.mxu0 %v23687_v17  ;;  %14817 = vmatprep.subr.bf16.mxu1 %v23688_v7 }
 0x1d0   : > { %2253 = vmatprep.mubr.f32.mxu0 %v23686_v31  ;;  %2943 = vmatprep.mubr.f32.mxu1 %v23686_v31 }
 0x1d1   : > { %2259 = vmatmul.mubr.f32.gmra.mrb[12].mxu0 %v2258_v20  ;;  %2949 = vmatmul.mubr.f32.gmra.mrb[12].mxu1 %v2258_v20 }
 0x1d2   : > { %2264 = vmatprep.mubr.f32.mxu0 %v23686_v31  ;;  %2954 = vmatprep.mubr.f32.mxu1 %v23686_v31 }
 0x1d5   : > { %2270 = vmatmul.mubr.f32.gmra.mrb[14].mxu0 %v2269_v8  ;;  %2960 = vmatmul.mubr.f32.gmra.mrb[14].mxu1 %v2269_v8 }
 0x1d6   : > { %2380 = vmatprep.mubr.f32.mxu0 %v23686_v31  ;;  %3070 = vmatprep.mubr.f32.mxu1 %v23686_v31 }
 0x1d9   : > { %2382 = vmatmul.mubr.f32.vlgmr.msra.gmra.mrb[8].mxu0 %v17708_v13  ;;  %3072 = vmatmul.mubr.f32.vlgmr.msra.gmra.mrb[8].mxu1 %v17708_v13 }
 0x1da   : > { %14771 = vmatpush1.bf16.msra.mxu0 %v23689_v28  ;;  %14819 = vmatpush1.bf16.msra.mxu1 %v23690_v40 }
 0x1db   : > { %14773 = vmatprep.subr.bf16.mxu0 %v14772_v57  ;;  %14821 = vmatprep.subr.bf16.mxu1 %v14820_v63 }
 0x1dc   : > { %2387 = vmatprep.mubr.f32.mxu0 %v23686_v31  ;;  %3077 = vmatprep.mubr.f32.mxu1 %v23686_v31 }
 0x1dd   : > { %2389 = vmatmul.mubr.f32.gmra.mrb[10].mxu0 %v17726_v27  ;;  %3079 = vmatmul.mubr.f32.gmra.mrb[10].mxu1 %v17726_v27 }
 0x1de   : > { %14775 = vmatpush1.bf16.msra.mxu0 %v14774_v23  ;;  %14823 = vmatpush1.bf16.msra.mxu1 %v14822_v19 }
 0x1df   : > { %14777 = vmatprep.subr.bf16.mxu0 %v17968_v33  ;;  %14825 = vmatprep.subr.bf16.mxu1 %v17971_v37 }
 0x1e0   : > { %2394 = vmatprep.mubr.f32.mxu0 %v23686_v31  ;;  %3084 = vmatprep.mubr.f32.mxu1 %v23686_v31 }
 0x1e1   : > { %2396 = vmatmul.mubr.f32.gmra.mrb[12].mxu0 %v17755_v56  ;;  %3086 = vmatmul.mubr.f32.gmra.mrb[12].mxu1 %v17755_v56 }
 0x1e2   : > { %2401 = vmatprep.mubr.f32.mxu0 %v23686_v31  ;;  %3091 = vmatprep.mubr.f32.mxu1 %v23686_v31 }
 0x1e5   : > { %2403 = vmatmul.mubr.f32.gmra.mrb[14].mxu0 %v18051_v58  ;;  %3093 = vmatmul.mubr.f32.gmra.mrb[14].mxu1 %v18051_v58 }
 0x1e6   : > { %2489 = vmatprep.mubr.f32.mxu0 %v23686_v31  ;;  %3179 = vmatprep.mubr.f32.mxu1 %v23686_v31 }
 0x1e9   : > { %2492 = vmatmul.mubr.f32.vlgmr.msra.gmra.mrb[8].mxu0 %v17723_v6  ;;  %3182 = vmatmul.mubr.f32.vlgmr.msra.gmra.mrb[8].mxu1 %v17723_v6  ;;  %v23693_v6 = vld [vmem:[#allocation25_spill] sm:$0xff] }
 0x1ea   : > { %14779 = vmatpush1.bf16.msra.mxu0 %v17979_v54  ;;  %14827 = vmatpush1.bf16.msra.mxu1 %v23691_v45 }
 0x1eb   : > { %14781 = vmatprep.subr.bf16.mxu0 %v18195_v5  ;;  %14829 = vmatprep.subr.bf16.mxu1 %v18203_v51 }
 0x1ec   : > { %2497 = vmatprep.mubr.f32.mxu0 %v23686_v31  ;;  %3187 = vmatprep.mubr.f32.mxu1 %v23686_v31 }
 0x1ed   : > { %2500 = vmatmul.mubr.f32.gmra.mrb[10].mxu0 %v17745_v62  ;;  %3190 = vmatmul.mubr.f32.gmra.mrb[10].mxu1 %v17745_v62 }
 0x1ee   : > { %14783 = vmatpush1.bf16.msra.mxu0 %v18159_v44  ;;  %14831 = vmatpush1.bf16.msra.mxu1 %v18182_v1 }
 0x1ef   : > { %14785 = vmatprep.subr.bf16.mxu0 %v18113_v43  ;;  %14833 = vmatprep.subr.bf16.mxu1 %v18119_v46  ;;  %v23692_v43 = vld [vmem:[#allocation23_spill] sm:$0xff] }
 0x1f0   : > { %2505 = vmatprep.mubr.f32.mxu0 %v23686_v31  ;;  %3195 = vmatprep.mubr.f32.mxu1 %v23686_v31 }
 0x1f1   : > { %2508 = vmatmul.mubr.f32.gmra.mrb[12].mxu0 %v17772_v24  ;;  %3198 = vmatmul.mubr.f32.gmra.mrb[12].mxu1 %v17772_v24 }
 0x1f2   : > { %2513 = vmatprep.mubr.f32.mxu0 %v23686_v31  ;;  %3203 = vmatprep.mubr.f32.mxu1 %v23686_v31 }
 0x1f5   : > { %2516 = vmatmul.mubr.f32.gmra.mrb[14].mxu0 %v18071_v38  ;;  %3206 = vmatmul.mubr.f32.gmra.mrb[14].mxu1 %v18071_v38 }
 0x1f6   : > { %2594 = vmatprep.mubr.f32.mxu0 %v23686_v31  ;;  %3284 = vmatprep.mubr.f32.mxu1 %v23686_v31 }
 0x1f9   : > { %2598 = vmatmul.mubr.f32.vlgmr.msra.gmra.mrb[8].mxu0 %v23692_v43  ;;  %3288 = vmatmul.mubr.f32.vlgmr.msra.gmra.mrb[8].mxu1 %v23692_v43 }
 0x1fa   : > { %14787 = vmatpush1.bf16.msra.mxu0 %v23693_v6  ;;  %14835 = vmatpush1.bf16.msra.mxu1 %v18134_v16  ;;  %v3795_v16 = vsel %vm2146_vm2, %v3764_v42, 0 }
 0x1fb   : > { %14789 = vmatprep.subr.bf16.mxu0 %v18221_v52  ;;  %14837 = vmatprep.subr.bf16.mxu1 %v18225_v29  ;;  %v18408_v34 = vand.u32 4294901760, %v3795_v16 }
 0x1fc   : > { %2603 = vmatprep.mubr.f32.mxu0 %v23686_v31  ;;  %3293 = vmatprep.mubr.f32.mxu1 %v23686_v31 }
 0x1fd   : > { %2607 = vmatmul.mubr.f32.gmra.mrb[10].mxu0 %v17753_v55  ;;  %3297 = vmatmul.mubr.f32.gmra.mrb[10].mxu1 %v17753_v55  ;;  %v18427_v28 = vsub.f32 %v3795_v16, %v18408_v34 }
 0x1fe   : > { %14791 = vmatpush1.bf16.msra.mxu0 %v18188_v59  ;;  %14839 = vmatpush1.bf16.msra.mxu1 %v18210_v22 }
 0x1ff   : > { %14793 = vmatprep.subr.bf16.mxu0 %v17968_v33  ;;  %14841 = vmatprep.subr.bf16.mxu1 %v17971_v37  ;;  %v2134_v37 = vpop.permute.xlu1 %2133 }
 0x200   : > { %2612 = vmatprep.mubr.f32.mxu0 %v23686_v31  ;;  %3302 = vmatprep.mubr.f32.mxu1 %v23686_v31 }
 0x201   : > { %2616 = vmatmul.mubr.f32.gmra.mrb[12].mxu0 %v18065_v47  ;;  %3306 = vmatmul.mubr.f32.gmra.mrb[12].mxu1 %v18065_v47 }
 0x202   : > { %2621 = vmatprep.mubr.f32.mxu0 %v23686_v31  ;;  %3311 = vmatprep.mubr.f32.mxu1 %v23686_v31 }
 0x205   : > { %2625 = vmatmul.mubr.f32.gmra.mrb[14].mxu0 %v18236_v18  ;;  %3315 = vmatmul.mubr.f32.gmra.mrb[14].mxu1 %v18236_v18 }
 0x206   : > { %2719 = vmatprep.mubr.f32.mxu0 %v23686_v31  ;;  %3409 = vmatprep.mubr.f32.mxu1 %v23686_v31 }
 0x209   : > { %2721 = vmatmul.mubr.f32.vlgmr.msra.gmra.mrb[8].mxu0 %v17708_v13  ;;  %3411 = vmatmul.mubr.f32.vlgmr.msra.gmra.mrb[8].mxu1 %v17708_v13 }
 0x20a   : > { %14795 = vmatpush1.bf16.msra.mxu0 %v17979_v54  ;;  %14843 = vmatpush1.bf16.msra.mxu1 %v23691_v45  ;;  %v3798_v45 = vsel %vm2146_vm2, %v3765_v48, 0 }
 0x20b   : > { %14797 = vmatprep.subr.bf16.mxu0 %v18195_v5  ;;  %14845 = vmatprep.subr.bf16.mxu1 %v18203_v51 }
 0x20c   : > { %2726 = vmatprep.mubr.f32.mxu0 %v23686_v31  ;;  %3416 = vmatprep.mubr.f32.mxu1 %v23686_v31 }
 0x20d   : > { %2728 = vmatmul.mubr.f32.gmra.mrb[10].mxu0 %v17726_v27  ;;  %3418 = vmatmul.mubr.f32.gmra.mrb[10].mxu1 %v17726_v27 }
 0x20e   : > { %14799 = vmatpush1.bf16.msra.mxu0 %v18159_v44  ;;  %14847 = vmatpush1.bf16.msra.mxu1 %v18182_v1 }
 0x20f   : > { %2733 = vmatprep.mubr.f32.mxu0 %v23686_v31  ;;  %3423 = vmatprep.mubr.f32.mxu1 %v23686_v31 }
 0x211   : > { %2735 = vmatmul.mubr.f32.gmra.mrb[12].mxu0 %v17755_v56  ;;  %3425 = vmatmul.mubr.f32.gmra.mrb[12].mxu1 %v17755_v56 }
 0x212   : > { %2740 = vmatprep.mubr.f32.mxu0 %v23686_v31  ;;  %3430 = vmatprep.mubr.f32.mxu1 %v23686_v31 }
 0x215   : > { %2742 = vmatmul.mubr.f32.gmra.mrb[14].mxu0 %v18051_v58  ;;  %3432 = vmatmul.mubr.f32.gmra.mrb[14].mxu1 %v18051_v58 }
 0x216   : > { %2820 = vmatprep.mubr.f32.mxu0 %v23686_v31  ;;  %3510 = vmatprep.mubr.f32.mxu1 %v23686_v31 }
 0x219   : > { %2822 = vmatmul.mubr.f32.vlgmr.msra.gmra.mrb[8].mxu0 %v17708_v13  ;;  %3512 = vmatmul.mubr.f32.vlgmr.msra.gmra.mrb[8].mxu1 %v17708_v13  ;;  %v3763_v13 = vld [vmem:[%s23256_s5] sm:$0xff] }
 0x21a   : > { %2827 = vmatprep.mubr.f32.mxu0 %v23686_v31  ;;  %3517 = vmatprep.mubr.f32.mxu1 %v23686_v31  ;;  %v3792_v61 = vsel %vm2146_vm2, %v3763_v13, 0 }
 0x21b   : > { %v18390_v46 = vand.u32 4294901760, %v3792_v61 }
 0x21d   : > { %2829 = vmatmul.mubr.f32.gmra.mrb[10].mxu0 %v17726_v27  ;;  %3519 = vmatmul.mubr.f32.gmra.mrb[10].mxu1 %v17726_v27  ;;  %v2129_v27 = vpop.permute.xlu0 %2128  ;;  %v18405_v14 = vsub.f32 %v3792_v61, %v18390_v46 }
 0x21e   : > { %2834 = vmatprep.mubr.f32.mxu0 %v23686_v31  ;;  %3524 = vmatprep.mubr.f32.mxu1 %v23686_v31 }
 0x21f   : > { %v18421_v20 = vand.u32 4294901760, %v18405_v14 }
 0x221   : > { %2836 = vmatmul.mubr.f32.gmra.mrb[12].mxu0 %v17755_v56  ;;  %3526 = vmatmul.mubr.f32.gmra.mrb[12].mxu1 %v17755_v56  ;;  %v2139_v22 = vpop.permute.xlu0 %2138  ;;  %23694 = vst [vmem:[#allocation24_spill] sm:$0xff] %v18421_v20  ;;  %v3879_v13 = vsub.f32 %v18405_v14, %v18421_v20 }
 0x222   : > { %2841 = vmatprep.mubr.f32.mxu0 %v23686_v31  ;;  %3531 = vmatprep.mubr.f32.mxu1 %v23686_v31 }
 0x223   : > { %v18447_v16 = vand.u32 4294901760, %v3879_v13 }
 0x225   : > { %2843 = vmatmul.mubr.f32.gmra.mrb[14].mxu0 %v18051_v58  ;;  %3533 = vmatmul.mubr.f32.gmra.mrb[14].mxu1 %v18051_v58 }
 0x226   : > { %3875 = vmatprep.mubr.f32.mxu0 %v23686_v31  ;;  %4565 = vmatprep.mubr.f32.mxu1 %v23686_v31 }
 0x2ec   : > { %v2823_v62 = vpop.f32.mrb[8].mxu0  ;;  %v3513_v55 = vpop.f32.mrb[8].mxu1 }
 0x2ed   : > { %v18374_v56 = vadd.f32 %v2823_v62, %v2129_v27  ;;  %v18376_v24 = vadd.f32 %v3513_v55, %v2129_v27  ;;  %v2825_v41 = vpop.f32.mrb[9].mxu0  ;;  %v3515_v39 = vpop.f32.mrb[9].mxu1  ;;  %v18435_v55 = vand.u32 4294901760, %v18427_v28 }
 0x2ee   : > { %v18382_v12 = vadd.f32 %v2825_v41, %v2129_v27  ;;  %v18384_v33 = vadd.f32 %v3515_v39, %v2129_v27  ;;  %v18437_v41 = vand.u32 4294901760, %v3798_v45 }
 0x2ef   : > { %v3555_v54 = vmin.f32 %v18374_v56, 20.0  ;;  %v3557_v58 = vmin.f32 %v18376_v24, 20.0  ;;  %vm3539_vm7 = vcmp.gt.f32.partialorder %v18374_v56, 20.0  ;;  %vm3541_vm10 = vcmp.gt.f32.partialorder %v18376_v24, 20.0 }
 0x2f0   : > { %v3556_v15 = vmin.f32 %v18382_v12, 20.0  ;;  %v3558_v47 = vmin.f32 %v18384_v33, 20.0  ;;  %v2830_v38 = vpop.f32.mrb[10].mxu0  ;;  %v3520_v30 = vpop.f32.mrb[10].mxu1  ;;  %vm3540_vm13 = vcmp.gt.f32.partialorder %v18382_v12, 20.0  ;;  %vm3542_vm14 = vcmp.gt.f32.partialorder %v18384_v33, 20.0 }
 0x2f1   : > { %v3571_v3 = vmul.f32 1.442695, %v3555_v54  ;;  %v3575_v44 = vmul.f32 1.442695, %v3557_v58  ;;  %v18393_v23 = vadd.f32 %v2830_v38, %v2134_v37  ;;  %v18395_v25 = vadd.f32 %v3520_v30, %v2134_v37  ;;  %v2832_v1 = vpop.f32.mrb[11].mxu0  ;;  %v3522_v59 = vpop.f32.mrb[11].mxu1 }
 0x2f2   : > { %v3573_v5 = vmul.f32 1.442695, %v3556_v15  ;;  %v3577_v19 = vmul.f32 1.442695, %v3558_v47  ;;  %v18397_v51 = vadd.f32 %v2832_v1, %v2134_v37  ;;  %v18399_v57 = vadd.f32 %v3522_v59, %v2134_v37  ;;  %v3766_v15 = vld [vmem:[%s23256_s5 + $0x18] sm:$0xff] }
 0x2f3   : > { %16751 = vpow2.f32 %v3571_v3  ;;  %v3559_v35 = vmin.f32 %v18393_v23, 20.0  ;;  %v3561_v49 = vmin.f32 %v18395_v25, 20.0  ;;  %vm3543_vm12 = vcmp.gt.f32.partialorder %v18393_v23, 20.0 }
 0x2f4   : > { %16753 = vpow2.f32 %v3575_v44  ;;  %v3560_v10 = vmin.f32 %v18397_v51, 20.0  ;;  %v2837_v63 = vpop.f32.mrb[12].mxu0  ;;  %v3527_v53 = vpop.f32.mrb[12].mxu1  ;;  %v3562_v52 = vmin.f32 %v18399_v57, 20.0  ;;  %vm3545_vm3 = vcmp.gt.f32.partialorder %v18395_v25, 20.0 }
 0x2f5   : > { %16755 = vpow2.f32 %v3573_v5  ;;  %v3579_v32 = vmul.f32 1.442695, %v3559_v35  ;;  %v2839_v60 = vpop.f32.mrb[13].mxu0  ;;  %v3529_v29 = vpop.f32.mrb[13].mxu1  ;;  %v3583_v50 = vmul.f32 1.442695, %v3561_v49  ;;  %v18410_v26 = vadd.f32 %v2837_v63, %v2139_v22 }
 0x2f6   : > { %16757 = vpow2.f32 %v3577_v19  ;;  %v3581_v4 = vmul.f32 1.442695, %v3560_v10  ;;  %v18412_v21 = vadd.f32 %v3527_v53, %v2139_v22  ;;  %v18414_v11 = vadd.f32 %v2839_v60, %v2139_v22  ;;  %v2144_v44 = vpop.permute.xlu1 %2143 }
 0x2f7   : > { %16759 = vpow2.f32 %v3579_v32  ;;  %v3585_v2 = vmul.f32 1.442695, %v3562_v52  ;;  %v3563_v18 = vmin.f32 %v18410_v26, 20.0  ;;  %v18424_v17 = vadd.f32 %v3529_v29, %v2139_v22 }
 0x2f8   : > { %v2844_v9 = vpop.f32.mrb[14].mxu0  ;;  %v3534_v36 = vpop.f32.mrb[14].mxu1  ;;  %16761 = vpow2.f32 %v3583_v50  ;;  %v3565_v0 = vmin.f32 %v18412_v21, 20.0  ;;  %v3564_v6 = vmin.f32 %v18414_v11, 20.0  ;;  %v18454_v5 = vsub.f32 %v3798_v45, %v18437_v41 }
 0x2f9   : > { %v2846_v7 = vpop.f32.mrb[15].mxu0  ;;  %v3536_v8 = vpop.f32.mrb[15].mxu1  ;;  %16763 = vpow2.f32 %v3581_v4  ;;  %v3587_v40 = vmul.f32 1.442695, %v3563_v18  ;;  %v3566_v62 = vmin.f32 %v18424_v17, 20.0  ;;  %v18457_v22 = vadd.f32 %v2844_v9, %v2144_v44 }
 0x2fa   : > { %v3591_v43 = vmul.f32 1.442695, %v3565_v0  ;;  %16765 = vpow2.f32 %v3585_v2  ;;  %v3589_v58 = vmul.f32 1.442695, %v3564_v6  ;;  %v18460_v35 = vsel %vm2146_vm2, %v3766_v15, 0 }
 0x2fb   : > { %16767 = vpow2.f32 %v3587_v40  ;;  %v3593_v1 = vmul.f32 1.442695, %v3566_v62  ;;  %v18468_v50 = vadd.f32 %v3534_v36, %v2144_v44  ;;  %v18470_v4 = vadd.f32 %v2846_v7, %v2144_v44 }
 0x2fc   : > { %16769 = vpow2.f32 %v3591_v43  ;;  %v18472_v48 = vadd.f32 %v3536_v8, %v2144_v44  ;;  %vm3544_vm5 = vcmp.gt.f32.partialorder %v18397_v51, 20.0 }
 0x2fd   : > { %v16752_v27 = vpop.eup %16751 }
 0x2fe   : > { %v16754_v39 = vpop.eup %16753  ;;  %v3603_v61 = vadd.f32 1.0, %v16752_v27  ;;  %v3606_v37 = vmul.f32 -0.5, %v16752_v27  ;;  %v3609_v63 = vand.u32 2147483647, %v16752_v27 }
 0x2ff   : > { %v18439_v42 = vpop.eup %16755  ;;  %v3621_v54 = vadd.f32 1.0, %v16754_v39  ;;  %v3624_v38 = vmul.f32 -0.5, %v16754_v39  ;;  %v3627_v53 = vand.u32 2147483647, %v16754_v39 }
 0x300   : > { %v18444_v47 = vpop.eup %16757  ;;  %16771 = vlog2.f32 %v3603_v61  ;;  %v3612_v30 = vadd.f32 1.0, %v18439_v42  ;;  %v3607_v10 = vadd.f32 1.0, %v3606_v37  ;;  %v3615_v60 = vmul.f32 -0.5, %v18439_v42 }
 0x301   : > { %v18449_v3 = vpop.eup %16759  ;;  %16773 = vlog2.f32 %v3621_v54  ;;  %v3630_v19 = vadd.f32 1.0, %v18444_v47  ;;  %v3625_v52 = vadd.f32 1.0, %v3624_v38  ;;  %v3618_v18 = vand.u32 2147483647, %v18439_v42 }
 0x302   : > { %16775 = vlog2.f32 %v3612_v30  ;;  %v18462_v49 = vpop.eup %16761  ;;  %v3639_v29 = vadd.f32 1.0, %v18449_v3  ;;  %v3633_v9 = vmul.f32 -0.5, %v18444_v47  ;;  %v3608_v40 = vmul.f32 %v16752_v27, %v3607_v10 }
 0x303   : > { %16777 = vpow2.f32 %v3589_v58  ;;  %v18464_v32 = vpop.eup %16763  ;;  %v3657_v0 = vadd.f32 1.0, %v18462_v49  ;;  %vm18480_vm8 = vcmp.lt.f32.partialorder %v3609_v63, 0.0004427343  ;;  %vm18484_vm9 = vcmp.lt.f32.partialorder %v3627_v53, 0.0004427343 }
 0x304   : > { %16779 = vlog2.f32 %v3630_v19  ;;  %v18474_v2 = vpop.eup %16765  ;;  %v3648_v7 = vadd.f32 1.0, %v18464_v32  ;;  %v3626_v43 = vmul.f32 %v16754_v39, %v3625_v52  ;;  %v3616_v6 = vadd.f32 1.0, %v3615_v60 }
 0x305   : > { %16781 = vpow2.f32 %v3593_v1  ;;  %v18489_v8 = vpop.eup %16767  ;;  %v3642_v13 = vmul.f32 -0.5, %v18449_v3  ;;  %v3636_v27 = vand.u32 2147483647, %v18444_v47  ;;  %v3660_v61 = vmul.f32 -0.5, %v18462_v49 }
 0x306   : > { %16783 = vlog2.f32 %v3639_v29  ;;  %v18492_v62 = vpop.eup %16769  ;;  %v3666_v37 = vadd.f32 1.0, %v18474_v2  ;;  %vm18498_vm11 = vcmp.lt.f32.partialorder %v3618_v18, 0.0004427343  ;;  %v3634_v39 = vadd.f32 1.0, %v3633_v9 }
 0x307   : > { %16785 = vlog2.f32 %v3657_v0  ;;  %v3645_v15 = vand.u32 2147483647, %v18449_v3  ;;  %v3651_v38 = vmul.f32 -0.5, %v18464_v32  ;;  %v3669_v1 = vmul.f32 -0.5, %v18474_v2 }
 0x308   : > { %16787 = vlog2.f32 %v3648_v7  ;;  %v3675_v19 = vadd.f32 1.0, %v18489_v8  ;;  %v3617_v53 = vmul.f32 %v18439_v42, %v3616_v6  ;;  %v3643_v52 = vadd.f32 1.0, %v3642_v13 }
 0x309   : > { %16789 = vlog2.f32 %v3666_v37  ;;  %v3663_v60 = vand.u32 2147483647, %v18462_v49  ;;  %v3661_v9 = vadd.f32 1.0, %v3660_v61  ;;  %v3654_v0 = vand.u32 2147483647, %v18464_v32 }
 0x30a   : > { %v16772_v54 = vpop.eup %16771  ;;  %16791 = vlog2.f32 %v3675_v19  ;;  %vm18517_vm15 = vcmp.lt.f32.partialorder %v3636_v27, 0.0004427343  ;;  %v3652_v6 = vadd.f32 1.0, %v3651_v38  ;;  %vm18525_vm0 = vcmp.lt.f32.partialorder %v3645_v15, 0.0004427343 }
 0x30b   : > { %v16774_v30 = vpop.eup %16773  ;;  %v3605_v44 = vmul.f32 0.6931472, %v16772_v54  ;;  %v3635_v54 = vmul.f32 %v18444_v47, %v3634_v39  ;;  %v3670_v61 = vadd.f32 1.0, %v3669_v1  ;;  %v3644_v27 = vmul.f32 %v18449_v3, %v3643_v52 }
 0x30c   : > { %v16776_v10 = vpop.eup %16775  ;;  %v3623_v63 = vmul.f32 0.6931472, %v16774_v30  ;;  %vm18536_vm4 = vcmp.lt.f32.partialorder %v3663_v60, 0.0004427343  ;;  %v3672_v36 = vand.u32 2147483647, %v18474_v2  ;;  %v3662_v15 = vmul.f32 %v18462_v49, %v3661_v9 }
 0x30d   : > { %v18511_v29 = vpop.eup %16777  ;;  %v3611_v18 = vsel %vm18480_vm8, %v3608_v40, %v3605_v44  ;;  %v3614_v37 = vmul.f32 0.6931472, %v16776_v10  ;;  %vm18543_vm6 = vcmp.lt.f32.partialorder %v3654_v0, 0.0004427343  ;;  %v3653_v10 = vmul.f32 %v18464_v32, %v3652_v6 }
 0x30e   : > { %v16780_v7 = vpop.eup %16779  ;;  %v3629_v30 = vsel %vm18484_vm9, %v3626_v43, %v3623_v63  ;;  %v18532_v47 = vsel %vm3539_vm7, %v18374_v56, %v3611_v18  ;;  %vm3546_vm7 = vcmp.gt.f32.partialorder %v18399_v57, 20.0  ;;  %v3678_v56 = vmul.f32 -0.5, %v18489_v8 }
 0x30f   : > { %v18521_v13 = vpop.eup %16781  ;;  %v3632_v45 = vmul.f32 0.6931472, %v16780_v7  ;;  %v18552_v1 = vsel %vm3541_vm10, %v18376_v24, %v3629_v30  ;;  %v3620_v19 = vsel %vm18498_vm11, %v3617_v53, %v3614_v37  ;;  %v3805_v52 = vand.u32 4294901760, %v18532_v47 }
 0x310   : > { %v16784_v44 = vpop.eup %16783  ;;  %v3671_v18 = vmul.f32 %v18474_v2, %v3670_v61  ;;  %v3693_v9 = vadd.f32 1.0, %v18492_v62  ;;  %v3681_v0 = vand.u32 2147483647, %v18489_v8  ;;  %v4495_v7 = vand.u32 4294901760, %v18552_v1 }
 0x311   : > { %v3641_v43 = vmul.f32 0.6931472, %v16784_v44  ;;  %v16786_v3 = vpop.eup %16785  ;;  %v3638_v49 = vsel %vm18517_vm15, %v3635_v54, %v3632_v45  ;;  %v3748_v37 = vsel %vm3540_vm13, %v18382_v12, %v3620_v19  ;;  %v3679_v54 = vadd.f32 1.0, %v3678_v56 }
 0x312   : > { %v16788_v63 = vpop.eup %16787  ;;  %v3659_v58 = vmul.f32 0.6931472, %v16786_v3  ;;  %v3750_v2 = vsel %vm3542_vm14, %v18384_v33, %v3638_v49  ;;  %vm3547_vm8 = vcmp.gt.f32.partialorder %v18410_v26, 20.0  ;;  %v18586_v12 = vsub.f32 %v18532_v47, %v3805_v52 }
 0x313   : > { %v3647_v60 = vsel %vm18525_vm0, %v3644_v27, %v3641_v43  ;;  %v3650_v53 = vmul.f32 0.6931472, %v16788_v63  ;;  %v16790_v32 = vpop.eup %16789  ;;  %vm3673_vm9 = vcmp.lt.f32.partialorder %v3672_v36, 0.0004427343  ;;  %16793 = vlog2.f32 %v3693_v9 }
 0x314   : > { %v18567_v24 = vsel %vm3543_vm12, %v18393_v23, %v3647_v60  ;;  %v3665_v23 = vsel %vm18536_vm4, %v3662_v15, %v3659_v58  ;;  %v3668_v30 = vmul.f32 0.6931472, %v16790_v32  ;;  %v16792_v45 = vpop.eup %16791  ;;  %v3696_v33 = vmul.f32 -0.5, %v18492_v62 }
 0x315   : > { %v3809_v42 = vand.u32 4294901760, %v18567_v24  ;;  %v3656_v6 = vsel %vm18543_vm6, %v3653_v10, %v3650_v53  ;;  %v3677_v61 = vmul.f32 0.6931472, %v16792_v45  ;;  %vm18589_vm10 = vcmp.lt.f32.partialorder %v3681_v0, 0.0004427343 }
 0x316   : > { %v3674_v40 = vsel %vm3673_vm9, %v3671_v18, %v3668_v30  ;;  %v3567_v27 = vmin.f32 %v18457_v22, 20.0  ;;  %v3803_v39 = vand.u32 4294901760, %v3748_v37  ;;  %v4493_v43 = vand.u32 4294901760, %v3750_v2 }
 0x317   : > { %v3753_v15 = vsel %vm3545_vm3, %v18395_v25, %v3665_v23  ;;  %v3752_v36 = vsel %vm3544_vm5, %v18397_v51, %v3656_v6  ;;  %v18603_v38 = vsub.f32 %v18552_v1, %v4495_v7  ;;  %v18608_v56 = vsub.f32 %v18567_v24, %v3809_v42 }
 0x318   : > { %v3754_v3 = vsel %vm3546_vm7, %v18399_v57, %v3674_v40  ;;  %v3680_v25 = vmul.f32 %v18489_v8, %v3679_v54  ;;  %v23309_v19 = vand.u32 4294901760, %v18586_v12  ;;  %v3697_v49 = vadd.f32 1.0, %v3696_v33 }
 0x319   : > { %v3699_v51 = vand.u32 2147483647, %v18492_v62  ;;  %v3684_v10 = vadd.f32 1.0, %v18511_v29  ;;  %v4499_v63 = vand.u32 4294901760, %v3753_v15  ;;  %v3807_v60 = vand.u32 4294901760, %v3752_v36 }
 0x31a   : > { %v3683_v18 = vsel %vm18589_vm10, %v3680_v25, %v3677_v61  ;;  %v3702_v9 = vadd.f32 1.0, %v18521_v13  ;;  %v18620_v58 = vsub.f32 %v3748_v37, %v3803_v39  ;;  %v18622_v53 = vsub.f32 %v3750_v2, %v4493_v43 }
 0x31b   : > { %v4497_v57 = vand.u32 4294901760, %v3754_v3  ;;  %16795 = vlog2.f32 %v3684_v10  ;;  %v23305_v8 = vand.u32 4294901760, %v18608_v56  ;;  %v3687_v0 = vmul.f32 -0.5, %v18511_v29 }
 0x31c   : > { %16797 = vlog2.f32 %v3702_v9  ;;  %v3595_v32 = vmul.f32 1.442695, %v3567_v27  ;;  %v18629_v54 = vsel %vm3547_vm8, %v18410_v26, %v3683_v18  ;;  %v18632_v23 = vmul.f32 %v18492_v62, %v3697_v49 }
 0x31d   : > { %v3705_v37 = vmul.f32 -0.5, %v18521_v13  ;;  %v3569_v2 = vmin.f32 %v18468_v50, 20.0  ;;  %v18636_v6 = vsub.f32 %v3753_v15, %v4499_v63  ;;  %v18638_v30 = vsub.f32 %v3752_v36, %v3807_v60  ;;  %v16794_v33 = vpop.eup %16793 }
 0x31e   : > { %vm18640_vm11 = vcmp.lt.f32.partialorder %v3699_v51, 0.0004427343  ;;  %16799 = vpow2.f32 %v3595_v32  ;;  %v18644_v40 = vsub.f32 %v3754_v3, %v4497_v57  ;;  %v3690_v26 = vand.u32 2147483647, %v18511_v29 }
 0x31f   : > { %v3599_v62 = vmul.f32 1.442695, %v3569_v2  ;;  %v3568_v61 = vmin.f32 %v18470_v4, 20.0  ;;  %v23307_v44 = vand.u32 4294901760, %v18629_v54  ;;  %v3688_v27 = vadd.f32 1.0, %v3687_v0 }
 0x320   : > { %v3570_v15 = vmin.f32 %v18472_v48, 20.0  ;;  %v18650_v36 = vpack.c.bf16 %v3807_v60, %v3803_v39  ;;  %vm3549_vm12 = vcmp.gt.f32.partialorder %v18412_v21, 20.0  ;;  %v3706_v25 = vadd.f32 1.0, %v3705_v37 }
 0x321   : > { %16801 = vpow2.f32 %v3599_v62  ;;  %v3597_v49 = vmul.f32 1.442695, %v3568_v61  ;;  %v18653_v51 = vpack.c.bf16 %v4497_v57, %v4493_v43  ;;  %v3695_v3 = vmul.f32 0.6931472, %v16794_v33 }
 0x322   : > { %vm3548_vm13 = vcmp.gt.f32.partialorder %v18414_v11, 20.0  ;;  %v3601_v10 = vmul.f32 1.442695, %v3570_v15  ;;  %14849 = vmatprep.subr.bf16.mxu0 %v18650_v36  ;;  %v18661_v18 = vpack.c.bf16 %v3809_v42, %v3805_v52  ;;  %v18665_v39 = vpack.c.bf16 %v4499_v63, %v4495_v7 }
 0x323   : > { %16803 = vpow2.f32 %v3597_v49  ;;  %14897 = vmatprep.subr.bf16.mxu1 %v18653_v51  ;;  %v23314_v43 = vand.u32 4294901760, %v18620_v58  ;;  %v23313_v60 = vand.u32 4294901760, %v18638_v30  ;;  %v23311_v9 = vand.u32 4294901760, %v18622_v53 }
 0x324   : > { %23713 = vst [vmem:[#allocation23_spill] sm:$0xff] %v18661_v18  ;;  %23714 = vst [vmem:[#allocation25_spill] sm:$0xff] %v18665_v39  ;;  %vm18671_vm14 = vcmp.lt.f32.partialorder %v3690_v26, 0.0004427343  ;;  %v3708_v47 = vand.u32 2147483647, %v18521_v13  ;;  %16805 = vpow2.f32 %v3601_v10  ;;  %14851 = vmatpush1.bf16.msra.mxu0 %v18661_v18  ;;  %14899 = vmatpush1.bf16.msra.mxu1 %v18665_v39  ;;  %v3941_v63 = vsub.f32 %v18608_v56, %v23305_v8 }
 0x325   : > { %v23310_v1 = vand.u32 4294901760, %v18644_v40  ;;  %v16796_v52 = vpop.eup %16795  ;;  %v3923_v24 = vsub.f32 %v18620_v58, %v23314_v43  ;;  %v3935_v7 = vsub.f32 %v18638_v30, %v23313_v60  ;;  %v4613_v42 = vsub.f32 %v18622_v53, %v23311_v9 }
 0x326   : > { %v16798_v0 = vpop.eup %16797  ;;  %v3686_v32 = vmul.f32 0.6931472, %v16796_v52  ;;  %v3689_v37 = vmul.f32 %v18511_v29, %v3688_v27  ;;  %v3929_v33 = vsub.f32 %v18586_v12, %v23309_v19  ;;  %v3701_v26 = vsel %vm18640_vm11, %v18632_v23, %v3695_v3 }
 0x327   : > { %v4625_v2 = vsub.f32 %v18644_v40, %v23310_v1  ;;  %v3704_v62 = vmul.f32 0.6931472, %v16798_v0  ;;  %v3707_v61 = vmul.f32 %v18521_v13, %v3706_v25  ;;  %v3936_v15 = vand.u32 4294901760, %v3935_v7 }
 0x328   : > { %v16800_v49 = vpop.eup %16799  ;;  %v3692_v29 = vsel %vm18671_vm14, %v3689_v37, %v3686_v32  ;;  %vm18704_vm15 = vcmp.lt.f32.partialorder %v3708_v47, 0.0004427343  ;;  %v3924_v10 = vand.u32 4294901760, %v3923_v24  ;;  %v4614_v45 = vand.u32 4294901760, %v4613_v42 }
 0x329   : > { %v4626_v52 = vand.u32 4294901760, %v4625_v2  ;;  %v3710_v59 = vsel %vm18704_vm15, %v3707_v61, %v3704_v62  ;;  %v3711_v8 = vadd.f32 1.0, %v16800_v49  ;;  %v3942_v23 = vand.u32 4294901760, %v3941_v63 }
 0x32a   : > { %v18713_v13 = vsel %vm3549_vm12, %v18412_v21, %v3701_v26  ;;  %vm3550_vm0 = vcmp.gt.f32.partialorder %v18424_v17, 20.0  ;;  %v18716_v25 = vpack.c.bf16 %v3936_v15, %v3924_v10  ;;  %v3930_v3 = vand.u32 4294901760, %v3929_v33 }
 0x32b   : > { %v18718_v57 = vpop.eup %16801  ;;  %v18723_v47 = vsel %vm3548_vm13, %v18414_v11, %v3692_v29  ;;  %16807 = vlog2.f32 %v3711_v8  ;;  %v3714_v24 = vmul.f32 -0.5, %v16800_v49  ;;  %v18725_v7 = vpack.c.bf16 %v4626_v52, %v4614_v45 }
 0x32c   : > { %v4618_v42 = vand.u32 4294901760, %v18603_v38  ;;  %v18729_v21 = vsel %vm3550_vm0, %v18424_v17, %v3710_v59  ;;  %v3729_v63 = vadd.f32 1.0, %v18718_v57  ;;  %v18733_v0 = vand.u32 4294901760, %v18460_v35 }
 0x32d   : > { %v16804_v32 = vpop.eup %16803  ;;  %v4630_v37 = vand.u32 4294901760, %v18636_v6  ;;  %v18739_v11 = vsub.f32 %v18629_v54, %v23307_v44  ;;  %v23306_v8 = vand.u32 4294901760, %v18713_v13  ;;  %v18742_v2 = vpack.c.bf16 %v3942_v23, %v3930_v3 }
 0x32e   : > { %v16806_v33 = vpop.eup %16805  ;;  %v23308_v17 = vand.u32 4294901760, %v18723_v47  ;;  %v3717_v59 = vand.u32 2147483647, %v16800_v49  ;;  %16809 = vlog2.f32 %v3729_v63  ;;  %v3720_v26 = vadd.f32 1.0, %v16804_v32 }
 0x32f   : > { %v23312_v62 = vand.u32 4294901760, %v18729_v21  ;;  %v3715_v61 = vadd.f32 1.0, %v3714_v24  ;;  %v3738_v15 = vadd.f32 1.0, %v16806_v33  ;;  %v18747_v29 = vand.u32 4294901760, %v18454_v5 }
 0x330   : > { %vm3551_vm3 = vcmp.gt.f32.partialorder %v18457_v22, 20.0  ;;  %16811 = vlog2.f32 %v3720_v26  ;;  %v4619_v27 = vsub.f32 %v18603_v38, %v4618_v42  ;;  %v18753_v10 = vsub.f32 %v18460_v35, %v18733_v0 }
 0x331   : > { %v3732_v45 = vmul.f32 -0.5, %v18718_v57  ;;  %v3723_v23 = vmul.f32 -0.5, %v16804_v32  ;;  %16813 = vlog2.f32 %v3738_v15  ;;  %v18760_v3 = vsub.f32 %v18713_v13, %v23306_v8 }
 0x332   : > { %v18765_v24 = vsub.f32 %v18723_v47, %v23308_v17  ;;  %vm18767_vm4 = vcmp.lt.f32.partialorder %v3717_v59, 0.0004427343  ;;  %v4631_v35 = vsub.f32 %v18636_v6, %v4630_v37  ;;  %v18775_v26 = vsub.f32 %v18729_v21, %v23312_v62 }
 0x333   : > { %v3716_v15 = vmul.f32 %v16800_v49, %v3715_v61  ;;  %vm3553_vm5 = vcmp.gt.f32.partialorder %v18468_v50, 20.0  ;;  %v3735_v8 = vand.u32 2147483647, %v18718_v57  ;;  %v3741_v52 = vmul.f32 -0.5, %v16806_v33 }
 0x334   : > { %v4620_v44 = vand.u32 4294901760, %v4619_v27  ;;  %v4632_v17 = vand.u32 4294901760, %v4631_v35  ;;  %v3733_v9 = vadd.f32 1.0, %v3732_v45  ;;  %vm3552_vm6 = vcmp.gt.f32.partialorder %v18470_v4, 20.0 }
 0x335   : > { %v16808_v1 = vpop.eup %16807  ;;  %v3724_v62 = vadd.f32 1.0, %v3723_v23  ;;  %v3726_v60 = vand.u32 2147483647, %v16804_v32  ;;  %vm3554_vm7 = vcmp.gt.f32.partialorder %v18472_v48, 20.0  ;;  %v3744_v27 = vand.u32 2147483647, %v16806_v33 }
 0x336   : > { %v3713_v61 = vmul.f32 0.6931472, %v16808_v1  ;;  %v18787_v35 = vpack.c.bf16 %v4632_v17, %v4620_v44  ;;  %v3742_v43 = vadd.f32 1.0, %v3741_v52  ;;  %v23721_v19 = vand.u32 4294901760, %v18620_v58 }
 0x337   : > { %v23722_v45 = vand.u32 4294901760, %v18638_v30  ;;  %v23723_v23 = vand.u32 4294901760, %v18622_v53  ;;  %v23724_v49 = vand.u32 4294901760, %v18644_v40  ;;  %v23725_v39 = vand.u32 4294901760, %v18586_v12 }
 0x338   : > { %v23726_v44 = vand.u32 4294901760, %v18608_v56  ;;  %v16810_v59 = vpop.eup %16809  ;;  %v4642_v52 = vand.u32 4294901760, %v18760_v3  ;;  %v3719_v18 = vsel %vm18767_vm4, %v3716_v15, %v3713_v61  ;;  %vm18812_vm8 = vcmp.lt.f32.partialorder %v3735_v8, 0.0004427343 }
 0x339   : > { %v18795_v20 = vpack.c.bf16 %v23722_v45, %v23721_v19  ;;  %v18801_v1 = vpack.c.bf16 %v23724_v49, %v23723_v23  ;;  %v18816_v45 = vpack.c.bf16 %v4630_v37, %v4618_v42  ;;  %v3759_v49 = vsel %vm3551_vm3, %v18457_v22, %v3719_v18 }
 0x33a   : > { %v18807_v17 = vpack.c.bf16 %v23726_v44, %v23725_v39  ;;  %v3731_v23 = vmul.f32 0.6931472, %v16810_v59  ;;  %v3734_v39 = vmul.f32 %v18718_v57, %v3733_v9  ;;  %vm18822_vm9 = vcmp.lt.f32.partialorder %v3726_v60, 0.0004427343 }
 0x33b   : > { %v3817_v63 = vand.u32 4294901760, %v3759_v49  ;;  %v3725_v15 = vmul.f32 %v16804_v32, %v3724_v62  ;;  %vm18826_vm10 = vcmp.lt.f32.partialorder %v3744_v27, 0.0004427343  ;;  %v3946_v42 = vand.u32 4294901760, %v18765_v24 }
 0x33c   : > { %23727 = vst [vmem:[#allocation26_spill] sm:$0xff] %v18807_v17  ;;  %v16812_v17 = vpop.eup %16811  ;;  %v3737_v22 = vsel %vm18812_vm8, %v3734_v39, %v3731_v23  ;;  %v3743_v59 = vmul.f32 %v16806_v33, %v3742_v43  ;;  %v4636_v60 = vand.u32 4294901760, %v18775_v26  ;;  %v23734_v62 = vand.u32 4294901760, %v18629_v54 }
 0x33d   : > { %v16814_v37 = vpop.eup %16813  ;;  %v3722_v18 = vmul.f32 0.6931472, %v16812_v17  ;;  %v18834_v9 = vsub.f32 %v3759_v49, %v3817_v63  ;;  %v3761_v57 = vsel %vm3553_vm5, %v18468_v50, %v3737_v22  ;;  %v23735_v17 = vand.u32 4294901760, %v18739_v11 }
 0x33e   : > { %v3740_v32 = vmul.f32 0.6931472, %v16814_v37  ;;  %v18841_v61 = vpack.c.bf16 %v3817_v63, %v23734_v62  ;;  %v4507_v27 = vand.u32 4294901760, %v3761_v57  ;;  %v4643_v33 = vsub.f32 %v18760_v3, %v4642_v52 }
 0x33f   : > { %v3728_v19 = vsel %vm18822_vm9, %v3725_v15, %v3722_v18  ;;  %v3953_v43 = vsub.f32 %v18739_v11, %v23735_v17  ;;  %v3964_v49 = vand.u32 4294901760, %v18834_v9  ;;  %v14870_v23 = vpack.c.bf16 %v18834_v9, %v18739_v11 }
 0x340   : > { %v3760_v50 = vsel %vm3552_vm6, %v18470_v4, %v3728_v19  ;;  %v3746_v54 = vsel %vm18826_vm10, %v3743_v59, %v3740_v32  ;;  %v18857_v39 = vsub.f32 %v3761_v57, %v4507_v27  ;;  %v23736_v15 = vand.u32 4294901760, %v18713_v13 }
 0x341   : > { %v3815_v44 = vand.u32 4294901760, %v3760_v50  ;;  %v3762_v63 = vsel %vm3554_vm7, %v18472_v48, %v3746_v54  ;;  %v3947_v4 = vsub.f32 %v18765_v24, %v3946_v42  ;;  %v3965_v8 = vsub.f32 %v18834_v9, %v3964_v49 }
 0x342   : > { %v18864_v37 = vpack.c.bf16 %v4507_v27, %v23736_v15  ;;  %v4505_v22 = vand.u32 4294901760, %v3762_v63  ;;  %v23737_v18 = vmov %v23735_v17  ;;  %v4654_v57 = vand.u32 4294901760, %v18857_v39 }
 0x343   : > { %v18870_v59 = vpack.c.bf16 %v3964_v49, %v23737_v18  ;;  %v18873_v32 = vsub.f32 %v3760_v50, %v3815_v44  ;;  %v23738_v62 = vand.u32 4294901760, %v18723_v47  ;;  %v14918_v13 = vpack.c.bf16 %v18857_v39, %v18760_v3 }
 0x344   : > { %v18881_v27 = vsub.f32 %v3762_v63, %v4505_v22  ;;  %v23739_v19 = vand.u32 4294901760, %v18729_v21  ;;  %v3954_v54 = vand.u32 4294901760, %v3953_v43  ;;  %v3966_v49 = vand.u32 4294901760, %v3965_v8 }
 0x345   : > { %v18877_v48 = vpack.c.bf16 %v3815_v44, %v23738_v62  ;;  %v3958_v50 = vand.u32 4294901760, %v18873_v32  ;;  %v4655_v15 = vsub.f32 %v18857_v39, %v4654_v57  ;;  %v14868_v47 = vpack.c.bf16 %v18873_v32, %v18765_v24 }
 0x346   : > { %v18885_v17 = vpack.c.bf16 %v4505_v22, %v23739_v19  ;;  %v18892_v44 = vpack.c.bf16 %v4654_v57, %v4642_v52  ;;  %v4637_v21 = vsub.f32 %v18775_v26, %v4636_v60  ;;  %v4648_v43 = vand.u32 4294901760, %v18881_v27 }
 0x347   : > { %14853 = vmatprep.subr.bf16.mxu0 %v18877_v48  ;;  %v14862_v63 = vpack.c.bf16 %v3966_v49, %v3954_v54  ;;  %v14916_v22 = vpack.c.bf16 %v18881_v27, %v18775_v26  ;;  %v3959_v24 = vsub.f32 %v18873_v32, %v3958_v50  ;;  %v4644_v52 = vand.u32 4294901760, %v4643_v33 }
 0x348   : > { %14901 = vmatprep.subr.bf16.mxu1 %v18885_v17  ;;  %14855 = vmatpush1.bf16.msra.mxu0 %v18841_v61  ;;  %v4656_v8 = vand.u32 4294901760, %v4655_v15  ;;  %v18903_v18 = vpack.c.bf16 %v3958_v50, %v3946_v42  ;;  %v4649_v57 = vsub.f32 %v18881_v27, %v4648_v43  ;;  %v18907_v62 = vpack.c.bf16 %v4648_v43, %v4636_v60 }
 0x349   : > { %14903 = vmatpush1.bf16.msra.mxu1 %v18864_v37  ;;  %14857 = vmatprep.subr.bf16.mxu0 %v18716_v25  ;;  %v23740_v26 = vsub.f32 %v18427_v28, %v18435_v55  ;;  %v3948_v54 = vand.u32 4294901760, %v3947_v4  ;;  %v3960_v25 = vand.u32 4294901760, %v3959_v24  ;;  %v4638_v42 = vand.u32 4294901760, %v4637_v21 }
 0x34a   : > { %14905 = vmatprep.subr.bf16.mxu1 %v18725_v7  ;;  %v14910_v49 = vpack.c.bf16 %v4656_v8, %v4644_v52  ;;  %v4650_v33 = vand.u32 4294901760, %v4649_v57  ;;  %v3901_v7 = vsub.f32 %v18454_v5, %v18747_v29  ;;  %v18918_v60 = vand.u32 4294901760, %v18753_v10 }
 0x34b   : > { %3881 = vmatmul.mubr.f32.vlgmr.msra.gmra.mrb[16].mxu0 %v18447_v16  ;;  %v3891_v19 = vand.u32 4294901760, %v23740_v26  ;;  %v14860_v32 = vpack.c.bf16 %v3960_v25, %v3948_v54  ;;  %v23741_v27 = vpack.c.bf16 %v18638_v30, %v18620_v58  ;;  %v23743_v58 = vpack.c.bf16 %v18608_v56, %v18586_v12  ;;  %v23745_v12 = vld [vmem:[#allocation23_spill] sm:$0xff] }
 0x34c   : > { %4571 = vmatmul.mubr.f32.vlgmr.msra.gmra.mrb[16].mxu1 %v18447_v16  ;;  %14859 = vmatpush1.bf16.msra.mxu0 %v18742_v2  ;;  %v14908_v4 = vpack.c.bf16 %v4650_v33, %v4638_v42  ;;  %v3902_v16 = vand.u32 4294901760, %v3901_v7  ;;  %v3912_v2 = vsub.f32 %v18753_v10, %v18918_v60  ;;  %v5410_v33 = vld [vmem:[%s23258_s7 + $0x18] sm:$0xff] }
 0x34d   : > { %14907 = vmatpush1.bf16.msra.mxu1 %v18787_v35  ;;  %3886 = vmatprep.mubr.f32.mxu0 %v23686_v31  ;;  %v23742_v35 = vpack.c.bf16 %v18644_v40, %v18622_v53  ;;  %v23744_v53 = vpack.c.bf16 %v18636_v6, %v18603_v38  ;;  %v23746_v38 = vld [vmem:[#allocation25_spill] sm:$0xff] }
 0x34e   : > { %4576 = vmatprep.mubr.f32.mxu1 %v23686_v31  ;;  %14861 = vmatprep.subr.bf16.mxu0 %v14860_v32  ;;  %v3913_v50 = vand.u32 4294901760, %v3912_v2 }
 0x34f   : > { %3892 = vmatmul.mubr.f32.gmra.mrb[18].mxu0 %v3891_v19  ;;  %14909 = vmatprep.subr.bf16.mxu1 %v14908_v4 }
 0x350   : > { %4582 = vmatmul.mubr.f32.gmra.mrb[18].mxu1 %v3891_v19  ;;  %14863 = vmatpush1.bf16.msra.mxu0 %v14862_v63 }
 0x351   : > { %14911 = vmatpush1.bf16.msra.mxu1 %v14910_v49  ;;  %14865 = vmatprep.subr.bf16.mxu0 %v23741_v27 }
 0x352   : > { %14913 = vmatprep.subr.bf16.mxu1 %v23742_v35  ;;  %3897 = vmatprep.mubr.f32.mxu0 %v23686_v31  ;;  %v5529_v35 = vsel %vm2146_vm2, %v5410_v33, 0 }
 0x353   : > { %4587 = vmatprep.mubr.f32.mxu1 %v23686_v31  ;;  %3903 = vmatmul.mubr.f32.gmra.mrb[20].mxu0 %v3902_v16 }
 0x354   : > { %4593 = vmatmul.mubr.f32.gmra.mrb[20].mxu1 %v3902_v16  ;;  %3908 = vmatprep.mubr.f32.mxu0 %v23686_v31 }
 0x355   : > { %4598 = vmatprep.mubr.f32.mxu1 %v23686_v31 }
 0x357   : > { %3914 = vmatmul.mubr.f32.gmra.mrb[22].mxu0 %v3913_v50 }
 0x358   : > { %4604 = vmatmul.mubr.f32.gmra.mrb[22].mxu1 %v3913_v50  ;;  %4024 = vmatprep.mubr.f32.mxu0 %v23686_v31 }
 0x359   : > { %4714 = vmatprep.mubr.f32.mxu1 %v23686_v31 }
 0x35b   : > { %4026 = vmatmul.mubr.f32.vlgmr.msra.gmra.mrb[16].mxu0 %v18390_v46 }
 0x35c   : > { %4716 = vmatmul.mubr.f32.vlgmr.msra.gmra.mrb[16].mxu1 %v18390_v46  ;;  %14867 = vmatpush1.bf16.msra.mxu0 %v23743_v58 }
 0x35d   : > { %14915 = vmatpush1.bf16.msra.mxu1 %v23744_v53  ;;  %14869 = vmatprep.subr.bf16.mxu0 %v14868_v47 }
 0x35e   : > { %14917 = vmatprep.subr.bf16.mxu1 %v14916_v22  ;;  %4031 = vmatprep.mubr.f32.mxu0 %v23686_v31 }
 0x35f   : > { %4721 = vmatprep.mubr.f32.mxu1 %v23686_v31  ;;  %4033 = vmatmul.mubr.f32.gmra.mrb[18].mxu0 %v18408_v34 }
 0x360   : > { %4723 = vmatmul.mubr.f32.gmra.mrb[18].mxu1 %v18408_v34  ;;  %14871 = vmatpush1.bf16.msra.mxu0 %v14870_v23 }
 0x361   : > { %14919 = vmatpush1.bf16.msra.mxu1 %v14918_v13  ;;  %14873 = vmatprep.subr.bf16.mxu0 %v18650_v36 }
 0x362   : > { %14921 = vmatprep.subr.bf16.mxu1 %v18653_v51  ;;  %4038 = vmatprep.mubr.f32.mxu0 %v23686_v31 }
 0x363   : > { %4728 = vmatprep.mubr.f32.mxu1 %v23686_v31  ;;  %4040 = vmatmul.mubr.f32.gmra.mrb[20].mxu0 %v18437_v41 }
 0x364   : > { %4730 = vmatmul.mubr.f32.gmra.mrb[20].mxu1 %v18437_v41  ;;  %4045 = vmatprep.mubr.f32.mxu0 %v23686_v31 }
 0x365   : > { %4735 = vmatprep.mubr.f32.mxu1 %v23686_v31 }
 0x367   : > { %4047 = vmatmul.mubr.f32.gmra.mrb[22].mxu0 %v18733_v0 }
 0x368   : > { %4737 = vmatmul.mubr.f32.gmra.mrb[22].mxu1 %v18733_v0  ;;  %4133 = vmatprep.mubr.f32.mxu0 %v23686_v31 }
 0x369   : > { %4823 = vmatprep.mubr.f32.mxu1 %v23686_v31 }
 0x36b   : > { %4136 = vmatmul.mubr.f32.vlgmr.msra.gmra.mrb[16].mxu0 %v18405_v14 }
 0x36c   : > { %4826 = vmatmul.mubr.f32.vlgmr.msra.gmra.mrb[16].mxu1 %v18405_v14  ;;  %14875 = vmatpush1.bf16.msra.mxu0 %v23745_v12  ;;  %v23747_v14 = vld [vmem:[#allocation24_spill] sm:$0xff] }
 0x36d   : > { %14923 = vmatpush1.bf16.msra.mxu1 %v23746_v38  ;;  %14877 = vmatprep.subr.bf16.mxu0 %v18877_v48 }
 0x36e   : > { %14925 = vmatprep.subr.bf16.mxu1 %v18885_v17  ;;  %4141 = vmatprep.mubr.f32.mxu0 %v23686_v31 }
 0x36f   : > { %4831 = vmatprep.mubr.f32.mxu1 %v23686_v31  ;;  %4144 = vmatmul.mubr.f32.gmra.mrb[18].mxu0 %v18427_v28 }
 0x370   : > { %4834 = vmatmul.mubr.f32.gmra.mrb[18].mxu1 %v18427_v28  ;;  %14879 = vmatpush1.bf16.msra.mxu0 %v18841_v61  ;;  %v3774_v28 = vpop.permute.xlu0 %3773 }
 0x371   : > { %14927 = vmatpush1.bf16.msra.mxu1 %v18864_v37  ;;  %14881 = vmatprep.subr.bf16.mxu0 %v18795_v20  ;;  %v23748_v20 = vld [vmem:[#allocation26_spill] sm:$0xff] }
 0x372   : > { %14929 = vmatprep.subr.bf16.mxu1 %v18801_v1  ;;  %4149 = vmatprep.mubr.f32.mxu0 %v23686_v31 }
 0x373   : > { %4839 = vmatprep.mubr.f32.mxu1 %v23686_v31  ;;  %4152 = vmatmul.mubr.f32.gmra.mrb[20].mxu0 %v18454_v5 }
 0x374   : > { %4842 = vmatmul.mubr.f32.gmra.mrb[20].mxu1 %v18454_v5  ;;  %4157 = vmatprep.mubr.f32.mxu0 %v23686_v31  ;;  %v3784_v22 = vpop.permute.xlu0 %3783 }
 0x375   : > { %4847 = vmatprep.mubr.f32.mxu1 %v23686_v31 }
 0x377   : > { %4160 = vmatmul.mubr.f32.gmra.mrb[22].mxu0 %v18753_v10 }
 0x378   : > { %4850 = vmatmul.mubr.f32.gmra.mrb[22].mxu1 %v18753_v10  ;;  %4238 = vmatprep.mubr.f32.mxu0 %v23686_v31 }
 0x379   : > { %4928 = vmatprep.mubr.f32.mxu1 %v23686_v31 }
 0x37b   : > { %4242 = vmatmul.mubr.f32.vlgmr.msra.gmra.mrb[16].mxu0 %v23747_v14 }
 0x37c   : > { %4932 = vmatmul.mubr.f32.vlgmr.msra.gmra.mrb[16].mxu1 %v23747_v14  ;;  %14883 = vmatpush1.bf16.msra.mxu0 %v23748_v20 }
 0x37d   : > { %14931 = vmatpush1.bf16.msra.mxu1 %v18816_v45  ;;  %14885 = vmatprep.subr.bf16.mxu0 %v18903_v18 }
 0x37e   : > { %14933 = vmatprep.subr.bf16.mxu1 %v18907_v62  ;;  %4247 = vmatprep.mubr.f32.mxu0 %v23686_v31 }
 0x37f   : > { %4937 = vmatprep.mubr.f32.mxu1 %v23686_v31  ;;  %4251 = vmatmul.mubr.f32.gmra.mrb[18].mxu0 %v18435_v55 }
 0x380   : > { %4941 = vmatmul.mubr.f32.gmra.mrb[18].mxu1 %v18435_v55  ;;  %14887 = vmatpush1.bf16.msra.mxu0 %v18870_v59 }
 0x381   : > { %14935 = vmatpush1.bf16.msra.mxu1 %v18892_v44  ;;  %14889 = vmatprep.subr.bf16.mxu0 %v18650_v36 }
 0x382   : > { %14937 = vmatprep.subr.bf16.mxu1 %v18653_v51  ;;  %4256 = vmatprep.mubr.f32.mxu0 %v23686_v31  ;;  %v5409_v51 = vld [vmem:[%s23258_s7 + $0x10] sm:$0xff] }
 0x383   : > { %4946 = vmatprep.mubr.f32.mxu1 %v23686_v31  ;;  %4260 = vmatmul.mubr.f32.gmra.mrb[20].mxu0 %v18747_v29 }
 0x384   : > { %4950 = vmatmul.mubr.f32.gmra.mrb[20].mxu1 %v18747_v29  ;;  %4265 = vmatprep.mubr.f32.mxu0 %v23686_v31  ;;  %v3779_v29 = vpop.permute.xlu1 %3778 }
 0x385   : > { %4955 = vmatprep.mubr.f32.mxu1 %v23686_v31 }
 0x387   : > { %4269 = vmatmul.mubr.f32.gmra.mrb[22].mxu0 %v18918_v60 }
 0x388   : > { %4959 = vmatmul.mubr.f32.gmra.mrb[22].mxu1 %v18918_v60  ;;  %4363 = vmatprep.mubr.f32.mxu0 %v23686_v31 }
 0x389   : > { %5053 = vmatprep.mubr.f32.mxu1 %v23686_v31 }
 0x38b   : > { %4365 = vmatmul.mubr.f32.vlgmr.msra.gmra.mrb[16].mxu0 %v18390_v46 }
 0x38c   : > { %5055 = vmatmul.mubr.f32.vlgmr.msra.gmra.mrb[16].mxu1 %v18390_v46  ;;  %14891 = vmatpush1.bf16.msra.mxu0 %v23745_v12 }
 0x38d   : > { %14939 = vmatpush1.bf16.msra.mxu1 %v23746_v38  ;;  %14893 = vmatprep.subr.bf16.mxu0 %v18877_v48 }
 0x38e   : > { %14941 = vmatprep.subr.bf16.mxu1 %v18885_v17  ;;  %4370 = vmatprep.mubr.f32.mxu0 %v23686_v31 }
 0x38f   : > { %5060 = vmatprep.mubr.f32.mxu1 %v23686_v31  ;;  %4372 = vmatmul.mubr.f32.gmra.mrb[18].mxu0 %v18408_v34 }
 0x390   : > { %5062 = vmatmul.mubr.f32.gmra.mrb[18].mxu1 %v18408_v34  ;;  %14895 = vmatpush1.bf16.msra.mxu0 %v18841_v61 }
 0x391   : > { %14943 = vmatpush1.bf16.msra.mxu1 %v18864_v37  ;;  %4377 = vmatprep.mubr.f32.mxu0 %v23686_v31  ;;  %v5526_v37 = vsel %vm2146_vm2, %v5409_v51, 0 }
 0x392   : > { %5067 = vmatprep.mubr.f32.mxu1 %v23686_v31  ;;  %v19095_v26 = vand.u32 4294901760, %v5526_v37 }
 0x393   : > { %4379 = vmatmul.mubr.f32.gmra.mrb[20].mxu0 %v18437_v41 }
 0x394   : > { %5069 = vmatmul.mubr.f32.gmra.mrb[20].mxu1 %v18437_v41  ;;  %4384 = vmatprep.mubr.f32.mxu0 %v23686_v31  ;;  %v19119_v14 = vsub.f32 %v5526_v37, %v19095_v26 }
 0x395   : > { %5074 = vmatprep.mubr.f32.mxu1 %v23686_v31 }
 0x397   : > { %4386 = vmatmul.mubr.f32.gmra.mrb[22].mxu0 %v18733_v0 }
 0x398   : > { %5076 = vmatmul.mubr.f32.gmra.mrb[22].mxu1 %v18733_v0  ;;  %4464 = vmatprep.mubr.f32.mxu0 %v23686_v31 }
 0x399   : > { %5154 = vmatprep.mubr.f32.mxu1 %v23686_v31 }
 0x39b   : > { %4466 = vmatmul.mubr.f32.vlgmr.msra.gmra.mrb[16].mxu0 %v18390_v46 }
 0x39c   : > { %5156 = vmatmul.mubr.f32.vlgmr.msra.gmra.mrb[16].mxu1 %v18390_v46  ;;  %4471 = vmatprep.mubr.f32.mxu0 %v23686_v31  ;;  %v5407_v46 = vld [vmem:[%s23258_s7] sm:$0xff] }
 0x39d   : > { %5161 = vmatprep.mubr.f32.mxu1 %v23686_v31  ;;  %v5520_v5 = vsel %vm2146_vm2, %v5407_v46, 0 }
 0x39e   : > { %v19074_v1 = vand.u32 4294901760, %v5520_v5 }
 0x39f   : > { %4473 = vmatmul.mubr.f32.gmra.mrb[18].mxu0 %v18408_v34 }
 0x3a0   : > { %5163 = vmatmul.mubr.f32.gmra.mrb[18].mxu1 %v18408_v34  ;;  %4478 = vmatprep.mubr.f32.mxu0 %v23686_v31  ;;  %v5408_v34 = vld [vmem:[%s23258_s7 + $0x8] sm:$0xff]  ;;  %v19091_v52 = vsub.f32 %v5520_v5, %v19074_v1  ;;  %v5411_v5 = vld [vmem:[%s23258_s7 + $0x20] sm:$0xff] }
 0x3a1   : > { %5168 = vmatprep.mubr.f32.mxu1 %v23686_v31  ;;  %v5523_v36 = vsel %vm2146_vm2, %v5408_v34, 0  ;;  %v19123_v34 = vand.u32 4294901760, %v5529_v35  ;;  %v19154_v37 = vsel %vm2146_vm2, %v5411_v5, 0 }
 0x3a2   : > { %v19078_v39 = vand.u32 4294901760, %v5523_v36  ;;  %v19113_v12 = vand.u32 4294901760, %v19091_v52 }
 0x3a3   : > { %4480 = vmatmul.mubr.f32.gmra.mrb[20].mxu0 %v18437_v41 }
 0x3a4   : > { %5170 = vmatmul.mubr.f32.gmra.mrb[20].mxu1 %v18437_v41  ;;  %4485 = vmatprep.mubr.f32.mxu0 %v23686_v31  ;;  %v19099_v42 = vsub.f32 %v5523_v36, %v19078_v39  ;;  %23750 = vst [vmem:[#allocation25_spill] sm:$0xff] %v19113_v12  ;;  %v5643_v36 = vsub.f32 %v19091_v52, %v19113_v12 }
 0x3a5   : > { %5175 = vmatprep.mubr.f32.mxu1 %v23686_v31 }
 0x3a6   : > { %23749 = vst [vmem:[#allocation23_spill] sm:$0xff] %v19099_v42  ;;  %v19116_v38 = vand.u32 4294901760, %v19099_v42 }
 0x3a7   : > { %4487 = vmatmul.mubr.f32.gmra.mrb[22].mxu0 %v18733_v0 }
 0x3a8   : > { %5177 = vmatmul.mubr.f32.gmra.mrb[22].mxu1 %v18733_v0  ;;  %5639 = vmatprep.mubr.f32.mxu0 %v23686_v31  ;;  %23751 = vst [vmem:[#allocation24_spill] sm:$0xff] %v19116_v38  ;;  %v5654_v51 = vsub.f32 %v19099_v42, %v19116_v38 }
 0x3a9   : > { %6917 = vmatprep.mubr.f32.mxu1 %v23686_v31 }
 0x46e   : > { %v4467_v55 = vpop.f32.mrb[16].mxu0 }
 0x46f   : > { %v5157_v41 = vpop.f32.mrb[16].mxu1  ;;  %v19060_v56 = vadd.f32 %v4467_v55, %v3774_v28  ;;  %v4469_v30 = vpop.f32.mrb[17].mxu0 }
 0x470   : > { %v19062_v6 = vadd.f32 %v5157_v41, %v3774_v28  ;;  %v5159_v40 = vpop.f32.mrb[17].mxu1  ;;  %v19068_v0 = vadd.f32 %v4469_v30, %v3774_v28 }
 0x471   : > { %v19070_v11 = vadd.f32 %v5159_v40, %v3774_v28  ;;  %v5199_v10 = vmin.f32 %v19060_v56, 20.0  ;;  %vm5183_vm11 = vcmp.gt.f32.partialorder %v19060_v56, 20.0 }
 0x472   : > { %v5201_v3 = vmin.f32 %v19062_v6, 20.0  ;;  %v5200_v45 = vmin.f32 %v19068_v0, 20.0  ;;  %v4474_v61 = vpop.f32.mrb[18].mxu0  ;;  %vm5185_vm13 = vcmp.gt.f32.partialorder %v19062_v6, 20.0  ;;  %vm5184_vm15 = vcmp.gt.f32.partialorder %v19068_v0, 20.0 }
 0x473   : > { %v5202_v9 = vmin.f32 %v19070_v11, 20.0  ;;  %v5164_v23 = vpop.f32.mrb[18].mxu1  ;;  %v5215_v59 = vmul.f32 1.442695, %v5199_v10  ;;  %v19081_v13 = vadd.f32 %v4474_v61, %v3779_v29  ;;  %v4476_v15 = vpop.f32.mrb[19].mxu0  ;;  %vm5186_vm4 = vcmp.gt.f32.partialorder %v19070_v11, 20.0 }
 0x474   : > { %v5219_v48 = vmul.f32 1.442695, %v5201_v3  ;;  %v19083_v17 = vadd.f32 %v5164_v23, %v3779_v29  ;;  %v5166_v47 = vpop.f32.mrb[19].mxu1  ;;  %v5217_v44 = vmul.f32 1.442695, %v5200_v45  ;;  %v19085_v43 = vadd.f32 %v4476_v15, %v3779_v29 }
 0x475   : > { %v5221_v21 = vmul.f32 1.442695, %v5202_v9  ;;  %v19087_v63 = vadd.f32 %v5166_v47, %v3779_v29  ;;  %16815 = vpow2.f32 %v5215_v59  ;;  %v5203_v24 = vmin.f32 %v19081_v13, 20.0 }
 0x476   : > { %16817 = vpow2.f32 %v5219_v48  ;;  %v5205_v8 = vmin.f32 %v19083_v17, 20.0  ;;  %v5204_v18 = vmin.f32 %v19085_v43, 20.0  ;;  %v4481_v57 = vpop.f32.mrb[20].mxu0  ;;  %v19141_v29 = vand.u32 4294901760, %v19119_v14 }
 0x477   : > { %v5171_v62 = vpop.f32.mrb[20].mxu1  ;;  %16819 = vpow2.f32 %v5217_v44  ;;  %v5223_v19 = vmul.f32 1.442695, %v5203_v24  ;;  %v5206_v54 = vmin.f32 %v19087_v63, 20.0  ;;  %v4483_v25 = vpop.f32.mrb[21].mxu0  ;;  %v19104_v32 = vadd.f32 %v4481_v57, %v3784_v22 }
 0x478   : > { %v5173_v49 = vpop.f32.mrb[21].mxu1  ;;  %16821 = vpow2.f32 %v5221_v21  ;;  %v5227_v7 = vmul.f32 1.442695, %v5205_v8  ;;  %v5225_v60 = vmul.f32 1.442695, %v5204_v18  ;;  %v19108_v50 = vadd.f32 %v5171_v62, %v3784_v22  ;;  %23752 = vst [vmem:[#allocation26_spill] sm:$0xff] %v19141_v29  ;;  %v19166_v24 = vpop.permute.xlu1 %3788 }
 0x479   : > { %16823 = vpow2.f32 %v5223_v19  ;;  %v5229_v4 = vmul.f32 1.442695, %v5206_v54  ;;  %v5207_v16 = vmin.f32 %v19104_v32, 20.0  ;;  %v19121_v46 = vadd.f32 %v4483_v25, %v3784_v22 }
 0x47a   : > { %v4488_v2 = vpop.f32.mrb[22].mxu0  ;;  %16825 = vpow2.f32 %v5227_v7  ;;  %v5209_v55 = vmin.f32 %v19108_v50, 20.0  ;;  %v19128_v41 = vadd.f32 %v5173_v49, %v3784_v22  ;;  %v19148_v9 = vsub.f32 %v5529_v35, %v19123_v34 }
 0x47b   : > { %v5178_v27 = vpop.f32.mrb[22].mxu1  ;;  %v4490_v58 = vpop.f32.mrb[23].mxu0  ;;  %16827 = vpow2.f32 %v5225_v60  ;;  %v5231_v20 = vmul.f32 1.442695, %v5207_v16  ;;  %v5208_v45 = vmin.f32 %v19121_v46, 20.0  ;;  %v19160_v44 = vand.u32 4294901760, %v5643_v36 }
 0x47c   : > { %v19110_v53 = vpop.f32.mrb[23].mxu1  ;;  %16829 = vpow2.f32 %v5229_v4  ;;  %v5235_v48 = vmul.f32 1.442695, %v5209_v55  ;;  %v5210_v15 = vmin.f32 %v19128_v41, 20.0  ;;  %v19162_v21 = vand.u32 4294901760, %v5654_v51 }
 0x47d   : > { %16831 = vpow2.f32 %v5231_v20  ;;  %v5233_v8 = vmul.f32 1.442695, %v5208_v45  ;;  %v19171_v57 = vand.u32 4294901760, %v19148_v9  ;;  %v19174_v62 = vand.u32 4294901760, %v19154_v37 }
 0x47e   : > { %v19181_v49 = vadd.f32 %v4488_v2, %v19166_v24  ;;  %v5237_v7 = vmul.f32 1.442695, %v5210_v15  ;;  %v19185_v60 = vadd.f32 %v5178_v27, %v19166_v24  ;;  %v19195_v5 = vadd.f32 %v4490_v58, %v19166_v24 }
 0x47f   : > { %v19125_v28 = vpop.eup %16815  ;;  %23753 = vst [vmem:[#allocation27_spill] sm:$0xff] %v19171_v57  ;;  %vm5187_vm3 = vcmp.gt.f32.partialorder %v19081_v13, 20.0  ;;  %vm5188_vm6 = vcmp.gt.f32.partialorder %v19085_v43, 20.0  ;;  %vm5190_vm8 = vcmp.gt.f32.partialorder %v19087_v63, 20.0  ;;  %vm5189_vm9 = vcmp.gt.f32.partialorder %v19083_v17, 20.0 }
 0x480   : > { %v19133_v30 = vpop.eup %16817  ;;  %v5247_v40 = vadd.f32 1.0, %v19125_v28  ;;  %v5250_v54 = vmul.f32 -0.5, %v19125_v28  ;;  %v5253_v16 = vand.u32 2147483647, %v19125_v28 }
 0x481   : > { %v19143_v10 = vpop.eup %16819  ;;  %v5265_v3 = vadd.f32 1.0, %v19133_v30  ;;  %v5268_v33 = vmul.f32 -0.5, %v19133_v30 }
 0x482   : > { %v19150_v61 = vpop.eup %16821  ;;  %16833 = vlog2.f32 %v5247_v40  ;;  %v5256_v23 = vadd.f32 1.0, %v19143_v10  ;;  %v5259_v35 = vmul.f32 -0.5, %v19143_v10  ;;  %v5251_v27 = vadd.f32 1.0, %v5250_v54 }
 0x483   : > { %v19156_v59 = vpop.eup %16823  ;;  %16835 = vlog2.f32 %v5265_v3  ;;  %v5274_v47 = vadd.f32 1.0, %v19150_v61  ;;  %v5277_v55 = vmul.f32 -0.5, %v19150_v61  ;;  %v5271_v40 = vand.u32 2147483647, %v19133_v30 }
 0x484   : > { %16837 = vlog2.f32 %v5256_v23  ;;  %v19164_v22 = vpop.eup %16825  ;;  %v5283_v25 = vadd.f32 1.0, %v19156_v59  ;;  %v5286_v36 = vmul.f32 -0.5, %v19156_v59  ;;  %v5269_v3 = vadd.f32 1.0, %v5268_v33 }
 0x485   : > { %v19176_v19 = vpop.eup %16827  ;;  %16839 = vlog2.f32 %v5274_v47  ;;  %v5301_v20 = vadd.f32 1.0, %v19164_v22  ;;  %v5262_v45 = vand.u32 2147483647, %v19143_v10  ;;  %vm19204_vm12 = vcmp.lt.f32.partialorder %v5253_v16, 0.0004427343 }
 0x486   : > { %16841 = vpow2.f32 %v5235_v48  ;;  %v19187_v4 = vpop.eup %16829  ;;  %v5292_v2 = vadd.f32 1.0, %v19176_v19  ;;  %v5260_v15 = vadd.f32 1.0, %v5259_v35  ;;  %v5304_v47 = vmul.f32 -0.5, %v19164_v22 }
 0x487   : > { %16843 = vlog2.f32 %v5283_v25  ;;  %v19200_v51 = vpop.eup %16831  ;;  %v5310_v23 = vadd.f32 1.0, %v19187_v4  ;;  %v5278_v25 = vadd.f32 1.0, %v5277_v55  ;;  %v5280_v33 = vand.u32 2147483647, %v19150_v61 }
 0x488   : > { %16845 = vpow2.f32 %v5233_v8  ;;  %v5287_v18 = vadd.f32 1.0, %v5286_v36  ;;  %v5295_v16 = vmul.f32 -0.5, %v19176_v19  ;;  %v5313_v38 = vmul.f32 -0.5, %v19187_v4 }
 0x489   : > { %16847 = vlog2.f32 %v5301_v20  ;;  %v5270_v12 = vmul.f32 %v19133_v30, %v5269_v3  ;;  %vm19215_vm14 = vcmp.lt.f32.partialorder %v5271_v40, 0.0004427343  ;;  %vm19220_vm0 = vcmp.lt.f32.partialorder %v5262_v45, 0.0004427343 }
 0x48a   : > { %16849 = vlog2.f32 %v5292_v2  ;;  %v5252_v2 = vmul.f32 %v19125_v28, %v5251_v27  ;;  %v5261_v36 = vmul.f32 %v19143_v10, %v5260_v15  ;;  %v5289_v30 = vand.u32 2147483647, %v19156_v59 }
 0x48b   : > { %16851 = vpow2.f32 %v5237_v7  ;;  %v5305_v40 = vadd.f32 1.0, %v5304_v47  ;;  %v5279_v45 = vmul.f32 %v19150_v61, %v5278_v25  ;;  %vm19233_vm5 = vcmp.lt.f32.partialorder %v5280_v33, 0.0004427343 }
 0x48c   : > { %v16834_v48 = vpop.eup %16833  ;;  %16853 = vlog2.f32 %v5310_v23  ;;  %v5296_v10 = vadd.f32 1.0, %v5295_v16  ;;  %v5298_v15 = vand.u32 2147483647, %v19176_v19  ;;  %v5314_v47 = vadd.f32 1.0, %v5313_v38 }
 0x48d   : > { %v16836_v8 = vpop.eup %16835  ;;  %v5249_v54 = vmul.f32 0.6931472, %v16834_v48  ;;  %vm19250_vm7 = vcmp.lt.f32.partialorder %v5289_v30, 0.0004427343  ;;  %v5306_v38 = vmul.f32 %v19164_v22, %v5305_v40  ;;  %v5322_v55 = vmul.f32 -0.5, %v19200_v51 }
 0x48e   : > { %v16838_v20 = vpop.eup %16837  ;;  %v5267_v35 = vmul.f32 0.6931472, %v16836_v8  ;;  %v5319_v8 = vadd.f32 1.0, %v19200_v51  ;;  %vm19276_vm10 = vcmp.lt.f32.partialorder %v5298_v15, 0.0004427343 }
 0x48f   : > { %v16840_v28 = vpop.eup %16839  ;;  %v5255_v27 = vsel %vm19204_vm12, %v5252_v2, %v5249_v54  ;;  %v5258_v23 = vmul.f32 0.6931472, %v16838_v20  ;;  %v5288_v54 = vmul.f32 %v19156_v59, %v5287_v18  ;;  %v5307_v18 = vand.u32 2147483647, %v19164_v22 }
 0x490   : > { %v19229_v3 = vpop.eup %16841  ;;  %v19245_v20 = vsel %vm5183_vm11, %v19060_v56, %v5255_v27  ;;  %v5273_v61 = vsel %vm19215_vm14, %v5270_v12, %v5267_v35  ;;  %v5276_v25 = vmul.f32 0.6931472, %v16840_v28  ;;  %v5316_v56 = vand.u32 2147483647, %v19187_v4 }
 0x491   : > { %v16844_v58 = vpop.eup %16843  ;;  %v5264_v12 = vsel %vm19220_vm0, %v5261_v36, %v5258_v23  ;;  %16855 = vlog2.f32 %v5319_v8  ;;  %v5337_v7 = vadd.f32 1.0, %v19229_v3  ;;  %v5569_v27 = vand.u32 4294901760, %v19245_v20 }
 0x492   : > { %v19240_v2 = vpop.eup %16845  ;;  %v5285_v33 = vmul.f32 0.6931472, %v16844_v58  ;;  %v19269_v22 = vsel %vm5185_vm13, %v19062_v6, %v5273_v61  ;;  %v5282_v40 = vsel %vm19233_vm5, %v5279_v45, %v5276_v25  ;;  %v5297_v23 = vmul.f32 %v19176_v19, %v5296_v10 }
 0x493   : > { %v16848_v42 = vpop.eup %16847  ;;  %v5315_v58 = vmul.f32 %v19187_v4, %v5314_v47  ;;  %v5392_v6 = vsel %vm5184_vm15, %v19068_v0, %v5264_v12  ;;  %v6847_v45 = vand.u32 4294901760, %v19269_v22  ;;  %vm19292_vm11 = vcmp.lt.f32.partialorder %v5316_v56, 0.0004427343 }
 0x494   : > { %v16850_v16 = vpop.eup %16849  ;;  %v5291_v35 = vsel %vm19250_vm7, %v5288_v54, %v5285_v33  ;;  %v5303_v61 = vmul.f32 0.6931472, %v16848_v42  ;;  %16857 = vlog2.f32 %v5337_v7  ;;  %v19299_v0 = vsub.f32 %v19245_v20, %v5569_v27 }
 0x495   : > { %v19263_v28 = vpop.eup %16851  ;;  %v5294_v30 = vmul.f32 0.6931472, %v16850_v16  ;;  %v19287_v54 = vsel %vm5187_vm3, %v19081_v13, %v5291_v35  ;;  %v5394_v13 = vsel %vm5186_vm4, %v19070_v11, %v5282_v40  ;;  %v5323_v4 = vadd.f32 1.0, %v5322_v55 }
 0x496   : > { %v16854_v36 = vpop.eup %16853  ;;  %v5567_v15 = vand.u32 4294901760, %v5392_v6  ;;  %v5573_v47 = vand.u32 4294901760, %v19287_v54  ;;  %vm19307_vm12 = vcmp.lt.f32.partialorder %v5307_v18, 0.0004427343  ;;  %v5325_v33 = vand.u32 2147483647, %v19200_v51 }
 0x497   : > { %v5312_v48 = vmul.f32 0.6931472, %v16854_v36  ;;  %v5300_v19 = vsel %vm19276_vm10, %v5297_v23, %v5294_v30  ;;  %v5309_v59 = vsel %vm19307_vm12, %v5306_v38, %v5303_v61  ;;  %v5340_v56 = vmul.f32 -0.5, %v19229_v3 }
 0x498   : > { %v5396_v11 = vsel %vm5188_vm6, %v19085_v43, %v5300_v19  ;;  %v5211_v16 = vmin.f32 %v19181_v49, 20.0  ;;  %v19320_v12 = vsub.f32 %v19269_v22, %v6847_v45  ;;  %v6845_v18 = vand.u32 4294901760, %v5394_v13 }
 0x499   : > { %v5318_v42 = vsel %vm19292_vm11, %v5315_v58, %v5312_v48  ;;  %v5328_v7 = vadd.f32 1.0, %v19240_v2  ;;  %v23330_v38 = vand.u32 4294901760, %v19299_v0  ;;  %v19328_v30 = vmul.f32 %v19200_v51, %v5323_v4 }
 0x49a   : > { %v5398_v35 = vsel %vm5190_vm8, %v19087_v63, %v5318_v42  ;;  %v5346_v43 = vadd.f32 1.0, %v19263_v28  ;;  %v19333_v55 = vadd.f32 %v19110_v53, %v19166_v24  ;;  %v19335_v36 = vsub.f32 %v5392_v6, %v5567_v15 }
 0x49b   : > { %v16856_v22 = vpop.eup %16855  ;;  %v19338_v40 = vsub.f32 %v19287_v54, %v5573_v47  ;;  %v5397_v63 = vsel %vm5189_vm9, %v19083_v17, %v5309_v59  ;;  %v5571_v23 = vand.u32 4294901760, %v5396_v11  ;;  %vm19343_vm13 = vcmp.lt.f32.partialorder %v5325_v33, 0.0004427343 }
 0x49c   : > { %v6849_v8 = vand.u32 4294901760, %v5398_v35  ;;  %v5341_v58 = vadd.f32 1.0, %v5340_v56  ;;  %16859 = vlog2.f32 %v5328_v7  ;;  %v5239_v53 = vmul.f32 1.442695, %v5211_v16 }
 0x49d   : > { %v23332_v24 = vand.u32 4294901760, %v19320_v12  ;;  %v19348_v6 = vsub.f32 %v5394_v13, %v6845_v18  ;;  %16861 = vlog2.f32 %v5346_v43  ;;  %v5213_v54 = vmin.f32 %v19185_v60, 20.0 }
 0x49e   : > { %v6851_v61 = vand.u32 4294901760, %v5397_v63  ;;  %vm5191_vm14 = vcmp.gt.f32.partialorder %v19104_v32, 20.0  ;;  %v5321_v17 = vmul.f32 0.6931472, %v16856_v22  ;;  %v5343_v48 = vand.u32 2147483647, %v19229_v3  ;;  %v16858_v19 = vpop.eup %16857 }
 0x49f   : > { %16863 = vpow2.f32 %v5239_v53  ;;  %v23327_v10 = vand.u32 4294901760, %v19338_v40  ;;  %v19354_v42 = vsub.f32 %v5396_v11, %v5571_v23  ;;  %v5243_v4 = vmul.f32 1.442695, %v5213_v54 }
 0x4a0   : > { %v5212_v25 = vmin.f32 %v19195_v5, 20.0  ;;  %v19357_v13 = vsub.f32 %v5398_v35, %v6849_v8  ;;  %v5342_v33 = vmul.f32 %v19229_v3, %v5341_v58  ;;  %v5214_v59 = vmin.f32 %v19333_v55, 20.0 }
 0x4a1   : > { %v19361_v56 = vpack.c.bf16 %v5571_v23, %v5567_v15  ;;  %vm5193_vm15 = vcmp.gt.f32.partialorder %v19108_v50, 20.0  ;;  %v5331_v16 = vmul.f32 -0.5, %v19240_v2  ;;  %16865 = vpow2.f32 %v5243_v4 }
 0x4a2   : > { %v5241_v7 = vmul.f32 1.442695, %v5212_v25  ;;  %v19365_v43 = vpack.c.bf16 %v6849_v8, %v6845_v18  ;;  %v5339_v11 = vmul.f32 0.6931472, %v16858_v19  ;;  %v5245_v22 = vmul.f32 1.442695, %v5214_v59 }
 0x4a3   : > { %14945 = vmatprep.subr.bf16.mxu0 %v19361_v56  ;;  %v19370_v35 = vpack.c.bf16 %v5573_v47, %v5569_v27  ;;  %v19372_v3 = vpack.c.bf16 %v6851_v61, %v6847_v45  ;;  %v23334_v15 = vand.u32 4294901760, %v19335_v36  ;;  %v23333_v23 = vand.u32 4294901760, %v19354_v42 }
 0x4a4   : > { %16867 = vpow2.f32 %v5241_v7  ;;  %14993 = vmatprep.subr.bf16.mxu1 %v19365_v43  ;;  %v23329_v18 = vand.u32 4294901760, %v19348_v6  ;;  %v5327_v8 = vsel %vm19343_vm13, %v19328_v30, %v5321_v17  ;;  %v5349_v58 = vmul.f32 -0.5, %v19263_v28 }
 0x4a5   : > { %16869 = vpow2.f32 %v5245_v22  ;;  %14947 = vmatpush1.bf16.msra.mxu0 %v19370_v35  ;;  %14995 = vmatpush1.bf16.msra.mxu1 %v19372_v3  ;;  %v23328_v20 = vand.u32 4294901760, %v19357_v13  ;;  %v5819_v27 = vsub.f32 %v19335_v36, %v23334_v15  ;;  %v5831_v45 = vsub.f32 %v19354_v42, %v23333_v23 }
 0x4a6   : > { %v7097_v47 = vsub.f32 %v19348_v6, %v23329_v18  ;;  %v5837_v30 = vsub.f32 %v19338_v40, %v23327_v10  ;;  %v16860_v51 = vpop.eup %16859  ;;  %v19397_v53 = vsub.f32 %v5397_v63, %v6851_v61  ;;  %vm19399_vm0 = vcmp.lt.f32.partialorder %v5343_v48, 0.0004427343 }
 0x4a7   : > { %v5332_v17 = vadd.f32 1.0, %v5331_v16  ;;  %v7109_v19 = vsub.f32 %v19357_v13, %v23328_v20  ;;  %v16862_v4 = vpop.eup %16861  ;;  %v19409_v25 = vsel %vm5191_vm14, %v19104_v32, %v5327_v8  ;;  %v5345_v59 = vsel %vm19399_vm0, %v5342_v33, %v5339_v11 }
 0x4a8   : > { %v5832_v63 = vand.u32 4294901760, %v5831_v45  ;;  %v5825_v61 = vsub.f32 %v19299_v0, %v23330_v38  ;;  %v5334_v16 = vand.u32 2147483647, %v19240_v2  ;;  %v5350_v7 = vadd.f32 1.0, %v5349_v58 }
 0x4a9   : > { %v19416_v48 = vpop.eup %16863  ;;  %v5820_v22 = vand.u32 4294901760, %v5819_v27  ;;  %v7110_v10 = vand.u32 4294901760, %v7109_v19  ;;  %v5330_v20 = vmul.f32 0.6931472, %v16860_v51  ;;  %v7098_v32 = vand.u32 4294901760, %v7097_v47 }
 0x4aa   : > { %v5355_v18 = vadd.f32 1.0, %v19416_v48  ;;  %v5838_v8 = vand.u32 4294901760, %v5837_v30  ;;  %v19423_v33 = vsel %vm5193_vm15, %v19108_v50, %v5345_v59  ;;  %v5333_v11 = vmul.f32 %v19240_v2, %v5332_v17 }
 0x4ab   : > { %v5352_v45 = vand.u32 2147483647, %v19263_v28  ;;  %v19427_v54 = vpack.c.bf16 %v5832_v63, %v5820_v22  ;;  %v19429_v38 = vpop.eup %16865  ;;  %v5348_v58 = vmul.f32 0.6931472, %v16862_v4  ;;  %v19431_v27 = vpack.c.bf16 %v7110_v10, %v7098_v32 }
 0x4ac   : > { %16871 = vlog2.f32 %v5355_v18  ;;  %v5826_v51 = vand.u32 4294901760, %v5825_v61  ;;  %v23331_v47 = vand.u32 4294901760, %v19397_v53  ;;  %v5577_v30 = vand.u32 4294901760, %v19409_v25 }
 0x4ad   : > { %vm19435_vm3 = vcmp.lt.f32.partialorder %v5334_v16, 0.0004427343  ;;  %v5373_v2 = vadd.f32 1.0, %v19429_v38  ;;  %v5351_v18 = vmul.f32 %v19263_v28, %v5350_v7  ;;  %v5358_v10 = vmul.f32 -0.5, %v19416_v48 }
 0x4ae   : > { %v19440_v17 = vpop.eup %16867  ;;  %v5336_v19 = vsel %vm19435_vm3, %v5333_v11, %v5330_v20  ;;  %v19446_v4 = vpack.c.bf16 %v5838_v8, %v5826_v51  ;;  %v23335_v63 = vand.u32 4294901760, %v19423_v33  ;;  %vm19451_vm4 = vcmp.lt.f32.partialorder %v5352_v45, 0.0004427343 }
 0x4af   : > { %v19448_v59 = vpop.eup %16869  ;;  %16873 = vlog2.f32 %v5373_v2  ;;  %v5364_v16 = vadd.f32 1.0, %v19440_v17  ;;  %vm5192_vm5 = vcmp.gt.f32.partialorder %v19121_v46, 20.0  ;;  %v5354_v28 = vsel %vm19451_vm4, %v5351_v18, %v5348_v58 }
 0x4b0   : > { %v5382_v20 = vadd.f32 1.0, %v19448_v59  ;;  %v19462_v7 = vsub.f32 %v19154_v37, %v19174_v62  ;;  %v19465_v22 = vsel %vm5192_vm5, %v19121_v46, %v5336_v19  ;;  %vm5194_vm6 = vcmp.gt.f32.partialorder %v19128_v41, 20.0 }
 0x4b1   : > { %16875 = vlog2.f32 %v5364_v16  ;;  %v7103_v32 = vsub.f32 %v19320_v12, %v23332_v24  ;;  %v19474_v8 = vsub.f32 %v19409_v25, %v5577_v30  ;;  %v5359_v11 = vadd.f32 1.0, %v5358_v10 }
 0x4b2   : > { %v5376_v45 = vmul.f32 -0.5, %v19429_v38  ;;  %16877 = vlog2.f32 %v5382_v20  ;;  %v19480_v46 = vsub.f32 %v19423_v33, %v23335_v63  ;;  %v19483_v37 = vsel %vm5194_vm6, %v19128_v41, %v5354_v28 }
 0x4b3   : > { %vm5195_vm7 = vcmp.gt.f32.partialorder %v19181_v49, 20.0  ;;  %v7115_v58 = vsub.f32 %v19397_v53, %v23331_v47  ;;  %v23336_v51 = vand.u32 4294901760, %v19465_v22  ;;  %v5361_v50 = vand.u32 2147483647, %v19416_v48 }
 0x4b4   : > { %vm5197_vm8 = vcmp.gt.f32.partialorder %v19185_v60, 20.0  ;;  %v5367_v2 = vmul.f32 -0.5, %v19440_v17  ;;  %v5385_v19 = vmul.f32 -0.5, %v19448_v59  ;;  %v7104_v18 = vand.u32 4294901760, %v7103_v32 }
 0x4b5   : > { %v7116_v10 = vand.u32 4294901760, %v7115_v58  ;;  %v6853_v20 = vand.u32 4294901760, %v19483_v37  ;;  %v5360_v47 = vmul.f32 %v19416_v48, %v5359_v11  ;;  %v5377_v24 = vadd.f32 1.0, %v5376_v45 }
 0x4b6   : > { %v16872_v16 = vpop.eup %16871  ;;  %v5379_v15 = vand.u32 2147483647, %v19429_v38  ;;  %v5370_v32 = vand.u32 2147483647, %v19440_v17  ;;  %vm5362_vm9 = vcmp.lt.f32.partialorder %v5361_v50, 0.0004427343  ;;  %v19510_v48 = vsub.f32 %v19465_v22, %v23336_v51 }
 0x4b7   : > { %v5357_v23 = vmul.f32 0.6931472, %v16872_v16  ;;  %v19503_v58 = vpack.c.bf16 %v7116_v10, %v7104_v18  ;;  %vm5196_vm10 = vcmp.gt.f32.partialorder %v19195_v5, 20.0  ;;  %v5368_v41 = vadd.f32 1.0, %v5367_v2 }
 0x4b8   : > { %v5386_v61 = vadd.f32 1.0, %v5385_v19  ;;  %vm5198_vm11 = vcmp.gt.f32.partialorder %v19333_v55, 20.0  ;;  %v5378_v18 = vmul.f32 %v19429_v38, %v5377_v24  ;;  %v5388_v2 = vand.u32 2147483647, %v19448_v59 }
 0x4b9   : > { %v16874_v63 = vpop.eup %16873  ;;  %v5363_v11 = vsel %vm5362_vm9, %v5360_v47, %v5357_v23  ;;  %v19519_v10 = vsub.f32 %v19483_v37, %v6853_v20  ;;  %vm5380_vm12 = vcmp.lt.f32.partialorder %v5379_v15, 0.0004427343  ;;  %vm19521_vm13 = vcmp.lt.f32.partialorder %v5370_v32, 0.0004427343 }
 0x4ba   : > { %v5403_v45 = vsel %vm5195_vm7, %v19181_v49, %v5363_v11  ;;  %v5375_v50 = vmul.f32 0.6931472, %v16874_v63  ;;  %v5369_v49 = vmul.f32 %v19440_v17, %v5368_v41  ;;  %v5387_v63 = vmul.f32 %v19448_v59, %v5386_v61  ;;  %v5412_v59 = vld [vmem:[%s23258_s7 + $0x28] sm:$0xff] }
 0x4bb   : > { %v16876_v19 = vpop.eup %16875  ;;  %v5581_v16 = vand.u32 4294901760, %v5403_v45  ;;  %vm5389_vm14 = vcmp.lt.f32.partialorder %v5388_v2, 0.0004427343  ;;  %v23338_v17 = vand.u32 4294901760, %v19510_v48 }
 0x4bc   : > { %v16878_v23 = vpop.eup %16877  ;;  %v5381_v47 = vsel %vm5380_vm12, %v5378_v18, %v5375_v50  ;;  %v5366_v51 = vmul.f32 0.6931472, %v16876_v19  ;;  %v23781_v50 = vand.u32 4294901760, %v19423_v33  ;;  %v7120_v19 = vand.u32 4294901760, %v19519_v10 }
 0x4bd   : > { %v19527_v38 = vsub.f32 %v5403_v45, %v5581_v16  ;;  %v5405_v24 = vsel %vm5197_vm8, %v19185_v60, %v5381_v47  ;;  %v5384_v37 = vmul.f32 0.6931472, %v16878_v23  ;;  %v19534_v15 = vpack.c.bf16 %v5581_v16, %v5577_v30 }
 0x4be   : > { %v6859_v32 = vand.u32 4294901760, %v5405_v24  ;;  %v5372_v11 = vsel %vm19521_vm13, %v5369_v49, %v5366_v51  ;;  %v23780_v30 = vand.u32 4294901760, %v19474_v8  ;;  %v5535_v16 = vsel %vm2146_vm2, %v5412_v59, 0 }
 0x4bf   : > { %v23337_v41 = vand.u32 4294901760, %v19527_v38  ;;  %v5404_v60 = vsel %vm5196_vm10, %v19195_v5, %v5372_v11  ;;  %v5390_v25 = vsel %vm5389_vm14, %v5387_v63, %v5384_v37  ;;  %v23782_v49 = vand.u32 4294901760, %v19465_v22 }
 0x4c0   : > { %v5849_v61 = vsub.f32 %v19474_v8, %v23780_v30  ;;  %v19549_v28 = vsub.f32 %v5405_v24, %v6859_v32  ;;  %v5579_v51 = vand.u32 4294901760, %v5404_v60  ;;  %v5406_v45 = vsel %vm5198_vm11, %v19333_v55, %v5390_v25  ;;  %v5413_v30 = vld [vmem:[%s23258_s7 + $0x30] sm:$0xff] }
 0x4c1   : > { %v19556_v18 = vpack.c.bf16 %v6859_v32, %v23781_v50  ;;  %v6857_v2 = vand.u32 4294901760, %v5406_v45  ;;  %v5861_v5 = vsub.f32 %v19527_v38, %v23337_v41  ;;  %v23783_v33 = vand.u32 4294901760, %v19480_v46 }
 0x4c2   : > { %v7138_v23 = vand.u32 4294901760, %v19549_v28  ;;  %v19564_v47 = vsub.f32 %v5404_v60, %v5579_v51  ;;  %v19568_v55 = vpack.c.bf16 %v5579_v51, %v23782_v49  ;;  %v5850_v32 = vand.u32 4294901760, %v5849_v61 }
 0x4c3   : > { %v7127_v63 = vsub.f32 %v19480_v46, %v23783_v33  ;;  %v19573_v24 = vsub.f32 %v5406_v45, %v6857_v2  ;;  %v19575_v37 = vpack.c.bf16 %v6857_v2, %v6853_v20  ;;  %v5862_v11 = vand.u32 4294901760, %v5861_v5 }
 0x4c4   : > { %14949 = vmatprep.subr.bf16.mxu0 %v19568_v55  ;;  %v5843_v59 = vsub.f32 %v19510_v48, %v23338_v17  ;;  %v5854_v22 = vand.u32 4294901760, %v19564_v47  ;;  %v7139_v60 = vsub.f32 %v19549_v28, %v7138_v23  ;;  %v19583_v25 = vand.u32 4294901760, %v5535_v16 }
 0x4c5   : > { %14997 = vmatprep.subr.bf16.mxu1 %v19575_v37  ;;  %14951 = vmatpush1.bf16.msra.mxu0 %v19534_v15  ;;  %v7121_v20 = vsub.f32 %v19519_v10, %v7120_v19  ;;  %v7132_v61 = vand.u32 4294901760, %v19573_v24  ;;  %v14958_v51 = vpack.c.bf16 %v5862_v11, %v5850_v32  ;;  %v7128_v2 = vand.u32 4294901760, %v7127_v63 }
 0x4c6   : > { %14999 = vmatpush1.bf16.msra.mxu1 %v19556_v18  ;;  %14953 = vmatprep.subr.bf16.mxu0 %v19427_v54  ;;  %v5855_v50 = vsub.f32 %v19564_v47, %v5854_v22  ;;  %v7140_v5 = vand.u32 4294901760, %v7139_v60  ;;  %v5538_v32 = vsel %vm2146_vm2, %v5413_v30, 0  ;;  %v5844_v54 = vand.u32 4294901760, %v5843_v59 }
 0x4c7   : > { %15001 = vmatprep.subr.bf16.mxu1 %v19431_v27  ;;  %v7133_v33 = vsub.f32 %v19573_v24, %v7132_v61  ;;  %v7122_v27 = vand.u32 4294901760, %v7121_v20  ;;  %v23784_v41 = vand.u32 4294901760, %v19335_v36  ;;  %v23785_v45 = vand.u32 4294901760, %v19354_v42 }
 0x4c8   : > { %5645 = vmatmul.mubr.f32.vlgmr.msra.gmra.mrb[24].mxu0 %v19160_v44  ;;  %v5856_v63 = vand.u32 4294901760, %v5855_v50  ;;  %v15006_v60 = vpack.c.bf16 %v7140_v5, %v7128_v2  ;;  %v23788_v50 = vand.u32 4294901760, %v19299_v0  ;;  %v23789_v2 = vand.u32 4294901760, %v19338_v40 }
 0x4c9   : > { %6923 = vmatmul.mubr.f32.vlgmr.msra.gmra.mrb[24].mxu1 %v19160_v44  ;;  %14955 = vmatpush1.bf16.msra.mxu0 %v19446_v4  ;;  %v7134_v30 = vand.u32 4294901760, %v7133_v33  ;;  %v19617_v17 = vpack.c.bf16 %v23785_v45, %v23784_v41  ;;  %v23786_v44 = vand.u32 4294901760, %v19348_v6  ;;  %v23787_v4 = vand.u32 4294901760, %v19357_v13  ;;  %v5414_v45 = vld [vmem:[%s23258_s7 + $0x38] sm:$0xff] }
 0x4ca   : > { %15003 = vmatpush1.bf16.msra.mxu1 %v19503_v58  ;;  %5650 = vmatprep.mubr.f32.mxu0 %v23686_v31  ;;  %v14956_v59 = vpack.c.bf16 %v5856_v63, %v5844_v54  ;;  %v19631_v5 = vpack.c.bf16 %v23789_v2, %v23788_v50  ;;  %v19635_v58 = vsub.f32 %v5535_v16, %v19583_v25  ;;  %v23790_v33 = vand.u32 4294901760, %v19320_v12 }
 0x4cb   : > { %v19625_v20 = vpack.c.bf16 %v23787_v4, %v23786_v44  ;;  %6928 = vmatprep.mubr.f32.mxu1 %v23686_v31  ;;  %v15004_v41 = vpack.c.bf16 %v7134_v30, %v7122_v27  ;;  %v23791_v54 = vand.u32 4294901760, %v19397_v53  ;;  %v23792_v44 = vand.u32 4294901760, %v19510_v48 }
 0x4cc   : > { %5656 = vmatmul.mubr.f32.gmra.mrb[26].mxu0 %v19162_v21  ;;  %14957 = vmatprep.subr.bf16.mxu0 %v14956_v59  ;;  %v19651_v27 = vand.u32 4294901760, %v5538_v32  ;;  %v19653_v16 = vpack.c.bf16 %v7132_v61, %v7120_v19  ;;  %v23795_v30 = vand.u32 4294901760, %v19474_v8  ;;  %v23796_v50 = vand.u32 4294901760, %v19527_v38 }
 0x4cd   : > { %v19644_v63 = vpack.c.bf16 %v23791_v54, %v23790_v33  ;;  %v19648_v4 = vpack.c.bf16 %v5854_v22, %v23792_v44  ;;  %v23798_v33 = vand.u32 4294901760, %v19480_v46  ;;  %6934 = vmatmul.mubr.f32.gmra.mrb[26].mxu1 %v19162_v21  ;;  %15005 = vmatprep.subr.bf16.mxu1 %v15004_v41  ;;  %v23800_v22 = vsub.f32 %v19119_v14, %v19141_v29  ;;  %v5415_v41 = vld [vmem:[%s23258_s7 + $0x40] sm:$0xff]  ;;  %v5421_v29 = vld [vmem:[%s23258_s7 + $0x70] sm:$0xff] }
 0x4ce   : > { %23794 = vst [vmem:[#allocation29_spill] sm:$0xff] %v19653_v16  ;;  %v19659_v2 = vpack.c.bf16 %v23796_v50, %v23795_v30  ;;  %v5676_v19 = vsub.f32 %v19148_v9, %v19171_v57  ;;  %v19672_v61 = vand.u32 4294901760, %v19462_v7  ;;  %14959 = vmatpush1.bf16.msra.mxu0 %v14958_v51  ;;  %15007 = vmatpush1.bf16.msra.mxu1 %v15006_v60  ;;  %v5541_v44 = vsel %vm2146_vm2, %v5414_v45, 0  ;;  %v5416_v45 = vld [vmem:[%s23258_s7 + $0x48] sm:$0xff] }
 0x4cf   : > { %23793 = vst [vmem:[#allocation28_spill] sm:$0xff] %v19648_v4  ;;  %v19663_v54 = vpack.c.bf16 %v7138_v23, %v23798_v33  ;;  %v5666_v59 = vand.u32 4294901760, %v23800_v22  ;;  %v23802_v23 = vpack.c.bf16 %v19354_v42, %v19335_v36  ;;  %v23803_v21 = vpack.c.bf16 %v19357_v13, %v19348_v6  ;;  %5661 = vmatprep.mubr.f32.mxu0 %v23686_v31 }
 0x4d0   : > { %23797 = vst [vmem:[#allocation30_spill] sm:$0xff] %v19659_v2  ;;  %23801 = vst [vmem:[#allocation32_spill] sm:$0xff] %v19672_v61  ;;  %6939 = vmatprep.mubr.f32.mxu1 %v23686_v31  ;;  %v19687_v51 = vand.u32 4294901760, %v19635_v58  ;;  %v19690_v60 = vsub.f32 %v5538_v32, %v19651_v27  ;;  %v5677_v36 = vand.u32 4294901760, %v5676_v19  ;;  %v5687_v6 = vsub.f32 %v19462_v7, %v19672_v61  ;;  %v5417_v19 = vld [vmem:[%s23258_s7 + $0x50] sm:$0xff] }
 0x4d1   : > { %23799 = vst [vmem:[#allocation31_spill] sm:$0xff] %v19663_v54  ;;  %14961 = vmatprep.subr.bf16.mxu0 %v23802_v23  ;;  %15009 = vmatprep.subr.bf16.mxu1 %v23803_v21  ;;  %v19694_v42 = vand.u32 4294901760, %v5541_v44  ;;  %v5544_v13 = vsel %vm2146_vm2, %v5415_v41, 0 }
 0x4d2   : > { %23804 = vst [vmem:[#allocation33_spill] sm:$0xff] %v19687_v51  ;;  %5667 = vmatmul.mubr.f32.gmra.mrb[28].mxu0 %v5666_v59  ;;  %6945 = vmatmul.mubr.f32.gmra.mrb[28].mxu1 %v5666_v59  ;;  %v5698_v32 = vsub.f32 %v19635_v58, %v19687_v51  ;;  %v19705_v30 = vand.u32 4294901760, %v19690_v60  ;;  %v5688_v50 = vand.u32 4294901760, %v5687_v6  ;;  %v19710_v22 = vand.u32 4294901760, %v5544_v13 }
 0x4d3   : > { %5672 = vmatprep.mubr.f32.mxu0 %v23686_v31  ;;  %6950 = vmatprep.mubr.f32.mxu1 %v23686_v31  ;;  %v19708_v33 = vsub.f32 %v5541_v44, %v19694_v42  ;;  %v5547_v59 = vsel %vm2146_vm2, %v5416_v45, 0  ;;  %v5550_v6 = vsel %vm2146_vm2, %v5417_v19, 0  ;;  %v5418_v45 = vld [vmem:[%s23258_s7 + $0x58] sm:$0xff] }
 0x4d4   : > { %23805 = vst [vmem:[#allocation34_spill] sm:$0xff] %v19705_v30  ;;  %v5699_v23 = vand.u32 4294901760, %v5698_v32  ;;  %v5709_v21 = vsub.f32 %v19690_v60, %v19705_v30  ;;  %v19724_v41 = vsub.f32 %v5544_v13, %v19710_v22  ;;  %v19734_v32 = vand.u32 4294901760, %v5550_v6 }
 0x4d5   : > { %v19721_v44 = vand.u32 4294901760, %v19708_v33  ;;  %v5553_v49 = vsel %vm2146_vm2, %v5418_v45, 0 }
 0x4d6   : > { %5678 = vmatmul.mubr.f32.gmra.mrb[30].mxu0 %v5677_v36  ;;  %6956 = vmatmul.mubr.f32.gmra.mrb[30].mxu1 %v5677_v36  ;;  %v19726_v36 = vand.u32 4294901760, %v5547_v59  ;;  %v19739_v11 = vand.u32 4294901760, %v19724_v41  ;;  %v19758_v51 = vand.u32 4294901760, %v5553_v49 }
 0x4d7   : > { %5683 = vmatprep.mubr.f32.mxu0 %v23686_v31  ;;  %6961 = vmatprep.mubr.f32.mxu1 %v23686_v31  ;;  %23806 = vst [vmem:[#allocation35_spill] sm:$0xff] %v19721_v44  ;;  %v5720_v13 = vsub.f32 %v19708_v33, %v19721_v44 }
 0x4d8   : > { %23807 = vst [vmem:[#allocation36_spill] sm:$0xff] %v19739_v11  ;;  %v19742_v19 = vsub.f32 %v5547_v59, %v19726_v36  ;;  %v5731_v59 = vsub.f32 %v19724_v41, %v19739_v11  ;;  %v19772_v61 = vsub.f32 %v5553_v49, %v19758_v51 }
 0x4d9   : > { %v5721_v44 = vand.u32 4294901760, %v5720_v13 }
 0x4da   : > { %5689 = vmatmul.mubr.f32.gmra.mrb[32].mxu0 %v5688_v50  ;;  %6967 = vmatmul.mubr.f32.gmra.mrb[32].mxu1 %v5688_v50  ;;  %v5710_v50 = vand.u32 4294901760, %v5709_v21  ;;  %v19751_v21 = vsub.f32 %v5550_v6, %v19734_v32  ;;  %v19756_v30 = vand.u32 4294901760, %v19742_v19  ;;  %v5420_v6 = vld [vmem:[%s23258_s7 + $0x68] sm:$0xff]  ;;  %v5732_v13 = vand.u32 4294901760, %v5731_v59 }
 0x4db   : > { %5694 = vmatprep.mubr.f32.mxu0 %v23686_v31  ;;  %6972 = vmatprep.mubr.f32.mxu1 %v23686_v31  ;;  %v19785_v49 = vand.u32 4294901760, %v19772_v61 }
 0x4dc   : > { %23808 = vst [vmem:[#allocation37_spill] sm:$0xff] %v19756_v30  ;;  %v5742_v11 = vsub.f32 %v19742_v19, %v19756_v30 }
 0x4dd   : > { %23810 = vst [vmem:[#allocation39_spill] sm:$0xff] %v19785_v49 }
 0x4de   : > { %5700 = vmatmul.mubr.f32.gmra.mrb[34].mxu0 %v5699_v23  ;;  %6978 = vmatmul.mubr.f32.gmra.mrb[34].mxu1 %v5699_v23  ;;  %v5419_v23 = vld [vmem:[%s23258_s7 + $0x60] sm:$0xff]  ;;  %v5743_v59 = vand.u32 4294901760, %v5742_v11 }
 0x4df   : > { %5705 = vmatprep.mubr.f32.mxu0 %v23686_v31  ;;  %6983 = vmatprep.mubr.f32.mxu1 %v23686_v31  ;;  %v5556_v45 = vsel %vm2146_vm2, %v5419_v23, 0  ;;  %v5559_v23 = vsel %vm2146_vm2, %v5420_v6, 0  ;;  %v5422_v6 = vld [vmem:[%s23258_s7 + $0x78] sm:$0xff] }
 0x4e0   : > { %v19774_v57 = vand.u32 4294901760, %v5556_v45  ;;  %v19790_v54 = vand.u32 4294901760, %v5559_v23  ;;  %v5565_v11 = vsel %vm2146_vm2, %v5422_v6, 0 }
 0x4e2   : > { %5711 = vmatmul.mubr.f32.gmra.mrb[36].mxu0 %v5710_v50  ;;  %6989 = vmatmul.mubr.f32.gmra.mrb[36].mxu1 %v5710_v50  ;;  %v19767_v50 = vand.u32 4294901760, %v19751_v21  ;;  %v19788_v30 = vsub.f32 %v5556_v45, %v19774_v57  ;;  %v5764_v45 = vsub.f32 %v19772_v61, %v19785_v49  ;;  %v19805_v16 = vsub.f32 %v5559_v23, %v19790_v54 }
 0x4e3   : > { %5716 = vmatprep.mubr.f32.mxu0 %v23686_v31  ;;  %6994 = vmatprep.mubr.f32.mxu1 %v23686_v31 }
 0x4e4   : > { %23809 = vst [vmem:[#allocation38_spill] sm:$0xff] %v19767_v50  ;;  %v19802_v2 = vand.u32 4294901760, %v19788_v30  ;;  %v19816_v6 = vand.u32 4294901760, %v19805_v16 }
 0x4e6   : > { %5722 = vmatmul.mubr.f32.gmra.mrb[38].mxu0 %v5721_v44  ;;  %7000 = vmatmul.mubr.f32.gmra.mrb[38].mxu1 %v5721_v44  ;;  %v5753_v44 = vsub.f32 %v19751_v21, %v19767_v50  ;;  %v5562_v50 = vsel %vm2146_vm2, %v5421_v29, 0  ;;  %23811 = vst [vmem:[#allocation40_spill] sm:$0xff] %v19802_v2  ;;  %v19811_v29 = vand.u32 4294901760, %v5565_v11  ;;  %23812 = vst [vmem:[#allocation41_spill] sm:$0xff] %v19816_v6 }
 0x4e7   : > { %5727 = vmatprep.mubr.f32.mxu0 %v23686_v31  ;;  %7005 = vmatprep.mubr.f32.mxu1 %v23686_v31  ;;  %v19807_v4 = vand.u32 4294901760, %v5562_v50 }
 0x4e9   : > { %v19819_v23 = vsub.f32 %v5562_v50, %v19807_v4 }
 0x4ea   : > { %5733 = vmatmul.mubr.f32.gmra.mrb[40].mxu0 %v5732_v13  ;;  %7011 = vmatmul.mubr.f32.gmra.mrb[40].mxu1 %v5732_v13  ;;  %v5754_v13 = vand.u32 4294901760, %v5753_v44  ;;  %v5765_v44 = vand.u32 4294901760, %v5764_v45 }
 0x4eb   : > { %5738 = vmatprep.mubr.f32.mxu0 %v23686_v31  ;;  %7016 = vmatprep.mubr.f32.mxu1 %v23686_v31  ;;  %v19826_v45 = vand.u32 4294901760, %v19819_v23 }
 0x4ee   : > { %5744 = vmatmul.mubr.f32.gmra.mrb[42].mxu0 %v5743_v59  ;;  %7022 = vmatmul.mubr.f32.gmra.mrb[42].mxu1 %v5743_v59  ;;  %v5775_v59 = vsub.f32 %v19788_v30, %v19802_v2  ;;  %v19829_v2 = vsub.f32 %v5565_v11, %v19811_v29 }
 0x4ef   : > { %5749 = vmatprep.mubr.f32.mxu0 %v23686_v31  ;;  %7027 = vmatprep.mubr.f32.mxu1 %v23686_v31 }
 0x4f0   : > { %v5776_v49 = vand.u32 4294901760, %v5775_v59  ;;  %v19836_v59 = vand.u32 4294901760, %v19829_v2 }
 0x4f2   : > { %5755 = vmatmul.mubr.f32.gmra.mrb[44].mxu0 %v5754_v13  ;;  %7033 = vmatmul.mubr.f32.gmra.mrb[44].mxu1 %v5754_v13  ;;  %v5786_v13 = vsub.f32 %v19805_v16, %v19816_v6  ;;  %v5808_v6 = vsub.f32 %v19829_v2, %v19836_v59 }
 0x4f3   : > { %5760 = vmatprep.mubr.f32.mxu0 %v23686_v31  ;;  %7038 = vmatprep.mubr.f32.mxu1 %v23686_v31 }
 0x4f4   : > { %v5787_v50 = vand.u32 4294901760, %v5786_v13  ;;  %v23813_v13 = vpack.c.bf16 %v19338_v40, %v19299_v0  ;;  %v23817_v0 = vpack.c.bf16 %v19527_v38, %v19474_v8  ;;  %v23819_v40 = vld [vmem:[#allocation23_spill] sm:$0xff] }
 0x4f5   : > { %v23825_v8 = vld [vmem:[#allocation31_spill] sm:$0xff] }
 0x4f6   : > { %5766 = vmatmul.mubr.f32.gmra.mrb[46].mxu0 %v5765_v44  ;;  %7044 = vmatmul.mubr.f32.gmra.mrb[46].mxu1 %v5765_v44  ;;  %v5797_v44 = vsub.f32 %v19819_v23, %v19826_v45  ;;  %v23831_v38 = vld [vmem:[#allocation35_spill] sm:$0xff] }
 0x4f7   : > { %5771 = vmatprep.mubr.f32.mxu0 %v23686_v31  ;;  %7049 = vmatprep.mubr.f32.mxu1 %v23686_v31 }
 0x4f8   : > { %v5798_v11 = vand.u32 4294901760, %v5797_v44  ;;  %v23816_v44 = vpack.c.bf16 %v19573_v24, %v19519_v10  ;;  %v23830_v10 = vld [vmem:[#allocation34_spill] sm:$0xff]  ;;  %v23835_v24 = vld [vmem:[#allocation39_spill] sm:$0xff] }
 0x4fa   : > { %5777 = vmatmul.mubr.f32.gmra.mrb[48].mxu0 %v5776_v49  ;;  %7055 = vmatmul.mubr.f32.gmra.mrb[48].mxu1 %v5776_v49  ;;  %v5809_v49 = vand.u32 4294901760, %v5808_v6  ;;  %v23814_v6 = vpack.c.bf16 %v19397_v53, %v19320_v12  ;;  %v23818_v12 = vpack.c.bf16 %v19549_v28, %v19480_v46  ;;  %v23823_v53 = vld [vmem:[#allocation24_spill] sm:$0xff]  ;;  %v23826_v46 = vld [vmem:[#allocation26_spill] sm:$0xff]  ;;  %v23833_v28 = vld [vmem:[#allocation37_spill] sm:$0xff] }
 0x4fb   : > { %5782 = vmatprep.mubr.f32.mxu0 %v23686_v31  ;;  %7060 = vmatprep.mubr.f32.mxu1 %v23686_v31 }
 0x4fe   : > { %5788 = vmatmul.mubr.f32.gmra.mrb[50].mxu0 %v5787_v50  ;;  %7066 = vmatmul.mubr.f32.gmra.mrb[50].mxu1 %v5787_v50  ;;  %v23815_v50 = vpack.c.bf16 %v19564_v47, %v19510_v48  ;;  %v23827_v48 = vld [vmem:[#allocation27_spill] sm:$0xff]  ;;  %v23834_v47 = vld [vmem:[#allocation38_spill] sm:$0xff] }
 0x4ff   : > { %5793 = vmatprep.mubr.f32.mxu0 %v23686_v31  ;;  %7071 = vmatprep.mubr.f32.mxu1 %v23686_v31 }
 0x502   : > { %5799 = vmatmul.mubr.f32.gmra.mrb[52].mxu0 %v5798_v11  ;;  %7077 = vmatmul.mubr.f32.gmra.mrb[52].mxu1 %v5798_v11 }
 0x503   : > { %5804 = vmatprep.mubr.f32.mxu0 %v23686_v31  ;;  %7082 = vmatprep.mubr.f32.mxu1 %v23686_v31 }
 0x506   : > { %5810 = vmatmul.mubr.f32.gmra.mrb[54].mxu0 %v5809_v49  ;;  %7088 = vmatmul.mubr.f32.gmra.mrb[54].mxu1 %v5809_v49 }
 0x507   : > { %5920 = vmatprep.mubr.f32.mxu0 %v23686_v31  ;;  %7198 = vmatprep.mubr.f32.mxu1 %v23686_v31 }
 0x50a   : > { %5922 = vmatmul.mubr.f32.vlgmr.msra.gmra.mrb[24].mxu0 %v19074_v1  ;;  %7200 = vmatmul.mubr.f32.vlgmr.msra.gmra.mrb[24].mxu1 %v19074_v1 }
 0x50b   : > { %14963 = vmatpush1.bf16.msra.mxu0 %v23813_v13  ;;  %15011 = vmatpush1.bf16.msra.mxu1 %v23814_v6  ;;  %v23848_v13 = vld [vmem:[#allocation17_spill] sm:$0xff]  ;;  %v23849_v6 = vld [vmem:[#allocation18_spill] sm:$0xff] }
 0x50c   : > { %14965 = vmatprep.subr.bf16.mxu0 %v23815_v50  ;;  %15013 = vmatprep.subr.bf16.mxu1 %v23816_v44  ;;  %v23850_v50 = vld [vmem:[#allocation19_spill] sm:$0xff]  ;;  %v23851_v44 = vld [vmem:[#allocation20_spill] sm:$0xff] }
 0x50d   : > { %5927 = vmatprep.mubr.f32.mxu0 %v23686_v31  ;;  %7205 = vmatprep.mubr.f32.mxu1 %v23686_v31 }
 0x50e   : > { %5929 = vmatmul.mubr.f32.gmra.mrb[26].mxu0 %v19078_v39  ;;  %7207 = vmatmul.mubr.f32.gmra.mrb[26].mxu1 %v19078_v39 }
 0x50f   : > { %14967 = vmatpush1.bf16.msra.mxu0 %v23817_v0  ;;  %15015 = vmatpush1.bf16.msra.mxu1 %v23818_v12  ;;  %v23852_v0 = vld [vmem:[#allocation21_spill] sm:$0xff]  ;;  %v23853_v12 = vld [vmem:[#allocation22_spill] sm:$0xff] }
 0x510   : > { %14969 = vmatprep.subr.bf16.mxu0 %v19361_v56  ;;  %15017 = vmatprep.subr.bf16.mxu1 %v19365_v43 }
 0x511   : > { %5934 = vmatprep.mubr.f32.mxu0 %v23686_v31  ;;  %7212 = vmatprep.mubr.f32.mxu1 %v23686_v31 }
 0x512   : > { %5936 = vmatmul.mubr.f32.gmra.mrb[28].mxu0 %v19095_v26  ;;  %7214 = vmatmul.mubr.f32.gmra.mrb[28].mxu1 %v19095_v26 }
 0x513   : > { %5941 = vmatprep.mubr.f32.mxu0 %v23686_v31  ;;  %7219 = vmatprep.mubr.f32.mxu1 %v23686_v31 }
 0x516   : > { %5943 = vmatmul.mubr.f32.gmra.mrb[30].mxu0 %v19123_v34  ;;  %7221 = vmatmul.mubr.f32.gmra.mrb[30].mxu1 %v19123_v34 }
 0x517   : > { %5948 = vmatprep.mubr.f32.mxu0 %v23686_v31  ;;  %7226 = vmatprep.mubr.f32.mxu1 %v23686_v31 }
 0x51a   : > { %5950 = vmatmul.mubr.f32.gmra.mrb[32].mxu0 %v19174_v62  ;;  %7228 = vmatmul.mubr.f32.gmra.mrb[32].mxu1 %v19174_v62 }
 0x51b   : > { %5955 = vmatprep.mubr.f32.mxu0 %v23686_v31  ;;  %7233 = vmatprep.mubr.f32.mxu1 %v23686_v31 }
 0x51e   : > { %5957 = vmatmul.mubr.f32.gmra.mrb[34].mxu0 %v19583_v25  ;;  %7235 = vmatmul.mubr.f32.gmra.mrb[34].mxu1 %v19583_v25 }
 0x51f   : > { %5962 = vmatprep.mubr.f32.mxu0 %v23686_v31  ;;  %7240 = vmatprep.mubr.f32.mxu1 %v23686_v31 }
 0x522   : > { %5964 = vmatmul.mubr.f32.gmra.mrb[36].mxu0 %v19651_v27  ;;  %7242 = vmatmul.mubr.f32.gmra.mrb[36].mxu1 %v19651_v27 }
 0x523   : > { %5969 = vmatprep.mubr.f32.mxu0 %v23686_v31  ;;  %7247 = vmatprep.mubr.f32.mxu1 %v23686_v31 }
 0x526   : > { %5971 = vmatmul.mubr.f32.gmra.mrb[38].mxu0 %v19694_v42  ;;  %7249 = vmatmul.mubr.f32.gmra.mrb[38].mxu1 %v19694_v42 }
 0x527   : > { %5976 = vmatprep.mubr.f32.mxu0 %v23686_v31  ;;  %7254 = vmatprep.mubr.f32.mxu1 %v23686_v31 }
 0x52a   : > { %5978 = vmatmul.mubr.f32.gmra.mrb[40].mxu0 %v19710_v22  ;;  %7256 = vmatmul.mubr.f32.gmra.mrb[40].mxu1 %v19710_v22 }
 0x52b   : > { %5983 = vmatprep.mubr.f32.mxu0 %v23686_v31  ;;  %7261 = vmatprep.mubr.f32.mxu1 %v23686_v31 }
 0x52e   : > { %5985 = vmatmul.mubr.f32.gmra.mrb[42].mxu0 %v19726_v36  ;;  %7263 = vmatmul.mubr.f32.gmra.mrb[42].mxu1 %v19726_v36 }
 0x52f   : > { %5990 = vmatprep.mubr.f32.mxu0 %v23686_v31  ;;  %7268 = vmatprep.mubr.f32.mxu1 %v23686_v31 }
 0x532   : > { %5992 = vmatmul.mubr.f32.gmra.mrb[44].mxu0 %v19734_v32  ;;  %7270 = vmatmul.mubr.f32.gmra.mrb[44].mxu1 %v19734_v32 }
 0x533   : > { %5997 = vmatprep.mubr.f32.mxu0 %v23686_v31  ;;  %7275 = vmatprep.mubr.f32.mxu1 %v23686_v31 }
 0x536   : > { %5999 = vmatmul.mubr.f32.gmra.mrb[46].mxu0 %v19758_v51  ;;  %7277 = vmatmul.mubr.f32.gmra.mrb[46].mxu1 %v19758_v51 }
 0x537   : > { %6004 = vmatprep.mubr.f32.mxu0 %v23686_v31  ;;  %7282 = vmatprep.mubr.f32.mxu1 %v23686_v31 }
 0x53a   : > { %6006 = vmatmul.mubr.f32.gmra.mrb[48].mxu0 %v19774_v57  ;;  %7284 = vmatmul.mubr.f32.gmra.mrb[48].mxu1 %v19774_v57 }
 0x53b   : > { %6011 = vmatprep.mubr.f32.mxu0 %v23686_v31  ;;  %7289 = vmatprep.mubr.f32.mxu1 %v23686_v31 }
 0x53e   : > { %6013 = vmatmul.mubr.f32.gmra.mrb[50].mxu0 %v19790_v54  ;;  %7291 = vmatmul.mubr.f32.gmra.mrb[50].mxu1 %v19790_v54 }
 0x53f   : > { %6018 = vmatprep.mubr.f32.mxu0 %v23686_v31  ;;  %7296 = vmatprep.mubr.f32.mxu1 %v23686_v31 }
 0x542   : > { %6020 = vmatmul.mubr.f32.gmra.mrb[52].mxu0 %v19807_v4  ;;  %7298 = vmatmul.mubr.f32.gmra.mrb[52].mxu1 %v19807_v4 }
 0x543   : > { %6025 = vmatprep.mubr.f32.mxu0 %v23686_v31  ;;  %7303 = vmatprep.mubr.f32.mxu1 %v23686_v31 }
 0x546   : > { %6027 = vmatmul.mubr.f32.gmra.mrb[54].mxu0 %v19811_v29  ;;  %7305 = vmatmul.mubr.f32.gmra.mrb[54].mxu1 %v19811_v29 }
 0x547   : > { %6113 = vmatprep.mubr.f32.mxu0 %v23686_v31  ;;  %7391 = vmatprep.mubr.f32.mxu1 %v23686_v31 }
 0x54a   : > { %6116 = vmatmul.mubr.f32.vlgmr.msra.gmra.mrb[24].mxu0 %v19091_v52  ;;  %7394 = vmatmul.mubr.f32.vlgmr.msra.gmra.mrb[24].mxu1 %v19091_v52  ;;  %v23820_v52 = vld [vmem:[#allocation25_spill] sm:$0xff] }
 0x54b   : > { %14971 = vmatpush1.bf16.msra.mxu0 %v19370_v35  ;;  %15019 = vmatpush1.bf16.msra.mxu1 %v19372_v3 }
 0x54c   : > { %14973 = vmatprep.subr.bf16.mxu0 %v19568_v55  ;;  %15021 = vmatprep.subr.bf16.mxu1 %v19575_v37 }
 0x54d   : > { %6121 = vmatprep.mubr.f32.mxu0 %v23686_v31  ;;  %7399 = vmatprep.mubr.f32.mxu1 %v23686_v31 }
 0x54e   : > { %6124 = vmatmul.mubr.f32.gmra.mrb[26].mxu0 %v23819_v40  ;;  %7402 = vmatmul.mubr.f32.gmra.mrb[26].mxu1 %v23819_v40 }
 0x54f   : > { %14975 = vmatpush1.bf16.msra.mxu0 %v19534_v15  ;;  %15023 = vmatpush1.bf16.msra.mxu1 %v19556_v18 }
 0x550   : > { %14977 = vmatprep.subr.bf16.mxu0 %v19617_v17  ;;  %15025 = vmatprep.subr.bf16.mxu1 %v19625_v20  ;;  %v23832_v17 = vld [vmem:[#allocation36_spill] sm:$0xff] }
 0x551   : > { %6129 = vmatprep.mubr.f32.mxu0 %v23686_v31  ;;  %7407 = vmatprep.mubr.f32.mxu1 %v23686_v31  ;;  %v23836_v20 = vld [vmem:[#allocation40_spill] sm:$0xff] }
 0x552   : > { %6132 = vmatmul.mubr.f32.gmra.mrb[28].mxu0 %v19119_v14  ;;  %7410 = vmatmul.mubr.f32.gmra.mrb[28].mxu1 %v19119_v14  ;;  %v23821_v14 = vld [vmem:[#allocation28_spill] sm:$0xff] }
 0x553   : > { %6137 = vmatprep.mubr.f32.mxu0 %v23686_v31  ;;  %7415 = vmatprep.mubr.f32.mxu1 %v23686_v31 }
 0x556   : > { %6140 = vmatmul.mubr.f32.gmra.mrb[30].mxu0 %v19148_v9  ;;  %7418 = vmatmul.mubr.f32.gmra.mrb[30].mxu1 %v19148_v9  ;;  %v23822_v9 = vld [vmem:[#allocation29_spill] sm:$0xff] }
 0x557   : > { %6145 = vmatprep.mubr.f32.mxu0 %v23686_v31  ;;  %7423 = vmatprep.mubr.f32.mxu1 %v23686_v31 }
 0x55a   : > { %6148 = vmatmul.mubr.f32.gmra.mrb[32].mxu0 %v19462_v7  ;;  %7426 = vmatmul.mubr.f32.gmra.mrb[32].mxu1 %v19462_v7  ;;  %v23824_v7 = vld [vmem:[#allocation30_spill] sm:$0xff] }
 0x55b   : > { %6153 = vmatprep.mubr.f32.mxu0 %v23686_v31  ;;  %7431 = vmatprep.mubr.f32.mxu1 %v23686_v31 }
 0x55e   : > { %6156 = vmatmul.mubr.f32.gmra.mrb[34].mxu0 %v19635_v58  ;;  %7434 = vmatmul.mubr.f32.gmra.mrb[34].mxu1 %v19635_v58 }
 0x55f   : > { %6161 = vmatprep.mubr.f32.mxu0 %v23686_v31  ;;  %7439 = vmatprep.mubr.f32.mxu1 %v23686_v31 }
 0x562   : > { %6164 = vmatmul.mubr.f32.gmra.mrb[36].mxu0 %v19690_v60  ;;  %7442 = vmatmul.mubr.f32.gmra.mrb[36].mxu1 %v19690_v60 }
 0x563   : > { %6169 = vmatprep.mubr.f32.mxu0 %v23686_v31  ;;  %7447 = vmatprep.mubr.f32.mxu1 %v23686_v31 }
 0x566   : > { %6172 = vmatmul.mubr.f32.gmra.mrb[38].mxu0 %v19708_v33  ;;  %7450 = vmatmul.mubr.f32.gmra.mrb[38].mxu1 %v19708_v33 }
 0x567   : > { %6177 = vmatprep.mubr.f32.mxu0 %v23686_v31  ;;  %7455 = vmatprep.mubr.f32.mxu1 %v23686_v31 }
 0x56a   : > { %6180 = vmatmul.mubr.f32.gmra.mrb[40].mxu0 %v19724_v41  ;;  %7458 = vmatmul.mubr.f32.gmra.mrb[40].mxu1 %v19724_v41 }
 0x56b   : > { %6185 = vmatprep.mubr.f32.mxu0 %v23686_v31  ;;  %7463 = vmatprep.mubr.f32.mxu1 %v23686_v31 }
 0x56e   : > { %6188 = vmatmul.mubr.f32.gmra.mrb[42].mxu0 %v19742_v19  ;;  %7466 = vmatmul.mubr.f32.gmra.mrb[42].mxu1 %v19742_v19 }
 0x56f   : > { %6193 = vmatprep.mubr.f32.mxu0 %v23686_v31  ;;  %7471 = vmatprep.mubr.f32.mxu1 %v23686_v31 }
 0x572   : > { %6196 = vmatmul.mubr.f32.gmra.mrb[44].mxu0 %v19751_v21  ;;  %7474 = vmatmul.mubr.f32.gmra.mrb[44].mxu1 %v19751_v21  ;;  %v23844_v21 = vld [vmem:[#allocation14_spill] sm:$0xff] }
 0x573   : > { %6201 = vmatprep.mubr.f32.mxu0 %v23686_v31  ;;  %7479 = vmatprep.mubr.f32.mxu1 %v23686_v31 }
 0x576   : > { %6204 = vmatmul.mubr.f32.gmra.mrb[46].mxu0 %v19772_v61  ;;  %7482 = vmatmul.mubr.f32.gmra.mrb[46].mxu1 %v19772_v61 }
 0x577   : > { %6209 = vmatprep.mubr.f32.mxu0 %v23686_v31  ;;  %7487 = vmatprep.mubr.f32.mxu1 %v23686_v31 }
 0x57a   : > { %6212 = vmatmul.mubr.f32.gmra.mrb[48].mxu0 %v19788_v30  ;;  %7490 = vmatmul.mubr.f32.gmra.mrb[48].mxu1 %v19788_v30 }
 0x57b   : > { %6217 = vmatprep.mubr.f32.mxu0 %v23686_v31  ;;  %7495 = vmatprep.mubr.f32.mxu1 %v23686_v31 }
 0x57e   : > { %6220 = vmatmul.mubr.f32.gmra.mrb[50].mxu0 %v19805_v16  ;;  %7498 = vmatmul.mubr.f32.gmra.mrb[50].mxu1 %v19805_v16  ;;  %v8126_v16 = vld [vmem:[%s23260_s9 + $0x18] sm:$0xff] }
 0x57f   : > { %6225 = vmatprep.mubr.f32.mxu0 %v23686_v31  ;;  %7503 = vmatprep.mubr.f32.mxu1 %v23686_v31 }
 0x582   : > { %6228 = vmatmul.mubr.f32.gmra.mrb[52].mxu0 %v19819_v23  ;;  %7506 = vmatmul.mubr.f32.gmra.mrb[52].mxu1 %v19819_v23  ;;  %v23846_v23 = vld [vmem:[#allocation13_spill] sm:$0xff] }
 0x583   : > { %6233 = vmatprep.mubr.f32.mxu0 %v23686_v31  ;;  %7511 = vmatprep.mubr.f32.mxu1 %v23686_v31 }
 0x586   : > { %6236 = vmatmul.mubr.f32.gmra.mrb[54].mxu0 %v19829_v2  ;;  %7514 = vmatmul.mubr.f32.gmra.mrb[54].mxu1 %v19829_v2 }
 0x587   : > { %6314 = vmatprep.mubr.f32.mxu0 %v23686_v31  ;;  %7592 = vmatprep.mubr.f32.mxu1 %v23686_v31 }
 0x58a   : > { %6318 = vmatmul.mubr.f32.vlgmr.msra.gmra.mrb[24].mxu0 %v23820_v52  ;;  %7596 = vmatmul.mubr.f32.vlgmr.msra.gmra.mrb[24].mxu1 %v23820_v52 }
 0x58b   : > { %14979 = vmatpush1.bf16.msra.mxu0 %v19631_v5  ;;  %15027 = vmatpush1.bf16.msra.mxu1 %v19644_v63  ;;  %v23837_v5 = vld [vmem:[#allocation41_spill] sm:$0xff] }
 0x58c   : > { %14981 = vmatprep.subr.bf16.mxu0 %v23821_v14  ;;  %15029 = vmatprep.subr.bf16.mxu1 %v23822_v9 }
 0x58d   : > { %6323 = vmatprep.mubr.f32.mxu0 %v23686_v31  ;;  %7601 = vmatprep.mubr.f32.mxu1 %v23686_v31 }
 0x58e   : > { %6327 = vmatmul.mubr.f32.gmra.mrb[26].mxu0 %v23823_v53  ;;  %7605 = vmatmul.mubr.f32.gmra.mrb[26].mxu1 %v23823_v53 }
 0x58f   : > { %14983 = vmatpush1.bf16.msra.mxu0 %v23824_v7  ;;  %15031 = vmatpush1.bf16.msra.mxu1 %v23825_v8 }
 0x590   : > { %14985 = vmatprep.subr.bf16.mxu0 %v19361_v56  ;;  %15033 = vmatprep.subr.bf16.mxu1 %v19365_v43  ;;  %v23828_v56 = vld [vmem:[#allocation32_spill] sm:$0xff]  ;;  %v23829_v43 = vld [vmem:[#allocation33_spill] sm:$0xff] }
 0x591   : > { %6332 = vmatprep.mubr.f32.mxu0 %v23686_v31  ;;  %7610 = vmatprep.mubr.f32.mxu1 %v23686_v31 }
 0x592   : > { %6336 = vmatmul.mubr.f32.gmra.mrb[28].mxu0 %v23826_v46  ;;  %7614 = vmatmul.mubr.f32.gmra.mrb[28].mxu1 %v23826_v46 }
 0x593   : > { %6341 = vmatprep.mubr.f32.mxu0 %v23686_v31  ;;  %7619 = vmatprep.mubr.f32.mxu1 %v23686_v31 }
 0x596   : > { %6345 = vmatmul.mubr.f32.gmra.mrb[30].mxu0 %v23827_v48  ;;  %7623 = vmatmul.mubr.f32.gmra.mrb[30].mxu1 %v23827_v48 }
 0x597   : > { %6350 = vmatprep.mubr.f32.mxu0 %v23686_v31  ;;  %7628 = vmatprep.mubr.f32.mxu1 %v23686_v31 }
 0x59a   : > { %6354 = vmatmul.mubr.f32.gmra.mrb[32].mxu0 %v23828_v56  ;;  %7632 = vmatmul.mubr.f32.gmra.mrb[32].mxu1 %v23828_v56 }
 0x59b   : > { %6359 = vmatprep.mubr.f32.mxu0 %v23686_v31  ;;  %7637 = vmatprep.mubr.f32.mxu1 %v23686_v31 }
 0x59e   : > { %6363 = vmatmul.mubr.f32.gmra.mrb[34].mxu0 %v23829_v43  ;;  %7641 = vmatmul.mubr.f32.gmra.mrb[34].mxu1 %v23829_v43 }
 0x59f   : > { %6368 = vmatprep.mubr.f32.mxu0 %v23686_v31  ;;  %7646 = vmatprep.mubr.f32.mxu1 %v23686_v31 }
 0x5a2   : > { %6372 = vmatmul.mubr.f32.gmra.mrb[36].mxu0 %v23830_v10  ;;  %7650 = vmatmul.mubr.f32.gmra.mrb[36].mxu1 %v23830_v10 }
 0x5a3   : > { %6377 = vmatprep.mubr.f32.mxu0 %v23686_v31  ;;  %7655 = vmatprep.mubr.f32.mxu1 %v23686_v31 }
 0x5a6   : > { %6381 = vmatmul.mubr.f32.gmra.mrb[38].mxu0 %v23831_v38  ;;  %7659 = vmatmul.mubr.f32.gmra.mrb[38].mxu1 %v23831_v38 }
 0x5a7   : > { %6386 = vmatprep.mubr.f32.mxu0 %v23686_v31  ;;  %7664 = vmatprep.mubr.f32.mxu1 %v23686_v31 }
 0x5aa   : > { %6390 = vmatmul.mubr.f32.gmra.mrb[40].mxu0 %v23832_v17  ;;  %7668 = vmatmul.mubr.f32.gmra.mrb[40].mxu1 %v23832_v17 }
 0x5ab   : > { %6395 = vmatprep.mubr.f32.mxu0 %v23686_v31  ;;  %7673 = vmatprep.mubr.f32.mxu1 %v23686_v31 }
 0x5ae   : > { %6399 = vmatmul.mubr.f32.gmra.mrb[42].mxu0 %v23833_v28  ;;  %7677 = vmatmul.mubr.f32.gmra.mrb[42].mxu1 %v23833_v28 }
 0x5af   : > { %6404 = vmatprep.mubr.f32.mxu0 %v23686_v31  ;;  %7682 = vmatprep.mubr.f32.mxu1 %v23686_v31 }
 0x5b2   : > { %6408 = vmatmul.mubr.f32.gmra.mrb[44].mxu0 %v23834_v47  ;;  %7686 = vmatmul.mubr.f32.gmra.mrb[44].mxu1 %v23834_v47 }
 0x5b3   : > { %6413 = vmatprep.mubr.f32.mxu0 %v23686_v31  ;;  %7691 = vmatprep.mubr.f32.mxu1 %v23686_v31 }
 0x5b6   : > { %6417 = vmatmul.mubr.f32.gmra.mrb[46].mxu0 %v23835_v24  ;;  %7695 = vmatmul.mubr.f32.gmra.mrb[46].mxu1 %v23835_v24 }
 0x5b7   : > { %6422 = vmatprep.mubr.f32.mxu0 %v23686_v31  ;;  %7700 = vmatprep.mubr.f32.mxu1 %v23686_v31 }
 0x5ba   : > { %6426 = vmatmul.mubr.f32.gmra.mrb[48].mxu0 %v23836_v20  ;;  %7704 = vmatmul.mubr.f32.gmra.mrb[48].mxu1 %v23836_v20 }
 0x5bb   : > { %6431 = vmatprep.mubr.f32.mxu0 %v23686_v31  ;;  %7709 = vmatprep.mubr.f32.mxu1 %v23686_v31 }
 0x5be   : > { %6435 = vmatmul.mubr.f32.gmra.mrb[50].mxu0 %v23837_v5  ;;  %7713 = vmatmul.mubr.f32.gmra.mrb[50].mxu1 %v23837_v5 }
 0x5bf   : > { %6440 = vmatprep.mubr.f32.mxu0 %v23686_v31  ;;  %7718 = vmatprep.mubr.f32.mxu1 %v23686_v31 }
 0x5c2   : > { %6444 = vmatmul.mubr.f32.gmra.mrb[52].mxu0 %v19826_v45  ;;  %7722 = vmatmul.mubr.f32.gmra.mrb[52].mxu1 %v19826_v45  ;;  %v23847_v45 = vld [vmem:[#allocation16_spill] sm:$0xff] }
 0x5c3   : > { %6449 = vmatprep.mubr.f32.mxu0 %v23686_v31  ;;  %7727 = vmatprep.mubr.f32.mxu1 %v23686_v31 }
 0x5c6   : > { %6453 = vmatmul.mubr.f32.gmra.mrb[54].mxu0 %v19836_v59  ;;  %7731 = vmatmul.mubr.f32.gmra.mrb[54].mxu1 %v19836_v59 }
 0x5c7   : > { %6547 = vmatprep.mubr.f32.mxu0 %v23686_v31  ;;  %7825 = vmatprep.mubr.f32.mxu1 %v23686_v31 }
 0x5ca   : > { %6549 = vmatmul.mubr.f32.vlgmr.msra.gmra.mrb[24].mxu0 %v19074_v1  ;;  %7827 = vmatmul.mubr.f32.vlgmr.msra.gmra.mrb[24].mxu1 %v19074_v1 }
 0x5cb   : > { %14987 = vmatpush1.bf16.msra.mxu0 %v19370_v35  ;;  %15035 = vmatpush1.bf16.msra.mxu1 %v19372_v3  ;;  %v23838_v35 = vld [vmem:[#allocation7_spill] sm:$0xff]  ;;  %v23839_v3 = vld [vmem:[#allocation8_spill] sm:$0xff] }
 0x5cc   : > { %14989 = vmatprep.subr.bf16.mxu0 %v19568_v55  ;;  %15037 = vmatprep.subr.bf16.mxu1 %v19575_v37  ;;  %v23842_v55 = vld [vmem:[#allocation11_spill] sm:$0xff]  ;;  %v23843_v37 = vld [vmem:[#allocation12_spill] sm:$0xff] }
 0x5cd   : > { %6554 = vmatprep.mubr.f32.mxu0 %v23686_v31  ;;  %7832 = vmatprep.mubr.f32.mxu1 %v23686_v31 }
 0x5ce   : > { %6556 = vmatmul.mubr.f32.gmra.mrb[26].mxu0 %v19078_v39  ;;  %7834 = vmatmul.mubr.f32.gmra.mrb[26].mxu1 %v19078_v39 }
 0x5cf   : > { %14991 = vmatpush1.bf16.msra.mxu0 %v19534_v15  ;;  %15039 = vmatpush1.bf16.msra.mxu1 %v19556_v18  ;;  %v23840_v15 = vld [vmem:[#allocation9_spill] sm:$0xff]  ;;  %v23841_v18 = vld [vmem:[#allocation10_spill] sm:$0xff] }
 0x5d0   : > { %6561 = vmatprep.mubr.f32.mxu0 %v23686_v31  ;;  %7839 = vmatprep.mubr.f32.mxu1 %v23686_v31 }
 0x5d1   : > { %15041 = vmatprep.subr.bf16.mxu0 %v23838_v35  ;;  %15065 = vmatprep.subr.bf16.mxu1 %v23839_v3 }
 0x5d2   : > { %6563 = vmatmul.mubr.f32.gmra.mrb[28].mxu0 %v19095_v26  ;;  %7841 = vmatmul.mubr.f32.gmra.mrb[28].mxu1 %v19095_v26 }
 0x5d3   : > { %6568 = vmatprep.mubr.f32.mxu0 %v23686_v31  ;;  %7846 = vmatprep.mubr.f32.mxu1 %v23686_v31 }
 0x5d6   : > { %6570 = vmatmul.mubr.f32.gmra.mrb[30].mxu0 %v19123_v34  ;;  %7848 = vmatmul.mubr.f32.gmra.mrb[30].mxu1 %v19123_v34 }
 0x5d7   : > { %6575 = vmatprep.mubr.f32.mxu0 %v23686_v31  ;;  %7853 = vmatprep.mubr.f32.mxu1 %v23686_v31 }
 0x5da   : > { %6577 = vmatmul.mubr.f32.gmra.mrb[32].mxu0 %v19174_v62  ;;  %7855 = vmatmul.mubr.f32.gmra.mrb[32].mxu1 %v19174_v62 }
 0x5db   : > { %6582 = vmatprep.mubr.f32.mxu0 %v23686_v31  ;;  %7860 = vmatprep.mubr.f32.mxu1 %v23686_v31 }
 0x5de   : > { %6584 = vmatmul.mubr.f32.gmra.mrb[34].mxu0 %v19583_v25  ;;  %7862 = vmatmul.mubr.f32.gmra.mrb[34].mxu1 %v19583_v25 }
 0x5df   : > { %6589 = vmatprep.mubr.f32.mxu0 %v23686_v31  ;;  %7867 = vmatprep.mubr.f32.mxu1 %v23686_v31 }
 0x5e2   : > { %6591 = vmatmul.mubr.f32.gmra.mrb[36].mxu0 %v19651_v27  ;;  %7869 = vmatmul.mubr.f32.gmra.mrb[36].mxu1 %v19651_v27 }
 0x5e3   : > { %6596 = vmatprep.mubr.f32.mxu0 %v23686_v31  ;;  %7874 = vmatprep.mubr.f32.mxu1 %v23686_v31 }
 0x5e6   : > { %6598 = vmatmul.mubr.f32.gmra.mrb[38].mxu0 %v19694_v42  ;;  %7876 = vmatmul.mubr.f32.gmra.mrb[38].mxu1 %v19694_v42 }
 0x5e7   : > { %6603 = vmatprep.mubr.f32.mxu0 %v23686_v31  ;;  %7881 = vmatprep.mubr.f32.mxu1 %v23686_v31 }
 0x5ea   : > { %6605 = vmatmul.mubr.f32.gmra.mrb[40].mxu0 %v19710_v22  ;;  %7883 = vmatmul.mubr.f32.gmra.mrb[40].mxu1 %v19710_v22 }
 0x5eb   : > { %6610 = vmatprep.mubr.f32.mxu0 %v23686_v31  ;;  %7888 = vmatprep.mubr.f32.mxu1 %v23686_v31 }
 0x5ee   : > { %6612 = vmatmul.mubr.f32.gmra.mrb[42].mxu0 %v19726_v36  ;;  %7890 = vmatmul.mubr.f32.gmra.mrb[42].mxu1 %v19726_v36 }
 0x5ef   : > { %6617 = vmatprep.mubr.f32.mxu0 %v23686_v31  ;;  %7895 = vmatprep.mubr.f32.mxu1 %v23686_v31 }
 0x5f2   : > { %6619 = vmatmul.mubr.f32.gmra.mrb[44].mxu0 %v19734_v32  ;;  %7897 = vmatmul.mubr.f32.gmra.mrb[44].mxu1 %v19734_v32 }
 0x5f3   : > { %6624 = vmatprep.mubr.f32.mxu0 %v23686_v31  ;;  %7902 = vmatprep.mubr.f32.mxu1 %v23686_v31 }
 0x5f6   : > { %6626 = vmatmul.mubr.f32.gmra.mrb[46].mxu0 %v19758_v51  ;;  %7904 = vmatmul.mubr.f32.gmra.mrb[46].mxu1 %v19758_v51 }
 0x5f7   : > { %6631 = vmatprep.mubr.f32.mxu0 %v23686_v31  ;;  %7909 = vmatprep.mubr.f32.mxu1 %v23686_v31 }
 0x5fa   : > { %6633 = vmatmul.mubr.f32.gmra.mrb[48].mxu0 %v19774_v57  ;;  %7911 = vmatmul.mubr.f32.gmra.mrb[48].mxu1 %v19774_v57 }
 0x5fb   : > { %6638 = vmatprep.mubr.f32.mxu0 %v23686_v31  ;;  %7916 = vmatprep.mubr.f32.mxu1 %v23686_v31 }
 0x5fe   : > { %6640 = vmatmul.mubr.f32.gmra.mrb[50].mxu0 %v19790_v54  ;;  %7918 = vmatmul.mubr.f32.gmra.mrb[50].mxu1 %v19790_v54 }
 0x5ff   : > { %6645 = vmatprep.mubr.f32.mxu0 %v23686_v31  ;;  %7923 = vmatprep.mubr.f32.mxu1 %v23686_v31 }
 0x602   : > { %6647 = vmatmul.mubr.f32.gmra.mrb[52].mxu0 %v19807_v4  ;;  %7925 = vmatmul.mubr.f32.gmra.mrb[52].mxu1 %v19807_v4 }
 0x603   : > { %6652 = vmatprep.mubr.f32.mxu0 %v23686_v31  ;;  %7930 = vmatprep.mubr.f32.mxu1 %v23686_v31 }
 0x606   : > { %6654 = vmatmul.mubr.f32.gmra.mrb[54].mxu0 %v19811_v29  ;;  %7932 = vmatmul.mubr.f32.gmra.mrb[54].mxu1 %v19811_v29 }
 0x607   : > { %6732 = vmatprep.mubr.f32.mxu0 %v23686_v31  ;;  %8010 = vmatprep.mubr.f32.mxu1 %v23686_v31 }
 0x60a   : > { %6734 = vmatmul.mubr.f32.vlgmr.msra.gmra.mrb[24].mxu0 %v19074_v1  ;;  %8012 = vmatmul.mubr.f32.vlgmr.msra.gmra.mrb[24].mxu1 %v19074_v1  ;;  %v8123_v1 = vld [vmem:[%s23260_s9] sm:$0xff] }
 0x60b   : > { %6739 = vmatprep.mubr.f32.mxu0 %v23686_v31  ;;  %8017 = vmatprep.mubr.f32.mxu1 %v23686_v31 }
 0x60c   : > { %15043 = vmatpush1.bf16.msra.mxu0 %v23840_v15  ;;  %15067 = vmatpush1.bf16.msra.mxu1 %v23841_v18 }
 0x60d   : > { %15045 = vmatprep.subr.bf16.mxu0 %v23842_v55  ;;  %15069 = vmatprep.subr.bf16.mxu1 %v23843_v37 }
 0x60e   : > { %6741 = vmatmul.mubr.f32.gmra.mrb[26].mxu0 %v19078_v39  ;;  %8019 = vmatmul.mubr.f32.gmra.mrb[26].mxu1 %v19078_v39  ;;  %v8152_v39 = vsel %vm592_vm1, %v8123_v1, 0 }
 0x60f   : > { %6746 = vmatprep.mubr.f32.mxu0 %v23686_v31  ;;  %8024 = vmatprep.mubr.f32.mxu1 %v23686_v31 }
 0x612   : > { %6748 = vmatmul.mubr.f32.gmra.mrb[28].mxu0 %v19095_v26  ;;  %8026 = vmatmul.mubr.f32.gmra.mrb[28].mxu1 %v19095_v26  ;;  %v8124_v26 = vld [vmem:[%s23260_s9 + $0x8] sm:$0xff] }
 0x613   : > { %6753 = vmatprep.mubr.f32.mxu0 %v23686_v31  ;;  %8031 = vmatprep.mubr.f32.mxu1 %v23686_v31 }
 0x616   : > { %6755 = vmatmul.mubr.f32.gmra.mrb[30].mxu0 %v19123_v34  ;;  %8033 = vmatmul.mubr.f32.gmra.mrb[30].mxu1 %v19123_v34  ;;  %v20205_v34 = vand.u32 4294901760, %v8152_v39 }
 0x617   : > { %6760 = vmatprep.mubr.f32.mxu0 %v23686_v31  ;;  %8038 = vmatprep.mubr.f32.mxu1 %v23686_v31 }
 0x618   : > { %v20216_v58 = vsub.f32 %v8152_v39, %v20205_v34 }
 0x61a   : > { %6762 = vmatmul.mubr.f32.gmra.mrb[32].mxu0 %v19174_v62  ;;  %8040 = vmatmul.mubr.f32.gmra.mrb[32].mxu1 %v19174_v62  ;;  %v8155_v62 = vsel %vm592_vm1, %v8124_v26, 0 }
 0x61b   : > { %6767 = vmatprep.mubr.f32.mxu0 %v23686_v31  ;;  %8045 = vmatprep.mubr.f32.mxu1 %v23686_v31  ;;  %v20218_v63 = vand.u32 4294901760, %v8155_v62 }
 0x61d   : > { %v20232_v2 = vsub.f32 %v8155_v62, %v20218_v63 }
 0x61e   : > { %6769 = vmatmul.mubr.f32.gmra.mrb[34].mxu0 %v19583_v25  ;;  %8047 = vmatmul.mubr.f32.gmra.mrb[34].mxu1 %v19583_v25  ;;  %v8125_v25 = vld [vmem:[%s23260_s9 + $0x10] sm:$0xff] }
 0x61f   : > { %6774 = vmatprep.mubr.f32.mxu0 %v23686_v31  ;;  %8052 = vmatprep.mubr.f32.mxu1 %v23686_v31  ;;  %v20244_v60 = vand.u32 4294901760, %v20232_v2 }
 0x621   : > { %v8246_v33 = vsub.f32 %v20232_v2, %v20244_v60 }
 0x622   : > { %6776 = vmatmul.mubr.f32.gmra.mrb[36].mxu0 %v19651_v27  ;;  %8054 = vmatmul.mubr.f32.gmra.mrb[36].mxu1 %v19651_v27  ;;  %v8158_v27 = vsel %vm592_vm1, %v8125_v25, 0 }
 0x623   : > { %6781 = vmatprep.mubr.f32.mxu0 %v23686_v31  ;;  %8059 = vmatprep.mubr.f32.mxu1 %v23686_v31  ;;  %v20234_v61 = vand.u32 4294901760, %v8158_v27 }
 0x626   : > { %6783 = vmatmul.mubr.f32.gmra.mrb[38].mxu0 %v19694_v42  ;;  %8061 = vmatmul.mubr.f32.gmra.mrb[38].mxu1 %v19694_v42  ;;  %v20247_v42 = vsub.f32 %v8158_v27, %v20234_v61 }
 0x627   : > { %6788 = vmatprep.mubr.f32.mxu0 %v23686_v31  ;;  %8066 = vmatprep.mubr.f32.mxu1 %v23686_v31 }
 0x62a   : > { %6790 = vmatmul.mubr.f32.gmra.mrb[40].mxu0 %v19710_v22  ;;  %8068 = vmatmul.mubr.f32.gmra.mrb[40].mxu1 %v19710_v22  ;;  %v20258_v22 = vand.u32 4294901760, %v20247_v42 }
 0x62b   : > { %6795 = vmatprep.mubr.f32.mxu0 %v23686_v31  ;;  %8073 = vmatprep.mubr.f32.mxu1 %v23686_v31 }
 0x62e   : > { %6797 = vmatmul.mubr.f32.gmra.mrb[42].mxu0 %v19726_v36  ;;  %8075 = vmatmul.mubr.f32.gmra.mrb[42].mxu1 %v19726_v36  ;;  %v8247_v36 = vand.u32 4294901760, %v8246_v33 }
 0x62f   : > { %6802 = vmatprep.mubr.f32.mxu0 %v23686_v31  ;;  %8080 = vmatprep.mubr.f32.mxu1 %v23686_v31 }
 0x632   : > { %6804 = vmatmul.mubr.f32.gmra.mrb[44].mxu0 %v19734_v32  ;;  %8082 = vmatmul.mubr.f32.gmra.mrb[44].mxu1 %v19734_v32  ;;  %v8257_v32 = vsub.f32 %v20247_v42, %v20258_v22 }
 0x633   : > { %6809 = vmatprep.mubr.f32.mxu0 %v23686_v31  ;;  %8087 = vmatprep.mubr.f32.mxu1 %v23686_v31 }
 0x634   : > { %v8258_v59 = vand.u32 4294901760, %v8257_v32 }
 0x636   : > { %6811 = vmatmul.mubr.f32.gmra.mrb[46].mxu0 %v19758_v51  ;;  %8089 = vmatmul.mubr.f32.gmra.mrb[46].mxu1 %v19758_v51  ;;  %v8161_v51 = vsel %vm592_vm1, %v8126_v16, 0 }
 0x637   : > { %6816 = vmatprep.mubr.f32.mxu0 %v23686_v31  ;;  %8094 = vmatprep.mubr.f32.mxu1 %v23686_v31  ;;  %v20249_v30 = vand.u32 4294901760, %v8161_v51 }
 0x639   : > { %v20261_v41 = vsub.f32 %v8161_v51, %v20249_v30 }
 0x63a   : > { %6818 = vmatmul.mubr.f32.gmra.mrb[48].mxu0 %v19774_v57  ;;  %8096 = vmatmul.mubr.f32.gmra.mrb[48].mxu1 %v19774_v57  ;;  %v20229_v57 = vand.u32 4294901760, %v20216_v58 }
 0x63b   : > { %6823 = vmatprep.mubr.f32.mxu0 %v23686_v31  ;;  %8101 = vmatprep.mubr.f32.mxu1 %v23686_v31  ;;  %v20268_v19 = vand.u32 4294901760, %v20261_v41 }
 0x63d   : > { %v8268_v11 = vsub.f32 %v20261_v41, %v20268_v19 }
 0x63e   : > { %6825 = vmatmul.mubr.f32.gmra.mrb[50].mxu0 %v19790_v54  ;;  %8103 = vmatmul.mubr.f32.gmra.mrb[50].mxu1 %v19790_v54  ;;  %v8235_v54 = vsub.f32 %v20216_v58, %v20229_v57 }
 0x63f   : > { %6830 = vmatprep.mubr.f32.mxu0 %v23686_v31  ;;  %8108 = vmatprep.mubr.f32.mxu1 %v23686_v31  ;;  %v8269_v49 = vand.u32 4294901760, %v8268_v11 }
 0x642   : > { %6832 = vmatmul.mubr.f32.gmra.mrb[52].mxu0 %v19807_v4  ;;  %8110 = vmatmul.mubr.f32.gmra.mrb[52].mxu1 %v19807_v4  ;;  %v8236_v4 = vand.u32 4294901760, %v8235_v54 }
 0x643   : > { %6837 = vmatprep.mubr.f32.mxu0 %v23686_v31  ;;  %8115 = vmatprep.mubr.f32.mxu1 %v23686_v31 }
 0x646   : > { %6839 = vmatmul.mubr.f32.gmra.mrb[54].mxu0 %v19811_v29  ;;  %8117 = vmatmul.mubr.f32.gmra.mrb[54].mxu1 %v19811_v29  ;;  %v23845_v29 = vld [vmem:[#allocation15_spill] sm:$0xff] }
 0x647   : > { %8231 = vmatprep.mubr.f32.mxu0 %v23686_v31  ;;  %8869 = vmatprep.mubr.f32.mxu1 %v23686_v31 }
 0x64a   : > { %8237 = vmatmul.mubr.f32.vlgmr.msra.gmra.mrb[56].mxu0 %v8236_v4  ;;  %8875 = vmatmul.mubr.f32.vlgmr.msra.gmra.mrb[56].mxu1 %v8236_v4 }
 0x64b   : > { %8242 = vmatprep.mubr.f32.mxu0 %v23686_v31  ;;  %8880 = vmatprep.mubr.f32.mxu1 %v23686_v31 }
 0x64c   : > { %15047 = vmatpush1.bf16.msra.mxu0 %v23844_v21  ;;  %15071 = vmatpush1.bf16.msra.mxu1 %v23845_v29 }
 0x64d   : > { %15049 = vmatprep.subr.bf16.mxu0 %v23846_v23  ;;  %15073 = vmatprep.subr.bf16.mxu1 %v23847_v45 }
 0x64e   : > { %8248 = vmatmul.mubr.f32.gmra.mrb[58].mxu0 %v8247_v36  ;;  %8886 = vmatmul.mubr.f32.gmra.mrb[58].mxu1 %v8247_v36 }
 0x64f   : > { %8253 = vmatprep.mubr.f32.mxu0 %v23686_v31  ;;  %8891 = vmatprep.mubr.f32.mxu1 %v23686_v31 }
 0x652   : > { %8259 = vmatmul.mubr.f32.gmra.mrb[60].mxu0 %v8258_v59  ;;  %8897 = vmatmul.mubr.f32.gmra.mrb[60].mxu1 %v8258_v59 }
 0x653   : > { %8264 = vmatprep.mubr.f32.mxu0 %v23686_v31  ;;  %8902 = vmatprep.mubr.f32.mxu1 %v23686_v31 }
 0x656   : > { %8270 = vmatmul.mubr.f32.gmra.mrb[62].mxu0 %v8269_v49  ;;  %8908 = vmatmul.mubr.f32.gmra.mrb[62].mxu1 %v8269_v49 }
 0x657   : > { %8360 = vmatprep.mubr.f32.mxu0 %v23686_v31  ;;  %8998 = vmatprep.mubr.f32.mxu1 %v23686_v31 }
 0x65a   : > { %8362 = vmatmul.mubr.f32.vlgmr.msra.gmra.mrb[56].mxu0 %v20205_v34  ;;  %9000 = vmatmul.mubr.f32.vlgmr.msra.gmra.mrb[56].mxu1 %v20205_v34 }
 0x65b   : > { %8367 = vmatprep.mubr.f32.mxu0 %v23686_v31  ;;  %9005 = vmatprep.mubr.f32.mxu1 %v23686_v31 }
 0x65c   : > { %15051 = vmatpush1.bf16.msra.mxu0 %v23848_v13  ;;  %15075 = vmatpush1.bf16.msra.mxu1 %v23849_v6 }
 0x65d   : > { %15053 = vmatprep.subr.bf16.mxu0 %v23838_v35  ;;  %15077 = vmatprep.subr.bf16.mxu1 %v23839_v3 }
 0x65e   : > { %8369 = vmatmul.mubr.f32.gmra.mrb[58].mxu0 %v20218_v63  ;;  %9007 = vmatmul.mubr.f32.gmra.mrb[58].mxu1 %v20218_v63 }
 0x65f   : > { %8374 = vmatprep.mubr.f32.mxu0 %v23686_v31  ;;  %9012 = vmatprep.mubr.f32.mxu1 %v23686_v31 }
 0x662   : > { %8376 = vmatmul.mubr.f32.gmra.mrb[60].mxu0 %v20234_v61  ;;  %9014 = vmatmul.mubr.f32.gmra.mrb[60].mxu1 %v20234_v61 }
 0x663   : > { %8381 = vmatprep.mubr.f32.mxu0 %v23686_v31  ;;  %9019 = vmatprep.mubr.f32.mxu1 %v23686_v31 }
 0x666   : > { %8383 = vmatmul.mubr.f32.gmra.mrb[62].mxu0 %v20249_v30  ;;  %9021 = vmatmul.mubr.f32.gmra.mrb[62].mxu1 %v20249_v30 }
 0x667   : > { %8461 = vmatprep.mubr.f32.mxu0 %v23686_v31  ;;  %9099 = vmatprep.mubr.f32.mxu1 %v23686_v31 }
 0x66a   : > { %8464 = vmatmul.mubr.f32.vlgmr.msra.gmra.mrb[56].mxu0 %v20216_v58  ;;  %9102 = vmatmul.mubr.f32.vlgmr.msra.gmra.mrb[56].mxu1 %v20216_v58 }
 0x66b   : > { %8469 = vmatprep.mubr.f32.mxu0 %v23686_v31  ;;  %9107 = vmatprep.mubr.f32.mxu1 %v23686_v31 }
 0x66c   : > { %15055 = vmatpush1.bf16.msra.mxu0 %v23840_v15  ;;  %15079 = vmatpush1.bf16.msra.mxu1 %v23841_v18 }
 0x66d   : > { %15057 = vmatprep.subr.bf16.mxu0 %v23850_v50  ;;  %15081 = vmatprep.subr.bf16.mxu1 %v23851_v44 }
 0x66e   : > { %8472 = vmatmul.mubr.f32.gmra.mrb[58].mxu0 %v20232_v2  ;;  %9110 = vmatmul.mubr.f32.gmra.mrb[58].mxu1 %v20232_v2 }
 0x66f   : > { %8477 = vmatprep.mubr.f32.mxu0 %v23686_v31  ;;  %9115 = vmatprep.mubr.f32.mxu1 %v23686_v31 }
 0x672   : > { %8480 = vmatmul.mubr.f32.gmra.mrb[60].mxu0 %v20247_v42  ;;  %9118 = vmatmul.mubr.f32.gmra.mrb[60].mxu1 %v20247_v42 }
 0x673   : > { %8485 = vmatprep.mubr.f32.mxu0 %v23686_v31  ;;  %9123 = vmatprep.mubr.f32.mxu1 %v23686_v31 }
 0x676   : > { %8488 = vmatmul.mubr.f32.gmra.mrb[62].mxu0 %v20261_v41  ;;  %9126 = vmatmul.mubr.f32.gmra.mrb[62].mxu1 %v20261_v41 }
 0x677   : > { %8562 = vmatprep.mubr.f32.mxu0 %v23686_v31  ;;  %9200 = vmatprep.mubr.f32.mxu1 %v23686_v31 }
 0x67a   : > { %8566 = vmatmul.mubr.f32.vlgmr.msra.gmra.mrb[56].mxu0 %v20229_v57  ;;  %9204 = vmatmul.mubr.f32.vlgmr.msra.gmra.mrb[56].mxu1 %v20229_v57 }
 0x67b   : > { %8571 = vmatprep.mubr.f32.mxu0 %v23686_v31  ;;  %9209 = vmatprep.mubr.f32.mxu1 %v23686_v31 }
 0x67c   : > { %15059 = vmatpush1.bf16.msra.mxu0 %v23852_v0  ;;  %15083 = vmatpush1.bf16.msra.mxu1 %v23853_v12 }
 0x67d   : > { %15061 = vmatprep.subr.bf16.mxu0 %v23838_v35  ;;  %15085 = vmatprep.subr.bf16.mxu1 %v23839_v3 }
 0x67e   : > { %8575 = vmatmul.mubr.f32.gmra.mrb[58].mxu0 %v20244_v60  ;;  %9213 = vmatmul.mubr.f32.gmra.mrb[58].mxu1 %v20244_v60 }
 0x67f   : > { %8580 = vmatprep.mubr.f32.mxu0 %v23686_v31  ;;  %9218 = vmatprep.mubr.f32.mxu1 %v23686_v31 }
 0x682   : > { %8584 = vmatmul.mubr.f32.gmra.mrb[60].mxu0 %v20258_v22  ;;  %9222 = vmatmul.mubr.f32.gmra.mrb[60].mxu1 %v20258_v22 }
 0x683   : > { %8589 = vmatprep.mubr.f32.mxu0 %v23686_v31  ;;  %9227 = vmatprep.mubr.f32.mxu1 %v23686_v31 }
 0x686   : > { %8593 = vmatmul.mubr.f32.gmra.mrb[62].mxu0 %v20268_v19  ;;  %9231 = vmatmul.mubr.f32.gmra.mrb[62].mxu1 %v20268_v19 }
 0x687   : > { %8675 = vmatprep.mubr.f32.mxu0 %v23686_v31  ;;  %9313 = vmatprep.mubr.f32.mxu1 %v23686_v31 }
 0x68a   : > { %8677 = vmatmul.mubr.f32.vlgmr.msra.gmra.mrb[56].mxu0 %v20205_v34  ;;  %9315 = vmatmul.mubr.f32.vlgmr.msra.gmra.mrb[56].mxu1 %v20205_v34 }
 0x68b   : > { %8682 = vmatprep.mubr.f32.mxu0 %v23686_v31  ;;  %9320 = vmatprep.mubr.f32.mxu1 %v23686_v31 }
 0x68c   : > { %15063 = vmatpush1.bf16.msra.mxu0 %v23840_v15  ;;  %15087 = vmatpush1.bf16.msra.mxu1 %v23841_v18 }
 0x68e   : > { %8684 = vmatmul.mubr.f32.gmra.mrb[58].mxu0 %v20218_v63  ;;  %9322 = vmatmul.mubr.f32.gmra.mrb[58].mxu1 %v20218_v63 }
 0x68f   : > { %8689 = vmatprep.mubr.f32.mxu0 %v23686_v31  ;;  %9327 = vmatprep.mubr.f32.mxu1 %v23686_v31 }
 0x692   : > { %8691 = vmatmul.mubr.f32.gmra.mrb[60].mxu0 %v20234_v61  ;;  %9329 = vmatmul.mubr.f32.gmra.mrb[60].mxu1 %v20234_v61 }
 0x693   : > { %8696 = vmatprep.mubr.f32.mxu0 %v23686_v31  ;;  %9334 = vmatprep.mubr.f32.mxu1 %v23686_v31 }
 0x696   : > { %8698 = vmatmul.mubr.f32.gmra.mrb[62].mxu0 %v20249_v30  ;;  %9336 = vmatmul.mubr.f32.gmra.mrb[62].mxu1 %v20249_v30 }
 0x697   : > { %8772 = vmatprep.mubr.f32.mxu0 %v23686_v31  ;;  %9410 = vmatprep.mubr.f32.mxu1 %v23686_v31 }
 0x69a   : > { %8774 = vmatmul.mubr.f32.vlgmr.msra.gmra.mrb[56].mxu0 %v20205_v34  ;;  %9412 = vmatmul.mubr.f32.vlgmr.msra.gmra.mrb[56].mxu1 %v20205_v34 }
 0x69b   : > { %8779 = vmatprep.mubr.f32.mxu0 %v23686_v31  ;;  %9417 = vmatprep.mubr.f32.mxu1 %v23686_v31 }
 0x69e   : > { %8781 = vmatmul.mubr.f32.gmra.mrb[58].mxu0 %v20218_v63  ;;  %9419 = vmatmul.mubr.f32.gmra.mrb[58].mxu1 %v20218_v63 }
 0x69f   : > { %8786 = vmatprep.mubr.f32.mxu0 %v23686_v31  ;;  %9424 = vmatprep.mubr.f32.mxu1 %v23686_v31 }
 0x6a2   : > { %8788 = vmatmul.mubr.f32.gmra.mrb[60].mxu0 %v20234_v61  ;;  %9426 = vmatmul.mubr.f32.gmra.mrb[60].mxu1 %v20234_v61 }
 0x6a3   : > { %8793 = vmatprep.mubr.f32.mxu0 %v23686_v31  ;;  %9431 = vmatprep.mubr.f32.mxu1 %v23686_v31 }
 0x6a6   : > { %8795 = vmatmul.mubr.f32.gmra.mrb[62].mxu0 %v20249_v30  ;;  %9433 = vmatmul.mubr.f32.gmra.mrb[62].mxu1 %v20249_v30 }
 0x6a7   : > { %9775 = vmatprep.mubr.f32.mxu0 %v23686_v31  ;;  %10465 = vmatprep.mubr.f32.mxu1 %v23686_v31 }
 0x6dd   : > { %v20378_v40 = vpop.f32.mrb[24].mxu0  ;;  %v20380_v52 = vpop.f32.mrb[24].mxu1 }
 0x6de   : > { %23854 = vst [vmem:[#allocation23_spill] sm:$0xff] %v20378_v40  ;;  %23855 = vst [vmem:[#allocation25_spill] sm:$0xff] %v20380_v52  ;;  %v20382_v14 = vpop.f32.mrb[25].mxu0  ;;  %v20384_v9 = vpop.f32.mrb[25].mxu1 }
 0x6df   : > { %23856 = vst [vmem:[#allocation28_spill] sm:$0xff] %v20382_v14  ;;  %23857 = vst [vmem:[#allocation29_spill] sm:$0xff] %v20384_v9 }
 0x6e1   : > { %v20386_v53 = vpop.f32.mrb[26].mxu0  ;;  %v20388_v7 = vpop.f32.mrb[26].mxu1 }
 0x6e2   : > { %23858 = vst [vmem:[#allocation24_spill] sm:$0xff] %v20386_v53  ;;  %23859 = vst [vmem:[#allocation30_spill] sm:$0xff] %v20388_v7  ;;  %v20390_v8 = vpop.f32.mrb[27].mxu0  ;;  %v20392_v46 = vpop.f32.mrb[27].mxu1 }
 0x6e3   : > { %23860 = vst [vmem:[#allocation31_spill] sm:$0xff] %v20390_v8  ;;  %23861 = vst [vmem:[#allocation26_spill] sm:$0xff] %v20392_v46 }
 0x6e5   : > { %v20394_v48 = vpop.f32.mrb[28].mxu0  ;;  %v20396_v56 = vpop.f32.mrb[28].mxu1 }
 0x6e6   : > { %23862 = vst [vmem:[#allocation27_spill] sm:$0xff] %v20394_v48  ;;  %23863 = vst [vmem:[#allocation32_spill] sm:$0xff] %v20396_v56  ;;  %v20398_v43 = vpop.f32.mrb[29].mxu0  ;;  %v20400_v10 = vpop.f32.mrb[29].mxu1 }
 0x6e7   : > { %23864 = vst [vmem:[#allocation33_spill] sm:$0xff] %v20398_v43  ;;  %23865 = vst [vmem:[#allocation34_spill] sm:$0xff] %v20400_v10 }
 0x6e9   : > { %v20402_v38 = vpop.f32.mrb[30].mxu0  ;;  %v20404_v17 = vpop.f32.mrb[30].mxu1 }
 0x6ea   : > { %23866 = vst [vmem:[#allocation35_spill] sm:$0xff] %v20402_v38  ;;  %23867 = vst [vmem:[#allocation36_spill] sm:$0xff] %v20404_v17  ;;  %v20406_v28 = vpop.f32.mrb[31].mxu0  ;;  %v20408_v47 = vpop.f32.mrb[31].mxu1 }
 0x6eb   : > { %23868 = vst [vmem:[#allocation37_spill] sm:$0xff] %v20406_v28  ;;  %23869 = vst [vmem:[#allocation38_spill] sm:$0xff] %v20408_v47 }
 0x6ed   : > { %v20410_v24 = vpop.f32.mrb[32].mxu0  ;;  %v20412_v20 = vpop.f32.mrb[32].mxu1 }
 0x6ee   : > { %23870 = vst [vmem:[#allocation39_spill] sm:$0xff] %v20410_v24  ;;  %23871 = vst [vmem:[#allocation40_spill] sm:$0xff] %v20412_v20  ;;  %v20414_v5 = vpop.f32.mrb[33].mxu0  ;;  %v20416_v35 = vpop.f32.mrb[33].mxu1 }
 0x6ef   : > { %23872 = vst [vmem:[#allocation41_spill] sm:$0xff] %v20414_v5  ;;  %23873 = vst [vmem:[#allocation7_spill] sm:$0xff] %v20416_v35 }
 0x6f1   : > { %v20418_v3 = vpop.f32.mrb[34].mxu0  ;;  %v20420_v15 = vpop.f32.mrb[34].mxu1 }
 0x6f2   : > { %23874 = vst [vmem:[#allocation8_spill] sm:$0xff] %v20418_v3  ;;  %23875 = vst [vmem:[#allocation9_spill] sm:$0xff] %v20420_v15  ;;  %v20422_v18 = vpop.f32.mrb[35].mxu0  ;;  %v20424_v55 = vpop.f32.mrb[35].mxu1 }
 0x6f3   : > { %23876 = vst [vmem:[#allocation10_spill] sm:$0xff] %v20422_v18  ;;  %23877 = vst [vmem:[#allocation11_spill] sm:$0xff] %v20424_v55 }
 0x6f5   : > { %v20426_v37 = vpop.f32.mrb[36].mxu0  ;;  %v20428_v1 = vpop.f32.mrb[36].mxu1 }
 0x6f6   : > { %23878 = vst [vmem:[#allocation12_spill] sm:$0xff] %v20426_v37  ;;  %23879 = vst [vmem:[#allocation14_spill] sm:$0xff] %v20428_v1  ;;  %v20430_v39 = vpop.f32.mrb[37].mxu0  ;;  %v20432_v26 = vpop.f32.mrb[37].mxu1 }
 0x6f7   : > { %23880 = vst [vmem:[#allocation15_spill] sm:$0xff] %v20430_v39  ;;  %23881 = vst [vmem:[#allocation13_spill] sm:$0xff] %v20432_v26  ;;  %v9666_v39 = vld [vmem:[%s23262_s11 + $0x18] sm:$0xff] }
 0x6f8   : > { %v20595_v5 = vsel %vm2146_vm2, %v9666_v39, 0 }
 0x6f9   : > { %v20434_v34 = vpop.f32.mrb[38].mxu0  ;;  %v20436_v62 = vpop.f32.mrb[38].mxu1 }
 0x6fa   : > { %23882 = vst [vmem:[#allocation16_spill] sm:$0xff] %v20434_v34  ;;  %23883 = vst [vmem:[#allocation17_spill] sm:$0xff] %v20436_v62  ;;  %v20438_v25 = vpop.f32.mrb[39].mxu0  ;;  %v20440_v58 = vpop.f32.mrb[39].mxu1 }
 0x6fb   : > { %23884 = vst [vmem:[#allocation18_spill] sm:$0xff] %v20438_v25  ;;  %23885 = vst [vmem:[#allocation19_spill] sm:$0xff] %v20440_v58 }
 0x6fd   : > { %v20442_v63 = vpop.f32.mrb[40].mxu0  ;;  %v20444_v27 = vpop.f32.mrb[40].mxu1 }
 0x6fe   : > { %23886 = vst [vmem:[#allocation20_spill] sm:$0xff] %v20442_v63  ;;  %23887 = vst [vmem:[#allocation21_spill] sm:$0xff] %v20444_v27  ;;  %v20446_v16 = vpop.f32.mrb[41].mxu0  ;;  %v20448_v57 = vpop.f32.mrb[41].mxu1 }
 0x6ff   : > { %23888 = vst [vmem:[#allocation22_spill] sm:$0xff] %v20446_v16  ;;  %23889 = vst [vmem:[#allocation42_spill] sm:$0xff] %v20448_v57 }
 0x701   : > { %v20450_v2 = vpop.f32.mrb[42].mxu0  ;;  %v20452_v61 = vpop.f32.mrb[42].mxu1 }
 0x702   : > { %23890 = vst [vmem:[#allocation43_spill] sm:$0xff] %v20450_v2  ;;  %23891 = vst [vmem:[#allocation44_spill] sm:$0xff] %v20452_v61  ;;  %v20454_v51 = vpop.f32.mrb[43].mxu0  ;;  %v20456_v54 = vpop.f32.mrb[43].mxu1 }
 0x703   : > { %23892 = vst [vmem:[#allocation45_spill] sm:$0xff] %v20454_v51  ;;  %23893 = vst [vmem:[#allocation46_spill] sm:$0xff] %v20456_v54 }
 0x705   : > { %v20458_v60 = vpop.f32.mrb[44].mxu0  ;;  %v20460_v42 = vpop.f32.mrb[44].mxu1 }
 0x706   : > { %23894 = vst [vmem:[#allocation47_spill] sm:$0xff] %v20458_v60  ;;  %23895 = vst [vmem:[#allocation48_spill] sm:$0xff] %v20460_v42  ;;  %v20462_v30 = vpop.f32.mrb[45].mxu0  ;;  %v20464_v4 = vpop.f32.mrb[45].mxu1 }
 0x707   : > { %23896 = vst [vmem:[#allocation49_spill] sm:$0xff] %v20462_v30  ;;  %23897 = vst [vmem:[#allocation50_spill] sm:$0xff] %v20464_v4 }
 0x709   : > { %v20466_v33 = vpop.f32.mrb[46].mxu0  ;;  %v20468_v22 = vpop.f32.mrb[46].mxu1 }
 0x70a   : > { %23898 = vst [vmem:[#allocation51_spill] sm:$0xff] %v20466_v33  ;;  %23899 = vst [vmem:[#allocation52_spill] sm:$0xff] %v20468_v22  ;;  %v20470_v41 = vpop.f32.mrb[47].mxu0  ;;  %v20472_v36 = vpop.f32.mrb[47].mxu1 }
 0x70b   : > { %23900 = vst [vmem:[#allocation53_spill] sm:$0xff] %v20470_v41  ;;  %23901 = vst [vmem:[#allocation54_spill] sm:$0xff] %v20472_v36 }
 0x70d   : > { %v20474_v32 = vpop.f32.mrb[48].mxu0  ;;  %v20476_v19 = vpop.f32.mrb[48].mxu1 }
 0x70e   : > { %23902 = vst [vmem:[#allocation55_spill] sm:$0xff] %v20474_v32  ;;  %23903 = vst [vmem:[#allocation56_spill] sm:$0xff] %v20476_v19  ;;  %v20478_v21 = vpop.f32.mrb[49].mxu0  ;;  %v20480_v29 = vpop.f32.mrb[49].mxu1 }
 0x70f   : > { %23904 = vst [vmem:[#allocation57_spill] sm:$0xff] %v20478_v21  ;;  %23905 = vst [vmem:[#allocation58_spill] sm:$0xff] %v20480_v29  ;;  %v8139_v21 = vpop.permute.xlu1 %8138 }
 0x711   : > { %v20482_v23 = vpop.f32.mrb[50].mxu0  ;;  %v20484_v45 = vpop.f32.mrb[50].mxu1 }
 0x712   : > { %23906 = vst [vmem:[#allocation59_spill] sm:$0xff] %v20482_v23  ;;  %23907 = vst [vmem:[#allocation60_spill] sm:$0xff] %v20484_v45  ;;  %v20486_v59 = vpop.f32.mrb[51].mxu0  ;;  %v20488_v11 = vpop.f32.mrb[51].mxu1 }
 0x713   : > { %23908 = vst [vmem:[#allocation61_spill] sm:$0xff] %v20486_v59  ;;  %23909 = vst [vmem:[#allocation62_spill] sm:$0xff] %v20488_v11  ;;  %v9663_v11 = vld [vmem:[%s23262_s11] sm:$0xff]  ;;  %v8134_v59 = vpop.permute.xlu0 %8133 }
 0x715   : > { %v20490_v49 = vpop.f32.mrb[52].mxu0  ;;  %v20492_v13 = vpop.f32.mrb[52].mxu1 }
 0x716   : > { %23910 = vst [vmem:[#allocation63_spill] sm:$0xff] %v20490_v49  ;;  %23911 = vst [vmem:[#allocation64_spill] sm:$0xff] %v20492_v13  ;;  %v20494_v6 = vpop.f32.mrb[53].mxu0  ;;  %v20496_v50 = vpop.f32.mrb[53].mxu1 }
 0x717   : > { %23912 = vst [vmem:[#allocation65_spill] sm:$0xff] %v20494_v6  ;;  %23913 = vst [vmem:[#allocation66_spill] sm:$0xff] %v20496_v50  ;;  %v8144_v61 = vpop.permute.xlu0 %8143 }
 0x719   : > { %v20498_v44 = vpop.f32.mrb[54].mxu0  ;;  %v20500_v0 = vpop.f32.mrb[54].mxu1 }
 0x71a   : > { %23914 = vst [vmem:[#allocation67_spill] sm:$0xff] %v20498_v44  ;;  %23915 = vst [vmem:[#allocation68_spill] sm:$0xff] %v20500_v0  ;;  %v20502_v12 = vpop.f32.mrb[55].mxu0  ;;  %v20504_v23 = vpop.f32.mrb[55].mxu1  ;;  %v9692_v44 = vsel %vm2146_vm2, %v9663_v11, 0 }
 0x71b   : > { %23916 = vst [vmem:[#allocation69_spill] sm:$0xff] %v20502_v12  ;;  %23917 = vst [vmem:[#allocation70_spill] sm:$0xff] %v20504_v23  ;;  %v9664_v12 = vld [vmem:[%s23262_s11 + $0x8] sm:$0xff]  ;;  %v20525_v11 = vand.u32 4294901760, %v9692_v44 }
 0x71c   : > { %v9695_v22 = vsel %vm2146_vm2, %v9664_v12, 0 }
 0x76d   : > { %v8775_v49 = vpop.f32.mrb[56].mxu0  ;;  %v9413_v45 = vpop.f32.mrb[56].mxu1 }
 0x76e   : > { %v20509_v13 = vadd.f32 %v8775_v49, %v8134_v59  ;;  %v20511_v6 = vadd.f32 %v9413_v45, %v8134_v59  ;;  %v8777_v50 = vpop.f32.mrb[57].mxu0  ;;  %v9415_v29 = vpop.f32.mrb[57].mxu1 }
 0x76f   : > { %v20517_v23 = vadd.f32 %v8777_v50, %v8134_v59  ;;  %v20519_v0 = vadd.f32 %v9415_v29, %v8134_v59 }
 0x770   : > { %v9455_v19 = vmin.f32 %v20509_v13, 20.0  ;;  %v9457_v49 = vmin.f32 %v20511_v6, 20.0  ;;  %vm9439_vm1 = vcmp.gt.f32.partialorder %v20509_v13, 20.0  ;;  %vm9441_vm3 = vcmp.gt.f32.partialorder %v20511_v6, 20.0 }
 0x771   : > { %v9456_v45 = vmin.f32 %v20517_v23, 20.0  ;;  %v9458_v32 = vmin.f32 %v20519_v0, 20.0  ;;  %v8782_v36 = vpop.f32.mrb[58].mxu0  ;;  %v9420_v41 = vpop.f32.mrb[58].mxu1  ;;  %vm9440_vm6 = vcmp.gt.f32.partialorder %v20517_v23, 20.0  ;;  %vm9442_vm7 = vcmp.gt.f32.partialorder %v20519_v0, 20.0 }
 0x772   : > { %v9471_v33 = vmul.f32 1.442695, %v9455_v19  ;;  %v9475_v50 = vmul.f32 1.442695, %v9457_v49  ;;  %v20528_v4 = vadd.f32 %v8782_v36, %v8139_v21  ;;  %v20530_v29 = vadd.f32 %v9420_v41, %v8139_v21  ;;  %v8784_v59 = vpop.f32.mrb[59].mxu0  ;;  %v9422_v30 = vpop.f32.mrb[59].mxu1 }
 0x773   : > { %v9473_v42 = vmul.f32 1.442695, %v9456_v45  ;;  %v9477_v60 = vmul.f32 1.442695, %v9458_v32  ;;  %v20532_v54 = vadd.f32 %v8784_v59, %v8139_v21  ;;  %v20534_v51 = vadd.f32 %v9422_v30, %v8139_v21 }
 0x774   : > { %16879 = vpow2.f32 %v9471_v33  ;;  %v9459_v2 = vmin.f32 %v20528_v4, 20.0  ;;  %v9461_v19 = vmin.f32 %v20530_v29, 20.0  ;;  %v20540_v49 = vsub.f32 %v9692_v44, %v20525_v11 }
 0x775   : > { %16881 = vpow2.f32 %v9475_v50  ;;  %v9460_v36 = vmin.f32 %v20532_v54, 20.0  ;;  %v8789_v12 = vpop.f32.mrb[60].mxu0  ;;  %v9427_v41 = vpop.f32.mrb[60].mxu1  ;;  %v9462_v45 = vmin.f32 %v20534_v51, 20.0  ;;  %v20543_v59 = vand.u32 4294901760, %v9695_v22 }
 0x776   : > { %16883 = vpow2.f32 %v9473_v42  ;;  %v9479_v32 = vmul.f32 1.442695, %v9459_v2  ;;  %v8791_v30 = vpop.f32.mrb[61].mxu0  ;;  %v9429_v21 = vpop.f32.mrb[61].mxu1  ;;  %v9483_v33 = vmul.f32 1.442695, %v9461_v19  ;;  %v20545_v57 = vadd.f32 %v8789_v12, %v8144_v61 }
 0x777   : > { %16885 = vpow2.f32 %v9477_v60  ;;  %v9481_v50 = vmul.f32 1.442695, %v9460_v36  ;;  %v20547_v16 = vadd.f32 %v9427_v41, %v8144_v61  ;;  %v20549_v27 = vadd.f32 %v8791_v30, %v8144_v61  ;;  %v9665_v2 = vld [vmem:[%s23262_s11 + $0x10] sm:$0xff] }
 0x778   : > { %16887 = vpow2.f32 %v9479_v32  ;;  %v9485_v42 = vmul.f32 1.442695, %v9462_v45  ;;  %v9463_v44 = vmin.f32 %v20545_v57, 20.0  ;;  %v20556_v60 = vand.u32 4294901760, %v20540_v49 }
 0x779   : > { %v8796_v63 = vpop.f32.mrb[62].mxu0  ;;  %v9434_v58 = vpop.f32.mrb[62].mxu1  ;;  %16889 = vpow2.f32 %v9483_v33  ;;  %v9465_v19 = vmin.f32 %v20547_v16, 20.0  ;;  %v20559_v36 = vadd.f32 %v9429_v21, %v8144_v61  ;;  %v20562_v32 = vsub.f32 %v9695_v22, %v20543_v59 }
 0x77a   : > { %23918 = vst [vmem:[#allocation71_spill] sm:$0xff] %v20556_v60  ;;  %v8798_v12 = vpop.f32.mrb[63].mxu0  ;;  %v9436_v41 = vpop.f32.mrb[63].mxu1  ;;  %16891 = vpow2.f32 %v9481_v50  ;;  %v9487_v30 = vmul.f32 1.442695, %v9463_v44  ;;  %v9698_v45 = vsel %vm2146_vm2, %v9665_v2, 0  ;;  %v9779_v33 = vsub.f32 %v20540_v49, %v20556_v60 }
 0x77b   : > { %v9491_v25 = vmul.f32 1.442695, %v9465_v19  ;;  %v9464_v62 = vmin.f32 %v20549_v27, 20.0  ;;  %16893 = vpow2.f32 %v9485_v42  ;;  %v9466_v61 = vmin.f32 %v20559_v36, 20.0 }
 0x77c   : > { %v20570_v21 = vand.u32 4294901760, %v20562_v32  ;;  %v20572_v26 = vand.u32 4294901760, %v9698_v45  ;;  %16895 = vpow2.f32 %v9487_v30  ;;  %v20582_v18 = vand.u32 4294901760, %v9779_v33  ;;  %v8149_v30 = vpop.permute.xlu1 %8148 }
 0x77d   : > { %16897 = vpow2.f32 %v9491_v25  ;;  %v9489_v42 = vmul.f32 1.442695, %v9464_v62  ;;  %v9493_v3 = vmul.f32 1.442695, %v9466_v61  ;;  %v20605_v47 = vadd.f32 %v8798_v12, %v8149_v30 }
 0x77e   : > { %v16880_v34 = vpop.eup %16879  ;;  %v20589_v25 = vsub.f32 %v9698_v45, %v20572_v26  ;;  %v20607_v39 = vadd.f32 %v9436_v41, %v8149_v30  ;;  %vm9443_vm5 = vcmp.gt.f32.partialorder %v20528_v4, 20.0  ;;  %vm9445_vm10 = vcmp.gt.f32.partialorder %v20530_v29, 20.0 }
 0x77f   : > { %v16882_v22 = vpop.eup %16881  ;;  %v9503_v50 = vadd.f32 1.0, %v16880_v34  ;;  %v9506_v2 = vmul.f32 -0.5, %v16880_v34  ;;  %v9509_v24 = vand.u32 2147483647, %v16880_v34  ;;  %vm9444_vm12 = vcmp.gt.f32.partialorder %v20532_v54, 20.0 }
 0x780   : > { %v20574_v44 = vpop.eup %16883  ;;  %v9521_v19 = vadd.f32 1.0, %v16882_v22  ;;  %v9524_v37 = vmul.f32 -0.5, %v16882_v22  ;;  %vm9446_vm14 = vcmp.gt.f32.partialorder %v20534_v51, 20.0 }
 0x781   : > { %v20579_v1 = vpop.eup %16885  ;;  %16899 = vlog2.f32 %v9503_v50  ;;  %v9512_v55 = vadd.f32 1.0, %v20574_v44  ;;  %v20592_v50 = vadd.f32 %v8796_v63, %v8149_v30  ;;  %v9507_v20 = vadd.f32 1.0, %v9506_v2 }
 0x782   : > { %v20584_v15 = vpop.eup %16887  ;;  %16901 = vlog2.f32 %v9521_v19  ;;  %v9530_v35 = vadd.f32 1.0, %v20579_v1  ;;  %v9527_v19 = vand.u32 2147483647, %v16882_v22  ;;  %v9525_v62 = vadd.f32 1.0, %v9524_v37 }
 0x783   : > { %16903 = vlog2.f32 %v9512_v55  ;;  %v20597_v33 = vpop.eup %16889  ;;  %v9515_v45 = vmul.f32 -0.5, %v20574_v44  ;;  %v9539_v55 = vadd.f32 1.0, %v20584_v15  ;;  %v20603_v63 = vadd.f32 %v9434_v58, %v8149_v30 }
 0x784   : > { %16905 = vpow2.f32 %v9489_v42  ;;  %v20599_v61 = vpop.eup %16891  ;;  %v9518_v2 = vand.u32 2147483647, %v20574_v44  ;;  %v9533_v42 = vmul.f32 -0.5, %v20579_v1  ;;  %v9557_v37 = vadd.f32 1.0, %v20597_v33 }
 0x785   : > { %16907 = vlog2.f32 %v9530_v35  ;;  %v20609_v28 = vpop.eup %16893  ;;  %v9508_v35 = vmul.f32 %v16880_v34, %v9507_v20  ;;  %vm20615_vm15 = vcmp.lt.f32.partialorder %v9509_v24, 0.0004427343  ;;  %vm20619_vm0 = vcmp.lt.f32.partialorder %v9527_v19, 0.0004427343 }
 0x786   : > { %16909 = vpow2.f32 %v9493_v3  ;;  %v9548_v12 = vadd.f32 1.0, %v20599_v61  ;;  %v20624_v41 = vpop.eup %16895  ;;  %v9526_v30 = vmul.f32 %v16882_v22, %v9525_v62  ;;  %v9516_v17 = vadd.f32 1.0, %v9515_v45 }
 0x787   : > { %16911 = vlog2.f32 %v9539_v55  ;;  %v9542_v55 = vmul.f32 -0.5, %v20584_v15  ;;  %v20627_v38 = vpop.eup %16897  ;;  %v9536_v24 = vand.u32 2147483647, %v20579_v1  ;;  %v9560_v20 = vmul.f32 -0.5, %v20597_v33 }
 0x788   : > { %16913 = vlog2.f32 %v9557_v37  ;;  %v9566_v34 = vadd.f32 1.0, %v20609_v28  ;;  %vm20633_vm4 = vcmp.lt.f32.partialorder %v9518_v2, 0.0004427343  ;;  %v9534_v22 = vadd.f32 1.0, %v9533_v42 }
 0x789   : > { %16915 = vlog2.f32 %v9548_v12  ;;  %v9545_v62 = vand.u32 2147483647, %v20584_v15  ;;  %v9551_v45 = vmul.f32 -0.5, %v20599_v61  ;;  %v9569_v56 = vmul.f32 -0.5, %v20609_v28 }
 0x78a   : > { %16917 = vlog2.f32 %v9566_v34  ;;  %v9575_v12 = vadd.f32 1.0, %v20624_v41  ;;  %v9517_v2 = vmul.f32 %v20574_v44, %v9516_v17  ;;  %v9543_v42 = vadd.f32 1.0, %v9542_v55 }
 0x78b   : > { %v16900_v19 = vpop.eup %16899  ;;  %v9563_v8 = vand.u32 2147483647, %v20597_v33  ;;  %v9554_v53 = vand.u32 2147483647, %v20599_v61  ;;  %v9535_v14 = vmul.f32 %v20579_v1, %v9534_v22  ;;  %vm20652_vm8 = vcmp.lt.f32.partialorder %v9536_v24, 0.0004427343 }
 0x78c   : > { %v16902_v37 = vpop.eup %16901  ;;  %v9505_v43 = vmul.f32 0.6931472, %v16900_v19  ;;  %v9561_v19 = vadd.f32 1.0, %v9560_v20  ;;  %16919 = vlog2.f32 %v9575_v12  ;;  %v9552_v44 = vadd.f32 1.0, %v9551_v45 }
 0x78d   : > { %v16904_v48 = vpop.eup %16903  ;;  %v9523_v46 = vmul.f32 0.6931472, %v16902_v37  ;;  %vm20660_vm9 = vcmp.lt.f32.partialorder %v9545_v62, 0.0004427343  ;;  %v9544_v1 = vmul.f32 %v20584_v15, %v9543_v42  ;;  %vm20671_vm11 = vcmp.lt.f32.partialorder %v9563_v8, 0.0004427343 }
 0x78e   : > { %v20646_v7 = vpop.eup %16905  ;;  %v9511_v34 = vsel %vm20615_vm15, %v9508_v35, %v9505_v43  ;;  %v9514_v37 = vmul.f32 0.6931472, %v16904_v48  ;;  %v9570_v35 = vadd.f32 1.0, %v9569_v56  ;;  %v9562_v56 = vmul.f32 %v20597_v33, %v9561_v19 }
 0x78f   : > { %v16908_v9 = vpop.eup %16907  ;;  %v9529_v52 = vsel %vm20619_vm0, %v9526_v30, %v9523_v46  ;;  %v20667_v48 = vsel %vm9439_vm1, %v20509_v13, %v9511_v34  ;;  %vm20678_vm13 = vcmp.lt.f32.partialorder %v9554_v53, 0.0004427343  ;;  %v9578_v15 = vmul.f32 -0.5, %v20624_v41 }
 0x790   : > { %v20656_v55 = vpop.eup %16909  ;;  %v9532_v3 = vmul.f32 0.6931472, %v16908_v9  ;;  %v9572_v9 = vand.u32 2147483647, %v20609_v28  ;;  %v20687_v8 = vsel %vm9441_vm3, %v20511_v6, %v9529_v52  ;;  %v9520_v30 = vsel %vm20633_vm4, %v9517_v2, %v9514_v37 }
 0x791   : > { %v16912_v20 = vpop.eup %16911  ;;  %v9553_v53 = vmul.f32 %v20599_v61, %v9552_v44  ;;  %v9705_v62 = vand.u32 4294901760, %v20667_v48  ;;  %v9571_v12 = vmul.f32 %v20609_v28, %v9570_v35  ;;  %v9593_v42 = vadd.f32 1.0, %v20627_v38 }
 0x792   : > { %v9541_v46 = vmul.f32 0.6931472, %v16912_v20  ;;  %v16914_v13 = vpop.eup %16913  ;;  %v9538_v33 = vsel %vm20652_vm8, %v9535_v14, %v9532_v3  ;;  %v9581_v14 = vand.u32 2147483647, %v20624_v41  ;;  %v10395_v2 = vand.u32 4294901760, %v20687_v8 }
 0x793   : > { %v16916_v22 = vpop.eup %16915  ;;  %v9559_v10 = vmul.f32 0.6931472, %v16914_v13  ;;  %v9648_v34 = vsel %vm9440_vm6, %v20517_v23, %v9520_v30  ;;  %v9650_v28 = vsel %vm9442_vm7, %v20519_v0, %v9538_v33  ;;  %v9579_v19 = vadd.f32 1.0, %v9578_v15 }
 0x794   : > { %v9547_v45 = vsel %vm20660_vm9, %v9544_v1, %v9541_v46  ;;  %v9550_v6 = vmul.f32 0.6931472, %v16916_v22  ;;  %v16918_v61 = vpop.eup %16917  ;;  %vm9447_vm1 = vcmp.gt.f32.partialorder %v20545_v57, 20.0  ;;  %v20721_v23 = vsub.f32 %v20667_v48, %v9705_v62 }
 0x795   : > { %v20702_v52 = vsel %vm9443_vm5, %v20528_v4, %v9547_v45  ;;  %v9565_v4 = vsel %vm20671_vm11, %v9562_v56, %v9559_v10  ;;  %v9568_v44 = vmul.f32 0.6931472, %v16918_v61  ;;  %vm9573_vm15 = vcmp.lt.f32.partialorder %v9572_v9, 0.0004427343 }
 0x796   : > { %v9709_v37 = vand.u32 4294901760, %v20702_v52  ;;  %v9556_v17 = vsel %vm20678_vm13, %v9553_v53, %v9550_v6  ;;  %v16920_v3 = vpop.eup %16919  ;;  %16921 = vlog2.f32 %v9593_v42  ;;  %v9596_v0 = vmul.f32 -0.5, %v20627_v38 }
 0x797   : > { %v9574_v43 = vsel %vm9573_vm15, %v9571_v12, %v9568_v44  ;;  %v9577_v35 = vmul.f32 0.6931472, %v16920_v3  ;;  %vm20724_vm0 = vcmp.lt.f32.partialorder %v9581_v14, 0.0004427343  ;;  %v9467_v1 = vmin.f32 %v20592_v50, 20.0 }
 0x798   : > { %v9703_v24 = vand.u32 4294901760, %v9648_v34  ;;  %v10393_v46 = vand.u32 4294901760, %v9650_v28  ;;  %v9653_v56 = vsel %vm9445_vm10, %v20530_v29, %v9565_v4  ;;  %v9652_v9 = vsel %vm9444_vm12, %v20532_v54, %v9556_v17 }
 0x799   : > { %v20738_v58 = vsub.f32 %v20687_v8, %v10395_v2  ;;  %v20743_v15 = vsub.f32 %v20702_v52, %v9709_v37  ;;  %v9654_v13 = vsel %vm9446_vm14, %v20534_v51, %v9574_v43  ;;  %v9580_v29 = vmul.f32 %v20624_v41, %v9579_v19 }
 0x79a   : > { %v23364_v30 = vand.u32 4294901760, %v20721_v23  ;;  %v9597_v33 = vadd.f32 1.0, %v9596_v0  ;;  %v9599_v54 = vand.u32 2147483647, %v20627_v38  ;;  %v9584_v53 = vadd.f32 1.0, %v20646_v7 }
 0x79b   : > { %v10399_v22 = vand.u32 4294901760, %v9653_v56  ;;  %v9707_v45 = vand.u32 4294901760, %v9652_v9  ;;  %v9583_v12 = vsel %vm20724_vm0, %v9580_v29, %v9577_v35  ;;  %v9602_v42 = vadd.f32 1.0, %v20656_v55 }
 0x79c   : > { %v20755_v10 = vsub.f32 %v9648_v34, %v9703_v24  ;;  %v20757_v6 = vsub.f32 %v9650_v28, %v10393_v46  ;;  %v10397_v51 = vand.u32 4294901760, %v9654_v13  ;;  %16923 = vlog2.f32 %v9584_v53 }
 0x79d   : > { %v23363_v41 = vand.u32 4294901760, %v20743_v15  ;;  %v9587_v14 = vmul.f32 -0.5, %v20646_v7  ;;  %16925 = vlog2.f32 %v9602_v42  ;;  %v9495_v61 = vmul.f32 1.442695, %v9467_v1 }
 0x79e   : > { %v20764_v19 = vsel %vm9447_vm1, %v20545_v57, %v9583_v12  ;;  %v20767_v4 = vmul.f32 %v20627_v38, %v9597_v33  ;;  %v9605_v34 = vmul.f32 -0.5, %v20656_v55  ;;  %v9469_v28 = vmin.f32 %v20603_v63, 20.0 }
 0x79f   : > { %v20771_v17 = vsub.f32 %v9653_v56, %v10399_v22  ;;  %v20773_v44 = vsub.f32 %v9652_v9, %v9707_v45  ;;  %vm20775_vm3 = vcmp.lt.f32.partialorder %v9599_v54, 0.0004427343  ;;  %16927 = vpow2.f32 %v9495_v61 }
 0x7a0   : > { %v16922_v0 = vpop.eup %16921  ;;  %v20779_v43 = vsub.f32 %v9654_v13, %v10397_v51  ;;  %v9590_v57 = vand.u32 2147483647, %v20646_v7  ;;  %v9499_v38 = vmul.f32 1.442695, %v9469_v28  ;;  %v9468_v35 = vmin.f32 %v20605_v47, 20.0 }
 0x7a1   : > { %v23366_v20 = vand.u32 4294901760, %v20764_v19  ;;  %v9588_v1 = vadd.f32 1.0, %v9587_v14  ;;  %v9470_v56 = vmin.f32 %v20607_v39, 20.0  ;;  %v20785_v9 = vpack.c.bf16 %v9707_v45, %v9703_v24 }
 0x7a2   : > { %vm9449_vm4 = vcmp.gt.f32.partialorder %v20547_v16, 20.0  ;;  %v9606_v29 = vadd.f32 1.0, %v9605_v34  ;;  %16929 = vpow2.f32 %v9499_v38  ;;  %v9497_v33 = vmul.f32 1.442695, %v9468_v35 }
 0x7a3   : > { %v20788_v54 = vpack.c.bf16 %v10397_v51, %v10393_v46  ;;  %v9595_v13 = vmul.f32 0.6931472, %v16922_v0  ;;  %vm9448_vm5 = vcmp.gt.f32.partialorder %v20549_v27, 20.0  ;;  %v9501_v53 = vmul.f32 1.442695, %v9470_v56  ;;  %15089 = vmatprep.subr.bf16.mxu0 %v20785_v9 }
 0x7a4   : > { %v20796_v12 = vpack.c.bf16 %v9709_v37, %v9705_v62  ;;  %v20800_v24 = vpack.c.bf16 %v10399_v22, %v10395_v2  ;;  %16931 = vpow2.f32 %v9497_v33  ;;  %v23372_v46 = vand.u32 4294901760, %v20755_v10 }
 0x7a5   : > { %15137 = vmatprep.subr.bf16.mxu1 %v20788_v54  ;;  %v23370_v45 = vand.u32 4294901760, %v20773_v44  ;;  %v23369_v42 = vand.u32 4294901760, %v20757_v6  ;;  %vm20806_vm6 = vcmp.lt.f32.partialorder %v9590_v57, 0.0004427343  ;;  %v9608_v48 = vand.u32 2147483647, %v20656_v55 }
 0x7a6   : > { %23937 = vst [vmem:[#allocation72_spill] sm:$0xff] %v20796_v12  ;;  %23938 = vst [vmem:[#allocation73_spill] sm:$0xff] %v20800_v24  ;;  %16933 = vpow2.f32 %v9501_v53  ;;  %15091 = vmatpush1.bf16.msra.mxu0 %v20796_v12  ;;  %15139 = vmatpush1.bf16.msra.mxu1 %v20800_v24  ;;  %v23368_v8 = vand.u32 4294901760, %v20779_v43  ;;  %v16924_v62 = vpop.eup %16923  ;;  %v9823_v52 = vsub.f32 %v20755_v10, %v23372_v46  ;;  %vm9450_vm8 = vcmp.gt.f32.partialorder %v20559_v36, 20.0 }
 0x7a7   : > { %v9835_v2 = vsub.f32 %v20773_v44, %v23370_v45  ;;  %v10513_v37 = vsub.f32 %v20757_v6, %v23369_v42  ;;  %v9841_v22 = vsub.f32 %v20743_v15, %v23363_v41  ;;  %v16926_v14 = vpop.eup %16925  ;;  %v9586_v61 = vmul.f32 0.6931472, %v16924_v62 }
 0x7a8   : > { %v9589_v34 = vmul.f32 %v20646_v7, %v9588_v1  ;;  %v10525_v28 = vsub.f32 %v20779_v43, %v23368_v8  ;;  %v9829_v0 = vsub.f32 %v20721_v23, %v23364_v30  ;;  %v9601_v57 = vsel %vm20775_vm3, %v20767_v4, %v9595_v13 }
 0x7a9   : > { %v9604_v38 = vmul.f32 0.6931472, %v16926_v14  ;;  %v9607_v35 = vmul.f32 %v20656_v55, %v9606_v29  ;;  %v9836_v56 = vand.u32 4294901760, %v9835_v2  ;;  %v16928_v33 = vpop.eup %16927  ;;  %vm20839_vm7 = vcmp.lt.f32.partialorder %v9608_v48, 0.0004427343 }
 0x7aa   : > { %v9592_v7 = vsel %vm20806_vm6, %v9589_v34, %v9586_v61  ;;  %v9824_v53 = vand.u32 4294901760, %v9823_v52  ;;  %v10526_v62 = vand.u32 4294901760, %v10525_v28  ;;  %v9611_v30 = vadd.f32 1.0, %v16928_v33 }
 0x7ab   : > { %v9610_v41 = vsel %vm20839_vm7, %v9607_v35, %v9604_v38  ;;  %v10514_v3 = vand.u32 4294901760, %v10513_v37  ;;  %v9842_v4 = vand.u32 4294901760, %v9841_v22  ;;  %v20848_v55 = vsel %vm9449_vm4, %v20547_v16, %v9601_v57 }
 0x7ac   : > { %v20851_v29 = vpack.c.bf16 %v9836_v56, %v9824_v53  ;;  %v9830_v13 = vand.u32 4294901760, %v9829_v0  ;;  %v20853_v51 = vpop.eup %16929  ;;  %v20858_v48 = vsel %vm9448_vm5, %v20549_v27, %v9592_v7  ;;  %16935 = vlog2.f32 %v9611_v30 }
 0x7ad   : > { %v9614_v52 = vmul.f32 -0.5, %v16928_v33  ;;  %v20860_v2 = vpack.c.bf16 %v10526_v62, %v10514_v3  ;;  %v10518_v37 = vand.u32 4294901760, %v20738_v58  ;;  %v20864_v16 = vsel %vm9450_vm8, %v20559_v36, %v9610_v41 }
 0x7ae   : > { %v9629_v22 = vadd.f32 1.0, %v20853_v51  ;;  %v20868_v14 = vand.u32 4294901760, %v20595_v5  ;;  %v16932_v61 = vpop.eup %16931  ;;  %v10530_v34 = vand.u32 4294901760, %v20771_v17  ;;  %v20874_v27 = vsub.f32 %v20764_v19, %v23366_v20 }
 0x7af   : > { %v23365_v30 = vand.u32 4294901760, %v20848_v55  ;;  %v20877_v28 = vpack.c.bf16 %v9842_v4, %v9830_v13  ;;  %v23367_v36 = vand.u32 4294901760, %v20858_v48  ;;  %v9617_v41 = vand.u32 2147483647, %v16928_v33 }
 0x7b0   : > { %v16934_v0 = vpop.eup %16933  ;;  %16937 = vlog2.f32 %v9629_v22  ;;  %v9620_v57 = vadd.f32 1.0, %v16932_v61  ;;  %v23371_v38 = vand.u32 4294901760, %v20864_v16  ;;  %v9615_v35 = vadd.f32 1.0, %v9614_v52 }
 0x7b1   : > { %v9638_v56 = vadd.f32 1.0, %v16934_v0  ;;  %v20882_v7 = vand.u32 4294901760, %v20589_v25  ;;  %vm9451_vm9 = vcmp.gt.f32.partialorder %v20592_v50, 20.0  ;;  %v10519_v1 = vsub.f32 %v20738_v58, %v10518_v37 }
 0x7b2   : > { %16939 = vlog2.f32 %v9620_v57  ;;  %v20888_v53 = vsub.f32 %v20595_v5, %v20868_v14  ;;  %v9632_v3 = vmul.f32 -0.5, %v20853_v51  ;;  %v9623_v4 = vmul.f32 -0.5, %v16932_v61 }
 0x7b3   : > { %16941 = vlog2.f32 %v9638_v56  ;;  %v20895_v13 = vsub.f32 %v20848_v55, %v23365_v30  ;;  %v20900_v52 = vsub.f32 %v20858_v48, %v23367_v36  ;;  %vm20902_vm10 = vcmp.lt.f32.partialorder %v9617_v41, 0.0004427343 }
 0x7b4   : > { %v10531_v5 = vsub.f32 %v20771_v17, %v10530_v34  ;;  %v20910_v57 = vsub.f32 %v20864_v16, %v23371_v38  ;;  %v9616_v56 = vmul.f32 %v16928_v33, %v9615_v35  ;;  %vm9453_vm11 = vcmp.gt.f32.partialorder %v20603_v63, 20.0 }
 0x7b5   : > { %v9635_v30 = vand.u32 2147483647, %v20853_v51  ;;  %v9641_v62 = vmul.f32 -0.5, %v16934_v0  ;;  %v10520_v20 = vand.u32 4294901760, %v10519_v1  ;;  %v9633_v45 = vadd.f32 1.0, %v9632_v3 }
 0x7b6   : > { %v10532_v36 = vand.u32 4294901760, %v10531_v5  ;;  %v16936_v42 = vpop.eup %16935  ;;  %vm9452_vm12 = vcmp.gt.f32.partialorder %v20605_v47, 20.0  ;;  %v9624_v38 = vadd.f32 1.0, %v9623_v4  ;;  %v9626_v46 = vand.u32 2147483647, %v16932_v61 }
 0x7b7   : > { %v9613_v35 = vmul.f32 0.6931472, %v16936_v42  ;;  %vm9454_vm13 = vcmp.gt.f32.partialorder %v20607_v39, 20.0  ;;  %v9644_v1 = vand.u32 2147483647, %v16934_v0  ;;  %v9642_v40 = vadd.f32 1.0, %v9641_v62 }
 0x7b8   : > { %v20922_v5 = vpack.c.bf16 %v10532_v36, %v10520_v20  ;;  %v23945_v8 = vand.u32 4294901760, %v20755_v10  ;;  %v23946_v3 = vand.u32 4294901760, %v20773_v44  ;;  %v23947_v4 = vand.u32 4294901760, %v20757_v6 }
 0x7b9   : > { %v23948_v33 = vand.u32 4294901760, %v20779_v43  ;;  %v23949_v24 = vand.u32 4294901760, %v20721_v23  ;;  %v23950_v20 = vand.u32 4294901760, %v20743_v15  ;;  %v10542_v62 = vand.u32 4294901760, %v20895_v13 }
 0x7ba   : > { %v20930_v60 = vpack.c.bf16 %v23946_v3, %v23945_v8  ;;  %v16938_v41 = vpop.eup %16937  ;;  %v9619_v12 = vsel %vm20902_vm10, %v9616_v56, %v9613_v35  ;;  %vm20947_vm14 = vcmp.lt.f32.partialorder %v9635_v30, 0.0004427343  ;;  %v20951_v3 = vpack.c.bf16 %v10530_v34, %v10518_v37 }
 0x7bb   : > { %v20936_v42 = vpack.c.bf16 %v23948_v33, %v23947_v4  ;;  %v20942_v36 = vpack.c.bf16 %v23950_v20, %v23949_v24  ;;  %v9659_v33 = vsel %vm9451_vm9, %v20592_v50, %v9619_v12  ;;  %v9631_v4 = vmul.f32 0.6931472, %v16938_v41 }
 0x7bc   : > { %v9634_v24 = vmul.f32 %v20853_v51, %v9633_v45  ;;  %vm20957_vm1 = vcmp.lt.f32.partialorder %v9626_v46, 0.0004427343  ;;  %v9717_v22 = vand.u32 4294901760, %v9659_v33  ;;  %v9625_v56 = vmul.f32 %v16932_v61, %v9624_v38 }
 0x7bd   : > { %23951 = vst [vmem:[#allocation74_spill] sm:$0xff] %v20942_v36  ;;  %v16940_v36 = vpop.eup %16939  ;;  %vm20961_vm15 = vcmp.lt.f32.partialorder %v9644_v1, 0.0004427343  ;;  %v9846_v37 = vand.u32 4294901760, %v20900_v52  ;;  %v9643_v41 = vmul.f32 %v16934_v0, %v9642_v40  ;;  %v10536_v46 = vand.u32 4294901760, %v20910_v57 }
 0x7be   : > { %v16942_v34 = vpop.eup %16941  ;;  %v9637_v50 = vsel %vm20947_vm14, %v9634_v24, %v9631_v4  ;;  %v9622_v12 = vmul.f32 0.6931472, %v16940_v36  ;;  %v20969_v45 = vsub.f32 %v9659_v33, %v9717_v22  ;;  %v23958_v38 = vand.u32 4294901760, %v20764_v19 }
 0x7bf   : > { %v9661_v51 = vsel %vm9453_vm11, %v20603_v63, %v9637_v50  ;;  %v9640_v61 = vmul.f32 0.6931472, %v16942_v34  ;;  %v23959_v36 = vand.u32 4294901760, %v20874_v27  ;;  %v10543_v0 = vsub.f32 %v20895_v13, %v10542_v62 }
 0x7c0   : > { %v20976_v35 = vpack.c.bf16 %v9717_v22, %v23958_v38  ;;  %v10407_v1 = vand.u32 4294901760, %v9661_v51  ;;  %v9628_v8 = vsel %vm20957_vm1, %v9625_v56, %v9622_v12  ;;  %v9864_v33 = vand.u32 4294901760, %v20969_v45 }
 0x7c1   : > { %v9853_v40 = vsub.f32 %v20874_v27, %v23959_v36  ;;  %v9660_v63 = vsel %vm9452_vm12, %v20605_v47, %v9628_v8  ;;  %v9646_v19 = vsel %vm20961_vm15, %v9643_v41, %v9640_v61  ;;  %v15110_v4 = vpack.c.bf16 %v20969_v45, %v20874_v27 }
 0x7c2   : > { %v20992_v24 = vsub.f32 %v9661_v51, %v10407_v1  ;;  %v9715_v20 = vand.u32 4294901760, %v9660_v63  ;;  %v9662_v22 = vsel %vm9454_vm13, %v20607_v39, %v9646_v19  ;;  %v23960_v56 = vand.u32 4294901760, %v20848_v55 }
 0x7c3   : > { %v10405_v50 = vand.u32 4294901760, %v9662_v22  ;;  %v9847_v47 = vsub.f32 %v20900_v52, %v9846_v37  ;;  %v9865_v30 = vsub.f32 %v20969_v45, %v9864_v33  ;;  %v23961_v12 = vmov %v23959_v36 }
 0x7c4   : > { %v20999_v34 = vpack.c.bf16 %v10407_v1, %v23960_v56  ;;  %v21005_v41 = vpack.c.bf16 %v9864_v33, %v23961_v12  ;;  %v10554_v51 = vand.u32 4294901760, %v20992_v24  ;;  %v21008_v61 = vsub.f32 %v9660_v63, %v9715_v20 }
 0x7c5   : > { %v23962_v38 = vand.u32 4294901760, %v20858_v48  ;;  %v15158_v55 = vpack.c.bf16 %v20992_v24, %v20895_v13  ;;  %v21016_v1 = vsub.f32 %v9662_v22, %v10405_v50  ;;  %v23963_v8 = vand.u32 4294901760, %v20864_v16 }
 0x7c6   : > { %v9854_v19 = vand.u32 4294901760, %v9853_v40  ;;  %v9866_v33 = vand.u32 4294901760, %v9865_v30  ;;  %v9858_v63 = vand.u32 4294901760, %v21008_v61  ;;  %v10555_v56 = vsub.f32 %v20992_v24, %v10554_v51 }
 0x7c7   : > { %v21012_v39 = vpack.c.bf16 %v9715_v20, %v23962_v38  ;;  %v21020_v36 = vpack.c.bf16 %v10405_v50, %v23963_v8  ;;  %v15108_v48 = vpack.c.bf16 %v21008_v61, %v20900_v52  ;;  %v21027_v20 = vpack.c.bf16 %v10554_v51, %v10542_v62 }
 0x7c8   : > { %v10537_v16 = vsub.f32 %v20910_v57, %v10536_v46  ;;  %v10548_v40 = vand.u32 4294901760, %v21016_v1  ;;  %v15102_v22 = vpack.c.bf16 %v9866_v33, %v9854_v19  ;;  %v15156_v50 = vpack.c.bf16 %v21016_v1, %v20910_v57 }
 0x7c9   : > { %15093 = vmatprep.subr.bf16.mxu0 %v21012_v39  ;;  %15141 = vmatprep.subr.bf16.mxu1 %v21020_v36  ;;  %v9859_v52 = vsub.f32 %v21008_v61, %v9858_v63  ;;  %v10544_v62 = vand.u32 4294901760, %v10543_v0  ;;  %v10556_v30 = vand.u32 4294901760, %v10555_v56  ;;  %v21038_v12 = vpack.c.bf16 %v9858_v63, %v9846_v37 }
 0x7ca   : > { %15095 = vmatpush1.bf16.msra.mxu0 %v20976_v35  ;;  %15143 = vmatpush1.bf16.msra.mxu1 %v20999_v34  ;;  %v10549_v51 = vsub.f32 %v21016_v1, %v10548_v40  ;;  %v21042_v38 = vpack.c.bf16 %v10548_v40, %v10536_v46  ;;  %v23964_v57 = vsub.f32 %v20562_v32, %v20570_v21  ;;  %v9848_v19 = vand.u32 4294901760, %v9847_v47 }
 0x7cb   : > { %15097 = vmatprep.subr.bf16.mxu0 %v20851_v29  ;;  %15145 = vmatprep.subr.bf16.mxu1 %v20860_v2  ;;  %v9860_v29 = vand.u32 4294901760, %v9859_v52  ;;  %v15150_v33 = vpack.c.bf16 %v10556_v30, %v10544_v62  ;;  %v10538_v37 = vand.u32 4294901760, %v10537_v16  ;;  %v9801_v2 = vsub.f32 %v20589_v25, %v20882_v7 }
 0x7cc   : > { %v9791_v8 = vand.u32 4294901760, %v23964_v57  ;;  %v10550_v0 = vand.u32 4294901760, %v10549_v51  ;;  %v21053_v46 = vand.u32 4294901760, %v20888_v53  ;;  %v23965_v1 = vpack.c.bf16 %v20773_v44, %v20755_v10 }
 0x7cd   : > { %9781 = vmatmul.mubr.f32.vlgmr.msra.gmra.mrb[64].mxu0 %v20582_v18  ;;  %10471 = vmatmul.mubr.f32.vlgmr.msra.gmra.mrb[64].mxu1 %v20582_v18  ;;  %v15100_v61 = vpack.c.bf16 %v9860_v29, %v9848_v19  ;;  %v9802_v18 = vand.u32 4294901760, %v9801_v2  ;;  %v23967_v10 = vpack.c.bf16 %v20743_v15, %v20721_v23  ;;  %v23969_v23 = vld [vmem:[#allocation72_spill] sm:$0xff]  ;;  %v11309_v2 = vld [vmem:[%s23264_s13 + $0x10] sm:$0xff] }
 0x7ce   : > { %15099 = vmatpush1.bf16.msra.mxu0 %v20877_v28  ;;  %15147 = vmatpush1.bf16.msra.mxu1 %v20922_v5  ;;  %v15148_v47 = vpack.c.bf16 %v10550_v0, %v10538_v37  ;;  %v9812_v28 = vsub.f32 %v20888_v53, %v21053_v46  ;;  %v23966_v5 = vpack.c.bf16 %v20779_v43, %v20757_v6  ;;  %v11308_v43 = vld [vmem:[%s23264_s13 + $0x8] sm:$0xff] }
 0x7cf   : > { %9786 = vmatprep.mubr.f32.mxu0 %v23686_v31  ;;  %10476 = vmatprep.mubr.f32.mxu1 %v23686_v31  ;;  %v23968_v6 = vpack.c.bf16 %v20771_v17, %v20738_v58  ;;  %v23970_v58 = vld [vmem:[#allocation73_spill] sm:$0xff] }
 0x7d0   : > { %15101 = vmatprep.subr.bf16.mxu0 %v15100_v61  ;;  %15149 = vmatprep.subr.bf16.mxu1 %v15148_v47  ;;  %v9813_v63 = vand.u32 4294901760, %v9812_v28 }
 0x7d1   : > { %9792 = vmatmul.mubr.f32.gmra.mrb[66].mxu0 %v9791_v8  ;;  %10482 = vmatmul.mubr.f32.gmra.mrb[66].mxu1 %v9791_v8 }
 0x7d2   : > { %15103 = vmatpush1.bf16.msra.mxu0 %v15102_v22  ;;  %15151 = vmatpush1.bf16.msra.mxu1 %v15150_v33 }
 0x7d3   : > { %15105 = vmatprep.subr.bf16.mxu0 %v23965_v1  ;;  %15153 = vmatprep.subr.bf16.mxu1 %v23966_v5 }
 0x7d4   : > { %9797 = vmatprep.mubr.f32.mxu0 %v23686_v31  ;;  %10487 = vmatprep.mubr.f32.mxu1 %v23686_v31 }
 0x7d5   : > { %9803 = vmatmul.mubr.f32.gmra.mrb[68].mxu0 %v9802_v18  ;;  %10493 = vmatmul.mubr.f32.gmra.mrb[68].mxu1 %v9802_v18 }
 0x7d6   : > { %9808 = vmatprep.mubr.f32.mxu0 %v23686_v31  ;;  %10498 = vmatprep.mubr.f32.mxu1 %v23686_v31 }
 0x7d9   : > { %9814 = vmatmul.mubr.f32.gmra.mrb[70].mxu0 %v9813_v63  ;;  %10504 = vmatmul.mubr.f32.gmra.mrb[70].mxu1 %v9813_v63 }
 0x7da   : > { %9924 = vmatprep.mubr.f32.mxu0 %v23686_v31  ;;  %10614 = vmatprep.mubr.f32.mxu1 %v23686_v31 }
 0x7dd   : > { %9926 = vmatmul.mubr.f32.vlgmr.msra.gmra.mrb[64].mxu0 %v20525_v11  ;;  %10616 = vmatmul.mubr.f32.vlgmr.msra.gmra.mrb[64].mxu1 %v20525_v11 }
 0x7de   : > { %15107 = vmatpush1.bf16.msra.mxu0 %v23967_v10  ;;  %15155 = vmatpush1.bf16.msra.mxu1 %v23968_v6 }
 0x7df   : > { %15109 = vmatprep.subr.bf16.mxu0 %v15108_v48  ;;  %15157 = vmatprep.subr.bf16.mxu1 %v15156_v50 }
 0x7e0   : > { %9931 = vmatprep.mubr.f32.mxu0 %v23686_v31  ;;  %10621 = vmatprep.mubr.f32.mxu1 %v23686_v31 }
 0x7e1   : > { %9933 = vmatmul.mubr.f32.gmra.mrb[66].mxu0 %v20543_v59  ;;  %10623 = vmatmul.mubr.f32.gmra.mrb[66].mxu1 %v20543_v59 }
 0x7e2   : > { %15111 = vmatpush1.bf16.msra.mxu0 %v15110_v4  ;;  %15159 = vmatpush1.bf16.msra.mxu1 %v15158_v55 }
 0x7e3   : > { %15113 = vmatprep.subr.bf16.mxu0 %v20785_v9  ;;  %15161 = vmatprep.subr.bf16.mxu1 %v20788_v54 }
 0x7e4   : > { %9938 = vmatprep.mubr.f32.mxu0 %v23686_v31  ;;  %10628 = vmatprep.mubr.f32.mxu1 %v23686_v31 }
 0x7e5   : > { %9940 = vmatmul.mubr.f32.gmra.mrb[68].mxu0 %v20572_v26  ;;  %10630 = vmatmul.mubr.f32.gmra.mrb[68].mxu1 %v20572_v26 }
 0x7e6   : > { %9945 = vmatprep.mubr.f32.mxu0 %v23686_v31  ;;  %10635 = vmatprep.mubr.f32.mxu1 %v23686_v31 }
 0x7e9   : > { %9947 = vmatmul.mubr.f32.gmra.mrb[70].mxu0 %v20868_v14  ;;  %10637 = vmatmul.mubr.f32.gmra.mrb[70].mxu1 %v20868_v14 }
 0x7ea   : > { %10033 = vmatprep.mubr.f32.mxu0 %v23686_v31  ;;  %10723 = vmatprep.mubr.f32.mxu1 %v23686_v31 }
 0x7ed   : > { %10036 = vmatmul.mubr.f32.vlgmr.msra.gmra.mrb[64].mxu0 %v20540_v49  ;;  %10726 = vmatmul.mubr.f32.vlgmr.msra.gmra.mrb[64].mxu1 %v20540_v49  ;;  %v23971_v49 = vld [vmem:[#allocation71_spill] sm:$0xff] }
 0x7ee   : > { %15115 = vmatpush1.bf16.msra.mxu0 %v23969_v23  ;;  %15163 = vmatpush1.bf16.msra.mxu1 %v23970_v58 }
 0x7ef   : > { %15117 = vmatprep.subr.bf16.mxu0 %v21012_v39  ;;  %15165 = vmatprep.subr.bf16.mxu1 %v21020_v36 }
 0x7f0   : > { %10041 = vmatprep.mubr.f32.mxu0 %v23686_v31  ;;  %10731 = vmatprep.mubr.f32.mxu1 %v23686_v31 }
 0x7f1   : > { %10044 = vmatmul.mubr.f32.gmra.mrb[66].mxu0 %v20562_v32  ;;  %10734 = vmatmul.mubr.f32.gmra.mrb[66].mxu1 %v20562_v32 }
 0x7f2   : > { %15119 = vmatpush1.bf16.msra.mxu0 %v20976_v35  ;;  %15167 = vmatpush1.bf16.msra.mxu1 %v20999_v34 }
 0x7f3   : > { %15121 = vmatprep.subr.bf16.mxu0 %v20930_v60  ;;  %15169 = vmatprep.subr.bf16.mxu1 %v20936_v42  ;;  %v23972_v60 = vld [vmem:[#allocation74_spill] sm:$0xff] }
 0x7f4   : > { %10049 = vmatprep.mubr.f32.mxu0 %v23686_v31  ;;  %10739 = vmatprep.mubr.f32.mxu1 %v23686_v31 }
 0x7f5   : > { %10052 = vmatmul.mubr.f32.gmra.mrb[68].mxu0 %v20589_v25  ;;  %10742 = vmatmul.mubr.f32.gmra.mrb[68].mxu1 %v20589_v25 }
 0x7f6   : > { %10057 = vmatprep.mubr.f32.mxu0 %v23686_v31  ;;  %10747 = vmatprep.mubr.f32.mxu1 %v23686_v31 }
 0x7f9   : > { %10060 = vmatmul.mubr.f32.gmra.mrb[70].mxu0 %v20888_v53  ;;  %10750 = vmatmul.mubr.f32.gmra.mrb[70].mxu1 %v20888_v53 }
 0x7fa   : > { %10138 = vmatprep.mubr.f32.mxu0 %v23686_v31  ;;  %10828 = vmatprep.mubr.f32.mxu1 %v23686_v31 }
 0x7fd   : > { %10142 = vmatmul.mubr.f32.vlgmr.msra.gmra.mrb[64].mxu0 %v23971_v49  ;;  %10832 = vmatmul.mubr.f32.vlgmr.msra.gmra.mrb[64].mxu1 %v23971_v49 }
 0x7fe   : > { %15123 = vmatpush1.bf16.msra.mxu0 %v23972_v60  ;;  %15171 = vmatpush1.bf16.msra.mxu1 %v20951_v3 }
 0x7ff   : > { %15125 = vmatprep.subr.bf16.mxu0 %v21038_v12  ;;  %15173 = vmatprep.subr.bf16.mxu1 %v21042_v38 }
 0x800   : > { %10147 = vmatprep.mubr.f32.mxu0 %v23686_v31  ;;  %10837 = vmatprep.mubr.f32.mxu1 %v23686_v31 }
 0x801   : > { %10151 = vmatmul.mubr.f32.gmra.mrb[66].mxu0 %v20570_v21  ;;  %10841 = vmatmul.mubr.f32.gmra.mrb[66].mxu1 %v20570_v21 }
 0x802   : > { %15127 = vmatpush1.bf16.msra.mxu0 %v21005_v41  ;;  %15175 = vmatpush1.bf16.msra.mxu1 %v21027_v20 }
 0x803   : > { %15129 = vmatprep.subr.bf16.mxu0 %v20785_v9  ;;  %15177 = vmatprep.subr.bf16.mxu1 %v20788_v54 }
 0x804   : > { %10156 = vmatprep.mubr.f32.mxu0 %v23686_v31  ;;  %10846 = vmatprep.mubr.f32.mxu1 %v23686_v31 }
 0x805   : > { %10160 = vmatmul.mubr.f32.gmra.mrb[68].mxu0 %v20882_v7  ;;  %10850 = vmatmul.mubr.f32.gmra.mrb[68].mxu1 %v20882_v7 }
 0x806   : > { %10165 = vmatprep.mubr.f32.mxu0 %v23686_v31  ;;  %10855 = vmatprep.mubr.f32.mxu1 %v23686_v31 }
 0x809   : > { %10169 = vmatmul.mubr.f32.gmra.mrb[70].mxu0 %v21053_v46  ;;  %10859 = vmatmul.mubr.f32.gmra.mrb[70].mxu1 %v21053_v46 }
 0x80a   : > { %10263 = vmatprep.mubr.f32.mxu0 %v23686_v31  ;;  %10953 = vmatprep.mubr.f32.mxu1 %v23686_v31 }
 0x80d   : > { %10265 = vmatmul.mubr.f32.vlgmr.msra.gmra.mrb[64].mxu0 %v20525_v11  ;;  %10955 = vmatmul.mubr.f32.vlgmr.msra.gmra.mrb[64].mxu1 %v20525_v11 }
 0x80e   : > { %15131 = vmatpush1.bf16.msra.mxu0 %v23969_v23  ;;  %15179 = vmatpush1.bf16.msra.mxu1 %v23970_v58  ;;  %v11342_v58 = vsel %vm2146_vm2, %v11309_v2, 0 }
 0x80f   : > { %15133 = vmatprep.subr.bf16.mxu0 %v21012_v39  ;;  %15181 = vmatprep.subr.bf16.mxu1 %v21020_v36 }
 0x810   : > { %10270 = vmatprep.mubr.f32.mxu0 %v23686_v31  ;;  %10960 = vmatprep.mubr.f32.mxu1 %v23686_v31 }
 0x811   : > { %10272 = vmatmul.mubr.f32.gmra.mrb[66].mxu0 %v20543_v59  ;;  %10962 = vmatmul.mubr.f32.gmra.mrb[66].mxu1 %v20543_v59 }
 0x812   : > { %15135 = vmatpush1.bf16.msra.mxu0 %v20976_v35  ;;  %15183 = vmatpush1.bf16.msra.mxu1 %v20999_v34  ;;  %v11339_v35 = vsel %vm2146_vm2, %v11308_v43, 0 }
 0x813   : > { %10277 = vmatprep.mubr.f32.mxu0 %v23686_v31  ;;  %10967 = vmatprep.mubr.f32.mxu1 %v23686_v31  ;;  %v21225_v8 = vand.u32 4294901760, %v11339_v35 }
 0x815   : > { %10279 = vmatmul.mubr.f32.gmra.mrb[68].mxu0 %v20572_v26  ;;  %10969 = vmatmul.mubr.f32.gmra.mrb[68].mxu1 %v20572_v26  ;;  %v21244_v6 = vsub.f32 %v11339_v35, %v21225_v8 }
 0x816   : > { %10284 = vmatprep.mubr.f32.mxu0 %v23686_v31  ;;  %10974 = vmatprep.mubr.f32.mxu1 %v23686_v31 }
 0x819   : > { %10286 = vmatmul.mubr.f32.gmra.mrb[70].mxu0 %v20868_v14  ;;  %10976 = vmatmul.mubr.f32.gmra.mrb[70].mxu1 %v20868_v14 }
 0x81a   : > { %10364 = vmatprep.mubr.f32.mxu0 %v23686_v31  ;;  %11054 = vmatprep.mubr.f32.mxu1 %v23686_v31 }
 0x81d   : > { %10366 = vmatmul.mubr.f32.vlgmr.msra.gmra.mrb[64].mxu0 %v20525_v11  ;;  %11056 = vmatmul.mubr.f32.vlgmr.msra.gmra.mrb[64].mxu1 %v20525_v11  ;;  %v11307_v11 = vld [vmem:[%s23264_s13] sm:$0xff] }
 0x81e   : > { %10371 = vmatprep.mubr.f32.mxu0 %v23686_v31  ;;  %11061 = vmatprep.mubr.f32.mxu1 %v23686_v31  ;;  %v11336_v44 = vsel %vm2146_vm2, %v11307_v11, 0 }
 0x81f   : > { %v21207_v45 = vand.u32 4294901760, %v11336_v44 }
 0x821   : > { %10373 = vmatmul.mubr.f32.gmra.mrb[66].mxu0 %v20543_v59  ;;  %11063 = vmatmul.mubr.f32.gmra.mrb[66].mxu1 %v20543_v59  ;;  %v9674_v59 = vpop.permute.xlu0 %9673  ;;  %v21222_v30 = vsub.f32 %v11336_v44, %v21207_v45 }
 0x822   : > { %10378 = vmatprep.mubr.f32.mxu0 %v23686_v31  ;;  %11068 = vmatprep.mubr.f32.mxu1 %v23686_v31 }
 0x823   : > { %v21238_v28 = vand.u32 4294901760, %v21222_v30 }
 0x825   : > { %10380 = vmatmul.mubr.f32.gmra.mrb[68].mxu0 %v20572_v26  ;;  %11070 = vmatmul.mubr.f32.gmra.mrb[68].mxu1 %v20572_v26  ;;  %v9684_v16 = vpop.permute.xlu0 %9683  ;;  %23973 = vst [vmem:[#allocation72_spill] sm:$0xff] %v21238_v28  ;;  %v11423_v11 = vsub.f32 %v21222_v30, %v21238_v28 }
 0x826   : > { %10385 = vmatprep.mubr.f32.mxu0 %v23686_v31  ;;  %11075 = vmatprep.mubr.f32.mxu1 %v23686_v31 }
 0x827   : > { %v21264_v35 = vand.u32 4294901760, %v11423_v11 }
 0x829   : > { %10387 = vmatmul.mubr.f32.gmra.mrb[70].mxu0 %v20868_v14  ;;  %11077 = vmatmul.mubr.f32.gmra.mrb[70].mxu1 %v20868_v14  ;;  %v9679_v14 = vpop.permute.xlu1 %9678 }
 0x82a   : > { %11419 = vmatprep.mubr.f32.mxu0 %v23686_v31  ;;  %12109 = vmatprep.mubr.f32.mxu1 %v23686_v31 }
 0x8f0   : > { %v10367_v32 = vpop.f32.mrb[64].mxu0  ;;  %v11057_v21 = vpop.f32.mrb[64].mxu1 }
 0x8f1   : > { %v21191_v26 = vadd.f32 %v10367_v32, %v9674_v59  ;;  %v21193_v25 = vadd.f32 %v11057_v21, %v9674_v59  ;;  %v10369_v15 = vpop.f32.mrb[65].mxu0  ;;  %v11059_v17 = vpop.f32.mrb[65].mxu1  ;;  %v21252_v21 = vand.u32 4294901760, %v21244_v6 }
 0x8f2   : > { %v21199_v9 = vadd.f32 %v10369_v15, %v9674_v59  ;;  %v21201_v54 = vadd.f32 %v11059_v17, %v9674_v59  ;;  %v21254_v15 = vand.u32 4294901760, %v11342_v58 }
 0x8f3   : > { %v11099_v27 = vmin.f32 %v21191_v26, 20.0  ;;  %v11101_v7 = vmin.f32 %v21193_v25, 20.0  ;;  %vm11085_vm4 = vcmp.gt.f32.partialorder %v21193_v25, 20.0 }
 0x8f4   : > { %v11100_v53 = vmin.f32 %v21199_v9, 20.0  ;;  %v11102_v13 = vmin.f32 %v21201_v54, 20.0  ;;  %v10374_v42 = vpop.f32.mrb[66].mxu0  ;;  %v11064_v3 = vpop.f32.mrb[66].mxu1  ;;  %vm11084_vm7 = vcmp.gt.f32.partialorder %v21199_v9, 20.0  ;;  %vm11086_vm8 = vcmp.gt.f32.partialorder %v21201_v54, 20.0 }
 0x8f5   : > { %v11115_v4 = vmul.f32 1.442695, %v11099_v27  ;;  %v11119_v24 = vmul.f32 1.442695, %v11101_v7  ;;  %v21210_v34 = vadd.f32 %v10374_v42, %v9679_v14  ;;  %v21212_v41 = vadd.f32 %v11064_v3, %v9679_v14  ;;  %v10376_v39 = vpop.f32.mrb[67].mxu0  ;;  %v11066_v55 = vpop.f32.mrb[67].mxu1 }
 0x8f6   : > { %v11117_v36 = vmul.f32 1.442695, %v11100_v53  ;;  %v11121_v56 = vmul.f32 1.442695, %v11102_v13  ;;  %v21214_v48 = vadd.f32 %v10376_v39, %v9679_v14  ;;  %v21216_v20 = vadd.f32 %v11066_v55, %v9679_v14  ;;  %v11310_v53 = vld [vmem:[%s23264_s13 + $0x18] sm:$0xff] }
 0x8f7   : > { %16943 = vpow2.f32 %v11115_v4  ;;  %v11103_v40 = vmin.f32 %v21210_v34, 20.0  ;;  %v11105_v22 = vmin.f32 %v21212_v41, 20.0  ;;  %vm11087_vm6 = vcmp.gt.f32.partialorder %v21210_v34, 20.0 }
 0x8f8   : > { %16945 = vpow2.f32 %v11119_v24  ;;  %v11104_v50 = vmin.f32 %v21214_v48, 20.0  ;;  %v10381_v52 = vpop.f32.mrb[68].mxu0  ;;  %v11071_v62 = vpop.f32.mrb[68].mxu1  ;;  %v11106_v51 = vmin.f32 %v21216_v20, 20.0  ;;  %vm11089_vm11 = vcmp.gt.f32.partialorder %v21212_v41, 20.0 }
 0x8f9   : > { %16947 = vpow2.f32 %v11117_v36  ;;  %v11123_v12 = vmul.f32 1.442695, %v11103_v40  ;;  %v10383_v38 = vpop.f32.mrb[69].mxu0  ;;  %v11073_v57 = vpop.f32.mrb[69].mxu1  ;;  %v11127_v19 = vmul.f32 1.442695, %v11105_v22  ;;  %v21227_v33 = vadd.f32 %v10381_v52, %v9684_v16 }
 0x8fa   : > { %16949 = vpow2.f32 %v11121_v56  ;;  %v11125_v29 = vmul.f32 1.442695, %v11104_v50  ;;  %v21229_v37 = vadd.f32 %v11071_v62, %v9684_v16  ;;  %v21231_v0 = vadd.f32 %v10383_v38, %v9684_v16  ;;  %v9689_v24 = vpop.permute.xlu1 %9688 }
 0x8fb   : > { %16951 = vpow2.f32 %v11123_v12  ;;  %v11129_v46 = vmul.f32 1.442695, %v11106_v51  ;;  %v11107_v61 = vmin.f32 %v21227_v33, 20.0  ;;  %v21241_v5 = vadd.f32 %v11073_v57, %v9684_v16 }
 0x8fc   : > { %v10388_v47 = vpop.f32.mrb[70].mxu0  ;;  %v11078_v18 = vpop.f32.mrb[70].mxu1  ;;  %16953 = vpow2.f32 %v11127_v19  ;;  %v11109_v1 = vmin.f32 %v21229_v37, 20.0  ;;  %v11108_v60 = vmin.f32 %v21231_v0, 20.0  ;;  %v21271_v36 = vsub.f32 %v11342_v58, %v21254_v15 }
 0x8fd   : > { %v10390_v63 = vpop.f32.mrb[71].mxu0  ;;  %v11080_v10 = vpop.f32.mrb[71].mxu1  ;;  %16955 = vpow2.f32 %v11125_v29  ;;  %v11131_v23 = vmul.f32 1.442695, %v11107_v61  ;;  %v11110_v32 = vmin.f32 %v21241_v5, 20.0  ;;  %v21274_v16 = vadd.f32 %v10388_v47, %v9689_v24 }
 0x8fe   : > { %v11135_v49 = vmul.f32 1.442695, %v11109_v1  ;;  %16957 = vpow2.f32 %v11129_v46  ;;  %v11133_v7 = vmul.f32 1.442695, %v11108_v60  ;;  %v21277_v40 = vsel %vm2146_vm2, %v11310_v53, 0 }
 0x8ff   : > { %16959 = vpow2.f32 %v11131_v23  ;;  %v11137_v39 = vmul.f32 1.442695, %v11110_v32  ;;  %v21285_v19 = vadd.f32 %v11078_v18, %v9689_v24  ;;  %v21287_v29 = vadd.f32 %v10390_v63, %v9689_v24 }
 0x900   : > { %16961 = vpow2.f32 %v11135_v49  ;;  %v21289_v2 = vadd.f32 %v11080_v10, %v9689_v24  ;;  %vm11083_vm2 = vcmp.gt.f32.partialorder %v21191_v26, 20.0  ;;  %vm11088_vm13 = vcmp.gt.f32.partialorder %v21214_v48, 20.0 }
 0x901   : > { %v16944_v59 = vpop.eup %16943  ;;  %vm11090_vm1 = vcmp.gt.f32.partialorder %v21216_v20, 20.0  ;;  %vm11091_vm15 = vcmp.gt.f32.partialorder %v21227_v33, 20.0 }
 0x902   : > { %v16946_v17 = vpop.eup %16945  ;;  %v11147_v44 = vadd.f32 1.0, %v16944_v59  ;;  %v11150_v14 = vmul.f32 -0.5, %v16944_v59  ;;  %v11153_v52 = vand.u32 2147483647, %v16944_v59 }
 0x903   : > { %v21256_v43 = vpop.eup %16947  ;;  %v11165_v27 = vadd.f32 1.0, %v16946_v17  ;;  %v11168_v42 = vmul.f32 -0.5, %v16946_v17  ;;  %v11171_v62 = vand.u32 2147483647, %v16946_v17 }
 0x904   : > { %v21261_v13 = vpop.eup %16949  ;;  %16963 = vlog2.f32 %v11147_v44  ;;  %v11156_v3 = vadd.f32 1.0, %v21256_v43  ;;  %v11151_v50 = vadd.f32 1.0, %v11150_v14  ;;  %v11159_v38 = vmul.f32 -0.5, %v21256_v43 }
 0x905   : > { %v21266_v4 = vpop.eup %16951  ;;  %16965 = vlog2.f32 %v11165_v27  ;;  %v11174_v56 = vadd.f32 1.0, %v21261_v13  ;;  %v11169_v51 = vadd.f32 1.0, %v11168_v42  ;;  %v11162_v61 = vand.u32 2147483647, %v21256_v43 }
 0x906   : > { %16967 = vlog2.f32 %v11156_v3  ;;  %v21279_v22 = vpop.eup %16953  ;;  %v11183_v57 = vadd.f32 1.0, %v21266_v4  ;;  %v11177_v47 = vmul.f32 -0.5, %v21261_v13  ;;  %v11152_v23 = vmul.f32 %v16944_v59, %v11151_v50 }
 0x907   : > { %16969 = vpow2.f32 %v11133_v7  ;;  %v21281_v12 = vpop.eup %16955  ;;  %v11201_v1 = vadd.f32 1.0, %v21279_v22  ;;  %vm21297_vm0 = vcmp.lt.f32.partialorder %v11153_v52, 0.0004427343  ;;  %vm21301_vm3 = vcmp.lt.f32.partialorder %v11171_v62, 0.0004427343 }
 0x908   : > { %16971 = vlog2.f32 %v11174_v56  ;;  %v21291_v46 = vpop.eup %16957  ;;  %v11192_v63 = vadd.f32 1.0, %v21281_v12  ;;  %v11170_v49 = vmul.f32 %v16946_v17, %v11169_v51  ;;  %v11160_v60 = vadd.f32 1.0, %v11159_v38 }
 0x909   : > { %16973 = vpow2.f32 %v11137_v39  ;;  %v21306_v10 = vpop.eup %16959  ;;  %v11186_v11 = vmul.f32 -0.5, %v21266_v4  ;;  %v11180_v59 = vand.u32 2147483647, %v21261_v13  ;;  %v11204_v44 = vmul.f32 -0.5, %v21279_v22 }
 0x90a   : > { %16975 = vlog2.f32 %v11183_v57  ;;  %v21309_v32 = vpop.eup %16961  ;;  %v11210_v14 = vadd.f32 1.0, %v21291_v46  ;;  %vm21315_vm5 = vcmp.lt.f32.partialorder %v11162_v61, 0.0004427343  ;;  %v11178_v17 = vadd.f32 1.0, %v11177_v47 }
 0x90b   : > { %16977 = vlog2.f32 %v11201_v1  ;;  %v11189_v53 = vand.u32 2147483647, %v21266_v4  ;;  %v11195_v42 = vmul.f32 -0.5, %v21281_v12  ;;  %v11213_v39 = vmul.f32 -0.5, %v21291_v46 }
 0x90c   : > { %16979 = vlog2.f32 %v11192_v63  ;;  %v11219_v56 = vadd.f32 1.0, %v21306_v10  ;;  %v11161_v62 = vmul.f32 %v21256_v43, %v11160_v60  ;;  %v11187_v51 = vadd.f32 1.0, %v11186_v11 }
 0x90d   : > { %16981 = vlog2.f32 %v11210_v14  ;;  %v11207_v38 = vand.u32 2147483647, %v21279_v22  ;;  %v11205_v47 = vadd.f32 1.0, %v11204_v44  ;;  %v11198_v1 = vand.u32 2147483647, %v21281_v12 }
 0x90e   : > { %v16964_v27 = vpop.eup %16963  ;;  %16983 = vlog2.f32 %v11219_v56  ;;  %vm21334_vm9 = vcmp.lt.f32.partialorder %v11180_v59, 0.0004427343  ;;  %v11196_v60 = vadd.f32 1.0, %v11195_v42  ;;  %vm21342_vm10 = vcmp.lt.f32.partialorder %v11189_v53, 0.0004427343 }
 0x90f   : > { %v16966_v3 = vpop.eup %16965  ;;  %v11149_v24 = vmul.f32 0.6931472, %v16964_v27  ;;  %v11179_v27 = vmul.f32 %v21261_v13, %v11178_v17  ;;  %v11214_v44 = vadd.f32 1.0, %v11213_v39  ;;  %v11188_v59 = vmul.f32 %v21266_v4, %v11187_v51 }
 0x910   : > { %v16968_v50 = vpop.eup %16967  ;;  %v11167_v52 = vmul.f32 0.6931472, %v16966_v3  ;;  %vm21353_vm12 = vcmp.lt.f32.partialorder %v11207_v38, 0.0004427343  ;;  %v11216_v18 = vand.u32 2147483647, %v21291_v46  ;;  %v11206_v53 = vmul.f32 %v21279_v22, %v11205_v47 }
 0x911   : > { %v21328_v57 = vpop.eup %16969  ;;  %v11155_v61 = vsel %vm21297_vm0, %v11152_v23, %v11149_v24  ;;  %v11158_v14 = vmul.f32 0.6931472, %v16968_v50  ;;  %vm21360_vm14 = vcmp.lt.f32.partialorder %v11198_v1, 0.0004427343  ;;  %v11197_v50 = vmul.f32 %v21281_v12, %v11196_v60 }
 0x912   : > { %v16972_v63 = vpop.eup %16971  ;;  %v11173_v3 = vsel %vm21301_vm3, %v11170_v49, %v11167_v52  ;;  %v21349_v13 = vsel %vm11083_vm2, %v21191_v26, %v11155_v61  ;;  %v11222_v26 = vmul.f32 -0.5, %v21306_v10  ;;  %v11215_v61 = vmul.f32 %v21291_v46, %v11214_v44 }
 0x913   : > { %v21338_v11 = vpop.eup %16973  ;;  %v11176_v58 = vmul.f32 0.6931472, %v16972_v63  ;;  %v21369_v39 = vsel %vm11085_vm4, %v21193_v25, %v11173_v3  ;;  %v11164_v56 = vsel %vm21315_vm5, %v11161_v62, %v11158_v14  ;;  %v11349_v51 = vand.u32 4294901760, %v21349_v13 }
 0x914   : > { %v16976_v24 = vpop.eup %16975  ;;  %v11237_v47 = vadd.f32 1.0, %v21309_v32  ;;  %v11225_v1 = vand.u32 2147483647, %v21306_v10  ;;  %v12039_v63 = vand.u32 4294901760, %v21369_v39  ;;  %v11292_v14 = vsel %vm11084_vm7, %v21199_v9, %v11164_v56 }
 0x915   : > { %v11185_v49 = vmul.f32 0.6931472, %v16976_v24  ;;  %v16978_v4 = vpop.eup %16977  ;;  %v11182_v22 = vsel %vm21334_vm9, %v11179_v27, %v11176_v58  ;;  %v11223_v27 = vadd.f32 1.0, %v11222_v26  ;;  %v21403_v9 = vsub.f32 %v21349_v13, %v11349_v51 }
 0x916   : > { %v16980_v52 = vpop.eup %16979  ;;  %v11203_v7 = vmul.f32 0.6931472, %v16978_v4  ;;  %v11294_v46 = vsel %vm11086_vm8, %v21201_v54, %v11182_v22  ;;  %vm11217_vm2 = vcmp.lt.f32.partialorder %v11216_v18, 0.0004427343  ;;  %16985 = vlog2.f32 %v11237_v47 }
 0x917   : > { %v11191_v38 = vsel %vm21342_vm10, %v11188_v59, %v11185_v49  ;;  %v11194_v62 = vmul.f32 0.6931472, %v16980_v52  ;;  %v16982_v12 = vpop.eup %16981  ;;  %v11240_v54 = vmul.f32 -0.5, %v21309_v32  ;;  %vm21406_vm0 = vcmp.lt.f32.partialorder %v11225_v1, 0.0004427343 }
 0x918   : > { %v21384_v25 = vsel %vm11087_vm6, %v21210_v34, %v11191_v38  ;;  %v11209_v34 = vsel %vm21353_vm12, %v11206_v53, %v11203_v7  ;;  %v11212_v3 = vmul.f32 0.6931472, %v16982_v12  ;;  %v16984_v58 = vpop.eup %16983  ;;  %v11111_v59 = vmin.f32 %v21274_v16, 20.0 }
 0x919   : > { %v11353_v43 = vand.u32 4294901760, %v21384_v25  ;;  %v11200_v60 = vsel %vm21360_vm14, %v11197_v50, %v11194_v62  ;;  %v11221_v44 = vmul.f32 0.6931472, %v16984_v58  ;;  %v11347_v17 = vand.u32 4294901760, %v11292_v14 }
 0x91a   : > { %v11218_v23 = vsel %vm11217_vm2, %v11215_v61, %v11212_v3  ;;  %v12037_v49 = vand.u32 4294901760, %v11294_v46  ;;  %v11297_v53 = vsel %vm11089_vm11, %v21212_v41, %v11209_v34  ;;  %v11296_v18 = vsel %vm11088_vm13, %v21214_v48, %v11200_v60 }
 0x91b   : > { %v21420_v42 = vsub.f32 %v21369_v39, %v12039_v63  ;;  %v21425_v26 = vsub.f32 %v21384_v25, %v11353_v43  ;;  %v11298_v4 = vsel %vm11090_vm1, %v21216_v20, %v11218_v23  ;;  %v11224_v41 = vmul.f32 %v21306_v10, %v11223_v27 }
 0x91c   : > { %v23383_v56 = vand.u32 4294901760, %v21403_v9  ;;  %v11241_v22 = vadd.f32 1.0, %v11240_v54  ;;  %v11243_v48 = vand.u32 2147483647, %v21309_v32  ;;  %v11228_v50 = vadd.f32 1.0, %v21328_v57 }
 0x91d   : > { %v12043_v52 = vand.u32 4294901760, %v11297_v53  ;;  %v11351_v38 = vand.u32 4294901760, %v11296_v18  ;;  %v11227_v61 = vsel %vm21406_vm0, %v11224_v41, %v11221_v44  ;;  %v11246_v47 = vadd.f32 1.0, %v21338_v11 }
 0x91e   : > { %v21437_v7 = vsub.f32 %v11292_v14, %v11347_v17  ;;  %v21439_v62 = vsub.f32 %v11294_v46, %v12037_v49  ;;  %v12041_v20 = vand.u32 4294901760, %v11298_v4  ;;  %16987 = vlog2.f32 %v11228_v50 }
 0x91f   : > { %v23379_v10 = vand.u32 4294901760, %v21425_v26  ;;  %v11231_v1 = vmul.f32 -0.5, %v21328_v57  ;;  %16989 = vlog2.f32 %v11246_v47  ;;  %v11139_v12 = vmul.f32 1.442695, %v11111_v59 }
 0x920   : > { %v21446_v27 = vsel %vm11091_vm15, %v21227_v33, %v11227_v61  ;;  %v21449_v34 = vmul.f32 %v21309_v32, %v11241_v22  ;;  %v11249_v14 = vmul.f32 -0.5, %v21338_v11  ;;  %v11113_v46 = vmin.f32 %v21285_v19, 20.0  ;;  %v16986_v54 = vpop.eup %16985 }
 0x921   : > { %v21453_v60 = vsub.f32 %v11297_v53, %v12043_v52  ;;  %v21455_v3 = vsub.f32 %v11296_v18, %v11351_v38  ;;  %vm21457_vm3 = vcmp.lt.f32.partialorder %v11243_v48, 0.0004427343  ;;  %16991 = vpow2.f32 %v11139_v12 }
 0x922   : > { %v21461_v23 = vsub.f32 %v11298_v4, %v12041_v20  ;;  %v11234_v33 = vand.u32 2147483647, %v21328_v57  ;;  %v11143_v32 = vmul.f32 1.442695, %v11113_v46  ;;  %v11112_v44 = vmin.f32 %v21287_v29, 20.0 }
 0x923   : > { %v23381_v24 = vand.u32 4294901760, %v21446_v27  ;;  %v11232_v59 = vadd.f32 1.0, %v11231_v1  ;;  %v11114_v53 = vmin.f32 %v21289_v2, 20.0  ;;  %v21467_v18 = vpack.c.bf16 %v11351_v38, %v11347_v17 }
 0x924   : > { %vm11093_vm4 = vcmp.gt.f32.partialorder %v21229_v37, 20.0  ;;  %v11250_v41 = vadd.f32 1.0, %v11249_v14  ;;  %16993 = vpow2.f32 %v11143_v32  ;;  %v11141_v22 = vmul.f32 1.442695, %v11112_v44 }
 0x925   : > { %v21470_v48 = vpack.c.bf16 %v12041_v20, %v12037_v49  ;;  %v11239_v4 = vmul.f32 0.6931472, %v16986_v54  ;;  %vm11092_vm5 = vcmp.gt.f32.partialorder %v21231_v0, 20.0  ;;  %v11145_v50 = vmul.f32 1.442695, %v11114_v53  ;;  %15185 = vmatprep.subr.bf16.mxu0 %v21467_v18 }
 0x926   : > { %v21478_v61 = vpack.c.bf16 %v11353_v43, %v11349_v51  ;;  %v21482_v17 = vpack.c.bf16 %v12043_v52, %v12039_v63  ;;  %16995 = vpow2.f32 %v11141_v22  ;;  %v23388_v49 = vand.u32 4294901760, %v21437_v7 }
 0x927   : > { %15233 = vmatprep.subr.bf16.mxu1 %v21470_v48  ;;  %v23387_v38 = vand.u32 4294901760, %v21455_v3  ;;  %v23385_v47 = vand.u32 4294901760, %v21439_v62  ;;  %vm21488_vm6 = vcmp.lt.f32.partialorder %v11234_v33, 0.0004427343  ;;  %v11252_v13 = vand.u32 2147483647, %v21338_v11 }
 0x928   : > { %23992 = vst [vmem:[#allocation73_spill] sm:$0xff] %v21478_v61  ;;  %23993 = vst [vmem:[#allocation71_spill] sm:$0xff] %v21482_v17  ;;  %16997 = vpow2.f32 %v11145_v50  ;;  %15187 = vmatpush1.bf16.msra.mxu0 %v21478_v61  ;;  %15235 = vmatpush1.bf16.msra.mxu1 %v21482_v17  ;;  %v23384_v39 = vand.u32 4294901760, %v21461_v23  ;;  %v16988_v51 = vpop.eup %16987  ;;  %v11467_v25 = vsub.f32 %v21437_v7, %v23388_v49  ;;  %vm11094_vm8 = vcmp.gt.f32.partialorder %v21241_v5, 20.0 }
 0x929   : > { %v11479_v63 = vsub.f32 %v21455_v3, %v23387_v38  ;;  %v12157_v43 = vsub.f32 %v21439_v62, %v23385_v47  ;;  %v11485_v52 = vsub.f32 %v21425_v26, %v23379_v10  ;;  %v16990_v1 = vpop.eup %16989  ;;  %v11230_v12 = vmul.f32 0.6931472, %v16988_v51 }
 0x92a   : > { %v11233_v14 = vmul.f32 %v21328_v57, %v11232_v59  ;;  %v12169_v46 = vsub.f32 %v21461_v23, %v23384_v39  ;;  %v11473_v54 = vsub.f32 %v21403_v9, %v23383_v56  ;;  %v11245_v33 = vsel %vm21457_vm3, %v21449_v34, %v11239_v4 }
 0x92b   : > { %v11248_v32 = vmul.f32 0.6931472, %v16990_v1  ;;  %v11251_v44 = vmul.f32 %v21338_v11, %v11250_v41  ;;  %v11480_v53 = vand.u32 4294901760, %v11479_v63  ;;  %v16992_v22 = vpop.eup %16991  ;;  %vm21521_vm7 = vcmp.lt.f32.partialorder %v11252_v13, 0.0004427343 }
 0x92c   : > { %v11236_v57 = vsel %vm21488_vm6, %v11233_v14, %v11230_v12  ;;  %v11468_v50 = vand.u32 4294901760, %v11467_v25  ;;  %v12170_v51 = vand.u32 4294901760, %v12169_v46  ;;  %v11255_v10 = vadd.f32 1.0, %v16992_v22 }
 0x92d   : > { %v11254_v55 = vsel %vm21521_vm7, %v11251_v44, %v11248_v32  ;;  %v12158_v58 = vand.u32 4294901760, %v12157_v43  ;;  %v11486_v34 = vand.u32 4294901760, %v11485_v52  ;;  %v21530_v11 = vsel %vm11093_vm4, %v21229_v37, %v11245_v33 }
 0x92e   : > { %v21533_v41 = vpack.c.bf16 %v11480_v53, %v11468_v50  ;;  %v11474_v4 = vand.u32 4294901760, %v11473_v54  ;;  %v21535_v20 = vpop.eup %16993  ;;  %v21540_v13 = vsel %vm11092_vm5, %v21231_v0, %v11236_v57  ;;  %16999 = vlog2.f32 %v11255_v10 }
 0x92f   : > { %v11258_v25 = vmul.f32 -0.5, %v16992_v22  ;;  %v21542_v63 = vpack.c.bf16 %v12170_v51, %v12158_v58  ;;  %v12162_v43 = vand.u32 4294901760, %v21420_v42  ;;  %v21546_v37 = vsel %vm11094_vm8, %v21241_v5, %v11254_v55 }
 0x930   : > { %v11273_v52 = vadd.f32 1.0, %v21535_v20  ;;  %v21550_v1 = vand.u32 4294901760, %v21277_v40  ;;  %v16996_v12 = vpop.eup %16995  ;;  %v12174_v14 = vand.u32 4294901760, %v21453_v60  ;;  %v21556_v0 = vsub.f32 %v21446_v27, %v23381_v24 }
 0x931   : > { %v23380_v10 = vand.u32 4294901760, %v21530_v11  ;;  %v21559_v46 = vpack.c.bf16 %v11486_v34, %v11474_v4  ;;  %v23382_v5 = vand.u32 4294901760, %v21540_v13  ;;  %v11261_v55 = vand.u32 2147483647, %v16992_v22 }
 0x932   : > { %v16998_v54 = vpop.eup %16997  ;;  %17001 = vlog2.f32 %v11273_v52  ;;  %v11264_v33 = vadd.f32 1.0, %v16996_v12  ;;  %v23386_v32 = vand.u32 4294901760, %v21546_v37  ;;  %v11259_v44 = vadd.f32 1.0, %v11258_v25 }
 0x933   : > { %v11282_v53 = vadd.f32 1.0, %v16998_v54  ;;  %v21564_v57 = vand.u32 4294901760, %v21271_v36  ;;  %vm11095_vm9 = vcmp.gt.f32.partialorder %v21274_v16, 20.0  ;;  %v12163_v59 = vsub.f32 %v21420_v42, %v12162_v43 }
 0x934   : > { %17003 = vlog2.f32 %v11264_v33  ;;  %v21570_v50 = vsub.f32 %v21277_v40, %v21550_v1  ;;  %v11276_v58 = vmul.f32 -0.5, %v21535_v20  ;;  %v11267_v34 = vmul.f32 -0.5, %v16996_v12 }
 0x935   : > { %17005 = vlog2.f32 %v11282_v53  ;;  %v21577_v4 = vsub.f32 %v21530_v11, %v23380_v10  ;;  %v21582_v25 = vsub.f32 %v21540_v13, %v23382_v5  ;;  %vm21584_vm10 = vcmp.lt.f32.partialorder %v11261_v55, 0.0004427343 }
 0x936   : > { %v12175_v40 = vsub.f32 %v21453_v60, %v12174_v14  ;;  %v21592_v33 = vsub.f32 %v21546_v37, %v23386_v32  ;;  %v11260_v53 = vmul.f32 %v16992_v22, %v11259_v44  ;;  %vm11097_vm11 = vcmp.gt.f32.partialorder %v21285_v19, 20.0 }
 0x937   : > { %v11279_v10 = vand.u32 2147483647, %v21535_v20  ;;  %v11285_v51 = vmul.f32 -0.5, %v16998_v54  ;;  %v12164_v24 = vand.u32 4294901760, %v12163_v59  ;;  %v11277_v47 = vadd.f32 1.0, %v11276_v58 }
 0x938   : > { %v12176_v5 = vand.u32 4294901760, %v12175_v40  ;;  %v17000_v39 = vpop.eup %16999  ;;  %vm11096_vm12 = vcmp.gt.f32.partialorder %v21287_v29, 20.0  ;;  %v11268_v32 = vadd.f32 1.0, %v11267_v34  ;;  %v11270_v38 = vand.u32 2147483647, %v16996_v12 }
 0x939   : > { %v11257_v44 = vmul.f32 0.6931472, %v17000_v39  ;;  %vm11098_vm13 = vcmp.gt.f32.partialorder %v21289_v2, 20.0  ;;  %v11288_v59 = vand.u32 2147483647, %v16998_v54  ;;  %v11286_v49 = vadd.f32 1.0, %v11285_v51 }
 0x93a   : > { %v21604_v40 = vpack.c.bf16 %v12176_v5, %v12164_v24  ;;  %v24000_v56 = vand.u32 4294901760, %v21437_v7  ;;  %v24001_v58 = vand.u32 4294901760, %v21455_v3  ;;  %v24002_v34 = vand.u32 4294901760, %v21439_v62 }
 0x93b   : > { %v24003_v22 = vand.u32 4294901760, %v21461_v23  ;;  %v24004_v17 = vand.u32 4294901760, %v21403_v9  ;;  %v24005_v24 = vand.u32 4294901760, %v21425_v26  ;;  %v12186_v51 = vand.u32 4294901760, %v21577_v4 }
 0x93c   : > { %v21612_v28 = vpack.c.bf16 %v24001_v58, %v24000_v56  ;;  %v17002_v55 = vpop.eup %17001  ;;  %v11263_v61 = vsel %vm21584_vm10, %v11260_v53, %v11257_v44  ;;  %vm21629_vm14 = vcmp.lt.f32.partialorder %v11279_v10, 0.0004427343  ;;  %v21633_v58 = vpack.c.bf16 %v12174_v14, %v12162_v43 }
 0x93d   : > { %v21618_v39 = vpack.c.bf16 %v24003_v22, %v24002_v34  ;;  %v21624_v5 = vpack.c.bf16 %v24005_v24, %v24004_v17  ;;  %v11303_v22 = vsel %vm11095_vm9, %v21274_v16, %v11263_v61  ;;  %v11275_v34 = vmul.f32 0.6931472, %v17002_v55 }
 0x93e   : > { %v11278_v17 = vmul.f32 %v21535_v20, %v11277_v47  ;;  %vm21639_vm1 = vcmp.lt.f32.partialorder %v11270_v38, 0.0004427343  ;;  %v11361_v52 = vand.u32 4294901760, %v11303_v22  ;;  %v11269_v53 = vmul.f32 %v16996_v12, %v11268_v32 }
 0x93f   : > { %24006 = vst [vmem:[#allocation74_spill] sm:$0xff] %v21624_v5  ;;  %v17004_v5 = vpop.eup %17003  ;;  %vm21643_vm15 = vcmp.lt.f32.partialorder %v11288_v59, 0.0004427343  ;;  %v11490_v43 = vand.u32 4294901760, %v21582_v25  ;;  %v11287_v55 = vmul.f32 %v16998_v54, %v11286_v49  ;;  %v12180_v38 = vand.u32 4294901760, %v21592_v33 }
 0x940   : > { %v17006_v14 = vpop.eup %17005  ;;  %v11281_v16 = vsel %vm21629_vm14, %v11278_v17, %v11275_v34  ;;  %v11266_v61 = vmul.f32 0.6931472, %v17004_v5  ;;  %v21651_v47 = vsub.f32 %v11303_v22, %v11361_v52  ;;  %v24013_v32 = vand.u32 4294901760, %v21446_v27 }
 0x941   : > { %v11305_v20 = vsel %vm11097_vm11, %v21285_v19, %v11281_v16  ;;  %v11284_v12 = vmul.f32 0.6931472, %v17006_v14  ;;  %v24014_v5 = vand.u32 4294901760, %v21556_v0  ;;  %v12187_v54 = vsub.f32 %v21577_v4, %v12186_v51 }
 0x942   : > { %v21658_v44 = vpack.c.bf16 %v11361_v52, %v24013_v32  ;;  %v12051_v59 = vand.u32 4294901760, %v11305_v20  ;;  %v11272_v56 = vsel %vm21639_vm1, %v11269_v53, %v11266_v61  ;;  %v11508_v22 = vand.u32 4294901760, %v21651_v47 }
 0x943   : > { %v11497_v49 = vsub.f32 %v21556_v0, %v24014_v5  ;;  %v11304_v19 = vsel %vm11096_vm12, %v21287_v29, %v11272_v56  ;;  %v11290_v27 = vsel %vm21643_vm15, %v11287_v55, %v11284_v12  ;;  %v15206_v34 = vpack.c.bf16 %v21651_v47, %v21556_v0  ;;  %v24029_v0 = vld [vmem:[#allocation25_spill] sm:$0xff] }
 0x944   : > { %v21674_v17 = vsub.f32 %v11305_v20, %v12051_v59  ;;  %v11359_v24 = vand.u32 4294901760, %v11304_v19  ;;  %v11306_v52 = vsel %vm11098_vm13, %v21289_v2, %v11290_v27  ;;  %v24015_v53 = vand.u32 4294901760, %v21530_v11 }
 0x945   : > { %v12049_v16 = vand.u32 4294901760, %v11306_v52  ;;  %v11491_v29 = vsub.f32 %v21582_v25, %v11490_v43  ;;  %v11509_v10 = vsub.f32 %v21651_v47, %v11508_v22  ;;  %v24016_v61 = vmov %v24014_v5  ;;  %v24032_v47 = vld [vmem:[#allocation24_spill] sm:$0xff] }
 0x946   : > { %v21681_v14 = vpack.c.bf16 %v12051_v59, %v24015_v53  ;;  %v21687_v55 = vpack.c.bf16 %v11508_v22, %v24016_v61  ;;  %v12198_v20 = vand.u32 4294901760, %v21674_v17  ;;  %v21690_v12 = vsub.f32 %v11304_v19, %v11359_v24 }
 0x947   : > { %v24017_v32 = vand.u32 4294901760, %v21540_v13  ;;  %v15254_v11 = vpack.c.bf16 %v21674_v17, %v21577_v4  ;;  %v21698_v59 = vsub.f32 %v11306_v52, %v12049_v16  ;;  %v24018_v56 = vand.u32 4294901760, %v21546_v37 }
 0x948   : > { %v11498_v27 = vand.u32 4294901760, %v11497_v49  ;;  %v11510_v22 = vand.u32 4294901760, %v11509_v10  ;;  %v11502_v19 = vand.u32 4294901760, %v21690_v12  ;;  %v12199_v53 = vsub.f32 %v21674_v17, %v12198_v20 }
 0x949   : > { %v21694_v2 = vpack.c.bf16 %v11359_v24, %v24017_v32  ;;  %v21702_v5 = vpack.c.bf16 %v12049_v16, %v24018_v56  ;;  %v15204_v13 = vpack.c.bf16 %v21690_v12, %v21582_v25  ;;  %v21709_v24 = vpack.c.bf16 %v12198_v20, %v12186_v51 }
 0x94a   : > { %v12181_v37 = vsub.f32 %v21592_v33, %v12180_v38  ;;  %v12192_v49 = vand.u32 4294901760, %v21698_v59  ;;  %v15198_v52 = vpack.c.bf16 %v11510_v22, %v11498_v27  ;;  %v15252_v16 = vpack.c.bf16 %v21698_v59, %v21592_v33 }
 0x94b   : > { %15189 = vmatprep.subr.bf16.mxu0 %v21694_v2  ;;  %15237 = vmatprep.subr.bf16.mxu1 %v21702_v5  ;;  %v11503_v25 = vsub.f32 %v21690_v12, %v11502_v19  ;;  %v12188_v51 = vand.u32 4294901760, %v12187_v54  ;;  %v12200_v10 = vand.u32 4294901760, %v12199_v53  ;;  %v21720_v61 = vpack.c.bf16 %v11502_v19, %v11490_v43 }
 0x94c   : > { %15191 = vmatpush1.bf16.msra.mxu0 %v21658_v44  ;;  %15239 = vmatpush1.bf16.msra.mxu1 %v21681_v14  ;;  %v12193_v20 = vsub.f32 %v21698_v59, %v12192_v49  ;;  %v21724_v32 = vpack.c.bf16 %v12192_v49, %v12180_v38  ;;  %v24019_v33 = vsub.f32 %v21244_v6, %v21252_v21  ;;  %v11492_v27 = vand.u32 4294901760, %v11491_v29 }
 0x94d   : > { %15193 = vmatprep.subr.bf16.mxu0 %v21533_v41  ;;  %15241 = vmatprep.subr.bf16.mxu1 %v21542_v63  ;;  %v11504_v41 = vand.u32 4294901760, %v11503_v25  ;;  %v15246_v22 = vpack.c.bf16 %v12200_v10, %v12188_v51  ;;  %v12182_v43 = vand.u32 4294901760, %v12181_v37  ;;  %v11445_v63 = vsub.f32 %v21271_v36, %v21564_v57  ;;  %v24038_v37 = vld [vmem:[#allocation33_spill] sm:$0xff]  ;;  %v24040_v51 = vld [vmem:[#allocation35_spill] sm:$0xff] }
 0x94e   : > { %v11435_v56 = vand.u32 4294901760, %v24019_v33  ;;  %v12194_v54 = vand.u32 4294901760, %v12193_v20  ;;  %v21735_v38 = vand.u32 4294901760, %v21570_v50  ;;  %v24020_v59 = vpack.c.bf16 %v21455_v3, %v21437_v7 }
 0x94f   : > { %11425 = vmatmul.mubr.f32.vlgmr.msra.gmra.mrb[72].mxu0 %v21264_v35  ;;  %12115 = vmatmul.mubr.f32.vlgmr.msra.gmra.mrb[72].mxu1 %v21264_v35  ;;  %v15196_v12 = vpack.c.bf16 %v11504_v41, %v11492_v27  ;;  %v11446_v35 = vand.u32 4294901760, %v11445_v63  ;;  %v24022_v7 = vpack.c.bf16 %v21425_v26, %v21403_v9  ;;  %v24024_v9 = vld [vmem:[#allocation73_spill] sm:$0xff] }
 0x950   : > { %15195 = vmatpush1.bf16.msra.mxu0 %v21559_v46  ;;  %15243 = vmatpush1.bf16.msra.mxu1 %v21604_v40  ;;  %v15244_v29 = vpack.c.bf16 %v12194_v54, %v12182_v43  ;;  %v11456_v46 = vsub.f32 %v21570_v50, %v21735_v38  ;;  %v24021_v40 = vpack.c.bf16 %v21461_v23, %v21439_v62  ;;  %v24046_v54 = vld [vmem:[#allocation40_spill] sm:$0xff] }
 0x951   : > { %11430 = vmatprep.mubr.f32.mxu0 %v23686_v31  ;;  %12120 = vmatprep.mubr.f32.mxu1 %v23686_v31  ;;  %v24023_v62 = vpack.c.bf16 %v21453_v60, %v21420_v42  ;;  %v24025_v42 = vld [vmem:[#allocation71_spill] sm:$0xff] }
 0x952   : > { %15197 = vmatprep.subr.bf16.mxu0 %v15196_v12  ;;  %15245 = vmatprep.subr.bf16.mxu1 %v15244_v29  ;;  %v11457_v19 = vand.u32 4294901760, %v11456_v46  ;;  %v24048_v29 = vld [vmem:[#allocation7_spill] sm:$0xff]  ;;  %v24049_v46 = vld [vmem:[#allocation8_spill] sm:$0xff] }
 0x953   : > { %11436 = vmatmul.mubr.f32.gmra.mrb[74].mxu0 %v11435_v56  ;;  %12126 = vmatmul.mubr.f32.gmra.mrb[74].mxu1 %v11435_v56  ;;  %v24043_v56 = vld [vmem:[#allocation38_spill] sm:$0xff] }
 0x954   : > { %15199 = vmatpush1.bf16.msra.mxu0 %v15198_v52  ;;  %15247 = vmatpush1.bf16.msra.mxu1 %v15246_v22  ;;  %v24039_v52 = vld [vmem:[#allocation34_spill] sm:$0xff]  ;;  %v24045_v22 = vld [vmem:[#allocation39_spill] sm:$0xff] }
 0x955   : > { %15201 = vmatprep.subr.bf16.mxu0 %v24020_v59  ;;  %15249 = vmatprep.subr.bf16.mxu1 %v24021_v40  ;;  %v24050_v40 = vld [vmem:[#allocation9_spill] sm:$0xff] }
 0x956   : > { %11441 = vmatprep.mubr.f32.mxu0 %v23686_v31  ;;  %12131 = vmatprep.mubr.f32.mxu1 %v23686_v31 }
 0x957   : > { %11447 = vmatmul.mubr.f32.gmra.mrb[76].mxu0 %v11446_v35  ;;  %12137 = vmatmul.mubr.f32.gmra.mrb[76].mxu1 %v11446_v35 }
 0x958   : > { %11452 = vmatprep.mubr.f32.mxu0 %v23686_v31  ;;  %12142 = vmatprep.mubr.f32.mxu1 %v23686_v31 }
 0x95b   : > { %11458 = vmatmul.mubr.f32.gmra.mrb[78].mxu0 %v11457_v19  ;;  %12148 = vmatmul.mubr.f32.gmra.mrb[78].mxu1 %v11457_v19 }
 0x95c   : > { %11568 = vmatprep.mubr.f32.mxu0 %v23686_v31  ;;  %12258 = vmatprep.mubr.f32.mxu1 %v23686_v31 }
 0x95f   : > { %11570 = vmatmul.mubr.f32.vlgmr.msra.gmra.mrb[72].mxu0 %v21207_v45  ;;  %12260 = vmatmul.mubr.f32.vlgmr.msra.gmra.mrb[72].mxu1 %v21207_v45 }
 0x960   : > { %15203 = vmatpush1.bf16.msra.mxu0 %v24022_v7  ;;  %15251 = vmatpush1.bf16.msra.mxu1 %v24023_v62  ;;  %v24051_v7 = vld [vmem:[#allocation10_spill] sm:$0xff] }
 0x961   : > { %15205 = vmatprep.subr.bf16.mxu0 %v15204_v13  ;;  %15253 = vmatprep.subr.bf16.mxu1 %v15252_v16  ;;  %v24037_v13 = vld [vmem:[#allocation32_spill] sm:$0xff] }
 0x962   : > { %11575 = vmatprep.mubr.f32.mxu0 %v23686_v31  ;;  %12265 = vmatprep.mubr.f32.mxu1 %v23686_v31 }
 0x963   : > { %11577 = vmatmul.mubr.f32.gmra.mrb[74].mxu0 %v21225_v8  ;;  %12267 = vmatmul.mubr.f32.gmra.mrb[74].mxu1 %v21225_v8 }
 0x964   : > { %15207 = vmatpush1.bf16.msra.mxu0 %v15206_v34  ;;  %15255 = vmatpush1.bf16.msra.mxu1 %v15254_v11  ;;  %v24033_v34 = vld [vmem:[#allocation30_spill] sm:$0xff] }
 0x965   : > { %15209 = vmatprep.subr.bf16.mxu0 %v21467_v18  ;;  %15257 = vmatprep.subr.bf16.mxu1 %v21470_v48 }
 0x966   : > { %11582 = vmatprep.mubr.f32.mxu0 %v23686_v31  ;;  %12272 = vmatprep.mubr.f32.mxu1 %v23686_v31 }
 0x967   : > { %11584 = vmatmul.mubr.f32.gmra.mrb[76].mxu0 %v21254_v15  ;;  %12274 = vmatmul.mubr.f32.gmra.mrb[76].mxu1 %v21254_v15 }
 0x968   : > { %11589 = vmatprep.mubr.f32.mxu0 %v23686_v31  ;;  %12279 = vmatprep.mubr.f32.mxu1 %v23686_v31 }
 0x96b   : > { %11591 = vmatmul.mubr.f32.gmra.mrb[78].mxu0 %v21550_v1  ;;  %12281 = vmatmul.mubr.f32.gmra.mrb[78].mxu1 %v21550_v1 }
 0x96c   : > { %11677 = vmatprep.mubr.f32.mxu0 %v23686_v31  ;;  %12367 = vmatprep.mubr.f32.mxu1 %v23686_v31 }
 0x96f   : > { %11680 = vmatmul.mubr.f32.vlgmr.msra.gmra.mrb[72].mxu0 %v21222_v30  ;;  %12370 = vmatmul.mubr.f32.vlgmr.msra.gmra.mrb[72].mxu1 %v21222_v30  ;;  %v24026_v30 = vld [vmem:[#allocation72_spill] sm:$0xff] }
 0x970   : > { %15211 = vmatpush1.bf16.msra.mxu0 %v24024_v9  ;;  %15259 = vmatpush1.bf16.msra.mxu1 %v24025_v42 }
 0x971   : > { %15213 = vmatprep.subr.bf16.mxu0 %v21694_v2  ;;  %15261 = vmatprep.subr.bf16.mxu1 %v21702_v5 }
 0x972   : > { %11685 = vmatprep.mubr.f32.mxu0 %v23686_v31  ;;  %12375 = vmatprep.mubr.f32.mxu1 %v23686_v31 }
 0x973   : > { %11688 = vmatmul.mubr.f32.gmra.mrb[74].mxu0 %v21244_v6  ;;  %12378 = vmatmul.mubr.f32.gmra.mrb[74].mxu1 %v21244_v6 }
 0x974   : > { %15215 = vmatpush1.bf16.msra.mxu0 %v21658_v44  ;;  %15263 = vmatpush1.bf16.msra.mxu1 %v21681_v14 }
 0x975   : > { %15217 = vmatprep.subr.bf16.mxu0 %v21612_v28  ;;  %15265 = vmatprep.subr.bf16.mxu1 %v21618_v39  ;;  %v24027_v28 = vld [vmem:[#allocation74_spill] sm:$0xff]  ;;  %v24031_v39 = vld [vmem:[#allocation29_spill] sm:$0xff] }
 0x976   : > { %11693 = vmatprep.mubr.f32.mxu0 %v23686_v31  ;;  %12383 = vmatprep.mubr.f32.mxu1 %v23686_v31 }
 0x977   : > { %11696 = vmatmul.mubr.f32.gmra.mrb[76].mxu0 %v21271_v36  ;;  %12386 = vmatmul.mubr.f32.gmra.mrb[76].mxu1 %v21271_v36 }
 0x978   : > { %11701 = vmatprep.mubr.f32.mxu0 %v23686_v31  ;;  %12391 = vmatprep.mubr.f32.mxu1 %v23686_v31 }
 0x97b   : > { %11704 = vmatmul.mubr.f32.gmra.mrb[78].mxu0 %v21570_v50  ;;  %12394 = vmatmul.mubr.f32.gmra.mrb[78].mxu1 %v21570_v50  ;;  %v24030_v50 = vld [vmem:[#allocation28_spill] sm:$0xff] }
 0x97c   : > { %11782 = vmatprep.mubr.f32.mxu0 %v23686_v31  ;;  %12472 = vmatprep.mubr.f32.mxu1 %v23686_v31 }
 0x97f   : > { %11786 = vmatmul.mubr.f32.vlgmr.msra.gmra.mrb[72].mxu0 %v24026_v30  ;;  %12476 = vmatmul.mubr.f32.vlgmr.msra.gmra.mrb[72].mxu1 %v24026_v30  ;;  %v24053_v30 = vld [vmem:[#allocation12_spill] sm:$0xff] }
 0x980   : > { %15219 = vmatpush1.bf16.msra.mxu0 %v24027_v28  ;;  %15267 = vmatpush1.bf16.msra.mxu1 %v21633_v58 }
 0x981   : > { %15221 = vmatprep.subr.bf16.mxu0 %v21720_v61  ;;  %15269 = vmatprep.subr.bf16.mxu1 %v21724_v32  ;;  %v24041_v61 = vld [vmem:[#allocation36_spill] sm:$0xff]  ;;  %v24042_v32 = vld [vmem:[#allocation37_spill] sm:$0xff] }
 0x982   : > { %11791 = vmatprep.mubr.f32.mxu0 %v23686_v31  ;;  %12481 = vmatprep.mubr.f32.mxu1 %v23686_v31 }
 0x983   : > { %11795 = vmatmul.mubr.f32.gmra.mrb[74].mxu0 %v21252_v21  ;;  %12485 = vmatmul.mubr.f32.gmra.mrb[74].mxu1 %v21252_v21 }
 0x984   : > { %15223 = vmatpush1.bf16.msra.mxu0 %v21687_v55  ;;  %15271 = vmatpush1.bf16.msra.mxu1 %v21709_v24 }
 0x985   : > { %15225 = vmatprep.subr.bf16.mxu0 %v21467_v18  ;;  %15273 = vmatprep.subr.bf16.mxu1 %v21470_v48  ;;  %v24028_v48 = vld [vmem:[#allocation23_spill] sm:$0xff] }
 0x986   : > { %11800 = vmatprep.mubr.f32.mxu0 %v23686_v31  ;;  %12490 = vmatprep.mubr.f32.mxu1 %v23686_v31 }
 0x987   : > { %11804 = vmatmul.mubr.f32.gmra.mrb[76].mxu0 %v21564_v57  ;;  %12494 = vmatmul.mubr.f32.gmra.mrb[76].mxu1 %v21564_v57 }
 0x988   : > { %11809 = vmatprep.mubr.f32.mxu0 %v23686_v31  ;;  %12499 = vmatprep.mubr.f32.mxu1 %v23686_v31 }
 0x98b   : > { %11813 = vmatmul.mubr.f32.gmra.mrb[78].mxu0 %v21735_v38  ;;  %12503 = vmatmul.mubr.f32.gmra.mrb[78].mxu1 %v21735_v38  ;;  %v24047_v38 = vld [vmem:[#allocation41_spill] sm:$0xff] }
 0x98c   : > { %11907 = vmatprep.mubr.f32.mxu0 %v23686_v31  ;;  %12597 = vmatprep.mubr.f32.mxu1 %v23686_v31 }
 0x98f   : > { %11909 = vmatmul.mubr.f32.vlgmr.msra.gmra.mrb[72].mxu0 %v21207_v45  ;;  %12599 = vmatmul.mubr.f32.vlgmr.msra.gmra.mrb[72].mxu1 %v21207_v45 }
 0x990   : > { %15227 = vmatpush1.bf16.msra.mxu0 %v24024_v9  ;;  %15275 = vmatpush1.bf16.msra.mxu1 %v24025_v42  ;;  %v24052_v9 = vld [vmem:[#allocation11_spill] sm:$0xff] }
 0x991   : > { %15229 = vmatprep.subr.bf16.mxu0 %v21694_v2  ;;  %15277 = vmatprep.subr.bf16.mxu1 %v21702_v5  ;;  %v24035_v2 = vld [vmem:[#allocation26_spill] sm:$0xff]  ;;  %v24036_v5 = vld [vmem:[#allocation27_spill] sm:$0xff] }
 0x992   : > { %11914 = vmatprep.mubr.f32.mxu0 %v23686_v31  ;;  %12604 = vmatprep.mubr.f32.mxu1 %v23686_v31 }
 0x993   : > { %11916 = vmatmul.mubr.f32.gmra.mrb[74].mxu0 %v21225_v8  ;;  %12606 = vmatmul.mubr.f32.gmra.mrb[74].mxu1 %v21225_v8 }
 0x994   : > { %15231 = vmatpush1.bf16.msra.mxu0 %v21658_v44  ;;  %15279 = vmatpush1.bf16.msra.mxu1 %v21681_v14  ;;  %v24034_v14 = vld [vmem:[#allocation31_spill] sm:$0xff] }
 0x995   : > { %11921 = vmatprep.mubr.f32.mxu0 %v23686_v31  ;;  %12611 = vmatprep.mubr.f32.mxu1 %v23686_v31 }
 0x997   : > { %11923 = vmatmul.mubr.f32.gmra.mrb[76].mxu0 %v21254_v15  ;;  %12613 = vmatmul.mubr.f32.gmra.mrb[76].mxu1 %v21254_v15 }
 0x998   : > { %11928 = vmatprep.mubr.f32.mxu0 %v23686_v31  ;;  %12618 = vmatprep.mubr.f32.mxu1 %v23686_v31 }
 0x99b   : > { %11930 = vmatmul.mubr.f32.gmra.mrb[78].mxu0 %v21550_v1  ;;  %12620 = vmatmul.mubr.f32.gmra.mrb[78].mxu1 %v21550_v1 }
 0x99c   : > { %12008 = vmatprep.mubr.f32.mxu0 %v23686_v31  ;;  %12698 = vmatprep.mubr.f32.mxu1 %v23686_v31 }
 0x99f   : > { %12010 = vmatmul.mubr.f32.vlgmr.msra.gmra.mrb[72].mxu0 %v21207_v45  ;;  %12700 = vmatmul.mubr.f32.vlgmr.msra.gmra.mrb[72].mxu1 %v21207_v45  ;;  %v11318_v45 = vpop.permute.xlu0 %11317 }
 0x9a0   : > { %12015 = vmatprep.mubr.f32.mxu0 %v23686_v31  ;;  %12705 = vmatprep.mubr.f32.mxu1 %v23686_v31 }
 0x9a3   : > { %12017 = vmatmul.mubr.f32.gmra.mrb[74].mxu0 %v21225_v8  ;;  %12707 = vmatmul.mubr.f32.gmra.mrb[74].mxu1 %v21225_v8  ;;  %v21870_v8 = vpop.permute.xlu1 %11322  ;;  %v21872_v6 = vpop.permute.xlu0 %11327 }
 0x9a4   : > { %12022 = vmatprep.mubr.f32.mxu0 %v23686_v31  ;;  %12712 = vmatprep.mubr.f32.mxu1 %v23686_v31 }
 0x9a7   : > { %12024 = vmatmul.mubr.f32.gmra.mrb[76].mxu0 %v21254_v15  ;;  %12714 = vmatmul.mubr.f32.gmra.mrb[76].mxu1 %v21254_v15  ;;  %v21874_v21 = vpop.permute.xlu1 %11332  ;;  %v5442_v15 = vpop.permute.xlu0 %5441 }
 0x9a8   : > { %12029 = vmatprep.mubr.f32.mxu0 %v23686_v31  ;;  %12719 = vmatprep.mubr.f32.mxu1 %v23686_v31  ;;  %v21880_v57 = vadd.f32 %v24029_v0, %v5442_v15  ;;  %v21883_v4 = vadd.f32 %v24030_v50, %v5442_v15  ;;  %v21886_v58 = vadd.f32 %v24031_v39, %v5442_v15  ;;  %v24057_v0 = vld [vmem:[#allocation16_spill] sm:$0xff]  ;;  %v24058_v39 = vld [vmem:[#allocation17_spill] sm:$0xff] }
 0x9ab   : > { %12031 = vmatmul.mubr.f32.gmra.mrb[78].mxu0 %v21550_v1  ;;  %12721 = vmatmul.mubr.f32.gmra.mrb[78].mxu1 %v21550_v1  ;;  %v5447_v36 = vpop.permute.xlu1 %5446  ;;  %v5452_v26 = vpop.permute.xlu0 %5451  ;;  %v21877_v1 = vadd.f32 %v24028_v48, %v5442_v15  ;;  %v24054_v15 = vld [vmem:[#allocation14_spill] sm:$0xff] }
 0x9ac   : > { %12984 = vmatprep.mubr.f32.mxu0 %v23686_v31  ;;  %13839 = vmatprep.mubr.f32.mxu1 %v23686_v31  ;;  %v21889_v44 = vadd.f32 %v24032_v47, %v5447_v36  ;;  %v21892_v17 = vadd.f32 %v24033_v34, %v5447_v36  ;;  %v21895_v55 = vadd.f32 %v24034_v14, %v5447_v36  ;;  %v24061_v14 = vld [vmem:[#allocation19_spill] sm:$0xff] }
 0x9ad   : > { %v21898_v11 = vadd.f32 %v24035_v2, %v5447_v36  ;;  %v21901_v53 = vadd.f32 %v24036_v5, %v5452_v26  ;;  %v21904_v24 = vadd.f32 %v24037_v13, %v5452_v26  ;;  %v21907_v49 = vadd.f32 %v24038_v37, %v5452_v26  ;;  %v24063_v37 = vld [vmem:[#allocation20_spill] sm:$0xff] }
 0x9ae   : > { %v21910_v16 = vadd.f32 %v24039_v52, %v5452_v26  ;;  %v24055_v26 = vld [vmem:[#allocation15_spill] sm:$0xff] }
 0x9af   : > { %v5457_v60 = vpop.permute.xlu1 %5456  ;;  %v5462_v3 = vpop.permute.xlu0 %5461 }
 0x9b0   : > { %v21913_v10 = vadd.f32 %v24040_v51, %v5457_v60  ;;  %v21916_v20 = vadd.f32 %v24041_v61, %v5457_v60  ;;  %v21919_v33 = vadd.f32 %v24042_v32, %v5457_v60  ;;  %v21922_v27 = vadd.f32 %v24043_v56, %v5457_v60  ;;  %v24064_v51 = vld [vmem:[#allocation21_spill] sm:$0xff] }
 0x9b1   : > { %v21925_v43 = vadd.f32 %v24045_v22, %v5462_v3  ;;  %v21928_v63 = vadd.f32 %v24046_v54, %v5462_v3  ;;  %v21931_v12 = vadd.f32 %v24047_v38, %v5462_v3  ;;  %v21934_v35 = vadd.f32 %v24048_v29, %v5462_v3  ;;  %v24056_v3 = vld [vmem:[#allocation13_spill] sm:$0xff]  ;;  %v24065_v38 = vld [vmem:[#allocation22_spill] sm:$0xff] }
 0x9b2   : > { %24044 = vst [vmem:[#allocation73_spill] sm:$0xff] %v21922_v27 }
 0x9b3   : > { %v5467_v23 = vpop.permute.xlu1 %5466  ;;  %v5472_v18 = vpop.permute.xlu0 %5471 }
 0x9b4   : > { %v21937_v59 = vadd.f32 %v24049_v46, %v5467_v23  ;;  %v21940_v19 = vadd.f32 %v24050_v40, %v5467_v23  ;;  %v21943_v62 = vadd.f32 %v24051_v7, %v5467_v23  ;;  %v21946_v42 = vadd.f32 %v24052_v9, %v5467_v23  ;;  %v24059_v23 = vld [vmem:[#allocation18_spill] sm:$0xff] }
 0x9b5   : > { %v21949_v28 = vadd.f32 %v24053_v30, %v5472_v18  ;;  %v21952_v36 = vadd.f32 %v24054_v15, %v5472_v18  ;;  %v21955_v60 = vadd.f32 %v24055_v26, %v5472_v18  ;;  %v21958_v48 = vadd.f32 %v24056_v3, %v5472_v18  ;;  %v24066_v46 = vld [vmem:[#allocation42_spill] sm:$0xff]  ;;  %v24067_v30 = vld [vmem:[#allocation43_spill] sm:$0xff]  ;;  %v24069_v26 = vld [vmem:[#allocation44_spill] sm:$0xff] }
 0x9b7   : > { %v5477_v25 = vpop.permute.xlu1 %5476  ;;  %v5482_v41 = vpop.permute.xlu0 %5481 }
 0x9b8   : > { %v21961_v50 = vadd.f32 %v24057_v0, %v5477_v25  ;;  %v21964_v47 = vadd.f32 %v24058_v39, %v5477_v25  ;;  %v21967_v34 = vadd.f32 %v24059_v23, %v5477_v25  ;;  %v21970_v2 = vadd.f32 %v24061_v14, %v5477_v25  ;;  %v24071_v23 = vld [vmem:[#allocation45_spill] sm:$0xff] }
 0x9b9   : > { %v21973_v52 = vadd.f32 %v24063_v37, %v5482_v41  ;;  %v21976_v18 = vadd.f32 %v24064_v51, %v5482_v41  ;;  %v21979_v29 = vadd.f32 %v24065_v38, %v5482_v41  ;;  %v21982_v40 = vadd.f32 %v24066_v46, %v5482_v41 }
 0x9ba   : > { %24060 = vst [vmem:[#allocation71_spill] sm:$0xff] %v21967_v34  ;;  %24062 = vst [vmem:[#allocation72_spill] sm:$0xff] %v21970_v2  ;;  %v24087_v34 = vld [vmem:[#allocation55_spill] sm:$0xff] }
 0x9bb   : > { %v5487_v54 = vpop.permute.xlu1 %5486  ;;  %v5492_v9 = vpop.permute.xlu0 %5491 }
 0x9bc   : > { %v21985_v15 = vadd.f32 %v24067_v30, %v5487_v54  ;;  %v21988_v3 = vadd.f32 %v24069_v26, %v5487_v54  ;;  %v21991_v14 = vadd.f32 %v24071_v23, %v5487_v54 }
 0x9be   : > { %24068 = vst [vmem:[#allocation74_spill] sm:$0xff] %v21985_v15  ;;  %24070 = vst [vmem:[#allocation23_spill] sm:$0xff] %v21988_v3 }
 0xa72   : > { %v12011_v5 = vpop.f32.mrb[72].mxu0  ;;  %v12701_v13 = vpop.f32.mrb[72].mxu1 }
 0xa73   : > { %v15808_v61 = vadd.f32 %v12011_v5, %v11318_v45  ;;  %v15816_v32 = vadd.f32 %v12701_v13, %v11318_v45  ;;  %v12013_v56 = vpop.f32.mrb[73].mxu0  ;;  %v12703_v22 = vpop.f32.mrb[73].mxu1  ;;  %v24072_v5 = vld [vmem:[#allocation46_spill] sm:$0xff] }
 0xa74   : > { %v15809_v25 = vadd.f32 %v12013_v56, %v11318_v45  ;;  %v15817_v7 = vadd.f32 %v12703_v22, %v11318_v45  ;;  %v21994_v13 = vadd.f32 %v24072_v5, %v5487_v54  ;;  %v24073_v54 = vld [vmem:[#allocation47_spill] sm:$0xff] }
 0xa75   : > { %v12727_v0 = vsub.f32 0.0, %v15808_v61  ;;  %v12729_v39 = vsub.f32 0.0, %v15816_v32  ;;  %v22001_v5 = vadd.f32 %v24073_v54, %v5492_v9 }
 0xa76   : > { %v12728_v37 = vsub.f32 0.0, %v15809_v25  ;;  %v12730_v41 = vsub.f32 0.0, %v15817_v7  ;;  %v12018_v51 = vpop.f32.mrb[74].mxu0  ;;  %v12708_v56 = vpop.f32.mrb[74].mxu1 }
 0xa77   : > { %v12743_v45 = vmul.f32 1.442695, %v12727_v0  ;;  %v12747_v22 = vmul.f32 1.442695, %v12729_v39  ;;  %v15810_v38 = vadd.f32 %v12018_v51, %v21870_v8  ;;  %v15818_v46 = vadd.f32 %v12708_v56, %v21870_v8  ;;  %v12020_v30 = vpop.f32.mrb[75].mxu0  ;;  %v12710_v26 = vpop.f32.mrb[75].mxu1 }
 0xa78   : > { %v12745_v61 = vmul.f32 1.442695, %v12728_v37  ;;  %v12749_v32 = vmul.f32 1.442695, %v12730_v41  ;;  %v15811_v23 = vadd.f32 %v12020_v30, %v21870_v8  ;;  %v15819_v31 = vadd.f32 %v12710_v26, %v21870_v8  ;;  %24074 = vst [vmem:[#allocation25_spill] sm:$0xff] %v22001_v5  ;;  %v24075_v0 = vld [vmem:[#allocation48_spill] sm:$0xff] }
 0xa79   : > { %17007 = vpow2.f32 %v12743_v45  ;;  %v12731_v25 = vsub.f32 0.0, %v15810_v38  ;;  %v12733_v7 = vsub.f32 0.0, %v15818_v46  ;;  %v22004_v39 = vadd.f32 %v24075_v0, %v5492_v9  ;;  %v12887_v37 = vld [vmem:[%s23266_s15] sm:$0xf] }
 0xa7a   : > { %17009 = vpow2.f32 %v12747_v22  ;;  %v12732_v51 = vsub.f32 0.0, %v15811_v23  ;;  %v12734_v56 = vsub.f32 0.0, %v15819_v31  ;;  %v12025_v3 = vpop.f32.mrb[76].mxu0  ;;  %v12715_v15 = vpop.f32.mrb[76].mxu1 }
 0xa7b   : > { %24076 = vst [vmem:[#allocation28_spill] sm:$0xff] %v22004_v39  ;;  %17011 = vpow2.f32 %v12745_v61  ;;  %v12751_v8 = vmul.f32 1.442695, %v12731_v25  ;;  %v12755_v41 = vmul.f32 1.442695, %v12733_v7  ;;  %v15812_v30 = vadd.f32 %v12025_v3, %v21872_v6  ;;  %v12027_v45 = vpop.f32.mrb[77].mxu0  ;;  %v5502_v23 = vpop.permute.xlu0 %5501 }
 0xa7c   : > { %v12717_v38 = vpop.f32.mrb[77].mxu1  ;;  %17013 = vpow2.f32 %v12749_v32  ;;  %v12753_v46 = vmul.f32 1.442695, %v12732_v51  ;;  %v12757_v26 = vmul.f32 1.442695, %v12734_v56  ;;  %v15820_v22 = vadd.f32 %v12715_v15, %v21872_v6  ;;  %v5497_v31 = vpop.permute.xlu1 %5496  ;;  %v24077_v61 = vld [vmem:[#allocation49_spill] sm:$0xff] }
 0xa7d   : > { %17015 = vpow2.f32 %v12751_v8  ;;  %v12735_v54 = vsub.f32 0.0, %v15812_v30  ;;  %v15813_v0 = vadd.f32 %v12027_v45, %v21872_v6  ;;  %v15821_v39 = vadd.f32 %v12717_v38, %v21872_v6  ;;  %v24080_v30 = vld [vmem:[#allocation50_spill] sm:$0xff]  ;;  %v24081_v45 = vld [vmem:[#allocation51_spill] sm:$0xff] }
 0xa7e   : > { %v22014_v25 = vadd.f32 %v24077_v61, %v5492_v9  ;;  %17017 = vpow2.f32 %v12755_v41  ;;  %v12737_v3 = vsub.f32 0.0, %v15820_v22  ;;  %v12032_v7 = vpop.f32.mrb[78].mxu0  ;;  %v12722_v5 = vpop.f32.mrb[78].mxu1  ;;  %v22016_v32 = vand.u32 4294901760, %v12887_v37  ;;  %v24083_v41 = vld [vmem:[#allocation52_spill] sm:$0xff] }
 0xa7f   : > { %17019 = vpow2.f32 %v12753_v46  ;;  %v12759_v51 = vmul.f32 1.442695, %v12735_v54  ;;  %v12736_v15 = vsub.f32 0.0, %v15813_v0  ;;  %v12738_v56 = vsub.f32 0.0, %v15821_v39  ;;  %v12034_v2 = vpop.f32.mrb[79].mxu0  ;;  %v12724_v8 = vpop.f32.mrb[79].mxu1 }
 0xa80   : > { %24078 = vst [vmem:[#allocation29_spill] sm:$0xff] %v22014_v25  ;;  %24079 = vst [vmem:[#allocation24_spill] sm:$0xff] %v22016_v32  ;;  %v22019_v27 = vadd.f32 %v24080_v30, %v5492_v9  ;;  %v22022_v6 = vadd.f32 %v24081_v45, %v5497_v31  ;;  %17021 = vpow2.f32 %v12757_v26  ;;  %v12763_v38 = vmul.f32 1.442695, %v12737_v3  ;;  %v24085_v46 = vld [vmem:[#allocation53_spill] sm:$0xff]  ;;  %v24086_v39 = vld [vmem:[#allocation54_spill] sm:$0xff]  ;;  %v5507_v45 = vpop.permute.xlu1 %5506 }
 0xa81   : > { %v22025_v22 = vadd.f32 %v24083_v41, %v5497_v31  ;;  %17023 = vpow2.f32 %v12759_v51  ;;  %v12761_v61 = vmul.f32 1.442695, %v12736_v15  ;;  %v12765_v25 = vmul.f32 1.442695, %v12738_v56  ;;  %v24089_v26 = vld [vmem:[#allocation56_spill] sm:$0xff]  ;;  %v24091_v41 = vld [vmem:[#allocation57_spill] sm:$0xff] }
 0xa82   : > { %24082 = vst [vmem:[#allocation30_spill] sm:$0xff] %v22022_v6  ;;  %v22028_v54 = vadd.f32 %v24085_v46, %v5497_v31  ;;  %v22031_v0 = vadd.f32 %v24086_v39, %v5497_v31  ;;  %v22034_v9 = vadd.f32 %v24087_v34, %v5502_v23  ;;  %17025 = vpow2.f32 %v12763_v38  ;;  %v24094_v56 = vld [vmem:[#allocation58_spill] sm:$0xff]  ;;  %v24096_v46 = vld [vmem:[#allocation59_spill] sm:$0xff] }
 0xa83   : > { %24084 = vst [vmem:[#allocation31_spill] sm:$0xff] %v22025_v22  ;;  %v17008_v30 = vpop.eup %17007  ;;  %v22037_v3 = vadd.f32 %v24089_v26, %v5502_v23  ;;  %v22040_v22 = vadd.f32 %v24091_v41, %v5502_v23  ;;  %17027 = vpow2.f32 %v12761_v61  ;;  %v22043_v51 = vsub.f32 %v12887_v37, %v22016_v32  ;;  %v24098_v26 = vld [vmem:[#allocation60_spill] sm:$0xff]  ;;  %v24100_v41 = vld [vmem:[#allocation61_spill] sm:$0xff]  ;;  %v24102_v61 = vld [vmem:[#allocation62_spill] sm:$0xff] }
 0xa84   : > { %24088 = vst [vmem:[#allocation26_spill] sm:$0xff] %v22034_v9  ;;  %v17010_v15 = vpop.eup %17009  ;;  %v22046_v31 = vadd.f32 %v24094_v56, %v5502_v23  ;;  %v22049_v34 = vadd.f32 %v24096_v46, %v5507_v45  ;;  %v12775_v38 = vadd.f32 1.0, %v17008_v30  ;;  %17029 = vpow2.f32 %v12765_v25  ;;  %v5512_v9 = vpop.permute.xlu0 %5511  ;;  %v24104_v23 = vld [vmem:[#allocation63_spill] sm:$0xff] }
 0xa85   : > { %24090 = vst [vmem:[#allocation27_spill] sm:$0xff] %v22037_v3  ;;  %24092 = vst [vmem:[#allocation32_spill] sm:$0xff] %v22040_v22  ;;  %v17012_v39 = vpop.eup %17011  ;;  %v22052_v3 = vadd.f32 %v24098_v26, %v5507_v45  ;;  %v22055_v22 = vadd.f32 %v24100_v41, %v5507_v45  ;;  %v22058_v37 = vadd.f32 %v24102_v61, %v5507_v45  ;;  %v12777_v32 = vadd.f32 1.0, %v17010_v15 }
 0xa86   : > { %24093 = vst [vmem:[#allocation33_spill] sm:$0xff] %v22043_v51  ;;  %24095 = vst [vmem:[#allocation34_spill] sm:$0xff] %v22046_v31  ;;  %v17014_v6 = vpop.eup %17013  ;;  %v22061_v56 = vadd.f32 %v24104_v23, %v5512_v9  ;;  %17031 = vrcp.f32 %v12775_v38  ;;  %v12776_v46 = vadd.f32 1.0, %v17012_v39  ;;  %v15814_v25 = vadd.f32 %v12032_v7, %v21874_v21  ;;  %v24107_v38 = vld [vmem:[#allocation64_spill] sm:$0xff]  ;;  %v24109_v7 = vld [vmem:[#allocation65_spill] sm:$0xff] }
 0xa87   : > { %24097 = vst [vmem:[#allocation35_spill] sm:$0xff] %v22049_v34  ;;  %24099 = vst [vmem:[#allocation36_spill] sm:$0xff] %v22052_v3  ;;  %v17016_v30 = vpop.eup %17015  ;;  %17033 = vrcp.f32 %v12777_v32  ;;  %v12778_v34 = vadd.f32 1.0, %v17014_v6  ;;  %v15822_v26 = vadd.f32 %v12722_v5, %v21874_v21  ;;  %v22066_v41 = vand.u32 4294901760, %v22043_v51  ;;  %v24111_v6 = vld [vmem:[#allocation66_spill] sm:$0xff] }
 0xa88   : > { %24101 = vst [vmem:[#allocation37_spill] sm:$0xff] %v22055_v22  ;;  %24103 = vst [vmem:[#allocation38_spill] sm:$0xff] %v22058_v37  ;;  %v17018_v3 = vpop.eup %17017  ;;  %17035 = vrcp.f32 %v12776_v46  ;;  %v12779_v45 = vadd.f32 1.0, %v17016_v30  ;;  %v15815_v15 = vadd.f32 %v12034_v2, %v21874_v21  ;;  %v15823_v61 = vadd.f32 %v12724_v8, %v21874_v21  ;;  %v24113_v22 = vld [vmem:[#allocation67_spill] sm:$0xff] }
 0xa89   : > { %24105 = vst [vmem:[#allocation39_spill] sm:$0xff] %v22061_v56  ;;  %24106 = vst [vmem:[#allocation40_spill] sm:$0xff] %v22066_v41  ;;  %v17020_v23 = vpop.eup %17019  ;;  %v22071_v39 = vadd.f32 %v24107_v38, %v5512_v9  ;;  %v22074_v56 = vadd.f32 %v24109_v7, %v5512_v9  ;;  %17037 = vrcp.f32 %v12778_v34  ;;  %v12781_v32 = vadd.f32 1.0, %v17018_v3 }
 0xa8a   : > { %v17022_v5 = vpop.eup %17021  ;;  %v22077_v37 = vadd.f32 %v24111_v6, %v5512_v9  ;;  %17039 = vrcp.f32 %v12779_v45  ;;  %v12780_v46 = vadd.f32 1.0, %v17020_v23  ;;  %v12739_v30 = vsub.f32 0.0, %v15814_v25  ;;  %v24115_v45 = vld [vmem:[#allocation68_spill] sm:$0xff] }
 0xa8b   : > { %24108 = vst [vmem:[#allocation41_spill] sm:$0xff] %v22071_v39  ;;  %24110 = vst [vmem:[#allocation7_spill] sm:$0xff] %v22074_v56  ;;  %v17024_v31 = vpop.eup %17023  ;;  %17041 = vrcp.f32 %v12781_v32  ;;  %v12782_v2 = vadd.f32 1.0, %v17022_v5  ;;  %v12741_v21 = vsub.f32 0.0, %v15822_v26  ;;  %v12988_v8 = vsub.f32 %v22043_v51, %v22066_v41  ;;  %v5517_v39 = vpop.permute.xlu1 %5516  ;;  %v24117_v26 = vld [vmem:[#allocation69_spill] sm:$0xff] }
 0xa8c   : > { %24112 = vst [vmem:[#allocation8_spill] sm:$0xff] %v22077_v37  ;;  %v17026_v38 = vpop.eup %17025  ;;  %17043 = vrcp.f32 %v12780_v46  ;;  %v12783_v7 = vadd.f32 1.0, %v17024_v31  ;;  %v12740_v34 = vsub.f32 0.0, %v15815_v15  ;;  %v12742_v3 = vsub.f32 0.0, %v15823_v61  ;;  %v24119_v46 = vld [vmem:[#allocation70_spill] sm:$0xff] }
 0xa8d   : > { %v17028_v56 = vpop.eup %17027  ;;  %v22082_v9 = vadd.f32 %v24113_v22, %v5517_v39  ;;  %v22085_v23 = vadd.f32 %v24115_v45, %v5517_v39  ;;  %17045 = vrcp.f32 %v12782_v2  ;;  %v12785_v25 = vadd.f32 1.0, %v17026_v38 }
 0xa8e   : > { %v17030_v32 = vpop.eup %17029  ;;  %v22088_v5 = vadd.f32 %v24117_v26, %v5517_v39  ;;  %17047 = vrcp.f32 %v12783_v7  ;;  %v12784_v6 = vadd.f32 1.0, %v17028_v56  ;;  %v12767_v41 = vmul.f32 1.442695, %v12739_v30 }
 0xa8f   : > { %24114 = vst [vmem:[#allocation9_spill] sm:$0xff] %v22082_v9  ;;  %24116 = vst [vmem:[#allocation10_spill] sm:$0xff] %v22085_v23  ;;  %v22091_v31 = vadd.f32 %v24119_v46, %v5517_v39  ;;  %17049 = vrcp.f32 %v12785_v25  ;;  %v12786_v15 = vadd.f32 1.0, %v17030_v32  ;;  %v12771_v61 = vmul.f32 1.442695, %v12741_v21 }
 0xa90   : > { %24118 = vst [vmem:[#allocation11_spill] sm:$0xff] %v22088_v5  ;;  %v22093_v22 = vpop.eup %17031  ;;  %17051 = vrcp.f32 %v12784_v6  ;;  %v12769_v45 = vmul.f32 1.442695, %v12740_v34  ;;  %v12773_v51 = vmul.f32 1.442695, %v12742_v3  ;;  %v22095_v2 = vand.u32 4294901760, %v12988_v8 }
 0xa91   : > { %24120 = vst [vmem:[#allocation12_spill] sm:$0xff] %v22091_v31  ;;  %24121 = vst [vmem:[#allocation14_spill] sm:$0xff] %v22093_v22  ;;  %v22097_v38 = vpop.eup %17033  ;;  %17053 = vrcp.f32 %v12786_v15  ;;  %v12823_v56 = vmul.f32 %v22093_v22, %v21877_v1  ;;  %v22103_v39 = vmul.f32 %v22093_v22, %v21925_v43  ;;  %v22107_v30 = vmul.f32 %v22093_v22, %v21973_v52 }
 0xa92   : > { %24122 = vst [vmem:[#allocation15_spill] sm:$0xff] %v22095_v2  ;;  %24123 = vst [vmem:[#allocation13_spill] sm:$0xff] %v22097_v38  ;;  %v22109_v21 = vpop.eup %17035  ;;  %17055 = vpow2.f32 %v12767_v41  ;;  %v12825_v8 = vmul.f32 %v22097_v38, %v21880_v57  ;;  %v22115_v7 = vmul.f32 %v22097_v38, %v21928_v63  ;;  %v22119_v1 = vmul.f32 %v22097_v38, %v21976_v18 }
 0xa93   : > { %v22121_v43 = vpop.eup %17037  ;;  %17057 = vpow2.f32 %v12771_v61  ;;  %v12824_v52 = vmul.f32 %v22109_v21, %v21883_v4  ;;  %v12890_v34 = vand.u32 4294901760, %v12823_v56  ;;  %v22127_v41 = vmul.f32 %v22109_v21, %v21931_v12 }
 0xa94   : > { %v22129_v57 = vpop.eup %17039  ;;  %17059 = vpow2.f32 %v12769_v45  ;;  %v12826_v63 = vmul.f32 %v22121_v43, %v21886_v58  ;;  %v13745_v3 = vand.u32 4294901760, %v12825_v8  ;;  %v22135_v18 = vmul.f32 %v22121_v43, %v21934_v35 }
 0xa95   : > { %v22137_v25 = vpop.eup %17041  ;;  %17061 = vpow2.f32 %v12773_v51  ;;  %v12888_v4 = vand.u32 4294901760, %v12824_v52  ;;  %v12827_v32 = vmul.f32 %v22129_v57, %v21889_v44  ;;  %v22141_v12 = vsub.f32 %v12823_v56, %v12890_v34 }
 0xa96   : > { %v22143_v26 = vpop.eup %17043  ;;  %v13743_v6 = vand.u32 4294901760, %v12826_v63  ;;  %v12829_v58 = vmul.f32 %v22137_v25, %v21892_v17  ;;  %v22147_v46 = vsub.f32 %v12825_v8, %v13745_v3  ;;  %v12904_v35 = vand.u32 4294901760, %v22127_v41 }
 0xa97   : > { %24124 = vst [vmem:[#allocation16_spill] sm:$0xff] %v22141_v12  ;;  %v22150_v15 = vpop.eup %17045  ;;  %v12828_v51 = vmul.f32 %v22143_v26, %v21895_v55  ;;  %v22154_v61 = vsub.f32 %v12824_v52, %v12888_v4  ;;  %v12894_v44 = vand.u32 4294901760, %v12827_v32  ;;  %v12844_v45 = vmul.f32 %v22143_v26, %v21943_v62 }
 0xa98   : > { %24125 = vst [vmem:[#allocation17_spill] sm:$0xff] %v22147_v46  ;;  %v22158_v56 = vpop.eup %17047  ;;  %v12830_v17 = vmul.f32 %v22150_v15, %v21898_v11  ;;  %v22162_v8 = vsub.f32 %v12826_v63, %v13743_v6  ;;  %v13749_v2 = vand.u32 4294901760, %v12829_v58  ;;  %v22165_v46 = vsub.f32 %v22127_v41, %v12904_v35 }
 0xa99   : > { %24126 = vst [vmem:[#allocation18_spill] sm:$0xff] %v22154_v61  ;;  %v22167_v12 = vpop.eup %17049  ;;  %v12892_v55 = vand.u32 4294901760, %v12828_v51  ;;  %v22169_v52 = vpack.c.bf16 %v12894_v44, %v12890_v34  ;;  %v22171_v23 = vsub.f32 %v12827_v32, %v12894_v44  ;;  %v22175_v62 = vmul.f32 %v22158_v56, %v21901_v53 }
 0xa9a   : > { %24127 = vst [vmem:[#allocation19_spill] sm:$0xff] %v22162_v8  ;;  %24128 = vst [vmem:[#allocation20_spill] sm:$0xff] %v22165_v46  ;;  %v22177_v9 = vpop.eup %17051  ;;  %v13747_v11 = vand.u32 4294901760, %v12830_v17  ;;  %v22179_v63 = vpack.c.bf16 %v13749_v2, %v13745_v3  ;;  %v22181_v8 = vsub.f32 %v12829_v58, %v13749_v2  ;;  %v22185_v41 = vmul.f32 %v22167_v12, %v21904_v24 }
 0xa9b   : > { %24129 = vst [vmem:[#allocation21_spill] sm:$0xff] %v22169_v52  ;;  %24130 = vst [vmem:[#allocation22_spill] sm:$0xff] %v22171_v23  ;;  %v22187_v46 = vpop.eup %17053  ;;  %v22189_v34 = vpack.c.bf16 %v12892_v55, %v12888_v4  ;;  %v22191_v32 = vsub.f32 %v12828_v51, %v12892_v55  ;;  %v22195_v53 = vmul.f32 %v22177_v9, %v21907_v49  ;;  %v23410_v44 = vand.u32 4294901760, %v22175_v62 }
 0xa9c   : > { %24131 = vst [vmem:[#allocation42_spill] sm:$0xff] %v22179_v63  ;;  %24132 = vst [vmem:[#allocation43_spill] sm:$0xff] %v22181_v8  ;;  %v17056_v3 = vpop.eup %17055  ;;  %v22198_v23 = vpack.c.bf16 %v13747_v11, %v13743_v6  ;;  %v22200_v2 = vsub.f32 %v12830_v17, %v13747_v11  ;;  %v22204_v24 = vmul.f32 %v22187_v46, %v21910_v16  ;;  %v23415_v4 = vand.u32 4294901760, %v22185_v41 }
 0xa9d   : > { %24133 = vst [vmem:[#allocation44_spill] sm:$0xff] %v22189_v34  ;;  %24134 = vst [vmem:[#allocation45_spill] sm:$0xff] %v22191_v32  ;;  %v17058_v58 = vpop.eup %17057  ;;  %v12787_v51 = vadd.f32 1.0, %v17056_v3  ;;  %15281 = vmatprep.subr.bf16.mxu0 %v22189_v34  ;;  %v22212_v55 = vsub.f32 %v22175_v62, %v23410_v44  ;;  %v12908_v6 = vand.u32 4294901760, %v12844_v45  ;;  %v12846_v49 = vmul.f32 %v22150_v15, %v21946_v42 }
 0xa9e   : > { %24135 = vst [vmem:[#allocation46_spill] sm:$0xff] %v22198_v23  ;;  %24136 = vst [vmem:[#allocation47_spill] sm:$0xff] %v22200_v2  ;;  %v17060_v17 = vpop.eup %17059  ;;  %v12789_v11 = vadd.f32 1.0, %v17058_v58  ;;  %15473 = vmatprep.subr.bf16.mxu1 %v22198_v23  ;;  %15283 = vmatpush1.bf16.msra.mxu0 %v22169_v52  ;;  %v22220_v3 = vsub.f32 %v22185_v41, %v23415_v4  ;;  %v24139_v58 = vand.u32 4294901760, %v22195_v53  ;;  %v24142_v4 = vand.u32 4294901760, %v22204_v24 }
 0xa9f   : > { %24137 = vst [vmem:[#allocation48_spill] sm:$0xff] %v22212_v55  ;;  %v17062_v34 = vpop.eup %17061  ;;  %17063 = vrcp.f32 %v12787_v51  ;;  %v12788_v44 = vadd.f32 1.0, %v17060_v17  ;;  %15475 = vmatpush1.bf16.msra.mxu1 %v22179_v63  ;;  %v22230_v52 = vpack.c.bf16 %v12908_v6, %v12904_v35  ;;  %v22237_v42 = vsub.f32 %v12844_v45, %v12908_v6 }
 0xaa0   : > { %24138 = vst [vmem:[#allocation49_spill] sm:$0xff] %v22220_v3  ;;  %v22228_v23 = vsub.f32 %v22195_v53, %v24139_v58  ;;  %17065 = vrcp.f32 %v12789_v11  ;;  %v12790_v16 = vadd.f32 1.0, %v17062_v34  ;;  %v22235_v3 = vsub.f32 %v22204_v24, %v24142_v4 }
 0xaa1   : > { %24141 = vst [vmem:[#allocation51_spill] sm:$0xff] %v22230_v52  ;;  %24144 = vst [vmem:[#allocation53_spill] sm:$0xff] %v22237_v42  ;;  %17067 = vrcp.f32 %v12788_v44  ;;  %v13759_v51 = vand.u32 4294901760, %v22135_v18  ;;  %v13763_v17 = vand.u32 4294901760, %v12846_v49  ;;  %v12843_v63 = vmul.f32 %v22129_v57, %v21937_v59 }
 0xaa2   : > { %24140 = vst [vmem:[#allocation50_spill] sm:$0xff] %v22228_v23  ;;  %24143 = vst [vmem:[#allocation52_spill] sm:$0xff] %v22235_v3  ;;  %17069 = vrcp.f32 %v12790_v16  ;;  %v12906_v35 = vand.u32 4294901760, %v22103_v39  ;;  %v12845_v34 = vmul.f32 %v22137_v25, %v21940_v19  ;;  %v13761_v11 = vand.u32 4294901760, %v22115_v7  ;;  %v24162_v23 = vld [vmem:[#allocation72_spill] sm:$0xff] }
 0xaa3   : > { %v22246_v58 = vpack.c.bf16 %v13763_v17, %v13759_v51  ;;  %v22249_v45 = vsub.f32 %v22135_v18, %v13759_v51  ;;  %v22251_v44 = vsub.f32 %v12846_v49, %v13763_v17  ;;  %v12910_v4 = vand.u32 4294901760, %v12843_v63 }
 0xaa4   : > { %v22254_v6 = vsub.f32 %v22103_v39, %v12906_v35  ;;  %v13765_v59 = vand.u32 4294901760, %v12845_v34  ;;  %v22257_v16 = vsub.f32 %v22115_v7, %v13761_v11  ;;  %v12848_v19 = vmul.f32 %v22177_v9, %v21955_v60 }
 0xaa5   : > { %24145 = vst [vmem:[#allocation54_spill] sm:$0xff] %v22246_v58  ;;  %24146 = vst [vmem:[#allocation55_spill] sm:$0xff] %v22249_v45  ;;  %v22261_v42 = vpack.c.bf16 %v12910_v4, %v12906_v35  ;;  %v22263_v55 = vsub.f32 %v12843_v63, %v12910_v4  ;;  %v12850_v18 = vmul.f32 %v22187_v46, %v21958_v48  ;;  %v24161_v45 = vld [vmem:[#allocation73_spill] sm:$0xff]  ;;  %v24169_v38 = vand.u32 4294901760, %v22195_v53 }
 0xaa6   : > { %24147 = vst [vmem:[#allocation56_spill] sm:$0xff] %v22251_v44  ;;  %24148 = vst [vmem:[#allocation57_spill] sm:$0xff] %v22254_v6  ;;  %v12847_v49 = vmul.f32 %v22158_v56, %v21949_v28  ;;  %v22269_v51 = vpack.c.bf16 %v13765_v59, %v13761_v11  ;;  %v22271_v39 = vsub.f32 %v12845_v34, %v13765_v59  ;;  %v12912_v17 = vand.u32 4294901760, %v12848_v19 }
 0xaa7   : > { %24149 = vst [vmem:[#allocation58_spill] sm:$0xff] %v22257_v16  ;;  %24150 = vst [vmem:[#allocation59_spill] sm:$0xff] %v22261_v42  ;;  %v12849_v7 = vmul.f32 %v22167_v12, %v21952_v36  ;;  %v13767_v16 = vand.u32 4294901760, %v12850_v18  ;;  %v12856_v63 = vmul.f32 %v22109_v21, %v21979_v29  ;;  %v12860_v35 = vmul.f32 %v22143_v26, %v21991_v14 }
 0xaa8   : > { %24151 = vst [vmem:[#allocation60_spill] sm:$0xff] %v22263_v55  ;;  %24152 = vst [vmem:[#allocation61_spill] sm:$0xff] %v22269_v51  ;;  %v12914_v60 = vand.u32 4294901760, %v12847_v49  ;;  %v22279_v48 = vsub.f32 %v12848_v19, %v12912_v17  ;;  %v12858_v28 = vmul.f32 %v22121_v43, %v21982_v40  ;;  %v12862_v34 = vmul.f32 %v22150_v15, %v21994_v13 }
 0xaa9   : > { %24153 = vst [vmem:[#allocation62_spill] sm:$0xff] %v22271_v39  ;;  %v13769_v4 = vand.u32 4294901760, %v12849_v7  ;;  %v22285_v11 = vpop.eup %17063  ;;  %v22287_v36 = vsub.f32 %v12850_v18, %v13767_v16  ;;  %v12920_v39 = vand.u32 4294901760, %v12856_v63  ;;  %v12924_v29 = vand.u32 4294901760, %v12860_v35 }
 0xaaa   : > { %24154 = vst [vmem:[#allocation63_spill] sm:$0xff] %v22279_v48  ;;  %v22289_v59 = vsub.f32 %v12847_v49, %v12914_v60  ;;  %v22291_v55 = vpop.eup %17065  ;;  %v12835_v14 = vmul.f32 %v22285_v11, %v21913_v10  ;;  %v12851_v19 = vmul.f32 %v22285_v11, %v21961_v50  ;;  %v13775_v48 = vand.u32 4294901760, %v12858_v28 }
 0xaab   : > { %24155 = vst [vmem:[#allocation64_spill] sm:$0xff] %v22287_v36  ;;  %v22297_v40 = vsub.f32 %v12849_v7, %v13769_v4  ;;  %v22299_v13 = vpop.eup %17067  ;;  %v12837_v18 = vmul.f32 %v22291_v55, %v21916_v20  ;;  %v12853_v49 = vmul.f32 %v22291_v55, %v21964_v47  ;;  %v22307_v36 = vsub.f32 %v12856_v63, %v12920_v39  ;;  %v24160_v7 = vld [vmem:[#allocation71_spill] sm:$0xff] }
 0xaac   : > { %24156 = vst [vmem:[#allocation65_spill] sm:$0xff] %v22289_v59  ;;  %v22305_v59 = vpack.c.bf16 %v12924_v29, %v12920_v39  ;;  %v22309_v6 = vpop.eup %17069  ;;  %v12836_v10 = vmul.f32 %v22299_v13, %v21919_v33  ;;  %v12902_v50 = vand.u32 4294901760, %v12835_v14  ;;  %v12918_v44 = vand.u32 4294901760, %v12851_v19 }
 0xaad   : > { %24157 = vst [vmem:[#allocation66_spill] sm:$0xff] %v22297_v40  ;;  %24159 = vst [vmem:[#allocation68_spill] sm:$0xff] %v22307_v36  ;;  %v12852_v40 = vmul.f32 %v22299_v13, %v24160_v7  ;;  %v12838_v20 = vmul.f32 %v22309_v6, %v24161_v45  ;;  %v13757_v3 = vand.u32 4294901760, %v12837_v18  ;;  %v12854_v47 = vmul.f32 %v22309_v6, %v24162_v23 }
 0xaae   : > { %24158 = vst [vmem:[#allocation67_spill] sm:$0xff] %v22305_v59  ;;  %v13773_v8 = vand.u32 4294901760, %v12853_v49  ;;  %v12900_v39 = vand.u32 4294901760, %v12836_v10  ;;  %v24163_v63 = vand.u32 4294901760, %v22175_v62  ;;  %v22323_v2 = vsub.f32 %v12835_v14, %v12902_v50 }
 0xaaf   : > { %v12916_v33 = vand.u32 4294901760, %v12852_v40  ;;  %v13755_v31 = vand.u32 4294901760, %v12838_v20  ;;  %v24166_v7 = vand.u32 4294901760, %v22185_v41  ;;  %v22329_v5 = vsub.f32 %v12837_v18, %v13757_v3  ;;  %v24180_v18 = vld [vmem:[#allocation74_spill] sm:$0xff] }
 0xab0   : > { %v22321_v36 = vpack.c.bf16 %v12902_v50, %v24163_v63  ;;  %24165 = vst [vmem:[#allocation70_spill] sm:$0xff] %v22323_v2  ;;  %v13771_v45 = vand.u32 4294901760, %v12854_v47  ;;  %v22333_v23 = vpack.c.bf16 %v12900_v39, %v24169_v38  ;;  %v22335_v22 = vsub.f32 %v12836_v10, %v12900_v39 }
 0xab1   : > { %v22327_v37 = vpack.c.bf16 %v13757_v3, %v24166_v7  ;;  %24168 = vst [vmem:[#allocation73_spill] sm:$0xff] %v22329_v5  ;;  %v22337_v62 = vpack.c.bf16 %v12916_v33, %v12912_v17  ;;  %v22339_v63 = vsub.f32 %v12852_v40, %v12916_v33  ;;  %v24173_v14 = vand.u32 4294901760, %v22204_v24 }
 0xab2   : > { %24164 = vst [vmem:[#allocation69_spill] sm:$0xff] %v22321_v36  ;;  %24170 = vst [vmem:[#allocation72_spill] sm:$0xff] %v22333_v23  ;;  %v22345_v41 = vsub.f32 %v12838_v20, %v13755_v31  ;;  %v22347_v7 = vpack.c.bf16 %v13771_v45, %v13767_v16  ;;  %v22349_v3 = vsub.f32 %v12854_v47, %v13771_v45  ;;  %15285 = vmatprep.subr.bf16.mxu0 %v22333_v23 }
 0xab3   : > { %24167 = vst [vmem:[#allocation71_spill] sm:$0xff] %v22327_v37  ;;  %24171 = vst [vmem:[#allocation75_spill] sm:$0xff] %v22337_v62  ;;  %v22343_v50 = vpack.c.bf16 %v13755_v31, %v24173_v14  ;;  %v22352_v38 = vpack.c.bf16 %v12918_v44, %v12914_v60  ;;  %v22354_v53 = vsub.f32 %v12851_v19, %v12918_v44  ;;  %15287 = vmatpush1.bf16.msra.mxu0 %v22321_v36  ;;  %v24182_v19 = vld [vmem:[#allocation29_spill] sm:$0xff] }
 0xab4   : > { %24172 = vst [vmem:[#allocation76_spill] sm:$0xff] %v22339_v63  ;;  %24175 = vst [vmem:[#allocation78_spill] sm:$0xff] %v22345_v41  ;;  %v22356_v17 = vpack.c.bf16 %v13773_v8, %v13769_v4  ;;  %v22358_v40 = vsub.f32 %v12853_v49, %v13773_v8  ;;  %v22362_v31 = vsub.f32 %v12860_v35, %v12924_v29  ;;  %v13779_v24 = vand.u32 4294901760, %v12862_v34  ;;  %v24181_v8 = vld [vmem:[#allocation23_spill] sm:$0xff] }
 0xab5   : > { %24174 = vst [vmem:[#allocation77_spill] sm:$0xff] %v22343_v50  ;;  %24176 = vst [vmem:[#allocation79_spill] sm:$0xff] %v22347_v7  ;;  %15477 = vmatprep.subr.bf16.mxu1 %v22343_v50  ;;  %v22364_v16 = vsub.f32 %v12858_v28, %v13775_v48  ;;  %v12859_v10 = vmul.f32 %v22129_v57, %v24180_v18  ;;  %15289 = vmatprep.subr.bf16.mxu0 %v22230_v52  ;;  %v12922_v44 = vand.u32 4294901760, %v22107_v30  ;;  %v24190_v18 = vld [vmem:[#allocation31_spill] sm:$0xff] }
 0xab6   : > { %24177 = vst [vmem:[#allocation80_spill] sm:$0xff] %v22352_v38  ;;  %24178 = vst [vmem:[#allocation81_spill] sm:$0xff] %v22354_v53  ;;  %15479 = vmatpush1.bf16.msra.mxu1 %v22327_v37  ;;  %v12861_v60 = vmul.f32 %v22137_v25, %v24181_v8  ;;  %v13777_v4 = vand.u32 4294901760, %v22119_v1  ;;  %v12864_v35 = vmul.f32 %v22177_v9, %v24182_v19  ;;  %v24187_v19 = vld [vmem:[#allocation25_spill] sm:$0xff]  ;;  %v23506_v50 = vand.u32 4294901760, %v22335_v22 }
 0xab7   : > { %24179 = vst [vmem:[#allocation82_spill] sm:$0xff] %v22356_v17  ;;  %15481 = vmatprep.subr.bf16.mxu1 %v22246_v58  ;;  %v22377_v28 = vpack.c.bf16 %v13779_v24, %v13775_v48  ;;  %v22379_v29 = vsub.f32 %v12862_v34, %v13779_v24  ;;  %v12926_v49 = vand.u32 4294901760, %v12859_v10  ;;  %v12868_v20 = vmul.f32 %v22299_v13, %v22028_v54 }
 0xab8   : > { %v22384_v47 = vsub.f32 %v22107_v30, %v12922_v44  ;;  %v13781_v39 = vand.u32 4294901760, %v12861_v60  ;;  %v22387_v33 = vsub.f32 %v22119_v1, %v13777_v4  ;;  %v12928_v45 = vand.u32 4294901760, %v12864_v35  ;;  %15291 = vmatpush1.bf16.msra.mxu0 %v22261_v42 }
 0xab9   : > { %24183 = vst [vmem:[#allocation74_spill] sm:$0xff] %v22377_v28  ;;  %v22390_v14 = vpack.c.bf16 %v12926_v49, %v12922_v44  ;;  %v22392_v48 = vsub.f32 %v12859_v10, %v12926_v49  ;;  %v12932_v34 = vand.u32 4294901760, %v12868_v20  ;;  %v12866_v24 = vmul.f32 %v22187_v46, %v22019_v27  ;;  %15293 = vmatprep.subr.bf16.mxu0 %v22337_v62  ;;  %v24188_v49 = vld [vmem:[#allocation30_spill] sm:$0xff]  ;;  %v24192_v62 = vld [vmem:[#allocation37_spill] sm:$0xff] }
 0xaba   : > { %15483 = vmatpush1.bf16.msra.mxu1 %v22269_v51  ;;  %v22398_v54 = vpack.c.bf16 %v13781_v39, %v13777_v4  ;;  %v22400_v30 = vsub.f32 %v12861_v60, %v13781_v39  ;;  %v22402_v1 = vsub.f32 %v12864_v35, %v12928_v45  ;;  %v12870_v27 = vmul.f32 %v22309_v6, %v22031_v0  ;;  %v24189_v35 = vld [vmem:[#allocation28_spill] sm:$0xff] }
 0xabb   : > { %24184 = vst [vmem:[#allocation23_spill] sm:$0xff] %v22390_v14  ;;  %15485 = vmatprep.subr.bf16.mxu1 %v22347_v7  ;;  %v22406_v10 = vpack.c.bf16 %v12932_v34, %v12928_v45  ;;  %v22408_v44 = vsub.f32 %v12868_v20, %v12932_v34  ;;  %v13783_v8 = vand.u32 4294901760, %v12866_v24  ;;  %v12863_v4 = vmul.f32 %v22158_v56, %v24187_v19  ;;  %v24191_v34 = vld [vmem:[#allocation32_spill] sm:$0xff] }
 0xabc   : > { %24185 = vst [vmem:[#allocation29_spill] sm:$0xff] %v22398_v54  ;;  %v12867_v60 = vmul.f32 %v22285_v11, %v24188_v49  ;;  %v12865_v39 = vmul.f32 %v22167_v12, %v24189_v35  ;;  %v12869_v7 = vmul.f32 %v22291_v55, %v24190_v18  ;;  %15295 = vmatpush1.bf16.msra.mxu0 %v22352_v38  ;;  %v13787_v20 = vand.u32 4294901760, %v12870_v27 }
 0xabd   : > { %24186 = vst [vmem:[#allocation83_spill] sm:$0xff] %v22406_v10  ;;  %v22421_v45 = vsub.f32 %v12866_v24, %v13783_v8  ;;  %v12872_v0 = vmul.f32 %v22109_v21, %v24191_v34  ;;  %v12876_v19 = vmul.f32 %v22143_v26, %v24192_v62  ;;  %15297 = vmatprep.subr.bf16.mxu0 %v22305_v59  ;;  %v12930_v49 = vand.u32 4294901760, %v12863_v4 }
 0xabe   : > { %15487 = vmatpush1.bf16.msra.mxu1 %v22356_v17  ;;  %v12934_v35 = vand.u32 4294901760, %v12867_v60  ;;  %v13785_v51 = vand.u32 4294901760, %v12865_v39  ;;  %v13789_v42 = vand.u32 4294901760, %v12869_v7  ;;  %v22430_v18 = vpack.c.bf16 %v13787_v20, %v13783_v8 }
 0xabf   : > { %15489 = vmatprep.subr.bf16.mxu1 %v22377_v28  ;;  %v22432_v24 = vsub.f32 %v12870_v27, %v13787_v20  ;;  %v12936_v38 = vand.u32 4294901760, %v12872_v0  ;;  %v12940_v58 = vand.u32 4294901760, %v12876_v19  ;;  %v22436_v34 = vsub.f32 %v12863_v4, %v12930_v49  ;;  %v24207_v28 = vld [vmem:[#allocation7_spill] sm:$0xff] }
 0xac0   : > { %24193 = vst [vmem:[#allocation25_spill] sm:$0xff] %v22430_v18  ;;  %v22434_v21 = vpack.c.bf16 %v12934_v35, %v12930_v49  ;;  %v22438_v26 = vsub.f32 %v12867_v60, %v12934_v35  ;;  %v22440_v62 = vpack.c.bf16 %v13789_v42, %v13785_v51  ;;  %15299 = vmatpush1.bf16.msra.mxu0 %v22390_v14  ;;  %v24199_v60 = vld [vmem:[#allocation34_spill] sm:$0xff] }
 0xac1   : > { %v22443_v59 = vsub.f32 %v12865_v39, %v13785_v51  ;;  %v22445_v17 = vsub.f32 %v12869_v7, %v13789_v42  ;;  %v22447_v8 = vpack.c.bf16 %v12940_v58, %v12936_v38  ;;  %v22449_v27 = vsub.f32 %v12872_v0, %v12936_v38  ;;  %15301 = vmatprep.subr.bf16.mxu0 %v22406_v10  ;;  %v24200_v49 = vld [vmem:[#allocation38_spill] sm:$0xff]  ;;  %v24203_v39 = vld [vmem:[#allocation35_spill] sm:$0xff]  ;;  %v24205_v10 = vld [vmem:[#allocation13_spill] sm:$0xff] }
 0xac2   : > { %24194 = vst [vmem:[#allocation30_spill] sm:$0xff] %v22434_v21  ;;  %24195 = vst [vmem:[#allocation28_spill] sm:$0xff] %v22440_v62  ;;  %15491 = vmatpush1.bf16.msra.mxu1 %v22398_v54  ;;  %v22453_v4 = vsub.f32 %v12876_v19, %v12940_v58  ;;  %v12874_v20 = vmul.f32 %v22121_v43, %v24199_v60  ;;  %v12878_v35 = vmul.f32 %v22150_v15, %v24200_v49  ;;  %v24201_v42 = vld [vmem:[#allocation26_spill] sm:$0xff]  ;;  %v24204_v54 = vld [vmem:[#allocation27_spill] sm:$0xff] }
 0xac3   : > { %24196 = vst [vmem:[#allocation31_spill] sm:$0xff] %v22447_v8  ;;  %24197 = vst [vmem:[#allocation32_spill] sm:$0xff] %v22449_v27  ;;  %15493 = vmatprep.subr.bf16.mxu1 %v22430_v18  ;;  %v24202_v7 = vld [vmem:[#allocation14_spill] sm:$0xff]  ;;  %v12875_v0 = vmul.f32 %v22129_v57, %v24203_v39  ;;  %v12873_v58 = vmul.f32 %v24205_v10, %v24204_v54  ;;  %v24206_v19 = vld [vmem:[#allocation36_spill] sm:$0xff]  ;;  %v12880_v15 = vmul.f32 %v22177_v9, %v24207_v28 }
 0xac4   : > { %24198 = vst [vmem:[#allocation37_spill] sm:$0xff] %v22453_v4  ;;  %v12871_v38 = vmul.f32 %v24202_v7, %v24201_v42  ;;  %v12877_v14 = vmul.f32 %v22137_v25, %v24206_v19  ;;  %v13791_v43 = vand.u32 4294901760, %v12874_v20  ;;  %v13795_v60 = vand.u32 4294901760, %v12878_v35  ;;  %v24208_v49 = vld [vmem:[#allocation11_spill] sm:$0xff]  ;;  %15303 = vmatpush1.bf16.msra.mxu0 %v22434_v21 }
 0xac5   : > { %v12884_v51 = vmul.f32 %v22299_v13, %v24208_v49  ;;  %v12942_v7 = vand.u32 4294901760, %v12875_v0  ;;  %v13793_v18 = vand.u32 4294901760, %v12873_v58  ;;  %15305 = vmatprep.subr.bf16.mxu0 %v22447_v8  ;;  %v12944_v9 = vand.u32 4294901760, %v12880_v15 }
 0xac6   : > { %v12938_v42 = vand.u32 4294901760, %v12871_v38  ;;  %v13797_v57 = vand.u32 4294901760, %v12877_v14  ;;  %15495 = vmatpush1.bf16.msra.mxu1 %v22440_v62  ;;  %v22476_v54 = vpack.c.bf16 %v13795_v60, %v13791_v43  ;;  %v22478_v25 = vsub.f32 %v12874_v20, %v13791_v43 }
 0xac7   : > { %v22480_v10 = vsub.f32 %v12878_v35, %v13795_v60  ;;  %v22486_v39 = vsub.f32 %v12875_v0, %v12942_v7  ;;  %v22491_v49 = vsub.f32 %v12873_v58, %v13793_v18  ;;  %v12948_v62 = vand.u32 4294901760, %v12884_v51  ;;  %v24219_v35 = vld [vmem:[#allocation8_spill] sm:$0xff]  ;;  %v24221_v60 = vld [vmem:[#allocation39_spill] sm:$0xff] }
 0xac8   : > { %24209 = vst [vmem:[#allocation34_spill] sm:$0xff] %v22476_v54  ;;  %24210 = vst [vmem:[#allocation38_spill] sm:$0xff] %v22478_v25  ;;  %v22482_v28 = vpack.c.bf16 %v12942_v7, %v12938_v42  ;;  %v22484_v13 = vsub.f32 %v12871_v38, %v12938_v42  ;;  %v22488_v19 = vpack.c.bf16 %v13797_v57, %v13793_v18  ;;  %15497 = vmatprep.subr.bf16.mxu1 %v22476_v54  ;;  %v24220_v38 = vld [vmem:[#allocation12_spill] sm:$0xff]  ;;  %v24222_v7 = vld [vmem:[#allocation9_spill] sm:$0xff] }
 0xac9   : > { %24211 = vst [vmem:[#allocation26_spill] sm:$0xff] %v22480_v10  ;;  %24214 = vst [vmem:[#allocation27_spill] sm:$0xff] %v22486_v39  ;;  %v22493_v8 = vsub.f32 %v12877_v14, %v13797_v57  ;;  %v22495_v20 = vsub.f32 %v12880_v15, %v12944_v9  ;;  %v12882_v43 = vmul.f32 %v22187_v46, %v24219_v35  ;;  %v24225_v15 = vld [vmem:[#allocation41_spill] sm:$0xff] }
 0xaca   : > { %24212 = vst [vmem:[#allocation14_spill] sm:$0xff] %v22482_v28  ;;  %24213 = vst [vmem:[#allocation35_spill] sm:$0xff] %v22484_v13  ;;  %15307 = vmatpush1.bf16.msra.mxu0 %v22482_v28  ;;  %v12886_v0 = vmul.f32 %v22309_v6, %v24220_v38  ;;  %v12879_v42 = vmul.f32 %v22158_v56, %v24221_v60  ;;  %v12883_v18 = vmul.f32 %v22285_v11, %v24222_v7  ;;  %v24226_v28 = vld [vmem:[#allocation10_spill] sm:$0xff] }
 0xacb   : > { %24215 = vst [vmem:[#allocation13_spill] sm:$0xff] %v22488_v19  ;;  %24216 = vst [vmem:[#allocation36_spill] sm:$0xff] %v22491_v49  ;;  %15499 = vmatpush1.bf16.msra.mxu1 %v22488_v19  ;;  %v22507_v14 = vpack.c.bf16 %v12948_v62, %v12944_v9  ;;  %v22509_v58 = vsub.f32 %v12884_v51, %v12948_v62  ;;  %v12881_v57 = vmul.f32 %v22167_v12, %v24225_v15 }
 0xacc   : > { %24217 = vst [vmem:[#allocation7_spill] sm:$0xff] %v22493_v8  ;;  %24218 = vst [vmem:[#allocation11_spill] sm:$0xff] %v22495_v20  ;;  %v12885_v46 = vmul.f32 %v22291_v55, %v24226_v28  ;;  %v13799_v35 = vand.u32 4294901760, %v12882_v43  ;;  %v13803_v6 = vand.u32 4294901760, %v12886_v0  ;;  %v12946_v38 = vand.u32 4294901760, %v12879_v42 }
 0xacd   : > { %24223 = vst [vmem:[#allocation8_spill] sm:$0xff] %v22507_v14  ;;  %24224 = vst [vmem:[#allocation12_spill] sm:$0xff] %v22509_v58  ;;  %v12950_v54 = vand.u32 4294901760, %v12883_v18  ;;  %15309 = vmatprep.subr.bf16.mxu0 %v22507_v14  ;;  %v13801_v56 = vand.u32 4294901760, %v12881_v57  ;;  %v24227_v60 = vand.u32 4294901760, %v22154_v61  ;;  %v24228_v62 = vand.u32 4294901760, %v22191_v32 }
 0xace   : > { %v13805_v11 = vand.u32 4294901760, %v12885_v46  ;;  %v22522_v12 = vpack.c.bf16 %v13803_v6, %v13799_v35  ;;  %v22524_v7 = vsub.f32 %v12882_v43, %v13799_v35  ;;  %v22526_v55 = vsub.f32 %v12886_v0, %v13803_v6  ;;  %v24238_v0 = vld [vmem:[#allocation19_spill] sm:$0xff] }
 0xacf   : > { %v12999_v9 = vsub.f32 %v22154_v61, %v24227_v60  ;;  %v13011_v51 = vsub.f32 %v22191_v32, %v24228_v62  ;;  %v22528_v28 = vpack.c.bf16 %v12950_v54, %v12946_v38  ;;  %v22530_v15 = vsub.f32 %v12879_v42, %v12946_v38  ;;  %v24239_v42 = vld [vmem:[#allocation47_spill] sm:$0xff]  ;;  %v24241_v62 = vld [vmem:[#allocation22_spill] sm:$0xff] }
 0xad0   : > { %24229 = vst [vmem:[#allocation39_spill] sm:$0xff] %v22522_v12  ;;  %24230 = vst [vmem:[#allocation9_spill] sm:$0xff] %v22524_v7  ;;  %v22532_v14 = vsub.f32 %v12883_v18, %v12950_v54  ;;  %v22534_v19 = vpack.c.bf16 %v13805_v11, %v13801_v56  ;;  %v22536_v21 = vsub.f32 %v12881_v57, %v13801_v56  ;;  %15501 = vmatprep.subr.bf16.mxu1 %v22522_v12  ;;  %v24240_v54 = vld [vmem:[#allocation16_spill] sm:$0xff]  ;;  %v24242_v57 = vld [vmem:[#allocation17_spill] sm:$0xff] }
 0xad1   : > { %24231 = vst [vmem:[#allocation41_spill] sm:$0xff] %v22526_v55  ;;  %24232 = vst [vmem:[#allocation10_spill] sm:$0xff] %v22528_v28  ;;  %15311 = vmatpush1.bf16.msra.mxu0 %v22528_v28  ;;  %v22540_v60 = vsub.f32 %v12885_v46, %v13805_v11  ;;  %v13000_v43 = vand.u32 4294901760, %v12999_v9  ;;  %v13012_v35 = vand.u32 4294901760, %v13011_v51  ;;  %v23488_v6 = vand.u32 4294901760, %v24238_v0  ;;  %v24243_v11 = vld [vmem:[#allocation43_spill] sm:$0xff] }
 0xad2   : > { %24233 = vst [vmem:[#allocation84_spill] sm:$0xff] %v22530_v15  ;;  %24234 = vst [vmem:[#allocation85_spill] sm:$0xff] %v22532_v14  ;;  %15503 = vmatpush1.bf16.msra.mxu1 %v22534_v19  ;;  %v23489_v38 = vand.u32 4294901760, %v24239_v42  ;;  %v23492_v18 = vand.u32 4294901760, %v24240_v54  ;;  %v23501_v56 = vand.u32 4294901760, %v24242_v57  ;;  %v23500_v9 = vand.u32 4294901760, %v24243_v11 }
 0xad3   : > { %24235 = vst [vmem:[#allocation86_spill] sm:$0xff] %v22534_v19  ;;  %24236 = vst [vmem:[#allocation87_spill] sm:$0xff] %v22536_v21  ;;  %v15312_v37 = vpack.c.bf16 %v13012_v35, %v13000_v43  ;;  %v13854_v46 = vsub.f32 %v24238_v0, %v23488_v6  ;;  %v24244_v51 = vld [vmem:[#allocation50_spill] sm:$0xff]  ;;  %v24245_v12 = vld [vmem:[#allocation15_spill] sm:$0xff]  ;;  %v24246_v43 = vand.u32 4294901760, %v24241_v62 }
 0xad4   : > { %24237 = vst [vmem:[#allocation88_spill] sm:$0xff] %v22540_v60  ;;  %v13866_v19 = vsub.f32 %v24239_v42, %v23489_v38  ;;  %12990 = vmatmul.mubr.f32.vlgmr.msra.gmra.mrb[80].mxu0 %v24245_v12  ;;  %v13005_v52 = vsub.f32 %v24240_v54, %v23492_v18  ;;  %v13860_v6 = vsub.f32 %v24242_v57, %v23501_v56  ;;  %v24247_v36 = vand.u32 4294901760, %v24244_v51 }
 0xad5   : > { %v13017_v35 = vsub.f32 %v24241_v62, %v24246_v43  ;;  %15313 = vmatprep.subr.bf16.mxu0 %v15312_v37  ;;  %v13855_v28 = vand.u32 4294901760, %v13854_v46  ;;  %13845 = vmatmul.mubr.f32.vlgmr.msra.gmra.mrb[80].mxu1 %v24245_v12  ;;  %v13872_v38 = vsub.f32 %v24243_v11, %v23500_v9  ;;  %v24248_v42 = vmov 0.0   ;;  %v24249_v9 = vld [vmem:[#allocation52_spill] sm:$0xff] }
 0xad6   : > { %v13023_v18 = vsub.f32 %v24244_v51, %v24247_v36  ;;  %v13867_v23 = vand.u32 4294901760, %v13866_v19  ;;  %v13006_v43 = vand.u32 4294901760, %v13005_v52  ;;  %v13861_v54 = vand.u32 4294901760, %v13860_v6  ;;  %13220 = vmatprep.mubr.f32.mxu0 %v24248_v42  ;;  %14075 = vmatprep.mubr.f32.mxu1 %v24248_v42  ;;  %v24250_v19 = vld [vmem:[#allocation48_spill] sm:$0xff] }
 0xad7   : > { %v13018_v62 = vand.u32 4294901760, %v13017_v35  ;;  %v13873_v37 = vand.u32 4294901760, %v13872_v38  ;;  %v13035_v46 = vsub.f32 %v22335_v22, %v23506_v50  ;;  %v23505_v56 = vand.u32 4294901760, %v24249_v9 }
 0xad8   : > { %v13024_v12 = vand.u32 4294901760, %v13023_v18  ;;  %v15504_v11 = vpack.c.bf16 %v13867_v23, %v13855_v28  ;;  %v23507_v51 = vand.u32 4294901760, %v22345_v41  ;;  %v23508_v52 = vand.u32 4294901760, %v24250_v19  ;;  %v24251_v28 = vld [vmem:[#allocation49_spill] sm:$0xff] }
 0xad9   : > { %v15314_v36 = vpack.c.bf16 %v13018_v62, %v13006_v43  ;;  %v15506_v35 = vpack.c.bf16 %v13873_v37, %v13861_v54  ;;  %v13036_v6 = vand.u32 4294901760, %v13035_v46  ;;  %v13878_v42 = vsub.f32 %v24249_v9, %v23505_v56  ;;  %v24252_v46 = vld [vmem:[#allocation20_spill] sm:$0xff] }
 0xada   : > { %v23509_v38 = vand.u32 4294901760, %v22323_v2  ;;  %15505 = vmatprep.subr.bf16.mxu1 %v15504_v11  ;;  %v13890_v18 = vsub.f32 %v22345_v41, %v23507_v51  ;;  %v13029_v23 = vsub.f32 %v24250_v19, %v23508_v52  ;;  %v23516_v62 = vand.u32 4294901760, %v24251_v28  ;;  %v24255_v41 = vld [vmem:[#allocation56_spill] sm:$0xff] }
 0xadb   : > { %15315 = vmatpush1.bf16.msra.mxu0 %v15314_v36  ;;  %v23519_v54 = vand.u32 4294901760, %v22329_v5  ;;  %15507 = vmatpush1.bf16.msra.mxu1 %v15506_v35  ;;  %v15316_v43 = vpack.c.bf16 %v13036_v6, %v13024_v12  ;;  %v13879_v37 = vand.u32 4294901760, %v13878_v42  ;;  %v23518_v36 = vand.u32 4294901760, %v24252_v46  ;;  %v24253_v12 = vld [vmem:[#allocation53_spill] sm:$0xff] }
 0xadc   : > { %v13041_v11 = vsub.f32 %v22323_v2, %v23509_v38  ;;  %v13891_v56 = vand.u32 4294901760, %v13890_v18  ;;  %v13030_v50 = vand.u32 4294901760, %v13029_v23  ;;  %v13884_v51 = vsub.f32 %v24251_v28, %v23516_v62  ;;  %v24254_v38 = vld [vmem:[#allocation55_spill] sm:$0xff] }
 0xadd   : > { %v13896_v52 = vsub.f32 %v22329_v5, %v23519_v54  ;;  %15317 = vmatprep.subr.bf16.mxu0 %v15316_v43  ;;  %v13047_v42 = vsub.f32 %v24252_v46, %v23518_v36  ;;  %v23521_v6 = vand.u32 4294901760, %v24253_v12  ;;  %v23526_v2 = vand.u32 4294901760, %v24254_v38 }
 0xade   : > { %v13042_v35 = vand.u32 4294901760, %v13041_v11  ;;  %v15508_v18 = vpack.c.bf16 %v13891_v56, %v13879_v37  ;;  %v13885_v23 = vand.u32 4294901760, %v13884_v51  ;;  %v23525_v9 = vand.u32 4294901760, %v24255_v41  ;;  %v24256_v51 = vld [vmem:[#allocation57_spill] sm:$0xff]  ;;  %v24257_v37 = vld [vmem:[#allocation60_spill] sm:$0xff] }
 0xadf   : > { %v13897_v19 = vand.u32 4294901760, %v13896_v52  ;;  %v13048_v28 = vand.u32 4294901760, %v13047_v42  ;;  %v13059_v43 = vsub.f32 %v24253_v12, %v23521_v6  ;;  %v13902_v11 = vsub.f32 %v24254_v38, %v23526_v2  ;;  %v24258_v42 = vld [vmem:[#allocation58_spill] sm:$0xff] }
 0xae0   : > { %v15318_v62 = vpack.c.bf16 %v13042_v35, %v13030_v50  ;;  %15509 = vmatprep.subr.bf16.mxu1 %v15508_v18  ;;  %v13914_v56 = vsub.f32 %v24255_v41, %v23525_v9  ;;  %v23527_v52 = vand.u32 4294901760, %v24256_v51  ;;  %v23528_v54 = vand.u32 4294901760, %v24257_v37  ;;  %v24259_v6 = vld [vmem:[#allocation62_spill] sm:$0xff] }
 0xae1   : > { %v15510_v36 = vpack.c.bf16 %v13897_v19, %v13885_v23  ;;  %v13060_v50 = vand.u32 4294901760, %v13059_v43  ;;  %v13903_v35 = vand.u32 4294901760, %v13902_v11  ;;  %v23530_v46 = vand.u32 4294901760, %v24258_v42  ;;  %v24260_v23 = vld [vmem:[#allocation63_spill] sm:$0xff] }
 0xae2   : > { %15319 = vmatpush1.bf16.msra.mxu0 %v15318_v62  ;;  %v23532_v12 = vand.u32 4294901760, %v24259_v6  ;;  %v13915_v5 = vand.u32 4294901760, %v13914_v56  ;;  %v13053_v19 = vsub.f32 %v24256_v51, %v23527_v52  ;;  %v13065_v18 = vsub.f32 %v24257_v37, %v23528_v54 }
 0xae3   : > { %15511 = vmatpush1.bf16.msra.mxu1 %v15510_v36  ;;  %v23537_v9 = vand.u32 4294901760, %v24260_v23  ;;  %v15320_v2 = vpack.c.bf16 %v13060_v50, %v13048_v28  ;;  %v13908_v62 = vsub.f32 %v24258_v42, %v23530_v46  ;;  %v23536_v43 = vand.u32 4294901760, %v22339_v63  ;;  %v24261_v46 = vld [vmem:[#allocation64_spill] sm:$0xff] }
 0xae4   : > { %v13920_v36 = vsub.f32 %v24259_v6, %v23532_v12  ;;  %v15512_v11 = vpack.c.bf16 %v13915_v5, %v13903_v35  ;;  %v13054_v56 = vand.u32 4294901760, %v13053_v19  ;;  %v13066_v52 = vand.u32 4294901760, %v13065_v18  ;;  %v24262_v35 = vld [vmem:[#allocation65_spill] sm:$0xff] }
 0xae5   : > { %v13071_v54 = vsub.f32 %v24260_v23, %v23537_v9  ;;  %15321 = vmatprep.subr.bf16.mxu0 %v15320_v2  ;;  %v13909_v37 = vand.u32 4294901760, %v13908_v62  ;;  %v13083_v50 = vsub.f32 %v22339_v63, %v23536_v43  ;;  %v23535_v42 = vand.u32 4294901760, %v24261_v46 }
 0xae6   : > { %v13921_v28 = vand.u32 4294901760, %v13920_v36  ;;  %15513 = vmatprep.subr.bf16.mxu1 %v15512_v11  ;;  %v15322_v12 = vpack.c.bf16 %v13066_v52, %v13054_v56  ;;  %v23538_v5 = vand.u32 4294901760, %v22349_v3  ;;  %v23539_v19 = vand.u32 4294901760, %v24262_v35  ;;  %v24263_v52 = vld [vmem:[#allocation66_spill] sm:$0xff] }
 0xae7   : > { %v13072_v6 = vand.u32 4294901760, %v13071_v54  ;;  %v13084_v51 = vand.u32 4294901760, %v13083_v50  ;;  %v13926_v2 = vsub.f32 %v24261_v46, %v23535_v42  ;;  %v23540_v62 = vand.u32 4294901760, %v22354_v53 }
 0xae8   : > { %v15514_v18 = vpack.c.bf16 %v13921_v28, %v13909_v37  ;;  %15323 = vmatpush1.bf16.msra.mxu0 %v15322_v12  ;;  %v13938_v36 = vsub.f32 %v22349_v3, %v23538_v5  ;;  %v13077_v54 = vsub.f32 %v24262_v35, %v23539_v19  ;;  %v23543_v11 = vand.u32 4294901760, %v24263_v52  ;;  %v24264_v12 = vld [vmem:[#allocation68_spill] sm:$0xff] }
 0xae9   : > { %v23553_v37 = vand.u32 4294901760, %v22358_v40  ;;  %v15324_v56 = vpack.c.bf16 %v13084_v51, %v13072_v6  ;;  %v13927_v28 = vand.u32 4294901760, %v13926_v2  ;;  %v13089_v50 = vsub.f32 %v22354_v53, %v23540_v62 }
 0xaea   : > { %15515 = vmatpush1.bf16.msra.mxu1 %v15514_v18  ;;  %v23545_v42 = vand.u32 4294901760, %v24264_v12  ;;  %v13939_v43 = vand.u32 4294901760, %v13938_v36  ;;  %v13078_v9 = vand.u32 4294901760, %v13077_v54  ;;  %v13932_v5 = vsub.f32 %v24263_v52, %v23543_v11 }
 0xaeb   : > { %v13944_v19 = vsub.f32 %v22358_v40, %v23553_v37  ;;  %15325 = vmatprep.subr.bf16.mxu0 %v15324_v56  ;;  %v13090_v18 = vand.u32 4294901760, %v13089_v50  ;;  %v23546_v51 = vand.u32 4294901760, %v22362_v31  ;;  %v23550_v2 = vand.u32 4294901760, %v22364_v16 }
 0xaec   : > { %v13095_v6 = vsub.f32 %v24264_v12, %v23545_v42  ;;  %v15516_v36 = vpack.c.bf16 %v13939_v43, %v13927_v28  ;;  %v13933_v54 = vand.u32 4294901760, %v13932_v5  ;;  %v23547_v53 = vand.u32 4294901760, %v22379_v29 }
 0xaed   : > { %v13945_v62 = vand.u32 4294901760, %v13944_v19  ;;  %v15326_v11 = vpack.c.bf16 %v13090_v18, %v13078_v9  ;;  %v13107_v56 = vsub.f32 %v22362_v31, %v23546_v51  ;;  %v13950_v50 = vsub.f32 %v22364_v16, %v23550_v2 }
 0xaee   : > { %v13096_v52 = vand.u32 4294901760, %v13095_v6  ;;  %15517 = vmatprep.subr.bf16.mxu1 %v15516_v36  ;;  %v13962_v43 = vsub.f32 %v22379_v29, %v23547_v53  ;;  %v23548_v5 = vand.u32 4294901760, %v22384_v47  ;;  %v23549_v19 = vand.u32 4294901760, %v22392_v48 }
 0xaef   : > { %v15518_v42 = vpack.c.bf16 %v13945_v62, %v13933_v54  ;;  %15327 = vmatpush1.bf16.msra.mxu0 %v15326_v11  ;;  %v13108_v9 = vand.u32 4294901760, %v13107_v56  ;;  %v13951_v28 = vand.u32 4294901760, %v13950_v50  ;;  %v23551_v18 = vand.u32 4294901760, %v22387_v33 }
 0xaf0   : > { %v23552_v6 = vand.u32 4294901760, %v22400_v30  ;;  %v13963_v51 = vand.u32 4294901760, %v13962_v43  ;;  %v13101_v62 = vsub.f32 %v22384_v47, %v23548_v5  ;;  %v13113_v36 = vsub.f32 %v22392_v48, %v23549_v19 }
 0xaf1   : > { %15519 = vmatpush1.bf16.msra.mxu1 %v15518_v42  ;;  %v23560_v54 = vand.u32 4294901760, %v22402_v1  ;;  %v15328_v53 = vpack.c.bf16 %v13108_v9, %v13096_v52  ;;  %v13956_v11 = vsub.f32 %v22387_v33, %v23551_v18  ;;  %v23558_v56 = vand.u32 4294901760, %v22408_v44 }
 0xaf2   : > { %v13968_v42 = vsub.f32 %v22400_v30, %v23552_v6  ;;  %v15520_v50 = vpack.c.bf16 %v13963_v51, %v13951_v28  ;;  %v13102_v43 = vand.u32 4294901760, %v13101_v62  ;;  %v13114_v5 = vand.u32 4294901760, %v13113_v36 }
 0xaf3   : > { %v13119_v19 = vsub.f32 %v22402_v1, %v23560_v54  ;;  %15329 = vmatprep.subr.bf16.mxu0 %v15328_v53  ;;  %v13957_v2 = vand.u32 4294901760, %v13956_v11  ;;  %v13131_v9 = vsub.f32 %v22408_v44, %v23558_v56  ;;  %v23554_v18 = vand.u32 4294901760, %v22421_v45 }
 0xaf4   : > { %v13969_v52 = vand.u32 4294901760, %v13968_v42  ;;  %15521 = vmatprep.subr.bf16.mxu1 %v15520_v50  ;;  %v15330_v6 = vpack.c.bf16 %v13114_v5, %v13102_v43  ;;  %v23555_v51 = vand.u32 4294901760, %v22432_v24  ;;  %v23556_v28 = vand.u32 4294901760, %v22436_v34 }
 0xaf5   : > { %v13120_v37 = vand.u32 4294901760, %v13119_v19  ;;  %v13132_v36 = vand.u32 4294901760, %v13131_v9  ;;  %v13974_v53 = vsub.f32 %v22421_v45, %v23554_v18  ;;  %v23557_v11 = vand.u32 4294901760, %v22438_v26 }
 0xaf6   : > { %v15522_v62 = vpack.c.bf16 %v13969_v52, %v13957_v2  ;;  %15331 = vmatpush1.bf16.msra.mxu0 %v15330_v6  ;;  %v13986_v42 = vsub.f32 %v22432_v24, %v23555_v51  ;;  %v13125_v5 = vsub.f32 %v22436_v34, %v23556_v28  ;;  %v23559_v19 = vand.u32 4294901760, %v22443_v59 }
 0xaf7   : > { %v23569_v2 = vand.u32 4294901760, %v22445_v17  ;;  %v15332_v50 = vpack.c.bf16 %v13132_v36, %v13120_v37  ;;  %v13975_v43 = vand.u32 4294901760, %v13974_v53  ;;  %v13137_v52 = vsub.f32 %v22438_v26, %v23557_v11 }
 0xaf8   : > { %15523 = vmatpush1.bf16.msra.mxu1 %v15522_v62  ;;  %v23561_v6 = vand.u32 4294901760, %v22449_v27  ;;  %v13987_v9 = vand.u32 4294901760, %v13986_v42  ;;  %v13126_v18 = vand.u32 4294901760, %v13125_v5  ;;  %v13980_v51 = vsub.f32 %v22443_v59, %v23559_v19 }
 0xaf9   : > { %v13992_v28 = vsub.f32 %v22445_v17, %v23569_v2  ;;  %15333 = vmatprep.subr.bf16.mxu0 %v15332_v50  ;;  %v13138_v62 = vand.u32 4294901760, %v13137_v52  ;;  %v23562_v36 = vand.u32 4294901760, %v22453_v4  ;;  %v23566_v53 = vand.u32 4294901760, %v22478_v25 }
 0xafa   : > { %v13143_v37 = vsub.f32 %v22449_v27, %v23561_v6  ;;  %v15524_v42 = vpack.c.bf16 %v13987_v9, %v13975_v43  ;;  %v13981_v5 = vand.u32 4294901760, %v13980_v51  ;;  %v23563_v56 = vand.u32 4294901760, %v22480_v10 }
 0xafb   : > { %v13993_v11 = vand.u32 4294901760, %v13992_v28  ;;  %v15334_v19 = vpack.c.bf16 %v13138_v62, %v13126_v18  ;;  %v13155_v50 = vsub.f32 %v22453_v4, %v23562_v36  ;;  %v13998_v52 = vsub.f32 %v22478_v25, %v23566_v53  ;;  %v24288_v4 = vld [vmem:[#allocation85_spill] sm:$0xff] }
 0xafc   : > { %v13144_v54 = vand.u32 4294901760, %v13143_v37  ;;  %15525 = vmatprep.subr.bf16.mxu1 %v15524_v42  ;;  %v14010_v43 = vsub.f32 %v22480_v10, %v23563_v56  ;;  %v23564_v51 = vand.u32 4294901760, %v22484_v13  ;;  %v23565_v28 = vand.u32 4294901760, %v22486_v39  ;;  %v24290_v10 = vld [vmem:[#allocation88_spill] sm:$0xff] }
 0xafd   : > { %v15526_v6 = vpack.c.bf16 %v13993_v11, %v13981_v5  ;;  %15335 = vmatpush1.bf16.msra.mxu0 %v15334_v19  ;;  %v13156_v18 = vand.u32 4294901760, %v13155_v50  ;;  %v13999_v9 = vand.u32 4294901760, %v13998_v52  ;;  %v23567_v62 = vand.u32 4294901760, %v22491_v49 }
 0xafe   : > { %v23568_v37 = vand.u32 4294901760, %v22493_v8  ;;  %v14011_v36 = vand.u32 4294901760, %v14010_v43  ;;  %v13149_v11 = vsub.f32 %v22484_v13, %v23564_v51  ;;  %v13161_v42 = vsub.f32 %v22486_v39, %v23565_v28 }
 0xaff   : > { %15527 = vmatpush1.bf16.msra.mxu1 %v15526_v6  ;;  %v23575_v5 = vand.u32 4294901760, %v22495_v20  ;;  %v15336_v56 = vpack.c.bf16 %v13156_v18, %v13144_v54  ;;  %v14004_v19 = vsub.f32 %v22491_v49, %v23567_v62  ;;  %v23574_v50 = vand.u32 4294901760, %v22509_v58 }
 0xb00   : > { %v14016_v6 = vsub.f32 %v22493_v8, %v23568_v37  ;;  %v15528_v52 = vpack.c.bf16 %v14011_v36, %v13999_v9  ;;  %v13150_v43 = vand.u32 4294901760, %v13149_v11  ;;  %v13162_v51 = vand.u32 4294901760, %v13161_v42 }
 0xb01   : > { %v13167_v28 = vsub.f32 %v22495_v20, %v23575_v5  ;;  %15337 = vmatprep.subr.bf16.mxu0 %v15336_v56  ;;  %v14005_v53 = vand.u32 4294901760, %v14004_v19  ;;  %v13179_v18 = vsub.f32 %v22509_v58, %v23574_v50  ;;  %v23572_v62 = vand.u32 4294901760, %v22524_v7  ;;  %v24268_v5 = vld [vmem:[#allocation43_spill] sm:$0xff] }
 0xb02   : > { %v14017_v54 = vand.u32 4294901760, %v14016_v6  ;;  %15529 = vmatprep.subr.bf16.mxu1 %v15528_v52  ;;  %v15338_v37 = vpack.c.bf16 %v13162_v51, %v13150_v43  ;;  %v23570_v36 = vand.u32 4294901760, %v22526_v55  ;;  %v23571_v9 = vand.u32 4294901760, %v22530_v15 }
 0xb03   : > { %v13168_v2 = vand.u32 4294901760, %v13167_v28  ;;  %v13180_v42 = vand.u32 4294901760, %v13179_v18  ;;  %v14022_v56 = vsub.f32 %v22524_v7, %v23572_v62  ;;  %v23573_v19 = vand.u32 4294901760, %v22532_v14 }
 0xb04   : > { %v15530_v11 = vpack.c.bf16 %v14017_v54, %v14005_v53  ;;  %15339 = vmatpush1.bf16.msra.mxu0 %v15338_v37  ;;  %v14034_v6 = vsub.f32 %v22526_v55, %v23570_v36  ;;  %v13173_v51 = vsub.f32 %v22530_v15, %v23571_v9  ;;  %v23580_v28 = vand.u32 4294901760, %v22536_v21  ;;  %v24270_v15 = vld [vmem:[#allocation52_spill] sm:$0xff] }
 0xb05   : > { %v23585_v53 = vand.u32 4294901760, %v22540_v60  ;;  %v15340_v52 = vpack.c.bf16 %v13180_v42, %v13168_v2  ;;  %v14023_v43 = vand.u32 4294901760, %v14022_v56  ;;  %v13185_v54 = vsub.f32 %v22532_v14, %v23573_v19  ;;  %v24266_v56 = vld [vmem:[#allocation16_spill] sm:$0xff]  ;;  %v24267_v19 = vld [vmem:[#allocation22_spill] sm:$0xff] }
 0xb06   : > { %15531 = vmatpush1.bf16.msra.mxu1 %v15530_v11  ;;  %v15344_v37 = vpack.c.bf16 %v22191_v32, %v22154_v61  ;;  %v14035_v18 = vand.u32 4294901760, %v14034_v6  ;;  %v13174_v36 = vand.u32 4294901760, %v13173_v51  ;;  %v14028_v9 = vsub.f32 %v22536_v21, %v23580_v28  ;;  %v24265_v11 = vld [vmem:[#allocation47_spill] sm:$0xff]  ;;  %v24269_v14 = vld [vmem:[#allocation50_spill] sm:$0xff] }
 0xb07   : > { %v14040_v62 = vsub.f32 %v22540_v60, %v23585_v53  ;;  %15341 = vmatprep.subr.bf16.mxu0 %v15340_v52  ;;  %v13186_v2 = vand.u32 4294901760, %v13185_v54  ;;  %v15536_v42 = vpack.c.bf16 %v24265_v11, %v24238_v0  ;;  %v15346_v50 = vpack.c.bf16 %v24267_v19, %v24266_v56  ;;  %v24271_v53 = vld [vmem:[#allocation78_spill] sm:$0xff]  ;;  %v24272_v54 = vld [vmem:[#allocation48_spill] sm:$0xff]  ;;  %v24274_v11 = vld [vmem:[#allocation49_spill] sm:$0xff] }
 0xb08   : > { %v15538_v6 = vpack.c.bf16 %v24268_v5, %v24242_v57  ;;  %v15532_v51 = vpack.c.bf16 %v14035_v18, %v14023_v43  ;;  %v14029_v32 = vand.u32 4294901760, %v14028_v9  ;;  %v15348_v28 = vpack.c.bf16 %v22335_v22, %v24269_v14  ;;  %v24273_v60 = vld [vmem:[#allocation70_spill] sm:$0xff]  ;;  %v24275_v0 = vld [vmem:[#allocation73_spill] sm:$0xff]  ;;  %v24276_v56 = vld [vmem:[#allocation20_spill] sm:$0xff] }
 0xb09   : > { %v14041_v61 = vand.u32 4294901760, %v14040_v62  ;;  %v15342_v21 = vpack.c.bf16 %v13186_v2, %v13174_v36  ;;  %v15540_v52 = vpack.c.bf16 %v24271_v53, %v24270_v15  ;;  %v15350_v55 = vpack.c.bf16 %v24273_v60, %v24272_v54  ;;  %v24277_v5 = vld [vmem:[#allocation53_spill] sm:$0xff]  ;;  %v24279_v18 = vld [vmem:[#allocation60_spill] sm:$0xff]  ;;  %v24280_v2 = vld [vmem:[#allocation58_spill] sm:$0xff] }
 0xb0a   : > { %v15542_v7 = vpack.c.bf16 %v24275_v0, %v24274_v11  ;;  %15533 = vmatprep.subr.bf16.mxu1 %v15532_v51  ;;  %v15352_v43 = vpack.c.bf16 %v24277_v5, %v24276_v56  ;;  %v15544_v62 = vpack.c.bf16 %v24255_v41, %v24254_v38  ;;  %v24278_v9 = vld [vmem:[#allocation57_spill] sm:$0xff]  ;;  %v24281_v53 = vld [vmem:[#allocation62_spill] sm:$0xff]  ;;  %v15356_v60 = vpack.c.bf16 %v22339_v63, %v24260_v23  ;;  %v24284_v41 = vld [vmem:[#allocation24_spill] sm:$0xff] }
 0xb0b   : > { %v15534_v19 = vpack.c.bf16 %v14041_v61, %v14029_v32  ;;  %v15354_v36 = vpack.c.bf16 %v24279_v18, %v24278_v9  ;;  %15343 = vmatpush1.bf16.msra.mxu0 %v15342_v21  ;;  %v15546_v15 = vpack.c.bf16 %v24281_v53, %v24280_v2  ;;  %v24282_v61 = vld [vmem:[#allocation81_spill] sm:$0xff]  ;;  %v24283_v5 = vld [vmem:[#allocation66_spill] sm:$0xff]  ;;  %v15372_v21 = vpack.c.bf16 %v22509_v58, %v22495_v20  ;;  %v24287_v32 = vld [vmem:[#allocation84_spill] sm:$0xff] }
 0xb0c   : > { %15345 = vmatprep.subr.bf16.mxu0 %v15344_v37  ;;  %v15370_v37 = vpack.c.bf16 %v22486_v39, %v22484_v13  ;;  %v24286_v53 = vld [vmem:[#allocation41_spill] sm:$0xff]  ;;  %v15374_v51 = vpack.c.bf16 %v24288_v4, %v24287_v32  ;;  %v24291_v25 = vmov 0.0   ;;  %v24292_v39 = vld [vmem:[#allocation19_spill] sm:$0xff]  ;;  %v24299_v58 = vld [vmem:[#allocation22_spill] sm:$0xff]  ;;  %v24302_v4 = vand.u32 4294901760, %v24242_v57 }
 0xb0d   : > { %15535 = vmatpush1.bf16.msra.mxu1 %v15534_v19  ;;  %v15562_v19 = vpack.c.bf16 %v22493_v8, %v22491_v49  ;;  %v24293_v13 = vand.u32 4294901760, %v24292_v39  ;;  %v24294_v8 = vld [vmem:[#allocation47_spill] sm:$0xff]  ;;  %v24300_v20 = vand.u32 4294901760, %v24299_v58  ;;  %v24305_v39 = vand.u32 4294901760, %v24269_v14 }
 0xb0e   : > { %15537 = vmatprep.subr.bf16.mxu1 %v15536_v42  ;;  %13222 = vmatmul.mubr.f32.vlgmr.msra.gmra.mrb[80].mxu0 %v24284_v41  ;;  %v24285_v42 = vld [vmem:[#allocation9_spill] sm:$0xff]  ;;  %v24295_v49 = vand.u32 4294901760, %v24294_v8  ;;  %v24306_v8 = vand.u32 4294901760, %v22335_v22  ;;  %v24316_v14 = vand.u32 4294901760, %v24276_v56  ;;  %v24325_v56 = vld [vmem:[#allocation62_spill] sm:$0xff] }
 0xb0f   : > { %15347 = vmatpush1.bf16.msra.mxu0 %v15346_v50  ;;  %v15564_v63 = vpack.c.bf16 %v24286_v53, %v24285_v42  ;;  %v24289_v50 = vld [vmem:[#allocation87_spill] sm:$0xff]  ;;  %13356 = vmatprep.mubr.f32.mxu0 %v24291_v25 }
 0xb10   : > { %14077 = vmatmul.mubr.f32.vlgmr.msra.gmra.mrb[80].mxu1 %v24284_v41  ;;  %15349 = vmatprep.subr.bf16.mxu0 %v15348_v28  ;;  %v15566_v41 = vpack.c.bf16 %v24290_v10, %v24289_v50  ;;  %v22866_v27 = vpack.c.bf16 %v24295_v49, %v24293_v13  ;;  %v24303_v10 = vld [vmem:[#allocation43_spill] sm:$0xff]  ;;  %v22885_v13 = vpack.c.bf16 %v24306_v8, %v24305_v39  ;;  %v24307_v49 = vld [vmem:[#allocation52_spill] sm:$0xff]  ;;  %v24319_v8 = vand.u32 4294901760, %v24254_v38 }
 0xb11   : > { %15539 = vmatpush1.bf16.msra.mxu1 %v15538_v6  ;;  %v24297_v6 = vld [vmem:[#allocation16_spill] sm:$0xff]  ;;  %14211 = vmatprep.mubr.f32.mxu1 %v24291_v25  ;;  %v24327_v38 = vand.u32 4294901760, %v24260_v23  ;;  %v24336_v23 = vand.u32 4294901760, %v22358_v40 }
 0xb12   : > { %15541 = vmatprep.subr.bf16.mxu1 %v15540_v52  ;;  %24296 = vst [vmem:[#allocation17_spill] sm:$0xff] %v22866_v27  ;;  %v24298_v28 = vand.u32 4294901760, %v24297_v6  ;;  %v24304_v52 = vand.u32 4294901760, %v24303_v10  ;;  %v24308_v6 = vand.u32 4294901760, %v24307_v49  ;;  %v24309_v27 = vld [vmem:[#allocation78_spill] sm:$0xff]  ;;  %v24315_v10 = vand.u32 4294901760, %v24275_v0 }
 0xb13   : > { %v24310_v58 = vand.u32 4294901760, %v24309_v27  ;;  %15351 = vmatpush1.bf16.msra.mxu0 %v15350_v55  ;;  %v24322_v55 = vand.u32 4294901760, %v24278_v9  ;;  %v24324_v0 = vand.u32 4294901760, %v24280_v2  ;;  %v24330_v9 = vand.u32 4294901760, %v24261_v46 }
 0xb14   : > { %v22872_v53 = vpack.c.bf16 %v24300_v20, %v24298_v28  ;;  %v22879_v50 = vpack.c.bf16 %v24304_v52, %v24302_v4  ;;  %v24311_v28 = vand.u32 4294901760, %v24272_v54  ;;  %v24314_v4 = vand.u32 4294901760, %v24274_v11  ;;  %v24317_v52 = vld [vmem:[#allocation53_spill] sm:$0xff]  ;;  %v24320_v54 = vld [vmem:[#allocation56_spill] sm:$0xff]  ;;  %15353 = vmatprep.subr.bf16.mxu0 %v15352_v43 }
 0xb15   : > { %v22891_v20 = vpack.c.bf16 %v24310_v58, %v24308_v6  ;;  %v24318_v39 = vand.u32 4294901760, %v24317_v52  ;;  %v24321_v49 = vand.u32 4294901760, %v24320_v54  ;;  %v24323_v11 = vand.u32 4294901760, %v24279_v18  ;;  %15543 = vmatpush1.bf16.msra.mxu1 %v15542_v7 }
 0xb16   : > { %24301 = vst [vmem:[#allocation15_spill] sm:$0xff] %v22872_v53  ;;  %v24312_v53 = vld [vmem:[#allocation70_spill] sm:$0xff]  ;;  %v22903_v22 = vpack.c.bf16 %v24315_v10, %v24314_v4  ;;  %v24326_v58 = vand.u32 4294901760, %v24325_v56  ;;  %v24331_v18 = vand.u32 4294901760, %v22349_v3  ;;  %15545 = vmatprep.subr.bf16.mxu1 %v15544_v62  ;;  %v24332_v7 = vand.u32 4294901760, %v24262_v35 }
 0xb17   : > { %v24313_v57 = vand.u32 4294901760, %v24312_v53  ;;  %v22909_v27 = vpack.c.bf16 %v24318_v39, %v24316_v14  ;;  %v22915_v53 = vpack.c.bf16 %v24321_v49, %v24319_v8  ;;  %v22921_v6 = vpack.c.bf16 %v24323_v11, %v24322_v55  ;;  %15355 = vmatpush1.bf16.msra.mxu0 %v15354_v36 }
 0xb18   : > { %v22939_v14 = vpack.c.bf16 %v24331_v18, %v24330_v9  ;;  %v24333_v43 = vand.u32 4294901760, %v24282_v61  ;;  %v24335_v52 = vand.u32 4294901760, %v24283_v5  ;;  %v24338_v8 = vand.u32 4294901760, %v24264_v12  ;;  %15357 = vmatprep.subr.bf16.mxu0 %v15356_v60 }
 0xb19   : > { %v22897_v25 = vpack.c.bf16 %v24313_v57, %v24311_v28  ;;  %v22927_v28 = vpack.c.bf16 %v24326_v58, %v24324_v0  ;;  %v24328_v57 = vld [vmem:[#allocation76_spill] sm:$0xff]  ;;  %v24339_v54 = vand.u32 4294901760, %v22362_v31  ;;  %v24341_v62 = vand.u32 4294901760, %v22364_v16  ;;  %15547 = vmatpush1.bf16.msra.mxu1 %v15546_v15 }
 0xb1a   : > { %v24329_v4 = vand.u32 4294901760, %v24328_v57  ;;  %v22945_v2 = vpack.c.bf16 %v24333_v43, %v24332_v7  ;;  %v22951_v39 = vpack.c.bf16 %v24336_v23, %v24335_v52  ;;  %v24342_v55 = vand.u32 4294901760, %v22379_v29 }
 0xb1b   : > { %v22957_v49 = vpack.c.bf16 %v24339_v54, %v24338_v8  ;;  %v24344_v0 = vand.u32 4294901760, %v22384_v47  ;;  %v24345_v56 = vand.u32 4294901760, %v22392_v48  ;;  %v24348_v57 = vand.u32 4294901760, %v22400_v30 }
 0xb1c   : > { %v22933_v10 = vpack.c.bf16 %v24329_v4, %v24327_v38  ;;  %24334 = vst [vmem:[#allocation55_spill] sm:$0xff] %v22945_v2  ;;  %24337 = vst [vmem:[#allocation63_spill] sm:$0xff] %v22951_v39  ;;  %v22963_v11 = vpack.c.bf16 %v24342_v55, %v24341_v62  ;;  %v24347_v38 = vand.u32 4294901760, %v22387_v33  ;;  %v24350_v9 = vand.u32 4294901760, %v22402_v1  ;;  %v24381_v39 = vld [vmem:[#allocation12_spill] sm:$0xff] }
 0xb1d   : > { %24340 = vst [vmem:[#allocation64_spill] sm:$0xff] %v22957_v49  ;;  %v22969_v58 = vpack.c.bf16 %v24345_v56, %v24344_v0  ;;  %v24351_v18 = vand.u32 4294901760, %v22408_v44  ;;  %v24353_v43 = vand.u32 4294901760, %v22421_v45  ;;  %v24354_v52 = vand.u32 4294901760, %v22432_v24 }
 0xb1e   : > { %24343 = vst [vmem:[#allocation65_spill] sm:$0xff] %v22963_v11  ;;  %v22975_v4 = vpack.c.bf16 %v24348_v57, %v24347_v38  ;;  %v24356_v8 = vand.u32 4294901760, %v22436_v34  ;;  %v24357_v54 = vand.u32 4294901760, %v22438_v26  ;;  %v24359_v55 = vand.u32 4294901760, %v22443_v59  ;;  %v24362_v38 = vld [vmem:[#allocation32_spill] sm:$0xff]  ;;  %v24377_v11 = vld [vmem:[#allocation7_spill] sm:$0xff] }
 0xb1f   : > { %24346 = vst [vmem:[#allocation68_spill] sm:$0xff] %v22969_v58  ;;  %v22981_v7 = vpack.c.bf16 %v24351_v18, %v24350_v9  ;;  %v22987_v23 = vpack.c.bf16 %v24354_v52, %v24353_v43  ;;  %v24360_v0 = vand.u32 4294901760, %v22445_v17  ;;  %v24363_v57 = vand.u32 4294901760, %v24362_v38  ;;  %v24364_v9 = vld [vmem:[#allocation37_spill] sm:$0xff]  ;;  %v24367_v43 = vld [vmem:[#allocation38_spill] sm:$0xff] }
 0xb20   : > { %24349 = vst [vmem:[#allocation50_spill] sm:$0xff] %v22975_v4  ;;  %v22993_v62 = vpack.c.bf16 %v24357_v54, %v24356_v8  ;;  %v24365_v18 = vand.u32 4294901760, %v24364_v9  ;;  %v24368_v36 = vand.u32 4294901760, %v24367_v43  ;;  %v24369_v52 = vld [vmem:[#allocation26_spill] sm:$0xff]  ;;  %v24371_v8 = vld [vmem:[#allocation35_spill] sm:$0xff]  ;;  %v24378_v49 = vand.u32 4294901760, %v24377_v11 }
 0xb21   : > { %24352 = vst [vmem:[#allocation48_spill] sm:$0xff] %v22981_v7  ;;  %24355 = vst [vmem:[#allocation49_spill] sm:$0xff] %v22987_v23  ;;  %v22999_v56 = vpack.c.bf16 %v24360_v0, %v24359_v55  ;;  %v24370_v23 = vand.u32 4294901760, %v24369_v52  ;;  %v24372_v54 = vand.u32 4294901760, %v24371_v8  ;;  %v24375_v0 = vld [vmem:[#allocation36_spill] sm:$0xff]  ;;  %v24382_v2 = vand.u32 4294901760, %v24381_v39 }
 0xb22   : > { %24358 = vst [vmem:[#allocation73_spill] sm:$0xff] %v22993_v62  ;;  %v23005_v7 = vpack.c.bf16 %v24365_v18, %v24363_v57  ;;  %v24373_v62 = vld [vmem:[#allocation27_spill] sm:$0xff]  ;;  %v24383_v15 = vpack.c.bf16 %v22349_v3, %v24261_v46  ;;  %v24384_v60 = vand.u32 4294901760, %v24285_v42  ;;  %v24387_v11 = vand.u32 4294901760, %v24287_v32 }
 0xb23   : > { %24361 = vst [vmem:[#allocation20_spill] sm:$0xff] %v22999_v56  ;;  %v23011_v4 = vpack.c.bf16 %v24370_v23, %v24368_v36  ;;  %v24374_v58 = vand.u32 4294901760, %v24373_v62  ;;  %v24376_v56 = vand.u32 4294901760, %v24375_v0  ;;  %v24379_v18 = vld [vmem:[#allocation11_spill] sm:$0xff]  ;;  %v24394_v3 = vpack.c.bf16 %v24282_v61, %v24262_v35 }
 0xb24   : > { %24366 = vst [vmem:[#allocation57_spill] sm:$0xff] %v23005_v7  ;;  %v24380_v7 = vand.u32 4294901760, %v24379_v18  ;;  %15549 = vmatprep.subr.bf16.mxu1 %v24383_v15  ;;  %v24395_v46 = vpack.c.bf16 %v22358_v40, %v24283_v5  ;;  %v24396_v32 = vpack.c.bf16 %v22362_v31, %v24264_v12  ;;  %v24397_v42 = vpack.c.bf16 %v22379_v29, %v22364_v16  ;;  %v24418_v12 = vld [vmem:[#allocation59_spill] sm:$0xff]  ;;  %v24419_v5 = vld [vmem:[#allocation61_spill] sm:$0xff] }
 0xb25   : > { %v23017_v55 = vpack.c.bf16 %v24374_v58, %v24372_v54  ;;  %v23023_v57 = vpack.c.bf16 %v24378_v49, %v24376_v56  ;;  %v24385_v58 = vld [vmem:[#allocation41_spill] sm:$0xff]  ;;  %v24390_v54 = vld [vmem:[#allocation87_spill] sm:$0xff]  ;;  %15359 = vmatpush1.bf16.msra.mxu0 %v24394_v3  ;;  %v24398_v18 = vpack.c.bf16 %v22392_v48, %v22384_v47  ;;  %v24399_v35 = vpack.c.bf16 %v22400_v30, %v22387_v33  ;;  %v24406_v48 = vld [vmem:[#allocation44_spill] sm:$0xff] }
 0xb26   : > { %v23029_v23 = vpack.c.bf16 %v24382_v2, %v24380_v7  ;;  %v24386_v62 = vand.u32 4294901760, %v24385_v58  ;;  %v24388_v49 = vld [vmem:[#allocation85_spill] sm:$0xff]  ;;  %v24391_v39 = vand.u32 4294901760, %v24390_v54  ;;  %v24392_v2 = vld [vmem:[#allocation88_spill] sm:$0xff]  ;;  %15551 = vmatpush1.bf16.msra.mxu1 %v24395_v46  ;;  %15361 = vmatprep.subr.bf16.mxu0 %v24396_v32  ;;  %v24400_v40 = vpack.c.bf16 %v22408_v44, %v22402_v1  ;;  %v24407_v30 = vld [vmem:[#allocation46_spill] sm:$0xff] }
 0xb27   : > { %v24389_v56 = vand.u32 4294901760, %v24388_v49  ;;  %v24393_v7 = vand.u32 4294901760, %v24392_v2  ;;  %15553 = vmatprep.subr.bf16.mxu1 %v24397_v42  ;;  %v24401_v31 = vpack.c.bf16 %v22432_v24, %v22421_v45  ;;  %v24402_v16 = vpack.c.bf16 %v22438_v26, %v22436_v34  ;;  %v24410_v1 = vld [vmem:[#allocation42_spill] sm:$0xff]  ;;  %v24411_v44 = vld [vmem:[#allocation72_spill] sm:$0xff]  ;;  %v24412_v45 = vld [vmem:[#allocation77_spill] sm:$0xff] }
 0xb28   : > { %v23038_v36 = vpack.c.bf16 %v24386_v62, %v24384_v60  ;;  %v24403_v29 = vpack.c.bf16 %v22445_v17, %v22443_v59  ;;  %v24404_v47 = vpack.c.bf16 %v24364_v9, %v24362_v38  ;;  %v24405_v33 = vpack.c.bf16 %v24369_v52, %v24367_v43  ;;  %v24408_v59 = vld [vmem:[#allocation33_spill] sm:$0xff]  ;;  %v24416_v34 = vld [vmem:[#allocation51_spill] sm:$0xff]  ;;  %v24417_v26 = vld [vmem:[#allocation54_spill] sm:$0xff] }
 0xb29   : > { %v23044_v8 = vpack.c.bf16 %v24389_v56, %v24387_v11  ;;  %v23050_v0 = vpack.c.bf16 %v24393_v7, %v24391_v39  ;;  %15363 = vmatpush1.bf16.msra.mxu0 %v24398_v18  ;;  %v24409_v17 = vld [vmem:[#allocation21_spill] sm:$0xff]  ;;  %v24413_v24 = vmov 0.0   ;;  %v24421_v61 = vld [vmem:[#allocation79_spill] sm:$0xff]  ;;  %v24425_v38 = vld [vmem:[#allocation74_spill] sm:$0xff] }
 0xb2a   : > { %15555 = vmatpush1.bf16.msra.mxu1 %v24399_v35  ;;  %15365 = vmatprep.subr.bf16.mxu0 %v24400_v40  ;;  %v24426_v9 = vld [vmem:[#allocation23_spill] sm:$0xff]  ;;  %v24427_v43 = vld [vmem:[#allocation29_spill] sm:$0xff]  ;;  %v24430_v60 = vld [vmem:[#allocation30_spill] sm:$0xff] }
 0xb2b   : > { %15557 = vmatprep.subr.bf16.mxu1 %v24401_v31  ;;  %v24428_v52 = vld [vmem:[#allocation83_spill] sm:$0xff]  ;;  %v24429_v15 = vld [vmem:[#allocation25_spill] sm:$0xff]  ;;  %v24431_v58 = vld [vmem:[#allocation28_spill] sm:$0xff] }
 0xb2c   : > { %v24432_v62 = vld [vmem:[#allocation31_spill] sm:$0xff]  ;;  %v24433_v11 = vld [vmem:[#allocation34_spill] sm:$0xff]  ;;  %v24435_v56 = vld [vmem:[#allocation13_spill] sm:$0xff] }
 0xb2d   : > { %15367 = vmatpush1.bf16.msra.mxu0 %v24402_v16  ;;  %v24434_v49 = vld [vmem:[#allocation14_spill] sm:$0xff]  ;;  %v24436_v54 = vld [vmem:[#allocation8_spill] sm:$0xff]  ;;  %v24437_v39 = vld [vmem:[#allocation39_spill] sm:$0xff] }
 0xb2e   : > { %15559 = vmatpush1.bf16.msra.mxu1 %v24403_v29  ;;  %15369 = vmatprep.subr.bf16.mxu0 %v24404_v47  ;;  %v24438_v2 = vld [vmem:[#allocation18_spill] sm:$0xff]  ;;  %v24440_v3 = vld [vmem:[#allocation45_spill] sm:$0xff]  ;;  %v24445_v40 = vld [vmem:[#allocation40_spill] sm:$0xff] }
 0xb2f   : > { %15561 = vmatprep.subr.bf16.mxu1 %v24405_v33  ;;  %v24439_v7 = vand.u32 4294901760, %v24438_v2  ;;  %v24441_v46 = vand.u32 4294901760, %v24440_v3  ;;  %v24442_v42 = vld [vmem:[#allocation10_spill] sm:$0xff]  ;;  %v24444_v35 = vld [vmem:[#allocation17_spill] sm:$0xff]  ;;  %v24446_v31 = vld [vmem:[#allocation15_spill] sm:$0xff] }
 0xb30   : > { %v24443_v18 = vld [vmem:[#allocation86_spill] sm:$0xff]  ;;  %v24458_v16 = vld [vmem:[#allocation24_spill] sm:$0xff] }
 0xb31   : > { %15371 = vmatpush1.bf16.msra.mxu0 %v15370_v37  ;;  %v24424_v37 = vld [vmem:[#allocation67_spill] sm:$0xff]  ;;  %v15408_v32 = vpack.c.bf16 %v24441_v46, %v24439_v7 }
 0xb32   : > { %15563 = vmatpush1.bf16.msra.mxu1 %v15562_v19  ;;  %15373 = vmatprep.subr.bf16.mxu0 %v15372_v21  ;;  %v24422_v21 = vld [vmem:[#allocation80_spill] sm:$0xff]  ;;  %v24423_v19 = vld [vmem:[#allocation82_spill] sm:$0xff] }
 0xb33   : > { %15565 = vmatprep.subr.bf16.mxu1 %v15564_v63  ;;  %v24414_v63 = vld [vmem:[#allocation69_spill] sm:$0xff] }
 0xb35   : > { %15375 = vmatpush1.bf16.msra.mxu0 %v15374_v51  ;;  %v24420_v51 = vld [vmem:[#allocation75_spill] sm:$0xff] }
 0xb36   : > { %15567 = vmatpush1.bf16.msra.mxu1 %v15566_v41  ;;  %15377 = vmatprep.subr.bf16.mxu0 %v24406_v48  ;;  %v24415_v41 = vld [vmem:[#allocation71_spill] sm:$0xff] }
 0xb37   : > { %15569 = vmatprep.subr.bf16.mxu1 %v24407_v30 }
 0xb38   : > { %13359 = vmatmul.mubr.f32.vlgmr.msra.gmra.mrb[80].mxu0 %v24408_v59 }
 0xb39   : > { %15379 = vmatpush1.bf16.msra.mxu0 %v24409_v17  ;;  %14214 = vmatmul.mubr.f32.vlgmr.msra.gmra.mrb[80].mxu1 %v24408_v59 }
 0xb3a   : > { %15571 = vmatpush1.bf16.msra.mxu1 %v24410_v1  ;;  %15381 = vmatprep.subr.bf16.mxu0 %v24411_v44 }
 0xb3b   : > { %15573 = vmatprep.subr.bf16.mxu1 %v24412_v45  ;;  %13461 = vmatprep.mubr.f32.mxu0 %v24413_v24 }
 0xb3c   : > { %14316 = vmatprep.mubr.f32.mxu1 %v24413_v24 }
 0xb3d   : > { %15383 = vmatpush1.bf16.msra.mxu0 %v24414_v63 }
 0xb3e   : > { %15575 = vmatpush1.bf16.msra.mxu1 %v24415_v41  ;;  %15385 = vmatprep.subr.bf16.mxu0 %v24416_v34 }
 0xb3f   : > { %15577 = vmatprep.subr.bf16.mxu1 %v24417_v26 }
 0xb41   : > { %15387 = vmatpush1.bf16.msra.mxu0 %v24418_v12 }
 0xb42   : > { %15579 = vmatpush1.bf16.msra.mxu1 %v24419_v5  ;;  %15389 = vmatprep.subr.bf16.mxu0 %v24420_v51 }
 0xb43   : > { %15581 = vmatprep.subr.bf16.mxu1 %v24421_v61 }
 0xb45   : > { %15391 = vmatpush1.bf16.msra.mxu0 %v24422_v21 }
 0xb46   : > { %15583 = vmatpush1.bf16.msra.mxu1 %v24423_v19  ;;  %15393 = vmatprep.subr.bf16.mxu0 %v24424_v37 }
 0xb47   : > { %15585 = vmatprep.subr.bf16.mxu1 %v24425_v38 }
 0xb49   : > { %15395 = vmatpush1.bf16.msra.mxu0 %v24426_v9 }
 0xb4a   : > { %15587 = vmatpush1.bf16.msra.mxu1 %v24427_v43  ;;  %15397 = vmatprep.subr.bf16.mxu0 %v24428_v52 }
 0xb4b   : > { %15589 = vmatprep.subr.bf16.mxu1 %v24429_v15 }
 0xb4d   : > { %15399 = vmatpush1.bf16.msra.mxu0 %v24430_v60 }
 0xb4e   : > { %15591 = vmatpush1.bf16.msra.mxu1 %v24431_v58  ;;  %15401 = vmatprep.subr.bf16.mxu0 %v24432_v62 }
 0xb4f   : > { %15593 = vmatprep.subr.bf16.mxu1 %v24433_v11 }
 0xb51   : > { %15403 = vmatpush1.bf16.msra.mxu0 %v24434_v49 }
 0xb52   : > { %15595 = vmatpush1.bf16.msra.mxu1 %v24435_v56  ;;  %15405 = vmatprep.subr.bf16.mxu0 %v24436_v54 }
 0xb53   : > { %15597 = vmatprep.subr.bf16.mxu1 %v24437_v39 }
 0xb55   : > { %15407 = vmatpush1.bf16.msra.mxu0 %v24442_v42 }
 0xb56   : > { %15599 = vmatpush1.bf16.msra.mxu1 %v24443_v18  ;;  %15409 = vmatprep.subr.bf16.mxu0 %v15408_v32 }
 0xb57   : > { %15601 = vmatprep.subr.bf16.mxu1 %v24444_v35 }
 0xb58   : > { %13465 = vmatmul.mubr.f32.vlgmr.msra.gmra.mrb[80].mxu0 %v24445_v40 }
 0xb59   : > { %15411 = vmatpush1.bf16.msra.mxu0 %v24446_v31  ;;  %14320 = vmatmul.mubr.f32.vlgmr.msra.gmra.mrb[80].mxu1 %v24445_v40 }
 0xb5a   : > { %15603 = vmatpush1.bf16.msra.mxu1 %v22879_v50  ;;  %15413 = vmatprep.subr.bf16.mxu0 %v22885_v13  ;;  %v24447_v50 = vld [vmem:[#allocation55_spill] sm:$0xff] }
 0xb5b   : > { %15605 = vmatprep.subr.bf16.mxu1 %v22891_v20  ;;  %13631 = vmatprep.mubr.f32.mxu0 %v24413_v24  ;;  %v24448_v13 = vld [vmem:[#allocation63_spill] sm:$0xff]  ;;  %v24449_v20 = vld [vmem:[#allocation64_spill] sm:$0xff] }
 0xb5c   : > { %14486 = vmatprep.mubr.f32.mxu1 %v24413_v24 }
 0xb5d   : > { %15415 = vmatpush1.bf16.msra.mxu0 %v22897_v25  ;;  %v24450_v25 = vld [vmem:[#allocation65_spill] sm:$0xff] }
 0xb5e   : > { %15607 = vmatpush1.bf16.msra.mxu1 %v22903_v22  ;;  %15417 = vmatprep.subr.bf16.mxu0 %v22909_v27  ;;  %v24451_v22 = vld [vmem:[#allocation68_spill] sm:$0xff]  ;;  %v24452_v27 = vld [vmem:[#allocation50_spill] sm:$0xff] }
 0xb5f   : > { %15609 = vmatprep.subr.bf16.mxu1 %v22915_v53  ;;  %v24453_v53 = vld [vmem:[#allocation48_spill] sm:$0xff] }
 0xb61   : > { %15419 = vmatpush1.bf16.msra.mxu0 %v22921_v6  ;;  %v24454_v6 = vld [vmem:[#allocation49_spill] sm:$0xff] }
 0xb62   : > { %15611 = vmatpush1.bf16.msra.mxu1 %v22927_v28  ;;  %15421 = vmatprep.subr.bf16.mxu0 %v22933_v10  ;;  %v24455_v28 = vld [vmem:[#allocation73_spill] sm:$0xff]  ;;  %v24456_v10 = vld [vmem:[#allocation20_spill] sm:$0xff] }
 0xb63   : > { %15613 = vmatprep.subr.bf16.mxu1 %v22939_v14  ;;  %v24457_v14 = vld [vmem:[#allocation57_spill] sm:$0xff] }
 0xb65   : > { %15423 = vmatpush1.bf16.msra.mxu0 %v24447_v50 }
 0xb66   : > { %15615 = vmatpush1.bf16.msra.mxu1 %v24448_v13  ;;  %15425 = vmatprep.subr.bf16.mxu0 %v24449_v20 }
 0xb67   : > { %15617 = vmatprep.subr.bf16.mxu1 %v24450_v25 }
 0xb69   : > { %15427 = vmatpush1.bf16.msra.mxu0 %v24451_v22 }
 0xb6a   : > { %15619 = vmatpush1.bf16.msra.mxu1 %v24452_v27  ;;  %15429 = vmatprep.subr.bf16.mxu0 %v24453_v53 }
 0xb6b   : > { %15621 = vmatprep.subr.bf16.mxu1 %v24454_v6 }
 0xb6d   : > { %15431 = vmatpush1.bf16.msra.mxu0 %v24455_v28 }
 0xb6e   : > { %15623 = vmatpush1.bf16.msra.mxu1 %v24456_v10  ;;  %15433 = vmatprep.subr.bf16.mxu0 %v24457_v14 }
 0xb6f   : > { %15625 = vmatprep.subr.bf16.mxu1 %v23011_v4 }
 0xb71   : > { %15435 = vmatpush1.bf16.msra.mxu0 %v23017_v55 }
 0xb72   : > { %15627 = vmatpush1.bf16.msra.mxu1 %v23023_v57  ;;  %15437 = vmatprep.subr.bf16.mxu0 %v23029_v23 }
 0xb73   : > { %15629 = vmatprep.subr.bf16.mxu1 %v23038_v36 }
 0xb75   : > { %15439 = vmatpush1.bf16.msra.mxu0 %v23044_v8 }
 0xb76   : > { %15631 = vmatpush1.bf16.msra.mxu1 %v23050_v0  ;;  %15441 = vmatprep.subr.bf16.mxu0 %v24406_v48 }
 0xb77   : > { %15633 = vmatprep.subr.bf16.mxu1 %v24407_v30 }
 0xb78   : > { %13633 = vmatmul.mubr.f32.vlgmr.msra.gmra.mrb[80].mxu0 %v24458_v16 }
 0xb79   : > { %15443 = vmatpush1.bf16.msra.mxu0 %v24409_v17  ;;  %14488 = vmatmul.mubr.f32.vlgmr.msra.gmra.mrb[80].mxu1 %v24458_v16 }
 0xb7a   : > { %15635 = vmatpush1.bf16.msra.mxu1 %v24410_v1  ;;  %15445 = vmatprep.subr.bf16.mxu0 %v24411_v44 }
 0xb7b   : > { %15637 = vmatprep.subr.bf16.mxu1 %v24412_v45  ;;  %13735 = vmatprep.mubr.f32.mxu0 %v24413_v24 }
 0xb7c   : > { %14590 = vmatprep.mubr.f32.mxu1 %v24413_v24 }
 0xb7d   : > { %15447 = vmatpush1.bf16.msra.mxu0 %v24414_v63 }
 0xb7e   : > { %15639 = vmatpush1.bf16.msra.mxu1 %v24415_v41  ;;  %15449 = vmatprep.subr.bf16.mxu0 %v24416_v34 }
 0xb7f   : > { %15641 = vmatprep.subr.bf16.mxu1 %v24417_v26 }
 0xb81   : > { %15451 = vmatpush1.bf16.msra.mxu0 %v24418_v12 }
 0xb82   : > { %15643 = vmatpush1.bf16.msra.mxu1 %v24419_v5  ;;  %15453 = vmatprep.subr.bf16.mxu0 %v24420_v51 }
 0xb83   : > { %15645 = vmatprep.subr.bf16.mxu1 %v24421_v61 }
 0xb85   : > { %15455 = vmatpush1.bf16.msra.mxu0 %v24422_v21 }
 0xb86   : > { %15647 = vmatpush1.bf16.msra.mxu1 %v24423_v19  ;;  %15457 = vmatprep.subr.bf16.mxu0 %v24424_v37 }
 0xb87   : > { %15649 = vmatprep.subr.bf16.mxu1 %v24425_v38 }
 0xb89   : > { %15459 = vmatpush1.bf16.msra.mxu0 %v24426_v9 }
 0xb8a   : > { %15651 = vmatpush1.bf16.msra.mxu1 %v24427_v43  ;;  %15461 = vmatprep.subr.bf16.mxu0 %v24428_v52 }
 0xb8b   : > { %15653 = vmatprep.subr.bf16.mxu1 %v24429_v15 }
 0xb8d   : > { %15463 = vmatpush1.bf16.msra.mxu0 %v24430_v60 }
 0xb8e   : > { %15655 = vmatpush1.bf16.msra.mxu1 %v24431_v58  ;;  %15465 = vmatprep.subr.bf16.mxu0 %v24432_v62 }
 0xb8f   : > { %15657 = vmatprep.subr.bf16.mxu1 %v24433_v11 }
 0xb91   : > { %15467 = vmatpush1.bf16.msra.mxu0 %v24434_v49 }
 0xb92   : > { %15659 = vmatpush1.bf16.msra.mxu1 %v24435_v56  ;;  %15469 = vmatprep.subr.bf16.mxu0 %v24436_v54 }
 0xb93   : > { %15661 = vmatprep.subr.bf16.mxu1 %v24437_v39 }
 0xb95   : > { %15471 = vmatpush1.bf16.msra.mxu0 %v24442_v42 }
 0xb96   : > { %15663 = vmatpush1.bf16.msra.mxu1 %v24443_v18 }
 0xb98   : > { %13737 = vmatmul.mubr.f32.vlgmr.msra.gmra.mrb[80].mxu0 %v24458_v16 }
 0xb99   : > { %14592 = vmatmul.mubr.f32.vlgmr.msra.gmra.mrb[80].mxu1 %v24458_v16 }
 0xc6b   : > { %v13738_v4 = vpop.f32.mrb[80].mxu0 }
 0xc6c   : > { %v14593_v55 = vpop.f32.mrb[80].mxu1  ;;  %v13740_v57 = vpop.f32.mrb[81].mxu0 }
 0xc6d   : > { %v14602_v23 = vcombine.low %v13738_v4, %v13740_v57  ;;  %v14595_v36 = vpop.f32.mrb[81].mxu1 }
 0xc6e   : > { %v14603_v8 = vcombine.low %v14593_v55, %v14595_v36 }
 0xc6f   : > { %14606 = vst [vmem:[%s553_s26] sm:$0xff] %v14602_v23 }
 0xc70   : > { %14607 = vst [vmem:[%s553_s26 + $0x8] sm:$0xff] %v14603_v8 }
 0xc71   : > { %17084 = shalt.err (!%p17081_p5)
}
 0xc72   : > { %s17085_s25 = scalar_lea.hbm %s23207_s1, 256  ;;  %s17089_s2 = scalar_lea.hbm %s23267_s16, 512 }
 0xc73   : > { %p17086_p7 = scmp.ne.s32.totalorder %s23207_s1, %s17085_s25  ;;  %p17090_p12 = scmp.lt.u32.totalorder %s23207_s1, %s23267_s16 }
 0xc74   : > { %p17091_p13 = scmp.lt.u32.totalorder %s17089_s2, %s17085_s25  ;;  %p17093_p1 = scmp.lt.u32.totalorder %s17085_s25, %s23207_s1 }
 0xc75   : > { %p17087_p10 = pnand %p17086_p7, %p17261_p6 }
 0xc76   : > { %p17092_p0 = por %p17091_p13, %p17090_p12 }
 0xc77   : > { %p17088_p11 = pneg %p17087_p10 }
 0xc78   : > { %p17094_p2 = por %p17093_p1, %p17092_p0 }
 0xc7a   : > { %p17095_p3 = pnand %p17094_p2, %p17088_p11 }
 0xc7c   : > { %17098 = shalt.err (!%p17095_p3)
}
 0xc7d   : > { %16644 = dma.vmem_to_hbm [thread:$0]  (%p17261_p6), %s23209_s18, 256, %s23207_s1, %s14609_s29  }
 0xc7e PF: > { %s14635_s4 = sand.u32 1, %s17121_s21   ;;  %p16647_p4 = pnand %p14690_p9, %p17265_p8 }
 0xc7f   : > { %s14636_s30 = scalar_lea.sflag [#allocation4], %s14635_s4 }
 0xc80   : > { %17116 = dma.done.wait (!%p16647_p4), %s14636_s30, 256  }
 0xc81   : > { %17118 = vsyncadd (!%p16647_p4), %s14636_s30, 4294967040  ;;  %s24460_s20 = sld [smem:[#allocation6_spill]]  ;;  %p26_p5 = scmp.ge.s32.totalorder %s17246_s27, 4  }
 0xc82   : > { %s24461_s21 = smov %s17125_s22  ;;  %s24462_s22 = smov %s17129_s23 }
 0xc83   : > { %s24464_s24 = smov %s17246_s27  ;;  %28 = sbr.rel (!%p26_p5) target bundleno = 9 (0x9), region = 147 }
 0xc87   : > { %s24463_s23 = smov %s24460_s20 }
 0xc8a   :  { %14641 = vsyncpa [#allocation4], 1 }
 0xc8b   :  { %14643 = vsyncpa [#allocation4 + $0x1], 1 }

</bundles_post_ra>
